<compile_context>
chip_gen: v7x
topology: tpu7x:2x2x1
jax: 0.10.0
libtpu: 0.0.40
codegen_flags: <defaults>
</compile_context>

<pallas_src>
import functools

import jax
import jax.numpy as jnp
from jax import lax
from jax.experimental import pallas as pl
from jax.experimental.pallas import tpu as pltpu


_MATMUL_DTYPE = jnp.bfloat16          # MXU operand dtype (v5e/v6e/v7x native)
_VMEM_LIMIT_BYTES = 48 * 1024 * 1024  # explicit scoped-VMEM budget


def _round_up(v, m):
    return ((v + m - 1) // m) * m


def _const_spec(arr):
    """Full-array block with a constant index map (replicated parameter)."""
    zeros = (0,) * arr.ndim
    # NOTE(v7x): these replicated weights could be single-buffered via
    # pipeline_mode=pl.Buffered(1) once d_ff grows; left at the default here.
    return pl.BlockSpec(arr.shape, lambda *_: zeros)


# --------------------------------------------------------------------------
# GRU (adaptive graph-conv recurrent cell) — one pallas_call per layer,
# grid over the batch axis, time recurrence inside the kernel.
# --------------------------------------------------------------------------
def _gru_layer_kernel(x_ref, h0_ref, sup_ref, pg_ref, pu_ref,
                      emb_ref, bg_ref, bu_ref, out_ref):
    """One AGCRN-style GRU layer for ONE batch sample (grid is over B).

    Per-grid-step shapes:
      x_ref   : (1, T, N, Cin)        f32
      h0_ref  : (1, N, H)             f32
      sup_ref : (K, N, N)             bf16  graph supports (stationary operand)
      pg_ref  : (K*(Cin+H), De*Og)    bf16  fused gate pool,  rows (k,c), cols (d,o)
      pu_ref  : (K*(Cin+H), De*Oh)    bf16  fused update pool
      emb_ref : (N, De)               f32
      bg_ref  : (N, 2H)               f32   E @ gate bias pool
      bu_ref  : (N, H)                f32   E @ update bias pool
      out_ref : (1, T, N, H)          f32
    """
    T, N, cin = x_ref.shape[1], x_ref.shape[2], x_ref.shape[3]
    H = h0_ref.shape[-1]
    K = sup_ref.shape[0]
    De = emb_ref.shape[-1]
    Og = pg_ref.shape[-1] // De          # lane-padded gate output width (>= 2H)
    Oh = pu_ref.shape[-1] // De          # lane-padded update output width (>= H)

    # Loop-invariant operands hoisted once (no per-step broadcasts).
    sups = [sup_ref[k] for k in range(K)]                 # K x (N, N) bf16
    pg = pg_ref[...]
    pu = pu_ref[...]
    e_cols = [emb_ref[:, d:d + 1] for d in range(De)]     # (N, 1) f32 each
    bg_z = bg_ref[:, :H]
    bg_r = bg_ref[:, H:]
    bu_v = bu_ref[...]

    def mix(t_acc, width):
        # out[n, o] = sum_d E[n, d] * t_acc[n, d*width + o]
        # width is 128-padded in prepare_gru_params -> lane-aligned slices.
        acc = e_cols[0] * t_acc[:, :width]
        for d in range(1, De):
            acc = acc + e_cols[d] * t_acc[:, d * width:(d + 1) * width]
        return acc

    def step(t, h):
        x_t = x_ref[0, t]                                              # (N, Cin)

        # ---- gate path: ONE graph conv per support on concat([x, h]) ----
        xh = jnp.concatenate([x_t, h], axis=-1).astype(_MATMUL_DTYPE)  # (N, Cx)
        g = [jnp.dot(sups[k], xh, preferred_element_type=jnp.float32)
             for k in range(K)]                                        # K x (N, Cx)
        g_gate = jnp.concatenate(g, axis=-1).astype(_MATMUL_DTYPE)     # (N, K*Cx)
        tg = jnp.dot(g_gate, pg, preferred_element_type=jnp.float32)   # (N, De*Og)
        zr = mix(tg, Og)
        z = jax.nn.sigmoid(zr[:, :H] + bg_z)
        r = jax.nn.sigmoid(zr[:, H:2 * H] + bg_r)

        # ---- candidate path: reuse sup@x, graph conv only on z*h ----
        zh = (z * h).astype(_MATMUL_DTYPE)                             # (N, H)
        gz = [jnp.dot(sups[k], zh, preferred_element_type=jnp.float32)
              for k in range(K)]
        upd_parts = []
        for k in range(K):
            upd_parts.append(g[k][:, :cin])      # sup_k @ x    (prefix slice)
            upd_parts.append(gz[k])              # sup_k @ (z*h)
        g_upd = jnp.concatenate(upd_parts, axis=-1).astype(_MATMUL_DTYPE)
        tu = jnp.dot(g_upd, pu, preferred_element_type=jnp.float32)    # (N, De*Oh)
        hc = jnp.tanh(mix(tu, Oh)[:, :H] + bu_v)

        h_new = r * h + (1.0 - r) * hc           # f32 state update
        out_ref[0, t] = h_new
        return h_new

    lax.fori_loop(0, T, step, h0_ref[0], unroll=True)


def gru_layer(x, h0, supports, kparams):
    """x: (B,T,N,Cin) f32, h0: (B,N,H) f32, supports: (K,N,N) bf16 -> (B,T,N,H)."""
    B, T, N, cin = x.shape
    H = h0.shape[-1]
    in_specs = [
        pl.BlockSpec((1, T, N, cin), lambda i: (i, 0, 0, 0)),
        pl.BlockSpec((1, N, H), lambda i: (i, 0, 0)),
        _const_spec(supports),
    ] + [_const_spec(p) for p in kparams]
    return pl.pallas_call(
        _gru_layer_kernel,
        out_shape=jax.ShapeDtypeStruct((B, T, N, H), jnp.float32),
        grid=(B,),
        in_specs=in_specs,
        out_specs=pl.BlockSpec((1, T, N, H), lambda i: (i, 0, 0, 0)),
        compiler_params=pltpu.CompilerParams(
            dimension_semantics=("parallel",),
            vmem_limit_bytes=_VMEM_LIMIT_BYTES),
    )(x, h0, supports, *kparams)


# --------------------------------------------------------------------------
# Transformer encoder block over the time axis — grid over blocks of (B*N),
# lane-dense (blk, T*D) in/out blocks, head-batched attention.
# --------------------------------------------------------------------------
def _transformer_kernel(x_ref, wqkv_ref, bqkv_ref, wo_ref, bo_ref,
                        g1_ref, be1_ref, w1_ref, bf1_ref, w2_ref, bf2_ref,
                        g2_ref, be2_ref, out_ref, *, seq_len, d_model, nheads):
    blk = x_ref.shape[0]
    T, D = seq_len, d_model
    dh = D // nheads
    scale = 1.0 / float(dh) ** 0.5

    # Lane-dense load: block arrives as (blk, T*D); reshape once in VMEM.
    xf = x_ref[...].reshape(blk * T, D)                       # (blk*T, D) f32

    # Fused QKV projection (single MXU matmul).
    qkv = jnp.dot(xf.astype(_MATMUL_DTYPE), wqkv_ref[...],
                  preferred_element_type=jnp.float32) + bqkv_ref[...]

    def split_heads(a2):
        # (blk*T, D) -> (nheads*blk, T, dh) head-major leading batch
        # (only leading-dim reshapes + concat, no in-kernel transposes).
        parts = [a2[:, h * dh:(h + 1) * dh].reshape(blk, T, dh)
                 for h in range(nheads)]
        return jnp.concatenate(parts, axis=0).astype(_MATMUL_DTYPE)

    qh = split_heads(qkv[:, :D])
    kh = split_heads(qkv[:, D:2 * D])
    vh = split_heads(qkv[:, 2 * D:])

    # Head-batched attention (batch dim = nheads*blk).
    s = jnp.einsum('bqd,bkd->bqk', qh, kh,
                   preferred_element_type=jnp.float32) * scale
    s = s - jnp.max(s, axis=-1, keepdims=True)
    p = jnp.exp(s)
    p = p * pl.reciprocal(jnp.sum(p, axis=-1, keepdims=True), approx=True)
    ctx = jnp.einsum('bqk,bkd->bqd', p.astype(_MATMUL_DTYPE), vh,
                     preferred_element_type=jnp.float32)      # (nheads*blk,T,dh)

    # Concatenate heads back along channels; ONE (D, D) output projection.
    ctx_cols = jnp.concatenate(
        [ctx[h * blk:(h + 1) * blk].reshape(blk * T, dh) for h in range(nheads)],
        axis=-1)                                              # (blk*T, D)
    attn = jnp.dot(ctx_cols.astype(_MATMUL_DTYPE), wo_ref[...],
                   preferred_element_type=jnp.float32) + bo_ref[...]

    def layer_norm(y, g, b):
        mu = jnp.mean(y, axis=-1, keepdims=True)
        var = jnp.mean((y - mu) ** 2, axis=-1, keepdims=True)
        return (y - mu) * lax.rsqrt(var + 1e-5) * g + b

    x1 = layer_norm(xf + attn, g1_ref[...], be1_ref[...])
    ff = jnp.maximum(
        jnp.dot(x1.astype(_MATMUL_DTYPE), w1_ref[...],
                preferred_element_type=jnp.float32) + bf1_ref[...], 0.0)
    ff = jnp.dot(ff.astype(_MATMUL_DTYPE), w2_ref[...],
                 preferred_element_type=jnp.float32) + bf2_ref[...]
    y = layer_norm(x1 + ff, g2_ref[...], be2_ref[...])
    out_ref[...] = y.reshape(blk, T * D)                      # lane-dense store


def _pick_bn_block(bn):
    # Large blocks to amortize per-step overhead, but keep >= 2 grid steps
    # when possible so v7x's 2 TensorCores both get work.
    blk = 256
    if bn < 2 * blk:
        blk = max(8, (bn + 1) // 2)
        blk = ((blk + 7) // 8) * 8
    return blk


def transformer_block(y, params, nheads):
    """y: (B*N, T, D) -> (B*N, T, D); one post-LN encoder block."""
    BN, T, D = y.shape
    blk = _pick_bn_block(BN)
    n_blocks = -(-BN // blk)
    BNp = n_blocks * blk
    if BNp != BN:
        # Pad rows up to a block multiple instead of shrinking blk.
        y = jnp.pad(y, ((0, BNp - BN), (0, 0), (0, 0)))
    y2 = y.reshape(BNp, T * D)                                # lane-dense slab

    kernel = functools.partial(_transformer_kernel,
                               seq_len=T, d_model=D, nheads=nheads)
    in_specs = [pl.BlockSpec((blk, T * D), lambda i: (i, 0))]
    in_specs += [_const_spec(p) for p in params]
    out = pl.pallas_call(
        kernel,
        out_shape=jax.ShapeDtypeStruct((BNp, T * D), jnp.float32),
        grid=(n_blocks,),
        in_specs=in_specs,
        out_specs=pl.BlockSpec((blk, T * D), lambda i: (i, 0)),
        compiler_params=pltpu.CompilerParams(
            dimension_semantics=("parallel",),
            vmem_limit_bytes=_VMEM_LIMIT_BYTES),
    )(y2, *params)
    return out.reshape(BNp, T, D)[:BN]


# --------------------------------------------------------------------------
# Plain-JAX glue: parameter pools, kernel-friendly re-layouts, supports.
# --------------------------------------------------------------------------
def init_gru_pool(key, cin, hidden, cheb_k, embed_dim):
    k1, k2, k3, k4 = jax.random.split(key, 4)
    wpool_gate = jax.random.normal(
        k1, (embed_dim, cheb_k, cin + hidden, 2 * hidden), jnp.float32) * 0.1
    bpool_gate = jax.random.normal(k2, (embed_dim, 2 * hidden), jnp.float32) * 0.1
    wpool_upd = jax.random.normal(
        k3, (embed_dim, cheb_k, cin + hidden, hidden), jnp.float32) * 0.1
    bpool_upd = jax.random.normal(k4, (embed_dim, hidden), jnp.float32) * 0.1
    return wpool_gate, bpool_gate, wpool_upd, bpool_upd


def prepare_gru_params(pool, node_embeddings, matmul_dtype=_MATMUL_DTYPE):
    """Re-layout the weight pools for the kernel:

      * rows stacked over (k, input-channel) so each gate needs ONE matmul,
      * output columns ordered (d, o) with o zero-padded to a 128 multiple so
        the in-loop embed-mix slices are lane-aligned,
      * per-node weights are never materialized (E is applied in the kernel).
    """
    wpg, bpg, wpu, bpu = pool            # (De,K,Cx,2H), (De,2H), (De,K,Cx,H), (De,H)
    de, k, cx, twoh = wpg.shape
    h = wpu.shape[-1]

    def pack(wp, out_dim):
        og = _round_up(out_dim, 128)
        wp = jnp.pad(wp, ((0, 0), (0, 0), (0, 0), (0, og - out_dim)))
        w = jnp.transpose(wp, (1, 2, 0, 3)).reshape(k * cx, de * og)
        return w.astype(matmul_dtype)

    pg = pack(wpg, twoh)                                  # (K*Cx, De*Og)
    pu = pack(wpu, h)                                     # (K*Cx, De*Oh)
    bg = (node_embeddings @ bpg).astype(jnp.float32)      # (N, 2H)
    bu = (node_embeddings @ bpu).astype(jnp.float32)      # (N, H)
    emb = node_embeddings.astype(jnp.float32)             # (N, De)
    return (pg, pu, emb, bg, bu)


def build_supports(node_embeddings, cheb_k):
    n = node_embeddings.shape[0]
    a = jax.nn.softmax(jax.nn.relu(node_embeddings @ node_embeddings.T), axis=1)
    supp = [jnp.eye(n, dtype=jnp.float32), a]
    for _ in range(2, cheb_k):
        supp.append(2.0 * a @ supp[-1] - supp[-2])
    return jnp.stack(supp[:cheb_k], axis=0)               # (K, N, N)


def init_trans_params(key, d_model, d_ff, nheads, matmul_dtype=_MATMUL_DTYPE):
    dh = d_model // nheads
    ks = jax.random.split(key, 4)
    wqkv = (jax.random.normal(ks[0], (d_model, 3 * d_model), jnp.float32) * 0.1
            ).astype(matmul_dtype)
    bqkv = jnp.zeros((1, 3 * d_model), jnp.float32)
    # Output projection stored already merged to (nheads*dh, D) = (D, D),
    # rows ordered (head, dh) to match the kernel's concatenated context.
    wo = (jax.random.normal(ks[1], (nheads * dh, d_model), jnp.float32) * 0.1
          ).astype(matmul_dtype)
    bo = jnp.zeros((1, d_model), jnp.float32)
    g1 = jnp.ones((1, d_model), jnp.float32)
    be1 = jnp.zeros((1, d_model), jnp.float32)
    w1 = (jax.random.normal(ks[2], (d_model, d_ff), jnp.float32) * 0.1
          ).astype(matmul_dtype)
    bf1 = jnp.zeros((1, d_ff), jnp.float32)
    w2 = (jax.random.normal(ks[3], (d_ff, d_model), jnp.float32) * 0.1
          ).astype(matmul_dtype)
    bf2 = jnp.zeros((1, d_model), jnp.float32)
    g2 = jnp.ones((1, d_model), jnp.float32)
    be2 = jnp.zeros((1, d_model), jnp.float32)
    return (wqkv, bqkv, wo, bo, g1, be1, w1, bf1, w2, bf2, g2, be2)


def avwdcrnn_forward(x, init_state, node_embeddings, adj,
                     gru_pools, trans_params, cheb_k, nheads):
    """Mirrors AVWDCRNN.forward: returns (current_inputs, output_hidden)."""
    B, T, N, _ = x.shape
    L = init_state.shape[0]
    H = init_state.shape[-1]
    del adj  # TODO(synk): `adj` is stored by the module but the (unprovided)
    #                     GRU class' use of it is unknown; not consumed here.

    supports = build_supports(node_embeddings, cheb_k).astype(_MATMUL_DTYPE)

    cur = x                                                  # (B, T, N, Cin)
    output_hidden = []
    for i in range(L):
        kparams = prepare_gru_params(gru_pools[i], node_embeddings)
        cur = gru_layer(cur, init_state[i], supports, kparams)   # (B, T, N, H)
        output_hidden.append(cur[:, -1])                     # state after last t

    # transformer over the time axis: (B,T,N,H) -> (B*N, T, H)
    y = jnp.transpose(cur, (0, 2, 1, 3)).reshape(B * N, T, H)
    for tp in trans_params:
        y = transformer_block(y, tp, nheads)
    y = jnp.transpose(y.reshape(B, N, T, H), (0, 2, 1, 3))   # (B, T, N, H)
    return y, output_hidden


# --------------------------------------------------------------------------
if __name__ == "__main__":
    B, T, N, DIM_IN, DIM_OUT = 2, 8, 16, 2, 32
    CHEB_K, EMBED_DIM, NUM_LAYERS = 2, 8, 2
    NHEADS, TRANS_LAYERS = 2, 2

    key = jax.random.PRNGKey(0)
    kx, ke, ka, kp = jax.random.split(key, 4)

    x = jax.random.normal(kx, (B, T, N, DIM_IN), jnp.float32)
    node_embeddings = jax.random.normal(ke, (N, EMBED_DIM), jnp.float32)
    adj = jax.nn.softmax(jax.random.normal(ka, (N, N), jnp.float32), axis=1)
    # init_hidden(): zeros of shape (num_layers, B, N, dim_out)
    init_state = jnp.zeros((NUM_LAYERS, B, N, DIM_OUT), jnp.float32)

    gru_pools = []
    kk = kp
    for i in range(NUM_LAYERS):
        kk, sub = jax.random.split(kk)
        cin = DIM_IN if i == 0 else DIM_OUT
        gru_pools.append(init_gru_pool(sub, cin, DIM_OUT, CHEB_K, EMBED_DIM))

    trans_params = []
    for _ in range(TRANS_LAYERS):  # transformer_layer(dim_out, dim_out, 2, 2)
        kk, sub = jax.random.split(kk)
        trans_params.append(init_trans_params(sub, DIM_OUT, DIM_OUT, NHEADS))

    out, output_hidden = avwdcrnn_forward(
        x, init_state, node_embeddings, adj, gru_pools, trans_params,
        CHEB_K, NHEADS)

    out = jax.block_until_ready(out)
    output_hidden = [jax.block_until_ready(h) for h in output_hidden]

    assert out.shape == (B, T, N, DIM_OUT)
    assert len(output_hidden) == NUM_LAYERS
    assert all(h.shape == (B, N, DIM_OUT) for h in output_hidden)
    assert bool(jnp.isfinite(out).all())

    print("KERNEL_OK")
</pallas_src>

<mosaic_0001>
module attributes {stable_mosaic.version = 11 : i64} {
  func.func @_gru_layer_kernel(%arg0: i32, %arg1: memref<1x8x16x2xf32, #tpu.memory_space<vmem>>, %arg2: memref<1x16x32xf32, #tpu.memory_space<vmem>>, %arg3: memref<2x16x16xbf16, #tpu.memory_space<vmem>>, %arg4: memref<68x1024xbf16, #tpu.memory_space<vmem>>, %arg5: memref<68x1024xbf16, #tpu.memory_space<vmem>>, %arg6: memref<16x8xf32, #tpu.memory_space<vmem>>, %arg7: memref<16x64xf32, #tpu.memory_space<vmem>>, %arg8: memref<16x32xf32, #tpu.memory_space<vmem>>, %arg9: memref<1x8x16x32xf32, #tpu.memory_space<vmem>>) attributes {dimension_semantics = [#tpu.dimension_semantics<parallel>], iteration_bounds = array<i64: 2>, scalar_prefetch = 0 : i64, scratch_operands = 0 : i64, tpu.core_type = #tpu.core_type<tc>, window_params = [{transform_indices = @transform_0, window_bounds = array<i64: 1, 8, 16, 2>}, {transform_indices = @transform_1, window_bounds = array<i64: 1, 16, 32>}, {pipeline_mode = #tpu.pipeline_mode<synchronous>, transform_indices = @transform_2, window_bounds = array<i64: 2, 16, 16>}, {pipeline_mode = #tpu.pipeline_mode<synchronous>, transform_indices = @transform_3, window_bounds = array<i64: 68, 1024>}, {pipeline_mode = #tpu.pipeline_mode<synchronous>, transform_indices = @transform_4, window_bounds = array<i64: 68, 1024>}, {pipeline_mode = #tpu.pipeline_mode<synchronous>, transform_indices = @transform_5, window_bounds = array<i64: 16, 8>}, {pipeline_mode = #tpu.pipeline_mode<synchronous>, transform_indices = @transform_6, window_bounds = array<i64: 16, 64>}, {pipeline_mode = #tpu.pipeline_mode<synchronous>, transform_indices = @transform_7, window_bounds = array<i64: 16, 32>}, {transform_indices = @transform_8, window_bounds = array<i64: 1, 8, 16, 32>}]} {
    %c0 = arith.constant 0 : index
    %c0_0 = arith.constant 0 : index
    %c0_1 = arith.constant 0 : index
    %0 = vector.load %arg3[%c0, %c0_0, %c0_1] : memref<2x16x16xbf16, #tpu.memory_space<vmem>>, vector<1x16x16xbf16>
    %1 = vector.shape_cast %0 : vector<1x16x16xbf16> to vector<16x16xbf16>
    %c1 = arith.constant 1 : index
    %c0_2 = arith.constant 0 : index
    %c0_3 = arith.constant 0 : index
    %2 = vector.load %arg3[%c1, %c0_2, %c0_3] : memref<2x16x16xbf16, #tpu.memory_space<vmem>>, vector<1x16x16xbf16>
    %3 = vector.shape_cast %2 : vector<1x16x16xbf16> to vector<16x16xbf16>
    %c0_4 = arith.constant 0 : index
    %c0_5 = arith.constant 0 : index
    %4 = vector.load %arg4[%c0_4, %c0_5] : memref<68x1024xbf16, #tpu.memory_space<vmem>>, vector<68x1024xbf16>
    %c0_6 = arith.constant 0 : index
    %c0_7 = arith.constant 0 : index
    %5 = vector.load %arg5[%c0_6, %c0_7] : memref<68x1024xbf16, #tpu.memory_space<vmem>>, vector<68x1024xbf16>
    %c0_8 = arith.constant 0 : index
    %c0_9 = arith.constant 0 : index
    %6 = vector.load %arg6[%c0_8, %c0_9] : memref<16x8xf32, #tpu.memory_space<vmem>>, vector<16x1xf32>
    %c0_10 = arith.constant 0 : index
    %c1_11 = arith.constant 1 : index
    %7 = vector.load %arg6[%c0_10, %c1_11] : memref<16x8xf32, #tpu.memory_space<vmem>>, vector<16x1xf32>
    %c0_12 = arith.constant 0 : index
    %c2 = arith.constant 2 : index
    %8 = vector.load %arg6[%c0_12, %c2] : memref<16x8xf32, #tpu.memory_space<vmem>>, vector<16x1xf32>
    %c0_13 = arith.constant 0 : index
    %c3 = arith.constant 3 : index
    %9 = vector.load %arg6[%c0_13, %c3] : memref<16x8xf32, #tpu.memory_space<vmem>>, vector<16x1xf32>
    %c0_14 = arith.constant 0 : index
    %c4 = arith.constant 4 : index
    %10 = vector.load %arg6[%c0_14, %c4] : memref<16x8xf32, #tpu.memory_space<vmem>>, vector<16x1xf32>
    %c0_15 = arith.constant 0 : index
    %c5 = arith.constant 5 : index
    %11 = vector.load %arg6[%c0_15, %c5] : memref<16x8xf32, #tpu.memory_space<vmem>>, vector<16x1xf32>
    %c0_16 = arith.constant 0 : index
    %c6 = arith.constant 6 : index
    %12 = vector.load %arg6[%c0_16, %c6] : memref<16x8xf32, #tpu.memory_space<vmem>>, vector<16x1xf32>
    %c0_17 = arith.constant 0 : index
    %c7 = arith.constant 7 : index
    %13 = vector.load %arg6[%c0_17, %c7] : memref<16x8xf32, #tpu.memory_space<vmem>>, vector<16x1xf32>
    %c0_18 = arith.constant 0 : index
    %c0_19 = arith.constant 0 : index
    %14 = vector.load %arg7[%c0_18, %c0_19] : memref<16x64xf32, #tpu.memory_space<vmem>>, vector<16x32xf32>
    %c0_20 = arith.constant 0 : index
    %c32 = arith.constant 32 : index
    %15 = vector.load %arg7[%c0_20, %c32] : memref<16x64xf32, #tpu.memory_space<vmem>>, vector<16x32xf32>
    %c0_21 = arith.constant 0 : index
    %c0_22 = arith.constant 0 : index
    %16 = vector.load %arg8[%c0_21, %c0_22] : memref<16x32xf32, #tpu.memory_space<vmem>>, vector<16x32xf32>
    %c0_23 = arith.constant 0 : index
    %c0_24 = arith.constant 0 : index
    %c0_25 = arith.constant 0 : index
    %17 = vector.load %arg2[%c0_23, %c0_24, %c0_25] : memref<1x16x32xf32, #tpu.memory_space<vmem>>, vector<1x16x32xf32>
    %18 = vector.shape_cast %17 : vector<1x16x32xf32> to vector<16x32xf32>
    %c0_i32 = arith.constant 0 : i32
    %c0_26 = arith.constant 0 : index
    %19 = arith.index_cast %c0_i32 : i32 to index
    %c0_27 = arith.constant 0 : index
    %c0_28 = arith.constant 0 : index
    %20 = vector.load %arg1[%c0_26, %19, %c0_27, %c0_28] : memref<1x8x16x2xf32, #tpu.memory_space<vmem>>, vector<1x1x16x2xf32>
    %21 = vector.shape_cast %20 : vector<1x1x16x2xf32> to vector<16x2xf32>
    %22 = tpu.concatenate %21, %18 in 1 : vector<16x2xf32>, vector<16x32xf32> -> vector<16x34xf32>
    %23 = arith.truncf %22 : vector<16x34xf32> to vector<16x34xbf16>
    %cst = arith.constant dense<0.000000e+00> : vector<16x34xf32>
    %24 = tpu.matmul %1, %23, %cst {dimension_numbers = #tpu.dot_dimension_numbers<[1], [0], [0], [1], [0, 0, 1, 1], [], []>} : vector<16x16xbf16>, vector<16x34xbf16>, vector<16x34xf32> -> vector<16x34xf32>
    %cst_29 = arith.constant dense<0.000000e+00> : vector<16x34xf32>
    %25 = tpu.matmul %3, %23, %cst_29 {dimension_numbers = #tpu.dot_dimension_numbers<[1], [0], [0], [1], [0, 0, 1, 1], [], []>} : vector<16x16xbf16>, vector<16x34xbf16>, vector<16x34xf32> -> vector<16x34xf32>
    %26 = tpu.concatenate %24, %25 in 1 : vector<16x34xf32>, vector<16x34xf32> -> vector<16x68xf32>
    %27 = arith.truncf %26 : vector<16x68xf32> to vector<16x68xbf16>
    %cst_30 = arith.constant dense<0.000000e+00> : vector<16x1024xf32>
    %28 = tpu.matmul %27, %4, %cst_30 {dimension_numbers = #tpu.dot_dimension_numbers<[1], [0], [0], [1], [0, 0, 1, 1], [], []>} : vector<16x68xbf16>, vector<68x1024xbf16>, vector<16x1024xf32> -> vector<16x1024xf32>
    %29 = vector.extract_strided_slice %28 {offsets = [0, 0], sizes = [16, 128], strides = [1, 1]} : vector<16x1024xf32> to vector<16x128xf32>
    %30 = vector.broadcast %6 : vector<16x1xf32> to vector<16x128xf32>
    %31 = arith.mulf %30, %29 : vector<16x128xf32>
    %32 = vector.extract_strided_slice %28 {offsets = [0, 128], sizes = [16, 128], strides = [1, 1]} : vector<16x1024xf32> to vector<16x128xf32>
    %33 = vector.broadcast %7 : vector<16x1xf32> to vector<16x128xf32>
    %34 = arith.mulf %33, %32 : vector<16x128xf32>
    %35 = arith.addf %31, %34 : vector<16x128xf32>
    %36 = vector.extract_strided_slice %28 {offsets = [0, 256], sizes = [16, 128], strides = [1, 1]} : vector<16x1024xf32> to vector<16x128xf32>
    %37 = vector.broadcast %8 : vector<16x1xf32> to vector<16x128xf32>
    %38 = arith.mulf %37, %36 : vector<16x128xf32>
    %39 = arith.addf %35, %38 : vector<16x128xf32>
    %40 = vector.extract_strided_slice %28 {offsets = [0, 384], sizes = [16, 128], strides = [1, 1]} : vector<16x1024xf32> to vector<16x128xf32>
    %41 = vector.broadcast %9 : vector<16x1xf32> to vector<16x128xf32>
    %42 = arith.mulf %41, %40 : vector<16x128xf32>
    %43 = arith.addf %39, %42 : vector<16x128xf32>
    %44 = vector.extract_strided_slice %28 {offsets = [0, 512], sizes = [16, 128], strides = [1, 1]} : vector<16x1024xf32> to vector<16x128xf32>
    %45 = vector.broadcast %10 : vector<16x1xf32> to vector<16x128xf32>
    %46 = arith.mulf %45, %44 : vector<16x128xf32>
    %47 = arith.addf %43, %46 : vector<16x128xf32>
    %48 = vector.extract_strided_slice %28 {offsets = [0, 640], sizes = [16, 128], strides = [1, 1]} : vector<16x1024xf32> to vector<16x128xf32>
    %49 = vector.broadcast %11 : vector<16x1xf32> to vector<16x128xf32>
    %50 = arith.mulf %49, %48 : vector<16x128xf32>
    %51 = arith.addf %47, %50 : vector<16x128xf32>
    %52 = vector.extract_strided_slice %28 {offsets = [0, 768], sizes = [16, 128], strides = [1, 1]} : vector<16x1024xf32> to vector<16x128xf32>
    %53 = vector.broadcast %12 : vector<16x1xf32> to vector<16x128xf32>
    %54 = arith.mulf %53, %52 : vector<16x128xf32>
    %55 = arith.addf %51, %54 : vector<16x128xf32>
    %56 = vector.extract_strided_slice %28 {offsets = [0, 896], sizes = [16, 128], strides = [1, 1]} : vector<16x1024xf32> to vector<16x128xf32>
    %57 = vector.broadcast %13 : vector<16x1xf32> to vector<16x128xf32>
    %58 = arith.mulf %57, %56 : vector<16x128xf32>
    %59 = arith.addf %55, %58 : vector<16x128xf32>
    %60 = vector.extract_strided_slice %59 {offsets = [0, 0], sizes = [16, 32], strides = [1, 1]} : vector<16x128xf32> to vector<16x32xf32>
    %61 = arith.addf %60, %14 : vector<16x32xf32>
    %62 = arith.negf %61 : vector<16x32xf32>
    %63 = math.exp %62 : vector<16x32xf32>
    %cst_31 = arith.constant 1.000000e+00 : f32
    %64 = vector.broadcast %cst_31 : f32 to vector<16x32xf32>
    %65 = arith.addf %64, %63 : vector<16x32xf32>
    %66 = arith.divf %64, %65 : vector<16x32xf32>
    %67 = vector.extract_strided_slice %59 {offsets = [0, 32], sizes = [16, 32], strides = [1, 1]} : vector<16x128xf32> to vector<16x32xf32>
    %68 = arith.addf %67, %15 : vector<16x32xf32>
    %69 = arith.negf %68 : vector<16x32xf32>
    %70 = math.exp %69 : vector<16x32xf32>
    %cst_32 = arith.constant 1.000000e+00 : f32
    %71 = vector.broadcast %cst_32 : f32 to vector<16x32xf32>
    %72 = arith.addf %71, %70 : vector<16x32xf32>
    %73 = arith.divf %71, %72 : vector<16x32xf32>
    %74 = arith.mulf %66, %18 : vector<16x32xf32>
    %75 = arith.truncf %74 : vector<16x32xf32> to vector<16x32xbf16>
    %cst_33 = arith.constant dense<0.000000e+00> : vector<16x32xf32>
    %76 = tpu.matmul %1, %75, %cst_33 {dimension_numbers = #tpu.dot_dimension_numbers<[1], [0], [0], [1], [0, 0, 1, 1], [], []>} : vector<16x16xbf16>, vector<16x32xbf16>, vector<16x32xf32> -> vector<16x32xf32>
    %cst_34 = arith.constant dense<0.000000e+00> : vector<16x32xf32>
    %77 = tpu.matmul %3, %75, %cst_34 {dimension_numbers = #tpu.dot_dimension_numbers<[1], [0], [0], [1], [0, 0, 1, 1], [], []>} : vector<16x16xbf16>, vector<16x32xbf16>, vector<16x32xf32> -> vector<16x32xf32>
    %78 = vector.extract_strided_slice %24 {offsets = [0, 0], sizes = [16, 2], strides = [1, 1]} : vector<16x34xf32> to vector<16x2xf32>
    %79 = vector.extract_strided_slice %25 {offsets = [0, 0], sizes = [16, 2], strides = [1, 1]} : vector<16x34xf32> to vector<16x2xf32>
    %80 = tpu.concatenate %78, %76, %79, %77 in 1 : vector<16x2xf32>, vector<16x32xf32>, vector<16x2xf32>, vector<16x32xf32> -> vector<16x68xf32>
    %81 = arith.truncf %80 : vector<16x68xf32> to vector<16x68xbf16>
    %cst_35 = arith.constant dense<0.000000e+00> : vector<16x1024xf32>
    %82 = tpu.matmul %81, %5, %cst_35 {dimension_numbers = #tpu.dot_dimension_numbers<[1], [0], [0], [1], [0, 0, 1, 1], [], []>} : vector<16x68xbf16>, vector<68x1024xbf16>, vector<16x1024xf32> -> vector<16x1024xf32>
    %83 = vector.extract_strided_slice %82 {offsets = [0, 0], sizes = [16, 128], strides = [1, 1]} : vector<16x1024xf32> to vector<16x128xf32>
    %84 = vector.broadcast %6 : vector<16x1xf32> to vector<16x128xf32>
    %85 = arith.mulf %84, %83 : vector<16x128xf32>
    %86 = vector.extract_strided_slice %82 {offsets = [0, 128], sizes = [16, 128], strides = [1, 1]} : vector<16x1024xf32> to vector<16x128xf32>
    %87 = vector.broadcast %7 : vector<16x1xf32> to vector<16x128xf32>
    %88 = arith.mulf %87, %86 : vector<16x128xf32>
    %89 = arith.addf %85, %88 : vector<16x128xf32>
    %90 = vector.extract_strided_slice %82 {offsets = [0, 256], sizes = [16, 128], strides = [1, 1]} : vector<16x1024xf32> to vector<16x128xf32>
    %91 = vector.broadcast %8 : vector<16x1xf32> to vector<16x128xf32>
    %92 = arith.mulf %91, %90 : vector<16x128xf32>
    %93 = arith.addf %89, %92 : vector<16x128xf32>
    %94 = vector.extract_strided_slice %82 {offsets = [0, 384], sizes = [16, 128], strides = [1, 1]} : vector<16x1024xf32> to vector<16x128xf32>
    %95 = vector.broadcast %9 : vector<16x1xf32> to vector<16x128xf32>
    %96 = arith.mulf %95, %94 : vector<16x128xf32>
    %97 = arith.addf %93, %96 : vector<16x128xf32>
    %98 = vector.extract_strided_slice %82 {offsets = [0, 512], sizes = [16, 128], strides = [1, 1]} : vector<16x1024xf32> to vector<16x128xf32>
    %99 = vector.broadcast %10 : vector<16x1xf32> to vector<16x128xf32>
    %100 = arith.mulf %99, %98 : vector<16x128xf32>
    %101 = arith.addf %97, %100 : vector<16x128xf32>
    %102 = vector.extract_strided_slice %82 {offsets = [0, 640], sizes = [16, 128], strides = [1, 1]} : vector<16x1024xf32> to vector<16x128xf32>
    %103 = vector.broadcast %11 : vector<16x1xf32> to vector<16x128xf32>
    %104 = arith.mulf %103, %102 : vector<16x128xf32>
    %105 = arith.addf %101, %104 : vector<16x128xf32>
    %106 = vector.extract_strided_slice %82 {offsets = [0, 768], sizes = [16, 128], strides = [1, 1]} : vector<16x1024xf32> to vector<16x128xf32>
    %107 = vector.broadcast %12 : vector<16x1xf32> to vector<16x128xf32>
    %108 = arith.mulf %107, %106 : vector<16x128xf32>
    %109 = arith.addf %105, %108 : vector<16x128xf32>
    %110 = vector.extract_strided_slice %82 {offsets = [0, 896], sizes = [16, 128], strides = [1, 1]} : vector<16x1024xf32> to vector<16x128xf32>
    %111 = vector.broadcast %13 : vector<16x1xf32> to vector<16x128xf32>
    %112 = arith.mulf %111, %110 : vector<16x128xf32>
    %113 = arith.addf %109, %112 : vector<16x128xf32>
    %114 = vector.extract_strided_slice %113 {offsets = [0, 0], sizes = [16, 32], strides = [1, 1]} : vector<16x128xf32> to vector<16x32xf32>
    %115 = arith.addf %114, %16 : vector<16x32xf32>
    %116 = math.tanh %115 : vector<16x32xf32>
    %117 = arith.mulf %73, %18 : vector<16x32xf32>
    %cst_36 = arith.constant 1.000000e+00 : f32
    %118 = vector.broadcast %cst_36 : f32 to vector<16x32xf32>
    %119 = arith.subf %118, %73 : vector<16x32xf32>
    %120 = arith.mulf %119, %116 : vector<16x32xf32>
    %121 = arith.addf %117, %120 : vector<16x32xf32>
    %c0_37 = arith.constant 0 : index
    %122 = arith.index_cast %c0_i32 : i32 to index
    %c0_38 = arith.constant 0 : index
    %c0_39 = arith.constant 0 : index
    %123 = vector.load %arg9[%c0_37, %122, %c0_38, %c0_39] : memref<1x8x16x32xf32, #tpu.memory_space<vmem>>, vector<1x1x16x32xf32>
    %124 = vector.shape_cast %123 : vector<1x1x16x32xf32> to vector<16x32xf32>
    %125 = vector.shape_cast %121 : vector<16x32xf32> to vector<1x1x16x32xf32>
    tpu.vector_store %arg9[%c0_37, %122, %c0_38, %c0_39], %125 {strides = array<i32>} : memref<1x8x16x32xf32, #tpu.memory_space<vmem>>, vector<1x1x16x32xf32>,
    %c1_i32 = arith.constant 1 : i32
    %c0_40 = arith.constant 0 : index
    %126 = arith.index_cast %c1_i32 : i32 to index
    %c0_41 = arith.constant 0 : index
    %c0_42 = arith.constant 0 : index
    %127 = vector.load %arg1[%c0_40, %126, %c0_41, %c0_42] : memref<1x8x16x2xf32, #tpu.memory_space<vmem>>, vector<1x1x16x2xf32>
    %128 = vector.shape_cast %127 : vector<1x1x16x2xf32> to vector<16x2xf32>
    %129 = tpu.concatenate %128, %121 in 1 : vector<16x2xf32>, vector<16x32xf32> -> vector<16x34xf32>
    %130 = arith.truncf %129 : vector<16x34xf32> to vector<16x34xbf16>
    %cst_43 = arith.constant dense<0.000000e+00> : vector<16x34xf32>
    %131 = tpu.matmul %1, %130, %cst_43 {dimension_numbers = #tpu.dot_dimension_numbers<[1], [0], [0], [1], [0, 0, 1, 1], [], []>} : vector<16x16xbf16>, vector<16x34xbf16>, vector<16x34xf32> -> vector<16x34xf32>
    %cst_44 = arith.constant dense<0.000000e+00> : vector<16x34xf32>
    %132 = tpu.matmul %3, %130, %cst_44 {dimension_numbers = #tpu.dot_dimension_numbers<[1], [0], [0], [1], [0, 0, 1, 1], [], []>} : vector<16x16xbf16>, vector<16x34xbf16>, vector<16x34xf32> -> vector<16x34xf32>
    %133 = tpu.concatenate %131, %132 in 1 : vector<16x34xf32>, vector<16x34xf32> -> vector<16x68xf32>
    %134 = arith.truncf %133 : vector<16x68xf32> to vector<16x68xbf16>
    %cst_45 = arith.constant dense<0.000000e+00> : vector<16x1024xf32>
    %135 = tpu.matmul %134, %4, %cst_45 {dimension_numbers = #tpu.dot_dimension_numbers<[1], [0], [0], [1], [0, 0, 1, 1], [], []>} : vector<16x68xbf16>, vector<68x1024xbf16>, vector<16x1024xf32> -> vector<16x1024xf32>
    %136 = vector.extract_strided_slice %135 {offsets = [0, 0], sizes = [16, 128], strides = [1, 1]} : vector<16x1024xf32> to vector<16x128xf32>
    %137 = vector.broadcast %6 : vector<16x1xf32> to vector<16x128xf32>
    %138 = arith.mulf %137, %136 : vector<16x128xf32>
    %139 = vector.extract_strided_slice %135 {offsets = [0, 128], sizes = [16, 128], strides = [1, 1]} : vector<16x1024xf32> to vector<16x128xf32>
    %140 = vector.broadcast %7 : vector<16x1xf32> to vector<16x128xf32>
    %141 = arith.mulf %140, %139 : vector<16x128xf32>
    %142 = arith.addf %138, %141 : vector<16x128xf32>
    %143 = vector.extract_strided_slice %135 {offsets = [0, 256], sizes = [16, 128], strides = [1, 1]} : vector<16x1024xf32> to vector<16x128xf32>
    %144 = vector.broadcast %8 : vector<16x1xf32> to vector<16x128xf32>
    %145 = arith.mulf %144, %143 : vector<16x128xf32>
    %146 = arith.addf %142, %145 : vector<16x128xf32>
    %147 = vector.extract_strided_slice %135 {offsets = [0, 384], sizes = [16, 128], strides = [1, 1]} : vector<16x1024xf32> to vector<16x128xf32>
    %148 = vector.broadcast %9 : vector<16x1xf32> to vector<16x128xf32>
    %149 = arith.mulf %148, %147 : vector<16x128xf32>
    %150 = arith.addf %146, %149 : vector<16x128xf32>
    %151 = vector.extract_strided_slice %135 {offsets = [0, 512], sizes = [16, 128], strides = [1, 1]} : vector<16x1024xf32> to vector<16x128xf32>
    %152 = vector.broadcast %10 : vector<16x1xf32> to vector<16x128xf32>
    %153 = arith.mulf %152, %151 : vector<16x128xf32>
    %154 = arith.addf %150, %153 : vector<16x128xf32>
    %155 = vector.extract_strided_slice %135 {offsets = [0, 640], sizes = [16, 128], strides = [1, 1]} : vector<16x1024xf32> to vector<16x128xf32>
    %156 = vector.broadcast %11 : vector<16x1xf32> to vector<16x128xf32>
    %157 = arith.mulf %156, %155 : vector<16x128xf32>
    %158 = arith.addf %154, %157 : vector<16x128xf32>
    %159 = vector.extract_strided_slice %135 {offsets = [0, 768], sizes = [16, 128], strides = [1, 1]} : vector<16x1024xf32> to vector<16x128xf32>
    %160 = vector.broadcast %12 : vector<16x1xf32> to vector<16x128xf32>
    %161 = arith.mulf %160, %159 : vector<16x128xf32>
    %162 = arith.addf %158, %161 : vector<16x128xf32>
    %163 = vector.extract_strided_slice %135 {offsets = [0, 896], sizes = [16, 128], strides = [1, 1]} : vector<16x1024xf32> to vector<16x128xf32>
    %164 = vector.broadcast %13 : vector<16x1xf32> to vector<16x128xf32>
    %165 = arith.mulf %164, %163 : vector<16x128xf32>
    %166 = arith.addf %162, %165 : vector<16x128xf32>
    %167 = vector.extract_strided_slice %166 {offsets = [0, 0], sizes = [16, 32], strides = [1, 1]} : vector<16x128xf32> to vector<16x32xf32>
    %168 = arith.addf %167, %14 : vector<16x32xf32>
    %169 = arith.negf %168 : vector<16x32xf32>
    %170 = math.exp %169 : vector<16x32xf32>
    %cst_46 = arith.constant 1.000000e+00 : f32
    %171 = vector.broadcast %cst_46 : f32 to vector<16x32xf32>
    %172 = arith.addf %171, %170 : vector<16x32xf32>
    %173 = arith.divf %171, %172 : vector<16x32xf32>
    %174 = vector.extract_strided_slice %166 {offsets = [0, 32], sizes = [16, 32], strides = [1, 1]} : vector<16x128xf32> to vector<16x32xf32>
    %175 = arith.addf %174, %15 : vector<16x32xf32>
    %176 = arith.negf %175 : vector<16x32xf32>
    %177 = math.exp %176 : vector<16x32xf32>
    %cst_47 = arith.constant 1.000000e+00 : f32
    %178 = vector.broadcast %cst_47 : f32 to vector<16x32xf32>
    %179 = arith.addf %178, %177 : vector<16x32xf32>
    %180 = arith.divf %178, %179 : vector<16x32xf32>
    %181 = arith.mulf %173, %121 : vector<16x32xf32>
    %182 = arith.truncf %181 : vector<16x32xf32> to vector<16x32xbf16>
    %cst_48 = arith.constant dense<0.000000e+00> : vector<16x32xf32>
    %183 = tpu.matmul %1, %182, %cst_48 {dimension_numbers = #tpu.dot_dimension_numbers<[1], [0], [0], [1], [0, 0, 1, 1], [], []>} : vector<16x16xbf16>, vector<16x32xbf16>, vector<16x32xf32> -> vector<16x32xf32>
    %cst_49 = arith.constant dense<0.000000e+00> : vector<16x32xf32>
    %184 = tpu.matmul %3, %182, %cst_49 {dimension_numbers = #tpu.dot_dimension_numbers<[1], [0], [0], [1], [0, 0, 1, 1], [], []>} : vector<16x16xbf16>, vector<16x32xbf16>, vector<16x32xf32> -> vector<16x32xf32>
    %185 = vector.extract_strided_slice %131 {offsets = [0, 0], sizes = [16, 2], strides = [1, 1]} : vector<16x34xf32> to vector<16x2xf32>
    %186 = vector.extract_strided_slice %132 {offsets = [0, 0], sizes = [16, 2], strides = [1, 1]} : vector<16x34xf32> to vector<16x2xf32>
    %187 = tpu.concatenate %185, %183, %186, %184 in 1 : vector<16x2xf32>, vector<16x32xf32>, vector<16x2xf32>, vector<16x32xf32> -> vector<16x68xf32>
    %188 = arith.truncf %187 : vector<16x68xf32> to vector<16x68xbf16>
    %cst_50 = arith.constant dense<0.000000e+00> : vector<16x1024xf32>
    %189 = tpu.matmul %188, %5, %cst_50 {dimension_numbers = #tpu.dot_dimension_numbers<[1], [0], [0], [1], [0, 0, 1, 1], [], []>} : vector<16x68xbf16>, vector<68x1024xbf16>, vector<16x1024xf32> -> vector<16x1024xf32>
    %190 = vector.extract_strided_slice %189 {offsets = [0, 0], sizes = [16, 128], strides = [1, 1]} : vector<16x1024xf32> to vector<16x128xf32>
    %191 = vector.broadcast %6 : vector<16x1xf32> to vector<16x128xf32>
    %192 = arith.mulf %191, %190 : vector<16x128xf32>
    %193 = vector.extract_strided_slice %189 {offsets = [0, 128], sizes = [16, 128], strides = [1, 1]} : vector<16x1024xf32> to vector<16x128xf32>
    %194 = vector.broadcast %7 : vector<16x1xf32> to vector<16x128xf32>
    %195 = arith.mulf %194, %193 : vector<16x128xf32>
    %196 = arith.addf %192, %195 : vector<16x128xf32>
    %197 = vector.extract_strided_slice %189 {offsets = [0, 256], sizes = [16, 128], strides = [1, 1]} : vector<16x1024xf32> to vector<16x128xf32>
    %198 = vector.broadcast %8 : vector<16x1xf32> to vector<16x128xf32>
    %199 = arith.mulf %198, %197 : vector<16x128xf32>
    %200 = arith.addf %196, %199 : vector<16x128xf32>
    %201 = vector.extract_strided_slice %189 {offsets = [0, 384], sizes = [16, 128], strides = [1, 1]} : vector<16x1024xf32> to vector<16x128xf32>
    %202 = vector.broadcast %9 : vector<16x1xf32> to vector<16x128xf32>
    %203 = arith.mulf %202, %201 : vector<16x128xf32>
    %204 = arith.addf %200, %203 : vector<16x128xf32>
    %205 = vector.extract_strided_slice %189 {offsets = [0, 512], sizes = [16, 128], strides = [1, 1]} : vector<16x1024xf32> to vector<16x128xf32>
    %206 = vector.broadcast %10 : vector<16x1xf32> to vector<16x128xf32>
    %207 = arith.mulf %206, %205 : vector<16x128xf32>
    %208 = arith.addf %204, %207 : vector<16x128xf32>
    %209 = vector.extract_strided_slice %189 {offsets = [0, 640], sizes = [16, 128], strides = [1, 1]} : vector<16x1024xf32> to vector<16x128xf32>
    %210 = vector.broadcast %11 : vector<16x1xf32> to vector<16x128xf32>
    %211 = arith.mulf %210, %209 : vector<16x128xf32>
    %212 = arith.addf %208, %211 : vector<16x128xf32>
    %213 = vector.extract_strided_slice %189 {offsets = [0, 768], sizes = [16, 128], strides = [1, 1]} : vector<16x1024xf32> to vector<16x128xf32>
    %214 = vector.broadcast %12 : vector<16x1xf32> to vector<16x128xf32>
    %215 = arith.mulf %214, %213 : vector<16x128xf32>
    %216 = arith.addf %212, %215 : vector<16x128xf32>
    %217 = vector.extract_strided_slice %189 {offsets = [0, 896], sizes = [16, 128], strides = [1, 1]} : vector<16x1024xf32> to vector<16x128xf32>
    %218 = vector.broadcast %13 : vector<16x1xf32> to vector<16x128xf32>
    %219 = arith.mulf %218, %217 : vector<16x128xf32>
    %220 = arith.addf %216, %219 : vector<16x128xf32>
    %221 = vector.extract_strided_slice %220 {offsets = [0, 0], sizes = [16, 32], strides = [1, 1]} : vector<16x128xf32> to vector<16x32xf32>
    %222 = arith.addf %221, %16 : vector<16x32xf32>
    %223 = math.tanh %222 : vector<16x32xf32>
    %224 = arith.mulf %180, %121 : vector<16x32xf32>
    %cst_51 = arith.constant 1.000000e+00 : f32
    %225 = vector.broadcast %cst_51 : f32 to vector<16x32xf32>
    %226 = arith.subf %225, %180 : vector<16x32xf32>
    %227 = arith.mulf %226, %223 : vector<16x32xf32>
    %228 = arith.addf %224, %227 : vector<16x32xf32>
    %c0_52 = arith.constant 0 : index
    %229 = arith.index_cast %c1_i32 : i32 to index
    %c0_53 = arith.constant 0 : index
    %c0_54 = arith.constant 0 : index
    %230 = vector.load %arg9[%c0_52, %229, %c0_53, %c0_54] : memref<1x8x16x32xf32, #tpu.memory_space<vmem>>, vector<1x1x16x32xf32>
    %231 = vector.shape_cast %230 : vector<1x1x16x32xf32> to vector<16x32xf32>
    %232 = vector.shape_cast %228 : vector<16x32xf32> to vector<1x1x16x32xf32>
    tpu.vector_store %arg9[%c0_52, %229, %c0_53, %c0_54], %232 {strides = array<i32>} : memref<1x8x16x32xf32, #tpu.memory_space<vmem>>, vector<1x1x16x32xf32>,
    %c2_i32 = arith.constant 2 : i32
    %c0_55 = arith.constant 0 : index
    %233 = arith.index_cast %c2_i32 : i32 to index
    %c0_56 = arith.constant 0 : index
    %c0_57 = arith.constant 0 : index
    %234 = vector.load %arg1[%c0_55, %233, %c0_56, %c0_57] : memref<1x8x16x2xf32, #tpu.memory_space<vmem>>, vector<1x1x16x2xf32>
    %235 = vector.shape_cast %234 : vector<1x1x16x2xf32> to vector<16x2xf32>
    %236 = tpu.concatenate %235, %228 in 1 : vector<16x2xf32>, vector<16x32xf32> -> vector<16x34xf32>
    %237 = arith.truncf %236 : vector<16x34xf32> to vector<16x34xbf16>
    %cst_58 = arith.constant dense<0.000000e+00> : vector<16x34xf32>
    %238 = tpu.matmul %1, %237, %cst_58 {dimension_numbers = #tpu.dot_dimension_numbers<[1], [0], [0], [1], [0, 0, 1, 1], [], []>} : vector<16x16xbf16>, vector<16x34xbf16>, vector<16x34xf32> -> vector<16x34xf32>
    %cst_59 = arith.constant dense<0.000000e+00> : vector<16x34xf32>
    %239 = tpu.matmul %3, %237, %cst_59 {dimension_numbers = #tpu.dot_dimension_numbers<[1], [0], [0], [1], [0, 0, 1, 1], [], []>} : vector<16x16xbf16>, vector<16x34xbf16>, vector<16x34xf32> -> vector<16x34xf32>
    %240 = tpu.concatenate %238, %239 in 1 : vector<16x34xf32>, vector<16x34xf32> -> vector<16x68xf32>
    %241 = arith.truncf %240 : vector<16x68xf32> to vector<16x68xbf16>
    %cst_60 = arith.constant dense<0.000000e+00> : vector<16x1024xf32>
    %242 = tpu.matmul %241, %4, %cst_60 {dimension_numbers = #tpu.dot_dimension_numbers<[1], [0], [0], [1], [0, 0, 1, 1], [], []>} : vector<16x68xbf16>, vector<68x1024xbf16>, vector<16x1024xf32> -> vector<16x1024xf32>
    %243 = vector.extract_strided_slice %242 {offsets = [0, 0], sizes = [16, 128], strides = [1, 1]} : vector<16x1024xf32> to vector<16x128xf32>
    %244 = vector.broadcast %6 : vector<16x1xf32> to vector<16x128xf32>
    %245 = arith.mulf %244, %243 : vector<16x128xf32>
    %246 = vector.extract_strided_slice %242 {offsets = [0, 128], sizes = [16, 128], strides = [1, 1]} : vector<16x1024xf32> to vector<16x128xf32>
    %247 = vector.broadcast %7 : vector<16x1xf32> to vector<16x128xf32>
    %248 = arith.mulf %247, %246 : vector<16x128xf32>
    %249 = arith.addf %245, %248 : vector<16x128xf32>
    %250 = vector.extract_strided_slice %242 {offsets = [0, 256], sizes = [16, 128], strides = [1, 1]} : vector<16x1024xf32> to vector<16x128xf32>
    %251 = vector.broadcast %8 : vector<16x1xf32> to vector<16x128xf32>
    %252 = arith.mulf %251, %250 : vector<16x128xf32>
    %253 = arith.addf %249, %252 : vector<16x128xf32>
    %254 = vector.extract_strided_slice %242 {offsets = [0, 384], sizes = [16, 128], strides = [1, 1]} : vector<16x1024xf32> to vector<16x128xf32>
    %255 = vector.broadcast %9 : vector<16x1xf32> to vector<16x128xf32>
    %256 = arith.mulf %255, %254 : vector<16x128xf32>
    %257 = arith.addf %253, %256 : vector<16x128xf32>
    %258 = vector.extract_strided_slice %242 {offsets = [0, 512], sizes = [16, 128], strides = [1, 1]} : vector<16x1024xf32> to vector<16x128xf32>
    %259 = vector.broadcast %10 : vector<16x1xf32> to vector<16x128xf32>
    %260 = arith.mulf %259, %258 : vector<16x128xf32>
    %261 = arith.addf %257, %260 : vector<16x128xf32>
    %262 = vector.extract_strided_slice %242 {offsets = [0, 640], sizes = [16, 128], strides = [1, 1]} : vector<16x1024xf32> to vector<16x128xf32>
    %263 = vector.broadcast %11 : vector<16x1xf32> to vector<16x128xf32>
    %264 = arith.mulf %263, %262 : vector<16x128xf32>
    %265 = arith.addf %261, %264 : vector<16x128xf32>
    %266 = vector.extract_strided_slice %242 {offsets = [0, 768], sizes = [16, 128], strides = [1, 1]} : vector<16x1024xf32> to vector<16x128xf32>
    %267 = vector.broadcast %12 : vector<16x1xf32> to vector<16x128xf32>
    %268 = arith.mulf %267, %266 : vector<16x128xf32>
    %269 = arith.addf %265, %268 : vector<16x128xf32>
    %270 = vector.extract_strided_slice %242 {offsets = [0, 896], sizes = [16, 128], strides = [1, 1]} : vector<16x1024xf32> to vector<16x128xf32>
    %271 = vector.broadcast %13 : vector<16x1xf32> to vector<16x128xf32>
    %272 = arith.mulf %271, %270 : vector<16x128xf32>
    %273 = arith.addf %269, %272 : vector<16x128xf32>
    %274 = vector.extract_strided_slice %273 {offsets = [0, 0], sizes = [16, 32], strides = [1, 1]} : vector<16x128xf32> to vector<16x32xf32>
    %275 = arith.addf %274, %14 : vector<16x32xf32>
    %276 = arith.negf %275 : vector<16x32xf32>
    %277 = math.exp %276 : vector<16x32xf32>
    %cst_61 = arith.constant 1.000000e+00 : f32
    %278 = vector.broadcast %cst_61 : f32 to vector<16x32xf32>
    %279 = arith.addf %278, %277 : vector<16x32xf32>
    %280 = arith.divf %278, %279 : vector<16x32xf32>
    %281 = vector.extract_strided_slice %273 {offsets = [0, 32], sizes = [16, 32], strides = [1, 1]} : vector<16x128xf32> to vector<16x32xf32>
    %282 = arith.addf %281, %15 : vector<16x32xf32>
    %283 = arith.negf %282 : vector<16x32xf32>
    %284 = math.exp %283 : vector<16x32xf32>
    %cst_62 = arith.constant 1.000000e+00 : f32
    %285 = vector.broadcast %cst_62 : f32 to vector<16x32xf32>
    %286 = arith.addf %285, %284 : vector<16x32xf32>
    %287 = arith.divf %285, %286 : vector<16x32xf32>
    %288 = arith.mulf %280, %228 : vector<16x32xf32>
    %289 = arith.truncf %288 : vector<16x32xf32> to vector<16x32xbf16>
    %cst_63 = arith.constant dense<0.000000e+00> : vector<16x32xf32>
    %290 = tpu.matmul %1, %289, %cst_63 {dimension_numbers = #tpu.dot_dimension_numbers<[1], [0], [0], [1], [0, 0, 1, 1], [], []>} : vector<16x16xbf16>, vector<16x32xbf16>, vector<16x32xf32> -> vector<16x32xf32>
    %cst_64 = arith.constant dense<0.000000e+00> : vector<16x32xf32>
    %291 = tpu.matmul %3, %289, %cst_64 {dimension_numbers = #tpu.dot_dimension_numbers<[1], [0], [0], [1], [0, 0, 1, 1], [], []>} : vector<16x16xbf16>, vector<16x32xbf16>, vector<16x32xf32> -> vector<16x32xf32>
    %292 = vector.extract_strided_slice %238 {offsets = [0, 0], sizes = [16, 2], strides = [1, 1]} : vector<16x34xf32> to vector<16x2xf32>
    %293 = vector.extract_strided_slice %239 {offsets = [0, 0], sizes = [16, 2], strides = [1, 1]} : vector<16x34xf32> to vector<16x2xf32>
    %294 = tpu.concatenate %292, %290, %293, %291 in 1 : vector<16x2xf32>, vector<16x32xf32>, vector<16x2xf32>, vector<16x32xf32> -> vector<16x68xf32>
    %295 = arith.truncf %294 : vector<16x68xf32> to vector<16x68xbf16>
    %cst_65 = arith.constant dense<0.000000e+00> : vector<16x1024xf32>
    %296 = tpu.matmul %295, %5, %cst_65 {dimension_numbers = #tpu.dot_dimension_numbers<[1], [0], [0], [1], [0, 0, 1, 1], [], []>} : vector<16x68xbf16>, vector<68x1024xbf16>, vector<16x1024xf32> -> vector<16x1024xf32>
    %297 = vector.extract_strided_slice %296 {offsets = [0, 0], sizes = [16, 128], strides = [1, 1]} : vector<16x1024xf32> to vector<16x128xf32>
    %298 = vector.broadcast %6 : vector<16x1xf32> to vector<16x128xf32>
    %299 = arith.mulf %298, %297 : vector<16x128xf32>
    %300 = vector.extract_strided_slice %296 {offsets = [0, 128], sizes = [16, 128], strides = [1, 1]} : vector<16x1024xf32> to vector<16x128xf32>
    %301 = vector.broadcast %7 : vector<16x1xf32> to vector<16x128xf32>
    %302 = arith.mulf %301, %300 : vector<16x128xf32>
    %303 = arith.addf %299, %302 : vector<16x128xf32>
    %304 = vector.extract_strided_slice %296 {offsets = [0, 256], sizes = [16, 128], strides = [1, 1]} : vector<16x1024xf32> to vector<16x128xf32>
    %305 = vector.broadcast %8 : vector<16x1xf32> to vector<16x128xf32>
    %306 = arith.mulf %305, %304 : vector<16x128xf32>
    %307 = arith.addf %303, %306 : vector<16x128xf32>
    %308 = vector.extract_strided_slice %296 {offsets = [0, 384], sizes = [16, 128], strides = [1, 1]} : vector<16x1024xf32> to vector<16x128xf32>
    %309 = vector.broadcast %9 : vector<16x1xf32> to vector<16x128xf32>
    %310 = arith.mulf %309, %308 : vector<16x128xf32>
    %311 = arith.addf %307, %310 : vector<16x128xf32>
    %312 = vector.extract_strided_slice %296 {offsets = [0, 512], sizes = [16, 128], strides = [1, 1]} : vector<16x1024xf32> to vector<16x128xf32>
    %313 = vector.broadcast %10 : vector<16x1xf32> to vector<16x128xf32>
    %314 = arith.mulf %313, %312 : vector<16x128xf32>
    %315 = arith.addf %311, %314 : vector<16x128xf32>
    %316 = vector.extract_strided_slice %296 {offsets = [0, 640], sizes = [16, 128], strides = [1, 1]} : vector<16x1024xf32> to vector<16x128xf32>
    %317 = vector.broadcast %11 : vector<16x1xf32> to vector<16x128xf32>
    %318 = arith.mulf %317, %316 : vector<16x128xf32>
    %319 = arith.addf %315, %318 : vector<16x128xf32>
    %320 = vector.extract_strided_slice %296 {offsets = [0, 768], sizes = [16, 128], strides = [1, 1]} : vector<16x1024xf32> to vector<16x128xf32>
    %321 = vector.broadcast %12 : vector<16x1xf32> to vector<16x128xf32>
    %322 = arith.mulf %321, %320 : vector<16x128xf32>
    %323 = arith.addf %319, %322 : vector<16x128xf32>
    %324 = vector.extract_strided_slice %296 {offsets = [0, 896], sizes = [16, 128], strides = [1, 1]} : vector<16x1024xf32> to vector<16x128xf32>
    %325 = vector.broadcast %13 : vector<16x1xf32> to vector<16x128xf32>
    %326 = arith.mulf %325, %324 : vector<16x128xf32>
    %327 = arith.addf %323, %326 : vector<16x128xf32>
    %328 = vector.extract_strided_slice %327 {offsets = [0, 0], sizes = [16, 32], strides = [1, 1]} : vector<16x128xf32> to vector<16x32xf32>
    %329 = arith.addf %328, %16 : vector<16x32xf32>
    %330 = math.tanh %329 : vector<16x32xf32>
    %331 = arith.mulf %287, %228 : vector<16x32xf32>
    %cst_66 = arith.constant 1.000000e+00 : f32
    %332 = vector.broadcast %cst_66 : f32 to vector<16x32xf32>
    %333 = arith.subf %332, %287 : vector<16x32xf32>
    %334 = arith.mulf %333, %330 : vector<16x32xf32>
    %335 = arith.addf %331, %334 : vector<16x32xf32>
    %c0_67 = arith.constant 0 : index
    %336 = arith.index_cast %c2_i32 : i32 to index
    %c0_68 = arith.constant 0 : index
    %c0_69 = arith.constant 0 : index
    %337 = vector.load %arg9[%c0_67, %336, %c0_68, %c0_69] : memref<1x8x16x32xf32, #tpu.memory_space<vmem>>, vector<1x1x16x32xf32>
    %338 = vector.shape_cast %337 : vector<1x1x16x32xf32> to vector<16x32xf32>
    %339 = vector.shape_cast %335 : vector<16x32xf32> to vector<1x1x16x32xf32>
    tpu.vector_store %arg9[%c0_67, %336, %c0_68, %c0_69], %339 {strides = array<i32>} : memref<1x8x16x32xf32, #tpu.memory_space<vmem>>, vector<1x1x16x32xf32>,
    %c3_i32 = arith.constant 3 : i32
    %c0_70 = arith.constant 0 : index
    %340 = arith.index_cast %c3_i32 : i32 to index
    %c0_71 = arith.constant 0 : index
    %c0_72 = arith.constant 0 : index
    %341 = vector.load %arg1[%c0_70, %340, %c0_71, %c0_72] : memref<1x8x16x2xf32, #tpu.memory_space<vmem>>, vector<1x1x16x2xf32>
    %342 = vector.shape_cast %341 : vector<1x1x16x2xf32> to vector<16x2xf32>
    %343 = tpu.concatenate %342, %335 in 1 : vector<16x2xf32>, vector<16x32xf32> -> vector<16x34xf32>
    %344 = arith.truncf %343 : vector<16x34xf32> to vector<16x34xbf16>
    %cst_73 = arith.constant dense<0.000000e+00> : vector<16x34xf32>
    %345 = tpu.matmul %1, %344, %cst_73 {dimension_numbers = #tpu.dot_dimension_numbers<[1], [0], [0], [1], [0, 0, 1, 1], [], []>} : vector<16x16xbf16>, vector<16x34xbf16>, vector<16x34xf32> -> vector<16x34xf32>
    %cst_74 = arith.constant dense<0.000000e+00> : vector<16x34xf32>
    %346 = tpu.matmul %3, %344, %cst_74 {dimension_numbers = #tpu.dot_dimension_numbers<[1], [0], [0], [1], [0, 0, 1, 1], [], []>} : vector<16x16xbf16>, vector<16x34xbf16>, vector<16x34xf32> -> vector<16x34xf32>
    %347 = tpu.concatenate %345, %346 in 1 : vector<16x34xf32>, vector<16x34xf32> -> vector<16x68xf32>
    %348 = arith.truncf %347 : vector<16x68xf32> to vector<16x68xbf16>
    %cst_75 = arith.constant dense<0.000000e+00> : vector<16x1024xf32>
    %349 = tpu.matmul %348, %4, %cst_75 {dimension_numbers = #tpu.dot_dimension_numbers<[1], [0], [0], [1], [0, 0, 1, 1], [], []>} : vector<16x68xbf16>, vector<68x1024xbf16>, vector<16x1024xf32> -> vector<16x1024xf32>
    %350 = vector.extract_strided_slice %349 {offsets = [0, 0], sizes = [16, 128], strides = [1, 1]} : vector<16x1024xf32> to vector<16x128xf32>
    %351 = vector.broadcast %6 : vector<16x1xf32> to vector<16x128xf32>
    %352 = arith.mulf %351, %350 : vector<16x128xf32>
    %353 = vector.extract_strided_slice %349 {offsets = [0, 128], sizes = [16, 128], strides = [1, 1]} : vector<16x1024xf32> to vector<16x128xf32>
    %354 = vector.broadcast %7 : vector<16x1xf32> to vector<16x128xf32>
    %355 = arith.mulf %354, %353 : vector<16x128xf32>
    %356 = arith.addf %352, %355 : vector<16x128xf32>
    %357 = vector.extract_strided_slice %349 {offsets = [0, 256], sizes = [16, 128], strides = [1, 1]} : vector<16x1024xf32> to vector<16x128xf32>
    %358 = vector.broadcast %8 : vector<16x1xf32> to vector<16x128xf32>
    %359 = arith.mulf %358, %357 : vector<16x128xf32>
    %360 = arith.addf %356, %359 : vector<16x128xf32>
    %361 = vector.extract_strided_slice %349 {offsets = [0, 384], sizes = [16, 128], strides = [1, 1]} : vector<16x1024xf32> to vector<16x128xf32>
    %362 = vector.broadcast %9 : vector<16x1xf32> to vector<16x128xf32>
    %363 = arith.mulf %362, %361 : vector<16x128xf32>
    %364 = arith.addf %360, %363 : vector<16x128xf32>
    %365 = vector.extract_strided_slice %349 {offsets = [0, 512], sizes = [16, 128], strides = [1, 1]} : vector<16x1024xf32> to vector<16x128xf32>
    %366 = vector.broadcast %10 : vector<16x1xf32> to vector<16x128xf32>
    %367 = arith.mulf %366, %365 : vector<16x128xf32>
    %368 = arith.addf %364, %367 : vector<16x128xf32>
    %369 = vector.extract_strided_slice %349 {offsets = [0, 640], sizes = [16, 128], strides = [1, 1]} : vector<16x1024xf32> to vector<16x128xf32>
    %370 = vector.broadcast %11 : vector<16x1xf32> to vector<16x128xf32>
    %371 = arith.mulf %370, %369 : vector<16x128xf32>
    %372 = arith.addf %368, %371 : vector<16x128xf32>
    %373 = vector.extract_strided_slice %349 {offsets = [0, 768], sizes = [16, 128], strides = [1, 1]} : vector<16x1024xf32> to vector<16x128xf32>
    %374 = vector.broadcast %12 : vector<16x1xf32> to vector<16x128xf32>
    %375 = arith.mulf %374, %373 : vector<16x128xf32>
    %376 = arith.addf %372, %375 : vector<16x128xf32>
    %377 = vector.extract_strided_slice %349 {offsets = [0, 896], sizes = [16, 128], strides = [1, 1]} : vector<16x1024xf32> to vector<16x128xf32>
    %378 = vector.broadcast %13 : vector<16x1xf32> to vector<16x128xf32>
    %379 = arith.mulf %378, %377 : vector<16x128xf32>
    %380 = arith.addf %376, %379 : vector<16x128xf32>
    %381 = vector.extract_strided_slice %380 {offsets = [0, 0], sizes = [16, 32], strides = [1, 1]} : vector<16x128xf32> to vector<16x32xf32>
    %382 = arith.addf %381, %14 : vector<16x32xf32>
    %383 = arith.negf %382 : vector<16x32xf32>
    %384 = math.exp %383 : vector<16x32xf32>
    %cst_76 = arith.constant 1.000000e+00 : f32
    %385 = vector.broadcast %cst_76 : f32 to vector<16x32xf32>
    %386 = arith.addf %385, %384 : vector<16x32xf32>
    %387 = arith.divf %385, %386 : vector<16x32xf32>
    %388 = vector.extract_strided_slice %380 {offsets = [0, 32], sizes = [16, 32], strides = [1, 1]} : vector<16x128xf32> to vector<16x32xf32>
    %389 = arith.addf %388, %15 : vector<16x32xf32>
    %390 = arith.negf %389 : vector<16x32xf32>
    %391 = math.exp %390 : vector<16x32xf32>
    %cst_77 = arith.constant 1.000000e+00 : f32
    %392 = vector.broadcast %cst_77 : f32 to vector<16x32xf32>
    %393 = arith.addf %392, %391 : vector<16x32xf32>
    %394 = arith.divf %392, %393 : vector<16x32xf32>
    %395 = arith.mulf %387, %335 : vector<16x32xf32>
    %396 = arith.truncf %395 : vector<16x32xf32> to vector<16x32xbf16>
    %cst_78 = arith.constant dense<0.000000e+00> : vector<16x32xf32>
    %397 = tpu.matmul %1, %396, %cst_78 {dimension_numbers = #tpu.dot_dimension_numbers<[1], [0], [0], [1], [0, 0, 1, 1], [], []>} : vector<16x16xbf16>, vector<16x32xbf16>, vector<16x32xf32> -> vector<16x32xf32>
    %cst_79 = arith.constant dense<0.000000e+00> : vector<16x32xf32>
    %398 = tpu.matmul %3, %396, %cst_79 {dimension_numbers = #tpu.dot_dimension_numbers<[1], [0], [0], [1], [0, 0, 1, 1], [], []>} : vector<16x16xbf16>, vector<16x32xbf16>, vector<16x32xf32> -> vector<16x32xf32>
    %399 = vector.extract_strided_slice %345 {offsets = [0, 0], sizes = [16, 2], strides = [1, 1]} : vector<16x34xf32> to vector<16x2xf32>
    %400 = vector.extract_strided_slice %346 {offsets = [0, 0], sizes = [16, 2], strides = [1, 1]} : vector<16x34xf32> to vector<16x2xf32>
    %401 = tpu.concatenate %399, %397, %400, %398 in 1 : vector<16x2xf32>, vector<16x32xf32>, vector<16x2xf32>, vector<16x32xf32> -> vector<16x68xf32>
    %402 = arith.truncf %401 : vector<16x68xf32> to vector<16x68xbf16>
    %cst_80 = arith.constant dense<0.000000e+00> : vector<16x1024xf32>
    %403 = tpu.matmul %402, %5, %cst_80 {dimension_numbers = #tpu.dot_dimension_numbers<[1], [0], [0], [1], [0, 0, 1, 1], [], []>} : vector<16x68xbf16>, vector<68x1024xbf16>, vector<16x1024xf32> -> vector<16x1024xf32>
    %404 = vector.extract_strided_slice %403 {offsets = [0, 0], sizes = [16, 128], strides = [1, 1]} : vector<16x1024xf32> to vector<16x128xf32>
    %405 = vector.broadcast %6 : vector<16x1xf32> to vector<16x128xf32>
    %406 = arith.mulf %405, %404 : vector<16x128xf32>
    %407 = vector.extract_strided_slice %403 {offsets = [0, 128], sizes = [16, 128], strides = [1, 1]} : vector<16x1024xf32> to vector<16x128xf32>
    %408 = vector.broadcast %7 : vector<16x1xf32> to vector<16x128xf32>
    %409 = arith.mulf %408, %407 : vector<16x128xf32>
    %410 = arith.addf %406, %409 : vector<16x128xf32>
    %411 = vector.extract_strided_slice %403 {offsets = [0, 256], sizes = [16, 128], strides = [1, 1]} : vector<16x1024xf32> to vector<16x128xf32>
    %412 = vector.broadcast %8 : vector<16x1xf32> to vector<16x128xf32>
    %413 = arith.mulf %412, %411 : vector<16x128xf32>
    %414 = arith.addf %410, %413 : vector<16x128xf32>
    %415 = vector.extract_strided_slice %403 {offsets = [0, 384], sizes = [16, 128], strides = [1, 1]} : vector<16x1024xf32> to vector<16x128xf32>
    %416 = vector.broadcast %9 : vector<16x1xf32> to vector<16x128xf32>
    %417 = arith.mulf %416, %415 : vector<16x128xf32>
    %418 = arith.addf %414, %417 : vector<16x128xf32>
    %419 = vector.extract_strided_slice %403 {offsets = [0, 512], sizes = [16, 128], strides = [1, 1]} : vector<16x1024xf32> to vector<16x128xf32>
    %420 = vector.broadcast %10 : vector<16x1xf32> to vector<16x128xf32>
    %421 = arith.mulf %420, %419 : vector<16x128xf32>
    %422 = arith.addf %418, %421 : vector<16x128xf32>
    %423 = vector.extract_strided_slice %403 {offsets = [0, 640], sizes = [16, 128], strides = [1, 1]} : vector<16x1024xf32> to vector<16x128xf32>
    %424 = vector.broadcast %11 : vector<16x1xf32> to vector<16x128xf32>
    %425 = arith.mulf %424, %423 : vector<16x128xf32>
    %426 = arith.addf %422, %425 : vector<16x128xf32>
    %427 = vector.extract_strided_slice %403 {offsets = [0, 768], sizes = [16, 128], strides = [1, 1]} : vector<16x1024xf32> to vector<16x128xf32>
    %428 = vector.broadcast %12 : vector<16x1xf32> to vector<16x128xf32>
    %429 = arith.mulf %428, %427 : vector<16x128xf32>
    %430 = arith.addf %426, %429 : vector<16x128xf32>
    %431 = vector.extract_strided_slice %403 {offsets = [0, 896], sizes = [16, 128], strides = [1, 1]} : vector<16x1024xf32> to vector<16x128xf32>
    %432 = vector.broadcast %13 : vector<16x1xf32> to vector<16x128xf32>
    %433 = arith.mulf %432, %431 : vector<16x128xf32>
    %434 = arith.addf %430, %433 : vector<16x128xf32>
    %435 = vector.extract_strided_slice %434 {offsets = [0, 0], sizes = [16, 32], strides = [1, 1]} : vector<16x128xf32> to vector<16x32xf32>
    %436 = arith.addf %435, %16 : vector<16x32xf32>
    %437 = math.tanh %436 : vector<16x32xf32>
    %438 = arith.mulf %394, %335 : vector<16x32xf32>
    %cst_81 = arith.constant 1.000000e+00 : f32
    %439 = vector.broadcast %cst_81 : f32 to vector<16x32xf32>
    %440 = arith.subf %439, %394 : vector<16x32xf32>
    %441 = arith.mulf %440, %437 : vector<16x32xf32>
    %442 = arith.addf %438, %441 : vector<16x32xf32>
    %c0_82 = arith.constant 0 : index
    %443 = arith.index_cast %c3_i32 : i32 to index
    %c0_83 = arith.constant 0 : index
    %c0_84 = arith.constant 0 : index
    %444 = vector.load %arg9[%c0_82, %443, %c0_83, %c0_84] : memref<1x8x16x32xf32, #tpu.memory_space<vmem>>, vector<1x1x16x32xf32>
    %445 = vector.shape_cast %444 : vector<1x1x16x32xf32> to vector<16x32xf32>
    %446 = vector.shape_cast %442 : vector<16x32xf32> to vector<1x1x16x32xf32>
    tpu.vector_store %arg9[%c0_82, %443, %c0_83, %c0_84], %446 {strides = array<i32>} : memref<1x8x16x32xf32, #tpu.memory_space<vmem>>, vector<1x1x16x32xf32>,
    %c4_i32 = arith.constant 4 : i32
    %c0_85 = arith.constant 0 : index
    %447 = arith.index_cast %c4_i32 : i32 to index
    %c0_86 = arith.constant 0 : index
    %c0_87 = arith.constant 0 : index
    %448 = vector.load %arg1[%c0_85, %447, %c0_86, %c0_87] : memref<1x8x16x2xf32, #tpu.memory_space<vmem>>, vector<1x1x16x2xf32>
    %449 = vector.shape_cast %448 : vector<1x1x16x2xf32> to vector<16x2xf32>
    %450 = tpu.concatenate %449, %442 in 1 : vector<16x2xf32>, vector<16x32xf32> -> vector<16x34xf32>
    %451 = arith.truncf %450 : vector<16x34xf32> to vector<16x34xbf16>
    %cst_88 = arith.constant dense<0.000000e+00> : vector<16x34xf32>
    %452 = tpu.matmul %1, %451, %cst_88 {dimension_numbers = #tpu.dot_dimension_numbers<[1], [0], [0], [1], [0, 0, 1, 1], [], []>} : vector<16x16xbf16>, vector<16x34xbf16>, vector<16x34xf32> -> vector<16x34xf32>
    %cst_89 = arith.constant dense<0.000000e+00> : vector<16x34xf32>
    %453 = tpu.matmul %3, %451, %cst_89 {dimension_numbers = #tpu.dot_dimension_numbers<[1], [0], [0], [1], [0, 0, 1, 1], [], []>} : vector<16x16xbf16>, vector<16x34xbf16>, vector<16x34xf32> -> vector<16x34xf32>
    %454 = tpu.concatenate %452, %453 in 1 : vector<16x34xf32>, vector<16x34xf32> -> vector<16x68xf32>
    %455 = arith.truncf %454 : vector<16x68xf32> to vector<16x68xbf16>
    %cst_90 = arith.constant dense<0.000000e+00> : vector<16x1024xf32>
    %456 = tpu.matmul %455, %4, %cst_90 {dimension_numbers = #tpu.dot_dimension_numbers<[1], [0], [0], [1], [0, 0, 1, 1], [], []>} : vector<16x68xbf16>, vector<68x1024xbf16>, vector<16x1024xf32> -> vector<16x1024xf32>
    %457 = vector.extract_strided_slice %456 {offsets = [0, 0], sizes = [16, 128], strides = [1, 1]} : vector<16x1024xf32> to vector<16x128xf32>
    %458 = vector.broadcast %6 : vector<16x1xf32> to vector<16x128xf32>
    %459 = arith.mulf %458, %457 : vector<16x128xf32>
    %460 = vector.extract_strided_slice %456 {offsets = [0, 128], sizes = [16, 128], strides = [1, 1]} : vector<16x1024xf32> to vector<16x128xf32>
    %461 = vector.broadcast %7 : vector<16x1xf32> to vector<16x128xf32>
    %462 = arith.mulf %461, %460 : vector<16x128xf32>
    %463 = arith.addf %459, %462 : vector<16x128xf32>
    %464 = vector.extract_strided_slice %456 {offsets = [0, 256], sizes = [16, 128], strides = [1, 1]} : vector<16x1024xf32> to vector<16x128xf32>
    %465 = vector.broadcast %8 : vector<16x1xf32> to vector<16x128xf32>
    %466 = arith.mulf %465, %464 : vector<16x128xf32>
    %467 = arith.addf %463, %466 : vector<16x128xf32>
    %468 = vector.extract_strided_slice %456 {offsets = [0, 384], sizes = [16, 128], strides = [1, 1]} : vector<16x1024xf32> to vector<16x128xf32>
    %469 = vector.broadcast %9 : vector<16x1xf32> to vector<16x128xf32>
    %470 = arith.mulf %469, %468 : vector<16x128xf32>
    %471 = arith.addf %467, %470 : vector<16x128xf32>
    %472 = vector.extract_strided_slice %456 {offsets = [0, 512], sizes = [16, 128], strides = [1, 1]} : vector<16x1024xf32> to vector<16x128xf32>
    %473 = vector.broadcast %10 : vector<16x1xf32> to vector<16x128xf32>
    %474 = arith.mulf %473, %472 : vector<16x128xf32>
    %475 = arith.addf %471, %474 : vector<16x128xf32>
    %476 = vector.extract_strided_slice %456 {offsets = [0, 640], sizes = [16, 128], strides = [1, 1]} : vector<16x1024xf32> to vector<16x128xf32>
    %477 = vector.broadcast %11 : vector<16x1xf32> to vector<16x128xf32>
    %478 = arith.mulf %477, %476 : vector<16x128xf32>
    %479 = arith.addf %475, %478 : vector<16x128xf32>
    %480 = vector.extract_strided_slice %456 {offsets = [0, 768], sizes = [16, 128], strides = [1, 1]} : vector<16x1024xf32> to vector<16x128xf32>
    %481 = vector.broadcast %12 : vector<16x1xf32> to vector<16x128xf32>
    %482 = arith.mulf %481, %480 : vector<16x128xf32>
    %483 = arith.addf %479, %482 : vector<16x128xf32>
    %484 = vector.extract_strided_slice %456 {offsets = [0, 896], sizes = [16, 128], strides = [1, 1]} : vector<16x1024xf32> to vector<16x128xf32>
    %485 = vector.broadcast %13 : vector<16x1xf32> to vector<16x128xf32>
    %486 = arith.mulf %485, %484 : vector<16x128xf32>
    %487 = arith.addf %483, %486 : vector<16x128xf32>
    %488 = vector.extract_strided_slice %487 {offsets = [0, 0], sizes = [16, 32], strides = [1, 1]} : vector<16x128xf32> to vector<16x32xf32>
    %489 = arith.addf %488, %14 : vector<16x32xf32>
    %490 = arith.negf %489 : vector<16x32xf32>
    %491 = math.exp %490 : vector<16x32xf32>
    %cst_91 = arith.constant 1.000000e+00 : f32
    %492 = vector.broadcast %cst_91 : f32 to vector<16x32xf32>
    %493 = arith.addf %492, %491 : vector<16x32xf32>
    %494 = arith.divf %492, %493 : vector<16x32xf32>
    %495 = vector.extract_strided_slice %487 {offsets = [0, 32], sizes = [16, 32], strides = [1, 1]} : vector<16x128xf32> to vector<16x32xf32>
    %496 = arith.addf %495, %15 : vector<16x32xf32>
    %497 = arith.negf %496 : vector<16x32xf32>
    %498 = math.exp %497 : vector<16x32xf32>
    %cst_92 = arith.constant 1.000000e+00 : f32
    %499 = vector.broadcast %cst_92 : f32 to vector<16x32xf32>
    %500 = arith.addf %499, %498 : vector<16x32xf32>
    %501 = arith.divf %499, %500 : vector<16x32xf32>
    %502 = arith.mulf %494, %442 : vector<16x32xf32>
    %503 = arith.truncf %502 : vector<16x32xf32> to vector<16x32xbf16>
    %cst_93 = arith.constant dense<0.000000e+00> : vector<16x32xf32>
    %504 = tpu.matmul %1, %503, %cst_93 {dimension_numbers = #tpu.dot_dimension_numbers<[1], [0], [0], [1], [0, 0, 1, 1], [], []>} : vector<16x16xbf16>, vector<16x32xbf16>, vector<16x32xf32> -> vector<16x32xf32>
    %cst_94 = arith.constant dense<0.000000e+00> : vector<16x32xf32>
    %505 = tpu.matmul %3, %503, %cst_94 {dimension_numbers = #tpu.dot_dimension_numbers<[1], [0], [0], [1], [0, 0, 1, 1], [], []>} : vector<16x16xbf16>, vector<16x32xbf16>, vector<16x32xf32> -> vector<16x32xf32>
    %506 = vector.extract_strided_slice %452 {offsets = [0, 0], sizes = [16, 2], strides = [1, 1]} : vector<16x34xf32> to vector<16x2xf32>
    %507 = vector.extract_strided_slice %453 {offsets = [0, 0], sizes = [16, 2], strides = [1, 1]} : vector<16x34xf32> to vector<16x2xf32>
    %508 = tpu.concatenate %506, %504, %507, %505 in 1 : vector<16x2xf32>, vector<16x32xf32>, vector<16x2xf32>, vector<16x32xf32> -> vector<16x68xf32>
    %509 = arith.truncf %508 : vector<16x68xf32> to vector<16x68xbf16>
    %cst_95 = arith.constant dense<0.000000e+00> : vector<16x1024xf32>
    %510 = tpu.matmul %509, %5, %cst_95 {dimension_numbers = #tpu.dot_dimension_numbers<[1], [0], [0], [1], [0, 0, 1, 1], [], []>} : vector<16x68xbf16>, vector<68x1024xbf16>, vector<16x1024xf32> -> vector<16x1024xf32>
    %511 = vector.extract_strided_slice %510 {offsets = [0, 0], sizes = [16, 128], strides = [1, 1]} : vector<16x1024xf32> to vector<16x128xf32>
    %512 = vector.broadcast %6 : vector<16x1xf32> to vector<16x128xf32>
    %513 = arith.mulf %512, %511 : vector<16x128xf32>
    %514 = vector.extract_strided_slice %510 {offsets = [0, 128], sizes = [16, 128], strides = [1, 1]} : vector<16x1024xf32> to vector<16x128xf32>
    %515 = vector.broadcast %7 : vector<16x1xf32> to vector<16x128xf32>
    %516 = arith.mulf %515, %514 : vector<16x128xf32>
    %517 = arith.addf %513, %516 : vector<16x128xf32>
    %518 = vector.extract_strided_slice %510 {offsets = [0, 256], sizes = [16, 128], strides = [1, 1]} : vector<16x1024xf32> to vector<16x128xf32>
    %519 = vector.broadcast %8 : vector<16x1xf32> to vector<16x128xf32>
    %520 = arith.mulf %519, %518 : vector<16x128xf32>
    %521 = arith.addf %517, %520 : vector<16x128xf32>
    %522 = vector.extract_strided_slice %510 {offsets = [0, 384], sizes = [16, 128], strides = [1, 1]} : vector<16x1024xf32> to vector<16x128xf32>
    %523 = vector.broadcast %9 : vector<16x1xf32> to vector<16x128xf32>
    %524 = arith.mulf %523, %522 : vector<16x128xf32>
    %525 = arith.addf %521, %524 : vector<16x128xf32>
    %526 = vector.extract_strided_slice %510 {offsets = [0, 512], sizes = [16, 128], strides = [1, 1]} : vector<16x1024xf32> to vector<16x128xf32>
    %527 = vector.broadcast %10 : vector<16x1xf32> to vector<16x128xf32>
    %528 = arith.mulf %527, %526 : vector<16x128xf32>
    %529 = arith.addf %525, %528 : vector<16x128xf32>
    %530 = vector.extract_strided_slice %510 {offsets = [0, 640], sizes = [16, 128], strides = [1, 1]} : vector<16x1024xf32> to vector<16x128xf32>
    %531 = vector.broadcast %11 : vector<16x1xf32> to vector<16x128xf32>
    %532 = arith.mulf %531, %530 : vector<16x128xf32>
    %533 = arith.addf %529, %532 : vector<16x128xf32>
    %534 = vector.extract_strided_slice %510 {offsets = [0, 768], sizes = [16, 128], strides = [1, 1]} : vector<16x1024xf32> to vector<16x128xf32>
    %535 = vector.broadcast %12 : vector<16x1xf32> to vector<16x128xf32>
    %536 = arith.mulf %535, %534 : vector<16x128xf32>
    %537 = arith.addf %533, %536 : vector<16x128xf32>
    %538 = vector.extract_strided_slice %510 {offsets = [0, 896], sizes = [16, 128], strides = [1, 1]} : vector<16x1024xf32> to vector<16x128xf32>
    %539 = vector.broadcast %13 : vector<16x1xf32> to vector<16x128xf32>
    %540 = arith.mulf %539, %538 : vector<16x128xf32>
    %541 = arith.addf %537, %540 : vector<16x128xf32>
    %542 = vector.extract_strided_slice %541 {offsets = [0, 0], sizes = [16, 32], strides = [1, 1]} : vector<16x128xf32> to vector<16x32xf32>
    %543 = arith.addf %542, %16 : vector<16x32xf32>
    %544 = math.tanh %543 : vector<16x32xf32>
    %545 = arith.mulf %501, %442 : vector<16x32xf32>
    %cst_96 = arith.constant 1.000000e+00 : f32
    %546 = vector.broadcast %cst_96 : f32 to vector<16x32xf32>
    %547 = arith.subf %546, %501 : vector<16x32xf32>
    %548 = arith.mulf %547, %544 : vector<16x32xf32>
    %549 = arith.addf %545, %548 : vector<16x32xf32>
    %c0_97 = arith.constant 0 : index
    %550 = arith.index_cast %c4_i32 : i32 to index
    %c0_98 = arith.constant 0 : index
    %c0_99 = arith.constant 0 : index
    %551 = vector.load %arg9[%c0_97, %550, %c0_98, %c0_99] : memref<1x8x16x32xf32, #tpu.memory_space<vmem>>, vector<1x1x16x32xf32>
    %552 = vector.shape_cast %551 : vector<1x1x16x32xf32> to vector<16x32xf32>
    %553 = vector.shape_cast %549 : vector<16x32xf32> to vector<1x1x16x32xf32>
    tpu.vector_store %arg9[%c0_97, %550, %c0_98, %c0_99], %553 {strides = array<i32>} : memref<1x8x16x32xf32, #tpu.memory_space<vmem>>, vector<1x1x16x32xf32>,
    %c5_i32 = arith.constant 5 : i32
    %c0_100 = arith.constant 0 : index
    %554 = arith.index_cast %c5_i32 : i32 to index
    %c0_101 = arith.constant 0 : index
    %c0_102 = arith.constant 0 : index
    %555 = vector.load %arg1[%c0_100, %554, %c0_101, %c0_102] : memref<1x8x16x2xf32, #tpu.memory_space<vmem>>, vector<1x1x16x2xf32>
    %556 = vector.shape_cast %555 : vector<1x1x16x2xf32> to vector<16x2xf32>
    %557 = tpu.concatenate %556, %549 in 1 : vector<16x2xf32>, vector<16x32xf32> -> vector<16x34xf32>
    %558 = arith.truncf %557 : vector<16x34xf32> to vector<16x34xbf16>
    %cst_103 = arith.constant dense<0.000000e+00> : vector<16x34xf32>
    %559 = tpu.matmul %1, %558, %cst_103 {dimension_numbers = #tpu.dot_dimension_numbers<[1], [0], [0], [1], [0, 0, 1, 1], [], []>} : vector<16x16xbf16>, vector<16x34xbf16>, vector<16x34xf32> -> vector<16x34xf32>
    %cst_104 = arith.constant dense<0.000000e+00> : vector<16x34xf32>
    %560 = tpu.matmul %3, %558, %cst_104 {dimension_numbers = #tpu.dot_dimension_numbers<[1], [0], [0], [1], [0, 0, 1, 1], [], []>} : vector<16x16xbf16>, vector<16x34xbf16>, vector<16x34xf32> -> vector<16x34xf32>
    %561 = tpu.concatenate %559, %560 in 1 : vector<16x34xf32>, vector<16x34xf32> -> vector<16x68xf32>
    %562 = arith.truncf %561 : vector<16x68xf32> to vector<16x68xbf16>
    %cst_105 = arith.constant dense<0.000000e+00> : vector<16x1024xf32>
    %563 = tpu.matmul %562, %4, %cst_105 {dimension_numbers = #tpu.dot_dimension_numbers<[1], [0], [0], [1], [0, 0, 1, 1], [], []>} : vector<16x68xbf16>, vector<68x1024xbf16>, vector<16x1024xf32> -> vector<16x1024xf32>
    %564 = vector.extract_strided_slice %563 {offsets = [0, 0], sizes = [16, 128], strides = [1, 1]} : vector<16x1024xf32> to vector<16x128xf32>
    %565 = vector.broadcast %6 : vector<16x1xf32> to vector<16x128xf32>
    %566 = arith.mulf %565, %564 : vector<16x128xf32>
    %567 = vector.extract_strided_slice %563 {offsets = [0, 128], sizes = [16, 128], strides = [1, 1]} : vector<16x1024xf32> to vector<16x128xf32>
    %568 = vector.broadcast %7 : vector<16x1xf32> to vector<16x128xf32>
    %569 = arith.mulf %568, %567 : vector<16x128xf32>
    %570 = arith.addf %566, %569 : vector<16x128xf32>
    %571 = vector.extract_strided_slice %563 {offsets = [0, 256], sizes = [16, 128], strides = [1, 1]} : vector<16x1024xf32> to vector<16x128xf32>
    %572 = vector.broadcast %8 : vector<16x1xf32> to vector<16x128xf32>
    %573 = arith.mulf %572, %571 : vector<16x128xf32>
    %574 = arith.addf %570, %573 : vector<16x128xf32>
    %575 = vector.extract_strided_slice %563 {offsets = [0, 384], sizes = [16, 128], strides = [1, 1]} : vector<16x1024xf32> to vector<16x128xf32>
    %576 = vector.broadcast %9 : vector<16x1xf32> to vector<16x128xf32>
    %577 = arith.mulf %576, %575 : vector<16x128xf32>
    %578 = arith.addf %574, %577 : vector<16x128xf32>
    %579 = vector.extract_strided_slice %563 {offsets = [0, 512], sizes = [16, 128], strides = [1, 1]} : vector<16x1024xf32> to vector<16x128xf32>
    %580 = vector.broadcast %10 : vector<16x1xf32> to vector<16x128xf32>
    %581 = arith.mulf %580, %579 : vector<16x128xf32>
    %582 = arith.addf %578, %581 : vector<16x128xf32>
    %583 = vector.extract_strided_slice %563 {offsets = [0, 640], sizes = [16, 128], strides = [1, 1]} : vector<16x1024xf32> to vector<16x128xf32>
    %584 = vector.broadcast %11 : vector<16x1xf32> to vector<16x128xf32>
    %585 = arith.mulf %584, %583 : vector<16x128xf32>
    %586 = arith.addf %582, %585 : vector<16x128xf32>
    %587 = vector.extract_strided_slice %563 {offsets = [0, 768], sizes = [16, 128], strides = [1, 1]} : vector<16x1024xf32> to vector<16x128xf32>
    %588 = vector.broadcast %12 : vector<16x1xf32> to vector<16x128xf32>
    %589 = arith.mulf %588, %587 : vector<16x128xf32>
    %590 = arith.addf %586, %589 : vector<16x128xf32>
    %591 = vector.extract_strided_slice %563 {offsets = [0, 896], sizes = [16, 128], strides = [1, 1]} : vector<16x1024xf32> to vector<16x128xf32>
    %592 = vector.broadcast %13 : vector<16x1xf32> to vector<16x128xf32>
    %593 = arith.mulf %592, %591 : vector<16x128xf32>
    %594 = arith.addf %590, %593 : vector<16x128xf32>
    %595 = vector.extract_strided_slice %594 {offsets = [0, 0], sizes = [16, 32], strides = [1, 1]} : vector<16x128xf32> to vector<16x32xf32>
    %596 = arith.addf %595, %14 : vector<16x32xf32>
    %597 = arith.negf %596 : vector<16x32xf32>
    %598 = math.exp %597 : vector<16x32xf32>
    %cst_106 = arith.constant 1.000000e+00 : f32
    %599 = vector.broadcast %cst_106 : f32 to vector<16x32xf32>
    %600 = arith.addf %599, %598 : vector<16x32xf32>
    %601 = arith.divf %599, %600 : vector<16x32xf32>
    %602 = vector.extract_strided_slice %594 {offsets = [0, 32], sizes = [16, 32], strides = [1, 1]} : vector<16x128xf32> to vector<16x32xf32>
    %603 = arith.addf %602, %15 : vector<16x32xf32>
    %604 = arith.negf %603 : vector<16x32xf32>
    %605 = math.exp %604 : vector<16x32xf32>
    %cst_107 = arith.constant 1.000000e+00 : f32
    %606 = vector.broadcast %cst_107 : f32 to vector<16x32xf32>
    %607 = arith.addf %606, %605 : vector<16x32xf32>
    %608 = arith.divf %606, %607 : vector<16x32xf32>
    %609 = arith.mulf %601, %549 : vector<16x32xf32>
    %610 = arith.truncf %609 : vector<16x32xf32> to vector<16x32xbf16>
    %cst_108 = arith.constant dense<0.000000e+00> : vector<16x32xf32>
    %611 = tpu.matmul %1, %610, %cst_108 {dimension_numbers = #tpu.dot_dimension_numbers<[1], [0], [0], [1], [0, 0, 1, 1], [], []>} : vector<16x16xbf16>, vector<16x32xbf16>, vector<16x32xf32> -> vector<16x32xf32>
    %cst_109 = arith.constant dense<0.000000e+00> : vector<16x32xf32>
    %612 = tpu.matmul %3, %610, %cst_109 {dimension_numbers = #tpu.dot_dimension_numbers<[1], [0], [0], [1], [0, 0, 1, 1], [], []>} : vector<16x16xbf16>, vector<16x32xbf16>, vector<16x32xf32> -> vector<16x32xf32>
    %613 = vector.extract_strided_slice %559 {offsets = [0, 0], sizes = [16, 2], strides = [1, 1]} : vector<16x34xf32> to vector<16x2xf32>
    %614 = vector.extract_strided_slice %560 {offsets = [0, 0], sizes = [16, 2], strides = [1, 1]} : vector<16x34xf32> to vector<16x2xf32>
    %615 = tpu.concatenate %613, %611, %614, %612 in 1 : vector<16x2xf32>, vector<16x32xf32>, vector<16x2xf32>, vector<16x32xf32> -> vector<16x68xf32>
    %616 = arith.truncf %615 : vector<16x68xf32> to vector<16x68xbf16>
    %cst_110 = arith.constant dense<0.000000e+00> : vector<16x1024xf32>
    %617 = tpu.matmul %616, %5, %cst_110 {dimension_numbers = #tpu.dot_dimension_numbers<[1], [0], [0], [1], [0, 0, 1, 1], [], []>} : vector<16x68xbf16>, vector<68x1024xbf16>, vector<16x1024xf32> -> vector<16x1024xf32>
    %618 = vector.extract_strided_slice %617 {offsets = [0, 0], sizes = [16, 128], strides = [1, 1]} : vector<16x1024xf32> to vector<16x128xf32>
    %619 = vector.broadcast %6 : vector<16x1xf32> to vector<16x128xf32>
    %620 = arith.mulf %619, %618 : vector<16x128xf32>
    %621 = vector.extract_strided_slice %617 {offsets = [0, 128], sizes = [16, 128], strides = [1, 1]} : vector<16x1024xf32> to vector<16x128xf32>
    %622 = vector.broadcast %7 : vector<16x1xf32> to vector<16x128xf32>
    %623 = arith.mulf %622, %621 : vector<16x128xf32>
    %624 = arith.addf %620, %623 : vector<16x128xf32>
    %625 = vector.extract_strided_slice %617 {offsets = [0, 256], sizes = [16, 128], strides = [1, 1]} : vector<16x1024xf32> to vector<16x128xf32>
    %626 = vector.broadcast %8 : vector<16x1xf32> to vector<16x128xf32>
    %627 = arith.mulf %626, %625 : vector<16x128xf32>
    %628 = arith.addf %624, %627 : vector<16x128xf32>
    %629 = vector.extract_strided_slice %617 {offsets = [0, 384], sizes = [16, 128], strides = [1, 1]} : vector<16x1024xf32> to vector<16x128xf32>
    %630 = vector.broadcast %9 : vector<16x1xf32> to vector<16x128xf32>
    %631 = arith.mulf %630, %629 : vector<16x128xf32>
    %632 = arith.addf %628, %631 : vector<16x128xf32>
    %633 = vector.extract_strided_slice %617 {offsets = [0, 512], sizes = [16, 128], strides = [1, 1]} : vector<16x1024xf32> to vector<16x128xf32>
    %634 = vector.broadcast %10 : vector<16x1xf32> to vector<16x128xf32>
    %635 = arith.mulf %634, %633 : vector<16x128xf32>
    %636 = arith.addf %632, %635 : vector<16x128xf32>
    %637 = vector.extract_strided_slice %617 {offsets = [0, 640], sizes = [16, 128], strides = [1, 1]} : vector<16x1024xf32> to vector<16x128xf32>
    %638 = vector.broadcast %11 : vector<16x1xf32> to vector<16x128xf32>
    %639 = arith.mulf %638, %637 : vector<16x128xf32>
    %640 = arith.addf %636, %639 : vector<16x128xf32>
    %641 = vector.extract_strided_slice %617 {offsets = [0, 768], sizes = [16, 128], strides = [1, 1]} : vector<16x1024xf32> to vector<16x128xf32>
    %642 = vector.broadcast %12 : vector<16x1xf32> to vector<16x128xf32>
    %643 = arith.mulf %642, %641 : vector<16x128xf32>
    %644 = arith.addf %640, %643 : vector<16x128xf32>
    %645 = vector.extract_strided_slice %617 {offsets = [0, 896], sizes = [16, 128], strides = [1, 1]} : vector<16x1024xf32> to vector<16x128xf32>
    %646 = vector.broadcast %13 : vector<16x1xf32> to vector<16x128xf32>
    %647 = arith.mulf %646, %645 : vector<16x128xf32>
    %648 = arith.addf %644, %647 : vector<16x128xf32>
    %649 = vector.extract_strided_slice %648 {offsets = [0, 0], sizes = [16, 32], strides = [1, 1]} : vector<16x128xf32> to vector<16x32xf32>
    %650 = arith.addf %649, %16 : vector<16x32xf32>
    %651 = math.tanh %650 : vector<16x32xf32>
    %652 = arith.mulf %608, %549 : vector<16x32xf32>
    %cst_111 = arith.constant 1.000000e+00 : f32
    %653 = vector.broadcast %cst_111 : f32 to vector<16x32xf32>
    %654 = arith.subf %653, %608 : vector<16x32xf32>
    %655 = arith.mulf %654, %651 : vector<16x32xf32>
    %656 = arith.addf %652, %655 : vector<16x32xf32>
    %c0_112 = arith.constant 0 : index
    %657 = arith.index_cast %c5_i32 : i32 to index
    %c0_113 = arith.constant 0 : index
    %c0_114 = arith.constant 0 : index
    %658 = vector.load %arg9[%c0_112, %657, %c0_113, %c0_114] : memref<1x8x16x32xf32, #tpu.memory_space<vmem>>, vector<1x1x16x32xf32>
    %659 = vector.shape_cast %658 : vector<1x1x16x32xf32> to vector<16x32xf32>
    %660 = vector.shape_cast %656 : vector<16x32xf32> to vector<1x1x16x32xf32>
    tpu.vector_store %arg9[%c0_112, %657, %c0_113, %c0_114], %660 {strides = array<i32>} : memref<1x8x16x32xf32, #tpu.memory_space<vmem>>, vector<1x1x16x32xf32>,
    %c6_i32 = arith.constant 6 : i32
    %c0_115 = arith.constant 0 : index
    %661 = arith.index_cast %c6_i32 : i32 to index
    %c0_116 = arith.constant 0 : index
    %c0_117 = arith.constant 0 : index
    %662 = vector.load %arg1[%c0_115, %661, %c0_116, %c0_117] : memref<1x8x16x2xf32, #tpu.memory_space<vmem>>, vector<1x1x16x2xf32>
    %663 = vector.shape_cast %662 : vector<1x1x16x2xf32> to vector<16x2xf32>
    %664 = tpu.concatenate %663, %656 in 1 : vector<16x2xf32>, vector<16x32xf32> -> vector<16x34xf32>
    %665 = arith.truncf %664 : vector<16x34xf32> to vector<16x34xbf16>
    %cst_118 = arith.constant dense<0.000000e+00> : vector<16x34xf32>
    %666 = tpu.matmul %1, %665, %cst_118 {dimension_numbers = #tpu.dot_dimension_numbers<[1], [0], [0], [1], [0, 0, 1, 1], [], []>} : vector<16x16xbf16>, vector<16x34xbf16>, vector<16x34xf32> -> vector<16x34xf32>
    %cst_119 = arith.constant dense<0.000000e+00> : vector<16x34xf32>
    %667 = tpu.matmul %3, %665, %cst_119 {dimension_numbers = #tpu.dot_dimension_numbers<[1], [0], [0], [1], [0, 0, 1, 1], [], []>} : vector<16x16xbf16>, vector<16x34xbf16>, vector<16x34xf32> -> vector<16x34xf32>
    %668 = tpu.concatenate %666, %667 in 1 : vector<16x34xf32>, vector<16x34xf32> -> vector<16x68xf32>
    %669 = arith.truncf %668 : vector<16x68xf32> to vector<16x68xbf16>
    %cst_120 = arith.constant dense<0.000000e+00> : vector<16x1024xf32>
    %670 = tpu.matmul %669, %4, %cst_120 {dimension_numbers = #tpu.dot_dimension_numbers<[1], [0], [0], [1], [0, 0, 1, 1], [], []>} : vector<16x68xbf16>, vector<68x1024xbf16>, vector<16x1024xf32> -> vector<16x1024xf32>
    %671 = vector.extract_strided_slice %670 {offsets = [0, 0], sizes = [16, 128], strides = [1, 1]} : vector<16x1024xf32> to vector<16x128xf32>
    %672 = vector.broadcast %6 : vector<16x1xf32> to vector<16x128xf32>
    %673 = arith.mulf %672, %671 : vector<16x128xf32>
    %674 = vector.extract_strided_slice %670 {offsets = [0, 128], sizes = [16, 128], strides = [1, 1]} : vector<16x1024xf32> to vector<16x128xf32>
    %675 = vector.broadcast %7 : vector<16x1xf32> to vector<16x128xf32>
    %676 = arith.mulf %675, %674 : vector<16x128xf32>
    %677 = arith.addf %673, %676 : vector<16x128xf32>
    %678 = vector.extract_strided_slice %670 {offsets = [0, 256], sizes = [16, 128], strides = [1, 1]} : vector<16x1024xf32> to vector<16x128xf32>
    %679 = vector.broadcast %8 : vector<16x1xf32> to vector<16x128xf32>
    %680 = arith.mulf %679, %678 : vector<16x128xf32>
    %681 = arith.addf %677, %680 : vector<16x128xf32>
    %682 = vector.extract_strided_slice %670 {offsets = [0, 384], sizes = [16, 128], strides = [1, 1]} : vector<16x1024xf32> to vector<16x128xf32>
    %683 = vector.broadcast %9 : vector<16x1xf32> to vector<16x128xf32>
    %684 = arith.mulf %683, %682 : vector<16x128xf32>
    %685 = arith.addf %681, %684 : vector<16x128xf32>
    %686 = vector.extract_strided_slice %670 {offsets = [0, 512], sizes = [16, 128], strides = [1, 1]} : vector<16x1024xf32> to vector<16x128xf32>
    %687 = vector.broadcast %10 : vector<16x1xf32> to vector<16x128xf32>
    %688 = arith.mulf %687, %686 : vector<16x128xf32>
    %689 = arith.addf %685, %688 : vector<16x128xf32>
    %690 = vector.extract_strided_slice %670 {offsets = [0, 640], sizes = [16, 128], strides = [1, 1]} : vector<16x1024xf32> to vector<16x128xf32>
    %691 = vector.broadcast %11 : vector<16x1xf32> to vector<16x128xf32>
    %692 = arith.mulf %691, %690 : vector<16x128xf32>
    %693 = arith.addf %689, %692 : vector<16x128xf32>
    %694 = vector.extract_strided_slice %670 {offsets = [0, 768], sizes = [16, 128], strides = [1, 1]} : vector<16x1024xf32> to vector<16x128xf32>
    %695 = vector.broadcast %12 : vector<16x1xf32> to vector<16x128xf32>
    %696 = arith.mulf %695, %694 : vector<16x128xf32>
    %697 = arith.addf %693, %696 : vector<16x128xf32>
    %698 = vector.extract_strided_slice %670 {offsets = [0, 896], sizes = [16, 128], strides = [1, 1]} : vector<16x1024xf32> to vector<16x128xf32>
    %699 = vector.broadcast %13 : vector<16x1xf32> to vector<16x128xf32>
    %700 = arith.mulf %699, %698 : vector<16x128xf32>
    %701 = arith.addf %697, %700 : vector<16x128xf32>
    %702 = vector.extract_strided_slice %701 {offsets = [0, 0], sizes = [16, 32], strides = [1, 1]} : vector<16x128xf32> to vector<16x32xf32>
    %703 = arith.addf %702, %14 : vector<16x32xf32>
    %704 = arith.negf %703 : vector<16x32xf32>
    %705 = math.exp %704 : vector<16x32xf32>
    %cst_121 = arith.constant 1.000000e+00 : f32
    %706 = vector.broadcast %cst_121 : f32 to vector<16x32xf32>
    %707 = arith.addf %706, %705 : vector<16x32xf32>
    %708 = arith.divf %706, %707 : vector<16x32xf32>
    %709 = vector.extract_strided_slice %701 {offsets = [0, 32], sizes = [16, 32], strides = [1, 1]} : vector<16x128xf32> to vector<16x32xf32>
    %710 = arith.addf %709, %15 : vector<16x32xf32>
    %711 = arith.negf %710 : vector<16x32xf32>
    %712 = math.exp %711 : vector<16x32xf32>
    %cst_122 = arith.constant 1.000000e+00 : f32
    %713 = vector.broadcast %cst_122 : f32 to vector<16x32xf32>
    %714 = arith.addf %713, %712 : vector<16x32xf32>
    %715 = arith.divf %713, %714 : vector<16x32xf32>
    %716 = arith.mulf %708, %656 : vector<16x32xf32>
    %717 = arith.truncf %716 : vector<16x32xf32> to vector<16x32xbf16>
    %cst_123 = arith.constant dense<0.000000e+00> : vector<16x32xf32>
    %718 = tpu.matmul %1, %717, %cst_123 {dimension_numbers = #tpu.dot_dimension_numbers<[1], [0], [0], [1], [0, 0, 1, 1], [], []>} : vector<16x16xbf16>, vector<16x32xbf16>, vector<16x32xf32> -> vector<16x32xf32>
    %cst_124 = arith.constant dense<0.000000e+00> : vector<16x32xf32>
    %719 = tpu.matmul %3, %717, %cst_124 {dimension_numbers = #tpu.dot_dimension_numbers<[1], [0], [0], [1], [0, 0, 1, 1], [], []>} : vector<16x16xbf16>, vector<16x32xbf16>, vector<16x32xf32> -> vector<16x32xf32>
    %720 = vector.extract_strided_slice %666 {offsets = [0, 0], sizes = [16, 2], strides = [1, 1]} : vector<16x34xf32> to vector<16x2xf32>
    %721 = vector.extract_strided_slice %667 {offsets = [0, 0], sizes = [16, 2], strides = [1, 1]} : vector<16x34xf32> to vector<16x2xf32>
    %722 = tpu.concatenate %720, %718, %721, %719 in 1 : vector<16x2xf32>, vector<16x32xf32>, vector<16x2xf32>, vector<16x32xf32> -> vector<16x68xf32>
    %723 = arith.truncf %722 : vector<16x68xf32> to vector<16x68xbf16>
    %cst_125 = arith.constant dense<0.000000e+00> : vector<16x1024xf32>
    %724 = tpu.matmul %723, %5, %cst_125 {dimension_numbers = #tpu.dot_dimension_numbers<[1], [0], [0], [1], [0, 0, 1, 1], [], []>} : vector<16x68xbf16>, vector<68x1024xbf16>, vector<16x1024xf32> -> vector<16x1024xf32>
    %725 = vector.extract_strided_slice %724 {offsets = [0, 0], sizes = [16, 128], strides = [1, 1]} : vector<16x1024xf32> to vector<16x128xf32>
    %726 = vector.broadcast %6 : vector<16x1xf32> to vector<16x128xf32>
    %727 = arith.mulf %726, %725 : vector<16x128xf32>
    %728 = vector.extract_strided_slice %724 {offsets = [0, 128], sizes = [16, 128], strides = [1, 1]} : vector<16x1024xf32> to vector<16x128xf32>
    %729 = vector.broadcast %7 : vector<16x1xf32> to vector<16x128xf32>
    %730 = arith.mulf %729, %728 : vector<16x128xf32>
    %731 = arith.addf %727, %730 : vector<16x128xf32>
    %732 = vector.extract_strided_slice %724 {offsets = [0, 256], sizes = [16, 128], strides = [1, 1]} : vector<16x1024xf32> to vector<16x128xf32>
    %733 = vector.broadcast %8 : vector<16x1xf32> to vector<16x128xf32>
    %734 = arith.mulf %733, %732 : vector<16x128xf32>
    %735 = arith.addf %731, %734 : vector<16x128xf32>
    %736 = vector.extract_strided_slice %724 {offsets = [0, 384], sizes = [16, 128], strides = [1, 1]} : vector<16x1024xf32> to vector<16x128xf32>
    %737 = vector.broadcast %9 : vector<16x1xf32> to vector<16x128xf32>
    %738 = arith.mulf %737, %736 : vector<16x128xf32>
    %739 = arith.addf %735, %738 : vector<16x128xf32>
    %740 = vector.extract_strided_slice %724 {offsets = [0, 512], sizes = [16, 128], strides = [1, 1]} : vector<16x1024xf32> to vector<16x128xf32>
    %741 = vector.broadcast %10 : vector<16x1xf32> to vector<16x128xf32>
    %742 = arith.mulf %741, %740 : vector<16x128xf32>
    %743 = arith.addf %739, %742 : vector<16x128xf32>
    %744 = vector.extract_strided_slice %724 {offsets = [0, 640], sizes = [16, 128], strides = [1, 1]} : vector<16x1024xf32> to vector<16x128xf32>
    %745 = vector.broadcast %11 : vector<16x1xf32> to vector<16x128xf32>
    %746 = arith.mulf %745, %744 : vector<16x128xf32>
    %747 = arith.addf %743, %746 : vector<16x128xf32>
    %748 = vector.extract_strided_slice %724 {offsets = [0, 768], sizes = [16, 128], strides = [1, 1]} : vector<16x1024xf32> to vector<16x128xf32>
    %749 = vector.broadcast %12 : vector<16x1xf32> to vector<16x128xf32>
    %750 = arith.mulf %749, %748 : vector<16x128xf32>
    %751 = arith.addf %747, %750 : vector<16x128xf32>
    %752 = vector.extract_strided_slice %724 {offsets = [0, 896], sizes = [16, 128], strides = [1, 1]} : vector<16x1024xf32> to vector<16x128xf32>
    %753 = vector.broadcast %13 : vector<16x1xf32> to vector<16x128xf32>
    %754 = arith.mulf %753, %752 : vector<16x128xf32>
    %755 = arith.addf %751, %754 : vector<16x128xf32>
    %756 = vector.extract_strided_slice %755 {offsets = [0, 0], sizes = [16, 32], strides = [1, 1]} : vector<16x128xf32> to vector<16x32xf32>
    %757 = arith.addf %756, %16 : vector<16x32xf32>
    %758 = math.tanh %757 : vector<16x32xf32>
    %759 = arith.mulf %715, %656 : vector<16x32xf32>
    %cst_126 = arith.constant 1.000000e+00 : f32
    %760 = vector.broadcast %cst_126 : f32 to vector<16x32xf32>
    %761 = arith.subf %760, %715 : vector<16x32xf32>
    %762 = arith.mulf %761, %758 : vector<16x32xf32>
    %763 = arith.addf %759, %762 : vector<16x32xf32>
    %c0_127 = arith.constant 0 : index
    %764 = arith.index_cast %c6_i32 : i32 to index
    %c0_128 = arith.constant 0 : index
    %c0_129 = arith.constant 0 : index
    %765 = vector.load %arg9[%c0_127, %764, %c0_128, %c0_129] : memref<1x8x16x32xf32, #tpu.memory_space<vmem>>, vector<1x1x16x32xf32>
    %766 = vector.shape_cast %765 : vector<1x1x16x32xf32> to vector<16x32xf32>
    %767 = vector.shape_cast %763 : vector<16x32xf32> to vector<1x1x16x32xf32>
    tpu.vector_store %arg9[%c0_127, %764, %c0_128, %c0_129], %767 {strides = array<i32>} : memref<1x8x16x32xf32, #tpu.memory_space<vmem>>, vector<1x1x16x32xf32>,
    %c7_i32 = arith.constant 7 : i32
    %c0_130 = arith.constant 0 : index
    %768 = arith.index_cast %c7_i32 : i32 to index
    %c0_131 = arith.constant 0 : index
    %c0_132 = arith.constant 0 : index
    %769 = vector.load %arg1[%c0_130, %768, %c0_131, %c0_132] : memref<1x8x16x2xf32, #tpu.memory_space<vmem>>, vector<1x1x16x2xf32>
    %770 = vector.shape_cast %769 : vector<1x1x16x2xf32> to vector<16x2xf32>
    %771 = tpu.concatenate %770, %763 in 1 : vector<16x2xf32>, vector<16x32xf32> -> vector<16x34xf32>
    %772 = arith.truncf %771 : vector<16x34xf32> to vector<16x34xbf16>
    %cst_133 = arith.constant dense<0.000000e+00> : vector<16x34xf32>
    %773 = tpu.matmul %1, %772, %cst_133 {dimension_numbers = #tpu.dot_dimension_numbers<[1], [0], [0], [1], [0, 0, 1, 1], [], []>} : vector<16x16xbf16>, vector<16x34xbf16>, vector<16x34xf32> -> vector<16x34xf32>
    %cst_134 = arith.constant dense<0.000000e+00> : vector<16x34xf32>
    %774 = tpu.matmul %3, %772, %cst_134 {dimension_numbers = #tpu.dot_dimension_numbers<[1], [0], [0], [1], [0, 0, 1, 1], [], []>} : vector<16x16xbf16>, vector<16x34xbf16>, vector<16x34xf32> -> vector<16x34xf32>
    %775 = tpu.concatenate %773, %774 in 1 : vector<16x34xf32>, vector<16x34xf32> -> vector<16x68xf32>
    %776 = arith.truncf %775 : vector<16x68xf32> to vector<16x68xbf16>
    %cst_135 = arith.constant dense<0.000000e+00> : vector<16x1024xf32>
    %777 = tpu.matmul %776, %4, %cst_135 {dimension_numbers = #tpu.dot_dimension_numbers<[1], [0], [0], [1], [0, 0, 1, 1], [], []>} : vector<16x68xbf16>, vector<68x1024xbf16>, vector<16x1024xf32> -> vector<16x1024xf32>
    %778 = vector.extract_strided_slice %777 {offsets = [0, 0], sizes = [16, 128], strides = [1, 1]} : vector<16x1024xf32> to vector<16x128xf32>
    %779 = vector.broadcast %6 : vector<16x1xf32> to vector<16x128xf32>
    %780 = arith.mulf %779, %778 : vector<16x128xf32>
    %781 = vector.extract_strided_slice %777 {offsets = [0, 128], sizes = [16, 128], strides = [1, 1]} : vector<16x1024xf32> to vector<16x128xf32>
    %782 = vector.broadcast %7 : vector<16x1xf32> to vector<16x128xf32>
    %783 = arith.mulf %782, %781 : vector<16x128xf32>
    %784 = arith.addf %780, %783 : vector<16x128xf32>
    %785 = vector.extract_strided_slice %777 {offsets = [0, 256], sizes = [16, 128], strides = [1, 1]} : vector<16x1024xf32> to vector<16x128xf32>
    %786 = vector.broadcast %8 : vector<16x1xf32> to vector<16x128xf32>
    %787 = arith.mulf %786, %785 : vector<16x128xf32>
    %788 = arith.addf %784, %787 : vector<16x128xf32>
    %789 = vector.extract_strided_slice %777 {offsets = [0, 384], sizes = [16, 128], strides = [1, 1]} : vector<16x1024xf32> to vector<16x128xf32>
    %790 = vector.broadcast %9 : vector<16x1xf32> to vector<16x128xf32>
    %791 = arith.mulf %790, %789 : vector<16x128xf32>
    %792 = arith.addf %788, %791 : vector<16x128xf32>
    %793 = vector.extract_strided_slice %777 {offsets = [0, 512], sizes = [16, 128], strides = [1, 1]} : vector<16x1024xf32> to vector<16x128xf32>
    %794 = vector.broadcast %10 : vector<16x1xf32> to vector<16x128xf32>
    %795 = arith.mulf %794, %793 : vector<16x128xf32>
    %796 = arith.addf %792, %795 : vector<16x128xf32>
    %797 = vector.extract_strided_slice %777 {offsets = [0, 640], sizes = [16, 128], strides = [1, 1]} : vector<16x1024xf32> to vector<16x128xf32>
    %798 = vector.broadcast %11 : vector<16x1xf32> to vector<16x128xf32>
    %799 = arith.mulf %798, %797 : vector<16x128xf32>
    %800 = arith.addf %796, %799 : vector<16x128xf32>
    %801 = vector.extract_strided_slice %777 {offsets = [0, 768], sizes = [16, 128], strides = [1, 1]} : vector<16x1024xf32> to vector<16x128xf32>
    %802 = vector.broadcast %12 : vector<16x1xf32> to vector<16x128xf32>
    %803 = arith.mulf %802, %801 : vector<16x128xf32>
    %804 = arith.addf %800, %803 : vector<16x128xf32>
    %805 = vector.extract_strided_slice %777 {offsets = [0, 896], sizes = [16, 128], strides = [1, 1]} : vector<16x1024xf32> to vector<16x128xf32>
    %806 = vector.broadcast %13 : vector<16x1xf32> to vector<16x128xf32>
    %807 = arith.mulf %806, %805 : vector<16x128xf32>
    %808 = arith.addf %804, %807 : vector<16x128xf32>
    %809 = vector.extract_strided_slice %808 {offsets = [0, 0], sizes = [16, 32], strides = [1, 1]} : vector<16x128xf32> to vector<16x32xf32>
    %810 = arith.addf %809, %14 : vector<16x32xf32>
    %811 = arith.negf %810 : vector<16x32xf32>
    %812 = math.exp %811 : vector<16x32xf32>
    %cst_136 = arith.constant 1.000000e+00 : f32
    %813 = vector.broadcast %cst_136 : f32 to vector<16x32xf32>
    %814 = arith.addf %813, %812 : vector<16x32xf32>
    %815 = arith.divf %813, %814 : vector<16x32xf32>
    %816 = vector.extract_strided_slice %808 {offsets = [0, 32], sizes = [16, 32], strides = [1, 1]} : vector<16x128xf32> to vector<16x32xf32>
    %817 = arith.addf %816, %15 : vector<16x32xf32>
    %818 = arith.negf %817 : vector<16x32xf32>
    %819 = math.exp %818 : vector<16x32xf32>
    %cst_137 = arith.constant 1.000000e+00 : f32
    %820 = vector.broadcast %cst_137 : f32 to vector<16x32xf32>
    %821 = arith.addf %820, %819 : vector<16x32xf32>
    %822 = arith.divf %820, %821 : vector<16x32xf32>
    %823 = arith.mulf %815, %763 : vector<16x32xf32>
    %824 = arith.truncf %823 : vector<16x32xf32> to vector<16x32xbf16>
    %cst_138 = arith.constant dense<0.000000e+00> : vector<16x32xf32>
    %825 = tpu.matmul %1, %824, %cst_138 {dimension_numbers = #tpu.dot_dimension_numbers<[1], [0], [0], [1], [0, 0, 1, 1], [], []>} : vector<16x16xbf16>, vector<16x32xbf16>, vector<16x32xf32> -> vector<16x32xf32>
    %cst_139 = arith.constant dense<0.000000e+00> : vector<16x32xf32>
    %826 = tpu.matmul %3, %824, %cst_139 {dimension_numbers = #tpu.dot_dimension_numbers<[1], [0], [0], [1], [0, 0, 1, 1], [], []>} : vector<16x16xbf16>, vector<16x32xbf16>, vector<16x32xf32> -> vector<16x32xf32>
    %827 = vector.extract_strided_slice %773 {offsets = [0, 0], sizes = [16, 2], strides = [1, 1]} : vector<16x34xf32> to vector<16x2xf32>
    %828 = vector.extract_strided_slice %774 {offsets = [0, 0], sizes = [16, 2], strides = [1, 1]} : vector<16x34xf32> to vector<16x2xf32>
    %829 = tpu.concatenate %827, %825, %828, %826 in 1 : vector<16x2xf32>, vector<16x32xf32>, vector<16x2xf32>, vector<16x32xf32> -> vector<16x68xf32>
    %830 = arith.truncf %829 : vector<16x68xf32> to vector<16x68xbf16>
    %cst_140 = arith.constant dense<0.000000e+00> : vector<16x1024xf32>
    %831 = tpu.matmul %830, %5, %cst_140 {dimension_numbers = #tpu.dot_dimension_numbers<[1], [0], [0], [1], [0, 0, 1, 1], [], []>} : vector<16x68xbf16>, vector<68x1024xbf16>, vector<16x1024xf32> -> vector<16x1024xf32>
    %832 = vector.extract_strided_slice %831 {offsets = [0, 0], sizes = [16, 128], strides = [1, 1]} : vector<16x1024xf32> to vector<16x128xf32>
    %833 = vector.broadcast %6 : vector<16x1xf32> to vector<16x128xf32>
    %834 = arith.mulf %833, %832 : vector<16x128xf32>
    %835 = vector.extract_strided_slice %831 {offsets = [0, 128], sizes = [16, 128], strides = [1, 1]} : vector<16x1024xf32> to vector<16x128xf32>
    %836 = vector.broadcast %7 : vector<16x1xf32> to vector<16x128xf32>
    %837 = arith.mulf %836, %835 : vector<16x128xf32>
    %838 = arith.addf %834, %837 : vector<16x128xf32>
    %839 = vector.extract_strided_slice %831 {offsets = [0, 256], sizes = [16, 128], strides = [1, 1]} : vector<16x1024xf32> to vector<16x128xf32>
    %840 = vector.broadcast %8 : vector<16x1xf32> to vector<16x128xf32>
    %841 = arith.mulf %840, %839 : vector<16x128xf32>
    %842 = arith.addf %838, %841 : vector<16x128xf32>
    %843 = vector.extract_strided_slice %831 {offsets = [0, 384], sizes = [16, 128], strides = [1, 1]} : vector<16x1024xf32> to vector<16x128xf32>
    %844 = vector.broadcast %9 : vector<16x1xf32> to vector<16x128xf32>
    %845 = arith.mulf %844, %843 : vector<16x128xf32>
    %846 = arith.addf %842, %845 : vector<16x128xf32>
    %847 = vector.extract_strided_slice %831 {offsets = [0, 512], sizes = [16, 128], strides = [1, 1]} : vector<16x1024xf32> to vector<16x128xf32>
    %848 = vector.broadcast %10 : vector<16x1xf32> to vector<16x128xf32>
    %849 = arith.mulf %848, %847 : vector<16x128xf32>
    %850 = arith.addf %846, %849 : vector<16x128xf32>
    %851 = vector.extract_strided_slice %831 {offsets = [0, 640], sizes = [16, 128], strides = [1, 1]} : vector<16x1024xf32> to vector<16x128xf32>
    %852 = vector.broadcast %11 : vector<16x1xf32> to vector<16x128xf32>
    %853 = arith.mulf %852, %851 : vector<16x128xf32>
    %854 = arith.addf %850, %853 : vector<16x128xf32>
    %855 = vector.extract_strided_slice %831 {offsets = [0, 768], sizes = [16, 128], strides = [1, 1]} : vector<16x1024xf32> to vector<16x128xf32>
    %856 = vector.broadcast %12 : vector<16x1xf32> to vector<16x128xf32>
    %857 = arith.mulf %856, %855 : vector<16x128xf32>
    %858 = arith.addf %854, %857 : vector<16x128xf32>
    %859 = vector.extract_strided_slice %831 {offsets = [0, 896], sizes = [16, 128], strides = [1, 1]} : vector<16x1024xf32> to vector<16x128xf32>
    %860 = vector.broadcast %13 : vector<16x1xf32> to vector<16x128xf32>
    %861 = arith.mulf %860, %859 : vector<16x128xf32>
    %862 = arith.addf %858, %861 : vector<16x128xf32>
    %863 = vector.extract_strided_slice %862 {offsets = [0, 0], sizes = [16, 32], strides = [1, 1]} : vector<16x128xf32> to vector<16x32xf32>
    %864 = arith.addf %863, %16 : vector<16x32xf32>
    %865 = math.tanh %864 : vector<16x32xf32>
    %866 = arith.mulf %822, %763 : vector<16x32xf32>
    %cst_141 = arith.constant 1.000000e+00 : f32
    %867 = vector.broadcast %cst_141 : f32 to vector<16x32xf32>
    %868 = arith.subf %867, %822 : vector<16x32xf32>
    %869 = arith.mulf %868, %865 : vector<16x32xf32>
    %870 = arith.addf %866, %869 : vector<16x32xf32>
    %c0_142 = arith.constant 0 : index
    %871 = arith.index_cast %c7_i32 : i32 to index
    %c0_143 = arith.constant 0 : index
    %c0_144 = arith.constant 0 : index
    %872 = vector.load %arg9[%c0_142, %871, %c0_143, %c0_144] : memref<1x8x16x32xf32, #tpu.memory_space<vmem>>, vector<1x1x16x32xf32>
    %873 = vector.shape_cast %872 : vector<1x1x16x32xf32> to vector<16x32xf32>
    %874 = vector.shape_cast %870 : vector<16x32xf32> to vector<1x1x16x32xf32>
    tpu.vector_store %arg9[%c0_142, %871, %c0_143, %c0_144], %874 {strides = array<i32>} : memref<1x8x16x32xf32, #tpu.memory_space<vmem>>, vector<1x1x16x32xf32>,
    %c8_i32 = arith.constant 8 : i32
    return
  }
  func.func @transform_0(%arg0: i32) -> (i32, i32, i32, i32) {
    %c0_i32 = arith.constant 0 : i32
    %c0_i32_0 = arith.constant 0 : i32
    %c0_i32_1 = arith.constant 0 : i32
    %c0_i32_2 = arith.constant 0 : i32
    return %arg0, %c0_i32, %c0_i32_0, %c0_i32_1 : i32, i32, i32, i32
  }
  func.func @transform_1(%arg0: i32) -> (i32, i32, i32) {
    %c0_i32 = arith.constant 0 : i32
    %c0_i32_0 = arith.constant 0 : i32
    %c0_i32_1 = arith.constant 0 : i32
    return %arg0, %c0_i32, %c0_i32_0 : i32, i32, i32
  }
  func.func @transform_2(%arg0: i32) -> (i32, i32, i32) {
    %c0_i32 = arith.constant 0 : i32
    %c0_i32_0 = arith.constant 0 : i32
    %c0_i32_1 = arith.constant 0 : i32
    %c0_i32_2 = arith.constant 0 : i32
    return %c0_i32, %c0_i32_0, %c0_i32_1 : i32, i32, i32
  }
  func.func @transform_3(%arg0: i32) -> (i32, i32) {
    %c0_i32 = arith.constant 0 : i32
    %c0_i32_0 = arith.constant 0 : i32
    %c0_i32_1 = arith.constant 0 : i32
    return %c0_i32, %c0_i32_0 : i32, i32
  }
  func.func @transform_4(%arg0: i32) -> (i32, i32) {
    %c0_i32 = arith.constant 0 : i32
    %c0_i32_0 = arith.constant 0 : i32
    %c0_i32_1 = arith.constant 0 : i32
    return %c0_i32, %c0_i32_0 : i32, i32
  }
  func.func @transform_5(%arg0: i32) -> (i32, i32) {
    %c0_i32 = arith.constant 0 : i32
    %c0_i32_0 = arith.constant 0 : i32
    %c0_i32_1 = arith.constant 0 : i32
    return %c0_i32, %c0_i32_0 : i32, i32
  }
  func.func @transform_6(%arg0: i32) -> (i32, i32) {
    %c0_i32 = arith.constant 0 : i32
    %c0_i32_0 = arith.constant 0 : i32
    %c0_i32_1 = arith.constant 0 : i32
    return %c0_i32, %c0_i32_0 : i32, i32
  }
  func.func @transform_7(%arg0: i32) -> (i32, i32) {
    %c0_i32 = arith.constant 0 : i32
    %c0_i32_0 = arith.constant 0 : i32
    %c0_i32_1 = arith.constant 0 : i32
    return %c0_i32, %c0_i32_0 : i32, i32
  }
  func.func @transform_8(%arg0: i32) -> (i32, i32, i32, i32) {
    %c0_i32 = arith.constant 0 : i32
    %c0_i32_0 = arith.constant 0 : i32
    %c0_i32_1 = arith.constant 0 : i32
    %c0_i32_2 = arith.constant 0 : i32
    return %arg0, %c0_i32, %c0_i32_0, %c0_i32_1 : i32, i32, i32, i32
  }
}

</mosaic_0001>

<bundles_post_ra>
// kernel: tpu_custom_call.1
= control target key start
LH: loop header
LB: loop body
LE: loop exit
PB: predicated region body
PF: predicated region fallthrough
CT: control target
= control target key end

     0   :  { %s10061_s0 = inlined_call_operand.vmem [shape: f32[2,8,16,2], index: 0, kind: input, shape index: {}]   ;;  %s10062_s1 = inlined_call_operand.vmem [shape: f32[2,16,32], index: 1, kind: input, shape index: {}]   ;;  %s10063_s2 = inlined_call_operand.hbm [shape: bf16[2,16,16], index: 2, kind: input, shape index: {}]   ;;  %s10064_s3 = inlined_call_operand.vmem [shape: bf16[68,1024], index: 3, kind: input, shape index: {}]   ;;  %s10065_s4 = inlined_call_operand.hbm [shape: bf16[68,1024], index: 4, kind: input, shape index: {}]   ;;  %s10066_s5 = inlined_call_operand.vmem [shape: f32[16,8], index: 5, kind: input, shape index: {}]   ;;  %s10067_s6 = inlined_call_operand.hbm [shape: f32[16,64], index: 6, kind: input, shape index: {}]   ;;  %s10068_s7 = inlined_call_operand.vmem [shape: f32[16,32], index: 7, kind: input, shape index: {}]   ;;  %s10069_s8 = inlined_call_operand.hbm [shape: f32[2,8,16,32], index: 8, kind: output, shape index: {}]  }
   0x1   :  { %10287 = sst [smem:[#allocation99_spill]] %s10065_s4 }
   0x2   :  { %13 = vsyncpa [#allocation3], 0 }
   0x3   :  { %14 = vsyncpa [#allocation6], 0 }
   0x4   :  { %15 = vsyncpa [#allocation4], 0 }
   0x5   :  { %17 = vsyncpa [#allocation4 + $0x1], 0  ;;  %s7615_s27 = smov 0   ;;  %s7617_s28 = smov 0  }
   0x6   :  { %s7619_s29 = smov 0   ;;  %s7621_s30 = smov 0  }
   0x7 LB: > { %10288 = sst [smem:[#allocation12_spill]] %s7536_s29  ;;  %s7636_s9 = sadd.s32 4294967295, %s7540_s30   ;;  %s7540_s30 = sphi %s7621_s30, %s10883_s30   ;;  %s7536_s29 = sphi %s7619_s29, %s10885_s29   ;;  %s7532_s28 = sphi %s7617_s28, %s10887_s28   ;;  %s7528_s27 = sphi %s7615_s27, %s10886_s27  }
   0x8   : > { %s6420_s10 = sadd.s32 4294967294, %s7540_s30   ;;  %s7640_s11 = sadd.s32 1, %s7540_s30  }
   0x9   : > { %10289 = sst [smem:[#allocation13_spill]] %s7640_s11  ;;  %s208_s12 = sadd.s32 1, %s7536_s29 }
   0xa   : > { %s205_s13 = ssub.s32 %s7540_s30, %s7640_s11  ;;  %p218_p0 = scmp.ne.s32.totalorder %s7536_s29, %s7532_s28 }
   0xb   : > { %p206_p1 = scmp.eq.s32.totalorder %s205_s13, 0  ;;  %p219_p2 = scmp.eq.s32.totalorder %s7636_s9, 1 }
   0xc   : > { %p224_p3 = scmp.ne.s32.totalorder %s7532_s28, %s7528_s27  ;;  %p225_p4 = scmp.eq.s32.totalorder %s6420_s10, 1 }
   0xd   : > { %s7651_s14 = scalar_select %p206_p1, %s7536_s29, %s208_s12  }
   0xe   : > { %p7653_p5 = por %p219_p2, %p218_p0  ;;  %p7657_p6 = por %p225_p4, %p224_p3 }
   0xf   : > { %10290 = sst [smem:[#allocation14_spill]] %s7651_s14  ;;  %p6421_p7 = scmp.ge.s32.totalorder %s7540_s30, 1 }
  0x10   : > { %s10291_s15 = scalar_select %p7653_p5, 1, 0 }
  0x11   : > { %s10292_s16 = scalar_select %p7657_p6, 1, 0 }
  0x12   : > { %p232_p8 = scmp.lt.s32.totalorder %s7540_s30, 3  ;;  %p10070_p9 = scmp.eq.s32.totalorder %s7636_s9, 0 }
  0x13   : > { %s7542_s18 = smov [#allocation5]   ;;  %s7543_s21 = smov [#allocation2]  }
  0x14   : > { %p7664_p10 = pnand %p6421_p7, %p232_p8  ;;  %s260_s19 = sshll.u32 %s7542_s18, 4  ;;  %s261_s19 = int_to_ptr.vmem [resolvable:$true] %s260_s19 }
  0x15   : > { %s244_s22 = sshll.u32 %s7543_s21, 4  ;;  %s10295_s4 = sld [smem:[#allocation99_spill]]  ;;  %s7676_s22 = int_to_ptr.vmem [resolvable:$true] %s244_s22 }
  0x16   : > { %s10293_s17 = scalar_select %p7664_p10, 1, 0 }
  0x17   : > { %p6999_p11 = pneg %p7664_p10 }
  0x19   : > { %p7672_p12 = pnand %p10070_p9, %p6999_p11 }
  0x1b   : > { %s7386_s25 = scalar_lea.hbm %s10295_s4, 4608  ;;  %p7686_p0 = pneg %p7672_p12 }
  0x1c   : > { %p7387_p13 = scmp.ne.s32.totalorder %s10295_s4, %s7386_s25  ;;  %p7393_p3 = scmp.lt.u32.totalorder %s7386_s25, %s10295_s4 }
  0x1e   : > { %p7389_p1 = pnand %p7686_p0, %p7387_p13 }
  0x20   : > { %p7390_p2 = pneg %p7389_p1 }
  0x22   : > { %p7395_p4 = pnand %p7393_p3, %p7390_p2 }
  0x24   : > { %7398 = shalt.err (!%p7395_p4)
}
  0x25   : > { %s7399_s21 = scalar_lea.vmem %s261_s19, 4608  ;;  %p7407_p9 = scmp.lt.s32.totalorder %s261_s19, %s261_s19 }
  0x26   : > { %p7400_p7 = scmp.ne.s32.totalorder %s261_s19, %s7399_s21  ;;  %p7408_p6 = scmp.lt.s32.totalorder %s7399_s21, %s7399_s21 }
  0x28   : > { %p7402_p8 = pnand %p7400_p7, %p7686_p0  ;;  %p7409_p5 = por %p7408_p6, %p7407_p9 }
  0x2a   : > { %p7403_p11 = pneg %p7402_p8 }
  0x2c   : > { %p7410_p10 = pnand %p7409_p5, %p7403_p11 }
  0x2e   : > { %7413 = shalt.err (!%p7410_p10)
}
  0x2f   : > { %s7544_s23 = smov 512   ;;  %s7545_s24 = smov 32  }
  0x30   : > { %7005 = dma.hbm_to_vmem [thread:$0]  (!%p7672_p12), %s10295_s4, 4608, %s261_s19, [#allocation6], %s7544_s23, %s7544_s23, %s7545_s24  }
  0x31   : > { %s7414_s18 = scalar_lea.hbm %s10063_s2, 256 }
  0x32   : > { %p7415_p13 = scmp.ne.s32.totalorder %s10063_s2, %s7414_s18  ;;  %p7421_p9 = scmp.lt.u32.totalorder %s7414_s18, %s10063_s2 }
  0x34   : > { %p7417_p5 = pnand %p7415_p13, %p7686_p0 }
  0x36   : > { %p7418_p6 = pneg %p7417_p5 }
  0x38   : > { %p7423_p10 = pnand %p7421_p9, %p7418_p6 }
  0x3a   : > { %7426 = shalt.err (!%p7423_p10)
}
  0x3b   : > { %s7427_s19 = scalar_lea.vmem %s7676_s22, 256  ;;  %p7435_p4 = scmp.lt.s32.totalorder %s7676_s22, %s7676_s22 }
  0x3c   : > { %p7428_p1 = scmp.ne.s32.totalorder %s7676_s22, %s7427_s19  ;;  %p7436_p7 = scmp.lt.s32.totalorder %s7427_s19, %s7427_s19 }
  0x3e   : > { %p7430_p2 = pnand %p7428_p1, %p7686_p0  ;;  %p7437_p8 = por %p7436_p7, %p7435_p4 }
  0x40   : > { %p7431_p3 = pneg %p7430_p2 }
  0x42   : > { %p7438_p11 = pnand %p7437_p8, %p7431_p3 }
  0x44   : > { %7441 = shalt.err (!%p7438_p11)
}
  0x45   : > { %s7546_s29 = smov 64   ;;  %s7547_s11 = smov 4  }
  0x46   : > { %7002 = dma.hbm_to_vmem [thread:$0]  (!%p7672_p12), %s10063_s2, 256, %s7676_s22, [#allocation3], %s7546_s29, %s7546_s29, %s7547_s11  }
  0x47   : > { %s7548_s24 = smov [#allocation7]   ;;  %s7442_s13 = scalar_lea.hbm %s10067_s6, 256 }
  0x48   : > { %s276_s26 = sshll.u32 %s7548_s24, 4  ;;  %p7443_p13 = scmp.ne.s32.totalorder %s10067_s6, %s7442_s13  ;;  %s277_s26 = int_to_ptr.vmem [resolvable:$true] %s276_s26 }
  0x49   : > { %p7449_p9 = scmp.lt.u32.totalorder %s7442_s13, %s10067_s6 }
  0x4a   : > { %p7445_p5 = pnand %p7443_p13, %p7686_p0 }
  0x4c   : > { %p7446_p6 = pneg %p7445_p5 }
  0x4e   : > { %p7451_p10 = pnand %p7449_p9, %p7446_p6 }
  0x50   : > { %7454 = shalt.err (!%p7451_p10)
}
  0x51   : > { %s7455_s22 = scalar_lea.vmem %s277_s26, 256  ;;  %p7463_p4 = scmp.lt.s32.totalorder %s277_s26, %s277_s26 }
  0x52   : > { %p7456_p1 = scmp.ne.s32.totalorder %s277_s26, %s7455_s22  ;;  %p7464_p7 = scmp.lt.s32.totalorder %s7455_s22, %s7455_s22 }
  0x54   : > { %p7458_p2 = pnand %p7456_p1, %p7686_p0  ;;  %p7465_p8 = por %p7464_p7, %p7463_p4 }
  0x56   : > { %p7459_p3 = pneg %p7458_p2 }
  0x58   : > { %p7466_p11 = pnand %p7465_p8, %p7459_p3 }
  0x5a   : > { %7469 = shalt.err (!%p7466_p11)
}
  0x5b   : > { %s7549_s29 = smov 128   ;;  %s7550_s11 = smov 8  }
  0x5c   : > { %7008 = dma.hbm_to_vmem [thread:$0]  (!%p7672_p12), %s10067_s6, 256, %s277_s26, [#allocation6], %s7549_s29, %s7549_s29, %s7550_s11  }
  0x5d   : > { %p10297_p13 = scmp.ne.s32.totalorder %s10293_s17, 0 }
  0x5f   : > { %311 = sbr.rel (%p10297_p13) target bundleno = 11878 (0x2e66), region = 52 }
  0x66   : > { %p10298_p5 = scmp.eq.s32.totalorder %s7636_s9, 0 }
  0x68   : > { %7515 = dma.done.wait (%p10298_p5), [#allocation3], 256   ;;  %p10299_p0 = pmov %p10298_p5 }
  0x6a   : > { %7517 = vsyncadd (%p10299_p0), [#allocation3], 4294967040  ;;  %p10300_p6 = pmov %p10299_p0 }
  0x6b   : > { %p10301_p9 = pmov %p10299_p0 }
  0x6c   : > { %7519 = dma.done.wait (%p10300_p6), [#allocation6], 4864  }
  0x6d   : > { %7521 = vsyncadd (%p10301_p9), [#allocation6], 4294962432  ;;  %p358_p10 = scmp.lt.s32.totalorder %s7636_s9, 1  ;;  %v10076_v0 = vmov 0.0   ;;  %vm7552_vm0 = vmmov 0   ;;  %s7553_s26 = smov 2  }
  0x6e   : > { %6793 = vmatprep.subr.bf16.mxu0 %v10076_v0  ;;  %6799 = vmatprep.subr.bf16.mxu1 %v10076_v0  ;;  %vm464_vm1 = vcmask 15360   ;;  %v7780_v12 = vld [vmem:[#allocation2 + $0x8] sm:$0xff]   ;;  %v7782_v13 = vld [vmem:[#allocation2] sm:$0xff]   ;;  %vm473_vm2 = vcmask 130048   ;;  %vm763_vm3 = vcmask 1041408   ;;  %v376_v54 = vld [vmem:[%s10064_s3 + $0x10] sm:$0xff] }
  0x6f   : > { %s359_s17 = scalar_select %p358_p10, %s7636_s9, 1  ;;  %6801 = vmatprep.mubr.msk.bf16.mxu1 %vm7552_vm0, %v10076_v0  ;;  %6795 = vmatprep.mubr.msk.bf16.mxu0 %vm7552_vm0, %v10076_v0  ;;  %v374_v14 = vld [vmem:[%s10064_s3] sm:$0xff]  ;;  %v375_v16 = vld [vmem:[%s10064_s3 + $0x8] sm:$0xff]  ;;  %v380_v55 = vld [vmem:[%s10064_s3 + $0x30] sm:$0xff]  ;;  %v10080_v61 = vmov 0   ;;  %vm575_vm4 = vcmask 277504  }
  0x70   : > { %v378_v15 = vld [vmem:[%s10064_s3 + $0x20] sm:$0xff]  ;;  %v379_v18 = vld [vmem:[%s10064_s3 + $0x28] sm:$0xff]  ;;  %v377_v56 = vld [vmem:[%s10064_s3 + $0x18] sm:$0xff]  ;;  %v7915_v57 = vcombine.high %v376_v54, %v380_v55  ;;  %v7922_v60 = vcombine.low %v376_v54, %v380_v55  ;;  %7089 = vset.pattern.permute.xlu1 %v10080_v61  ;;  %s7555_s13 = smov 34   ;;  %vm759_vm5 = vcmask 556032   ;;  %s7563_s11 = smov 36  }
  0x71   : > { %s6727_s20 = sshll.u32 %s359_s17, 4  ;;  %s6726_s25 = sshll.u32 %s359_s17, 7  ;;  %v7797_v17 = vcombine.high %v374_v14, %v378_v15  ;;  %v7802_v19 = vcombine.low %v374_v14, %v378_v15  ;;  %v382_v20 = vld [vmem:[%s10064_s3 + $0x40] sm:$0xff]  ;;  %v7810_v22 = vcombine.high %v375_v16, %v379_v18  ;;  %v7812_v23 = vcombine.low %v375_v16, %v379_v18  ;;  %v383_v25 = vld [vmem:[%s10064_s3 + $0x48] sm:$0xff]  ;;  %v381_v58 = vld [vmem:[%s10064_s3 + $0x38] sm:$0xff] }
  0x72   : > { %s367_s24 = scalar_lea.vmem %s10062_s1, %s6727_s20  ;;  %s7774_s18 = scalar_lea.vmem %s10061_s0, %s6726_s25  ;;  %v386_v21 = vld [vmem:[%s10064_s3 + $0x60] sm:$0xff]  ;;  %v387_v26 = vld [vmem:[%s10064_s3 + $0x68] sm:$0xff]  ;;  %10322 = vst [vmem:[#allocation35_spill] sm:$0xff] %v7915_v57  ;;  %v7920_v59 = vcombine.high %v377_v56, %v381_v58  ;;  %10324 = vst [vmem:[#allocation37_spill] sm:$0xff] %v7922_v60  ;;  %v7926_v62 = vcombine.low %v377_v56, %v381_v58  ;;  %v7556_v14 = vmov 1   ;;  %v7557_v16 = vmov 2  }
  0x73   : > { %v7764_v1 = vld [vmem:[%s367_s24] sm:$0xff]  ;;  %v7766_v2 = vld [vmem:[%s367_s24 + $0x8] sm:$0xff]  ;;  %10302 = vst [vmem:[#allocation15_spill] sm:$0xff] %v7797_v17  ;;  %10303 = vst [vmem:[#allocation16_spill] sm:$0xff] %v7802_v19  ;;  %v7814_v24 = vcombine.high %v382_v20, %v386_v21  ;;  %v7826_v28 = vcombine.high %v383_v25, %v387_v26  ;;  %v7839_v32 = vcombine.low %v382_v20, %v386_v21  ;;  %7090 = vset.pattern.permute.xlu0 %v7556_v14  ;;  %v7558_v18 = vmov 4   ;;  %s7564_s14 = smov 32  }
  0x74   : > { %v7079_v3 = vpack.i.bf16 %v7766_v2, %v7764_v1  ;;  %v454_v5 = vld [vmem:[%s7774_s18] sm:$0xff]  ;;  %v455_v6 = vld [vmem:[%s7774_s18 + $0x8] sm:$0xff]  ;;  %10304 = vst [vmem:[#allocation17_spill] sm:$0xff] %v7810_v22  ;;  %10305 = vst [vmem:[#allocation18_spill] sm:$0xff] %v7812_v23  ;;  %v7843_v33 = vcombine.low %v383_v25, %v387_v26  ;;  %v7559_v20 = vmov 5   ;;  %v7560_v21 = vmov 3  }
  0x75   : > { %10306 = vst [vmem:[#allocation19_spill] sm:$0xff] %v7814_v24  ;;  %v390_v27 = vld [vmem:[%s10064_s3 + $0x80] sm:$0xff]  ;;  %10307 = vst [vmem:[#allocation20_spill] sm:$0xff] %v7826_v28  ;;  %v391_v30 = vld [vmem:[%s10064_s3 + $0x88] sm:$0xff]  ;;  %v7561_v25 = vmov 7   ;;  %v7562_v26 = vmov 6  }
  0x76   : > { %7080 = vrot.lane.b32.xlu0 %v7079_v3, %s7553_s26  ;;  %v394_v29 = vld [vmem:[%s10064_s3 + $0xa0] sm:$0xff]  ;;  %v395_v31 = vld [vmem:[%s10064_s3 + $0xa8] sm:$0xff]  ;;  %10308 = vst [vmem:[#allocation21_spill] sm:$0xff] %v7839_v32  ;;  %10309 = vst [vmem:[#allocation22_spill] sm:$0xff] %v7843_v33  ;;  %vm1175_vm6 = vcmask 293888   ;;  %s7565_s23 = smov 98  }
  0x77   : > { %v7845_v34 = vcombine.high %v390_v27, %v394_v29  ;;  %v7848_v35 = vcombine.high %v391_v30, %v395_v31  ;;  %v398_v36 = vld [vmem:[%s10064_s3 + $0xc0] sm:$0xff]  ;;  %v399_v38 = vld [vmem:[%s10064_s3 + $0xc8] sm:$0xff]  ;;  %v7863_v40 = vcombine.low %v390_v27, %v394_v29  ;;  %v7867_v41 = vcombine.low %v391_v30, %v395_v31  ;;  %10323 = vst [vmem:[#allocation36_spill] sm:$0xff] %v7920_v59  ;;  %v384_v29 = vld [vmem:[%s10064_s3 + $0x50] sm:$0xff]  ;;  %s7566_s24 = smov 96   ;;  %s355_s25 = sand.u32 1, %s7532_s28  }
  0x78   : > { %v402_v37 = vld [vmem:[%s10064_s3 + $0xe0] sm:$0xff]  ;;  %v403_v39 = vld [vmem:[%s10064_s3 + $0xe8] sm:$0xff]  ;;  %10325 = vst [vmem:[#allocation38_spill] sm:$0xff] %v7926_v62  ;;  %v392_v54 = vld [vmem:[%s10064_s3 + $0x90] sm:$0xff]  ;;  %s6430_s10 = sshll.u32 %s355_s25, 7  ;;  %vm1622_vm7 = vcmask 261120  }
  0x79   : > { %10310 = vst [vmem:[#allocation23_spill] sm:$0xff] %v7845_v34  ;;  %10311 = vst [vmem:[#allocation24_spill] sm:$0xff] %v7848_v35  ;;  %v7869_v42 = vcombine.high %v398_v36, %v402_v37  ;;  %v7872_v43 = vcombine.high %v399_v38, %v403_v39  ;;  %v7875_v44 = vcombine.low %v398_v36, %v402_v37  ;;  %v406_v46 = vld [vmem:[%s10064_s3 + $0x100] sm:$0x33]  ;;  %v407_v47 = vld [vmem:[%s10064_s3 + $0x108] sm:$0x33] }
  0x7a   : > { %10312 = vst [vmem:[#allocation25_spill] sm:$0xff] %v7863_v40  ;;  %10313 = vst [vmem:[#allocation26_spill] sm:$0xff] %v7867_v41  ;;  %v7879_v45 = vcombine.low %v399_v38, %v403_v39  ;;  %v7890_v48 = vcombine.high %v406_v46, %v406_v46  ;;  %v7892_v49 = vcombine.high %v407_v47, %v407_v47  ;;  %v447_v15 = vld [vmem:[%s10066_s5 + $0x8] sm:$0xff]  ;;  %v388_v36 = vld [vmem:[%s10064_s3 + $0x70] sm:$0xff]  ;;  %s8340_s21 = scalar_lea.vmem [#allocation8], %s6430_s10  ;;  %p10881_p1 = scmp.ne.s32.totalorder %s10291_s15, 0 }
  0x7b   : > { %10314 = vst [vmem:[#allocation27_spill] sm:$0xff] %v7869_v42  ;;  %10315 = vst [vmem:[#allocation28_spill] sm:$0xff] %v7872_v43  ;;  %v6471_v50 = vcombine.low %v406_v46, %v406_v46  ;;  %v6473_v51 = vcombine.low %v407_v47, %v407_v47  ;;  %v385_v37 = vld [vmem:[%s10064_s3 + $0x58] sm:$0xff]  ;;  %v396_v55 = vld [vmem:[%s10064_s3 + $0xb0] sm:$0xff] }
  0x7c   : > { %10316 = vst [vmem:[#allocation29_spill] sm:$0xff] %v7875_v44  ;;  %10317 = vst [vmem:[#allocation30_spill] sm:$0xff] %v7879_v45  ;;  %v389_v38 = vld [vmem:[%s10064_s3 + $0x78] sm:$0xff] }
  0x7d   : > { %10318 = vst [vmem:[#allocation31_spill] sm:$0xff] %v7890_v48  ;;  %10319 = vst [vmem:[#allocation32_spill] sm:$0xff] %v7892_v49  ;;  %v7899_v52 = vsel %vm763_vm3, %v6471_v50, 0  ;;  %v7902_v53 = vsel %vm763_vm3, %v6473_v51, 0  ;;  %v7966_v50 = vcombine.high %v384_v29, %v388_v36  ;;  %v7968_v51 = vcombine.high %v385_v37, %v389_v38  ;;  %v393_v56 = vld [vmem:[%s10064_s3 + $0x98] sm:$0xff] }
  0x7e   : > { %10320 = vst [vmem:[#allocation33_spill] sm:$0xff] %v7899_v52  ;;  %10321 = vst [vmem:[#allocation34_spill] sm:$0xff] %v7902_v53  ;;  %v397_v58 = vld [vmem:[%s10064_s3 + $0xb8] sm:$0xff] }
  0x7f   : > { %10326 = vst [vmem:[#allocation39_spill] sm:$0xff] %v7966_v50  ;;  %10327 = vst [vmem:[#allocation40_spill] sm:$0xff] %v7968_v51 }
  0xe8   : > { %v7081_v4 = vpop.permute.xlu0 %7080 }
  0xe9   : > { %v7083_v7 = vunpack.i.h.bf16 %v7081_v4  ;;  %v7082_v8 = vunpack.i.l.bf16 %v7081_v4 }
  0xeb   : > { %v465_v9 = vsel %vm464_vm1, %v454_v5, %v7082_v8  ;;  %v466_v10 = vsel %vm464_vm1, %v455_v6, %v7083_v7 }
  0xec   : > { %v467_v11 = vpack.c.bf16 %v466_v10, %v465_v9 }
  0xee   : > { %6794 = vmatpush3.bf16.msra.mxu0 %v467_v11  ;;  %6800 = vmatpush3.bf16.msra.mxu1 %v467_v11  ;;  %v446_v11 = vld [vmem:[%s10066_s5] sm:$0xff] }
  0xef   : > { %788 = vmatprep.subr.bf16.mxu0 %v7797_v17  ;;  %831 = vmatprep.subr.bf16.mxu1 %v7810_v22 }
  0xf0   : > { %962 = vperm.xlu1 %7089, %v446_v11  }
  0xf1   : > { %6802 = vmatmul.mubr.msk.bf16.vlgmr.msra.gmra.mrb[0].mxu1 %vm473_vm2, %v7780_v12  ;;  %6796 = vmatmul.mubr.msk.bf16.vlgmr.msra.gmra.mrb[0].mxu0 %vm473_vm2, %v7782_v13 }
  0xf2   : > { %789 = vmatpush1.bf16.msra.mxu0 %v7802_v19  ;;  %832 = vmatpush1.bf16.msra.mxu1 %v7812_v23 }
  0xf3   : > { %790 = vmatprep.subr.bf16.mxu0 %v7814_v24  ;;  %833 = vmatprep.subr.bf16.mxu1 %v7826_v28 }
  0xf4   : > { %820 = vmatprep.mubr.bf16.mxu0 %v10080_v61  ;;  %863 = vmatprep.mubr.bf16.mxu1 %v10080_v61 }
  0xf5   : > { %967 = vperm.xlu1 %7089, %v447_v15  }
  0xf6   : > { %791 = vmatpush1.bf16.msra.mxu0 %v7839_v32  ;;  %834 = vmatpush1.bf16.msra.mxu1 %v7843_v33 }
  0xf7   : > { %792 = vmatprep.subr.bf16.mxu0 %v7845_v34  ;;  %835 = vmatprep.subr.bf16.mxu1 %v7848_v35 }
  0xf9   : > { %7091 = vset.pattern.permute.xlu1 %v7556_v14  ;;  %v8012_v14 = vcombine.low %v392_v54, %v396_v55 }
  0xfa   : > { %793 = vmatpush1.bf16.msra.mxu0 %v7863_v40  ;;  %836 = vmatpush1.bf16.msra.mxu1 %v7867_v41 }
  0xfb   : > { %794 = vmatprep.subr.bf16.mxu0 %v7869_v42  ;;  %837 = vmatprep.subr.bf16.mxu1 %v7872_v43  ;;  %10332 = vst [vmem:[#allocation45_spill] sm:$0xff] %v8012_v14 }
  0xfc   : > { %977 = vperm.xlu1 %7091, %v447_v15  }
  0xfe   : > { %795 = vmatpush1.bf16.msra.mxu0 %v7875_v44  ;;  %838 = vmatpush1.bf16.msra.mxu1 %v7879_v45 }
  0xff   : > { %6479 = vmatprep.subr.msk.bf16.mxu0 %vm763_vm3, %v7890_v48  ;;  %6481 = vmatprep.subr.msk.bf16.mxu1 %vm763_vm3, %v7892_v49 }
 0x100   : > { %7092 = vset.pattern.permute.xlu1 %v7557_v16 }
 0x101   : > { %985 = vperm.xlu1 %7092, %v446_v11  }
 0x102   : > { %797 = vmatpush1.bf16.msra.mxu0 %v7899_v52  ;;  %840 = vmatpush1.bf16.msra.mxu1 %v7902_v53  ;;  %v8112_v53 = vld [vmem:[#allocation7 + $0x8] sm:$0xff] }
 0x103   : > { %874 = vmatprep.subr.bf16.mxu0 %v7915_v57  ;;  %917 = vmatprep.subr.bf16.mxu1 %v7920_v59  ;;  %10346 = vst [vmem:[#allocation59_spill] sm:$0xff] %v8112_v53 }
 0x105   : > { %7094 = vset.pattern.permute.xlu1 %v7560_v21  ;;  %v409_v21 = vld [vmem:[%s10064_s3 + $0x118] sm:$0x33] }
 0x106   : > { %997 = vperm.xlu1 %7094, %v446_v11  }
 0x10a   : > { %1001 = vperm.xlu1 %7094, %v447_v15  }
 0x10e   : > { %7096 = vset.pattern.permute.xlu1 %v7558_v18 }
 0x10f   : > { %1013 = vperm.xlu1 %7096, %v447_v15  }
 0x113   : > { %7097 = vset.pattern.permute.xlu1 %v7559_v20 }
 0x114   : > { %1021 = vperm.xlu1 %7097, %v446_v11  }
 0x118   : > { %7099 = vset.pattern.permute.xlu1 %v7562_v26 }
 0x119   : > { %1033 = vperm.xlu1 %7099, %v446_v11  }
 0x11d   : > { %1037 = vperm.xlu1 %7099, %v447_v15  }
 0x121   : > { %7101 = vset.pattern.permute.xlu1 %v7561_v25 }
 0x122   : > { %1049 = vperm.xlu1 %7101, %v447_v15  }
 0x1c4   : > { %v560_v63 = vpop.f32.mrb[0].mxu1  ;;  %v7931_v3 = vpop.f32.mrb[0].mxu0 }
 0x1c5   : > { %v6803_v4 = vpop.f32.mrb[1].mxu1  ;;  %v6797_v5 = vpop.f32.mrb[1].mxu0 }
 0x1c6   : > { %v563_v6 = vpop.f32.mrb[2].mxu1  ;;  %v7933_v7 = vpop.f32.mrb[2].mxu0  ;;  %v7988_v4 = vcombine.low %v385_v37, %v389_v38  ;;  %v7992_v5 = vcombine.high %v392_v54, %v396_v55  ;;  %v6477_v38 = vcombine.low %v409_v21, %v409_v21 }
 0x1c7   : > { %v7084_v8 = vpack.i.bf16 %v563_v6, %v560_v63  ;;  %v6804_v9 = vpop.f32.mrb[3].mxu1  ;;  %v6798_v10 = vpop.f32.mrb[3].mxu0  ;;  %v7986_v63 = vcombine.low %v384_v29, %v388_v36  ;;  %v7994_v6 = vcombine.high %v393_v56, %v397_v58  ;;  %v8038_v36 = vcombine.high %v409_v21, %v409_v21 }
 0x1c8   : > { %10329 = vst [vmem:[#allocation42_spill] sm:$0xff] %v7988_v4  ;;  %10330 = vst [vmem:[#allocation43_spill] sm:$0xff] %v7992_v5  ;;  %v404_v9 = vld [vmem:[%s10064_s3 + $0xf0] sm:$0xff]  ;;  %v401_v10 = vld [vmem:[%s10064_s3 + $0xd8] sm:$0xff]  ;;  %v8062_v54 = vpop.permute.xlu1 %962 }
 0x1c9   : > { %7085 = vrot.lane.b32.xlu0 %v7084_v8, %s7555_s13  ;;  %10328 = vst [vmem:[#allocation41_spill] sm:$0xff] %v7986_v63  ;;  %10331 = vst [vmem:[#allocation44_spill] sm:$0xff] %v7994_v6  ;;  %v400_v8 = vld [vmem:[%s10064_s3 + $0xd0] sm:$0xff] }
 0x1ca   : > { %10339 = vst [vmem:[#allocation52_spill] sm:$0xff] %v8038_v36  ;;  %10342 = vst [vmem:[#allocation55_spill] sm:$0xff] %v8062_v54 }
 0x1cc   : > { %v8064_v55 = vpop.permute.xlu1 %967 }
 0x1cd   : > { %973 = vperm.xlu0 %7090, %v446_v11   ;;  %10343 = vst [vmem:[#allocation56_spill] sm:$0xff] %v8064_v55 }
 0x1d1   : > { %7093 = vset.pattern.permute.xlu0 %v7557_v16  ;;  %v8018_v16 = vcombine.high %v400_v8, %v404_v9 }
 0x1d2   : > { %989 = vperm.xlu0 %7093, %v447_v15  }
 0x1d3   : > { %10334 = vst [vmem:[#allocation47_spill] sm:$0xff] %v8018_v16 }
 0x1d6   : > { %7095 = vset.pattern.permute.xlu0 %v7558_v18 }
 0x1d7   : > { %1009 = vperm.xlu0 %7095, %v446_v11  }
 0x1db   : > { %7098 = vset.pattern.permute.xlu0 %v7559_v20  ;;  %v408_v20 = vld [vmem:[%s10064_s3 + $0x110] sm:$0x33] }
 0x1dc   : > { %1025 = vperm.xlu0 %7098, %v447_v15   ;;  %v8014_v15 = vcombine.low %v393_v56, %v397_v58  ;;  %v8034_v29 = vcombine.high %v408_v20, %v408_v20  ;;  %v6475_v37 = vcombine.low %v408_v20, %v408_v20  ;;  %v8066_v56 = vpop.permute.xlu1 %977 }
 0x1de   : > { %10333 = vst [vmem:[#allocation46_spill] sm:$0xff] %v8014_v15  ;;  %10338 = vst [vmem:[#allocation51_spill] sm:$0xff] %v8034_v29 }
 0x1e0   : > { %7100 = vset.pattern.permute.xlu0 %v7561_v25  ;;  %v8030_v25 = vcombine.low %v400_v8, %v404_v9  ;;  %v8068_v58 = vpop.permute.xlu1 %985 }
 0x1e1   : > { %1045 = vperm.xlu0 %7100, %v446_v11   ;;  %v405_v11 = vld [vmem:[%s10064_s3 + $0xf8] sm:$0xff] }
 0x1e2   : > { %v8020_v18 = vcombine.high %v401_v10, %v405_v11  ;;  %10336 = vst [vmem:[#allocation49_spill] sm:$0xff] %v8030_v25  ;;  %v8032_v26 = vcombine.low %v401_v10, %v405_v11 }
 0x1e4   : > { %10335 = vst [vmem:[#allocation48_spill] sm:$0xff] %v8020_v18  ;;  %10337 = vst [vmem:[#allocation50_spill] sm:$0xff] %v8032_v26  ;;  %v8070_v8 = vpop.permute.xlu1 %997 }
 0x1e8   : > { %v8074_v10 = vpop.permute.xlu1 %1001 }
 0x1ec   : > { %v8078_v11 = vpop.permute.xlu1 %1013 }
 0x23b   : > { %v7942_v27 = vpop.permute.xlu0 %7085 }
 0x23c   : > { %v10079_v30 = vunpack.i.h.bf16 %v7942_v27  ;;  %v10078_v31 = vunpack.i.l.bf16 %v7942_v27 }
 0x23e   : > { %v576_v39 = vsel %vm575_vm4, %v7931_v3, %v10078_v31  ;;  %v577_v46 = vsel %vm575_vm4, %v7933_v7, %v10079_v30 }
 0x23f   : > { %v578_v47 = vpack.c.bf16 %v577_v46, %v576_v39  ;;  %v8047_v39 = vsel %vm763_vm3, %v6475_v37, 0  ;;  %v8050_v46 = vsel %vm763_vm3, %v6477_v38, 0 }
 0x240   : > { %10340 = vst [vmem:[#allocation53_spill] sm:$0xff] %v8047_v39  ;;  %10341 = vst [vmem:[#allocation54_spill] sm:$0xff] %v8050_v46 }
 0x241   : > { %6480 = vmatmul.mubr.msk.bf16.vlgmr.msra.gmra.mrb[4].mxu0 %vm759_vm5, %v578_v47  ;;  %6482 = vmatmul.mubr.msk.bf16.vlgmr.msra.gmra.mrb[4].mxu1 %vm759_vm5, %v578_v47 }
 0x242   : > { %875 = vmatpush1.bf16.msra.mxu0 %v7922_v60  ;;  %918 = vmatpush1.bf16.msra.mxu1 %v7926_v62 }
 0x243   : > { %876 = vmatprep.subr.bf16.mxu0 %v7966_v50  ;;  %919 = vmatprep.subr.bf16.mxu1 %v7968_v51 }
 0x244   : > { %906 = vmatprep.mubr.bf16.mxu0 %v10080_v61  ;;  %949 = vmatprep.mubr.bf16.mxu1 %v10080_v61 }
 0x246   : > { %877 = vmatpush1.bf16.msra.mxu0 %v7986_v63  ;;  %920 = vmatpush1.bf16.msra.mxu1 %v7988_v4 }
 0x247   : > { %878 = vmatprep.subr.bf16.mxu0 %v7992_v5  ;;  %921 = vmatprep.subr.bf16.mxu1 %v7994_v6 }
 0x24a   : > { %879 = vmatpush1.bf16.msra.mxu0 %v8012_v14  ;;  %922 = vmatpush1.bf16.msra.mxu1 %v8014_v15  ;;  %v8087_v14 = vpop.permute.xlu1 %1021 }
 0x24b   : > { %880 = vmatprep.subr.bf16.mxu0 %v8018_v16  ;;  %923 = vmatprep.subr.bf16.mxu1 %v8020_v18 }
 0x24c   : > { %v8072_v9 = vpop.permute.xlu0 %973 }
 0x24d   : > { %10344 = vst [vmem:[#allocation57_spill] sm:$0xff] %v8072_v9 }
 0x24e   : > { %881 = vmatpush1.bf16.msra.mxu0 %v8030_v25  ;;  %924 = vmatpush1.bf16.msra.mxu1 %v8032_v26  ;;  %v8092_v63 = vpop.permute.xlu1 %1033 }
 0x24f   : > { %6483 = vmatprep.subr.msk.bf16.mxu0 %vm763_vm3, %v8034_v29  ;;  %6485 = vmatprep.subr.msk.bf16.mxu1 %vm763_vm3, %v8038_v36 }
 0x252   : > { %883 = vmatpush1.bf16.msra.mxu0 %v8047_v39  ;;  %926 = vmatpush1.bf16.msra.mxu1 %v8050_v46 }
 0x253   : > { %6805 = vmatprep.subr.bf16.mxu0 %v10076_v0  ;;  %6811 = vmatprep.subr.bf16.mxu1 %v10076_v0 }
 0x255   : > { %6484 = vmatmul.mubr.msk.bf16.vlgmr.msra.gmra.mrb[8].mxu0 %vm759_vm5, %v578_v47  ;;  %6486 = vmatmul.mubr.msk.bf16.vlgmr.msra.gmra.mrb[8].mxu1 %vm759_vm5, %v578_v47  ;;  %v8076_v47 = vpop.permute.xlu0 %989 }
 0x256   : > { %6807 = vmatprep.mubr.msk.bf16.mxu0 %vm7552_vm0, %v10076_v0  ;;  %6813 = vmatprep.mubr.msk.bf16.mxu1 %vm7552_vm0, %v10076_v0 }
 0x259   : > { %v8090_v4 = vpop.permute.xlu0 %1009 }
 0x314   : > { %v822_v20 = vpop.f32.mrb[4].mxu0  ;;  %v865_v21 = vpop.f32.mrb[4].mxu1 }
 0x315   : > { %v970_v37 = vmul.f32 %v8062_v54, %v822_v20  ;;  %v824_v38 = vpop.f32.mrb[5].mxu0  ;;  %v867_v0 = vpop.f32.mrb[5].mxu1  ;;  %v992_v29 = vmul.f32 %v8068_v58, %v865_v21 }
 0x316   : > { %v980_v31 = vmul.f32 %v8072_v9, %v824_v38  ;;  %v826_v30 = vpop.f32.mrb[6].mxu0  ;;  %v869_v61 = vpop.f32.mrb[6].mxu1  ;;  %v1004_v16 = vmul.f32 %v8070_v8, %v867_v0 }
 0x317   : > { %v971_v46 = vmul.f32 %v8064_v55, %v826_v30  ;;  %v828_v39 = vpop.f32.mrb[7].mxu0  ;;  %v871_v36 = vpop.f32.mrb[7].mxu1  ;;  %v993_v20 = vmul.f32 %v8076_v47, %v869_v61 }
 0x318   : > { %v982_v26 = vadd.f32 %v980_v31, %v970_v37  ;;  %v981_v25 = vmul.f32 %v8066_v56, %v828_v39  ;;  %v1005_v5 = vmul.f32 %v8074_v10, %v871_v36  ;;  %v8094_v31 = vpop.permute.xlu0 %1025  ;;  %v8096_v39 = vpop.permute.xlu1 %1037 }
 0x319   : > { %10345 = vst [vmem:[#allocation58_spill] sm:$0xff] %v8094_v31 }
 0x31a   : > { %v994_v18 = vadd.f32 %v992_v29, %v982_v26  ;;  %v983_v15 = vadd.f32 %v981_v25, %v971_v46 }
 0x31c   : > { %v1006_v38 = vadd.f32 %v1004_v16, %v994_v18  ;;  %v995_v6 = vadd.f32 %v993_v20, %v983_v15  ;;  %v8101_v21 = vpop.permute.xlu0 %1045 }
 0x31e   : > { %v1007_v30 = vadd.f32 %v1005_v5, %v995_v6 }
 0x328   : > { %v908_v26 = vpop.f32.mrb[8].mxu0  ;;  %v951_v0 = vpop.f32.mrb[8].mxu1 }
 0x329   : > { %v1016_v61 = vmul.f32 %v8090_v4, %v908_v26  ;;  %v910_v25 = vpop.f32.mrb[9].mxu0  ;;  %v953_v29 = vpop.f32.mrb[9].mxu1  ;;  %v1040_v20 = vmul.f32 %v8092_v63, %v951_v0 }
 0x32a   : > { %v1028_v16 = vmul.f32 %v8087_v14, %v910_v25  ;;  %v912_v15 = vpop.f32.mrb[10].mxu0  ;;  %v955_v18 = vpop.f32.mrb[10].mxu1  ;;  %v1052_v25 = vmul.f32 %v8101_v21, %v953_v29 }
 0x32b   : > { %v1018_v36 = vadd.f32 %v1016_v61, %v1006_v38  ;;  %v1017_v5 = vmul.f32 %v8078_v11, %v912_v15  ;;  %v914_v6 = vpop.f32.mrb[11].mxu0  ;;  %v957_v46 = vpop.f32.mrb[11].mxu1  ;;  %v1041_v60 = vmul.f32 %v8096_v39, %v955_v18  ;;  %v8109_v61 = vld [vmem:[#allocation7] sm:$0xff] }
 0x32c   : > { %v1029_v37 = vmul.f32 %v8094_v31, %v914_v6  ;;  %v8105_v26 = vpop.permute.xlu1 %1049 }
 0x32d   : > { %v1030_v51 = vadd.f32 %v1028_v16, %v1018_v36  ;;  %v1019_v50 = vadd.f32 %v1017_v5, %v1007_v30  ;;  %v1053_v57 = vmul.f32 %v8105_v26, %v957_v46  ;;  %v10347_v46 = vmov 0  }
 0x32f   : > { %v1042_v62 = vadd.f32 %v1040_v20, %v1030_v51  ;;  %v1031_v38 = vadd.f32 %v1029_v37, %v1019_v50  ;;  %v410_v37 = vld [vmem:[#allocation5] sm:$0xff] }
 0x330   : > { %v414_v20 = vld [vmem:[#allocation5 + $0x20] sm:$0xff] }
 0x331   : > { %v1054_v15 = vadd.f32 %v1052_v25, %v1042_v62  ;;  %v1043_v59 = vadd.f32 %v1041_v60, %v1031_v38  ;;  %v411_v25 = vld [vmem:[#allocation5 + $0x8] sm:$0xff]  ;;  %v8130_v38 = vcombine.high %v410_v37, %v414_v20 }
 0x333   : > { %v1056_v0 = vadd.f32 %v1054_v15, %v8109_v61  ;;  %v1055_v16 = vadd.f32 %v1053_v57, %v1043_v59  ;;  %10348 = vst [vmem:[#allocation60_spill] sm:$0xff] %v8130_v38  ;;  %v415_v15 = vld [vmem:[#allocation5 + $0x28] sm:$0xff] }
 0x335   : > { %v6487_v30 = vmul.f32 -1.442695, %v1056_v0  ;;  %v1057_v36 = vadd.f32 %v1055_v16, %v8112_v53  ;;  %v8132_v0 = vcombine.low %v410_v37, %v414_v20  ;;  %v418_v16 = vld [vmem:[#allocation5 + $0x40] sm:$0xff]  ;;  %v435_v53 = vld [vmem:[#allocation5 + $0xc8] sm:$0xff] }
 0x337   : > { %7270 = vpow2.f32 %v6487_v30  ;;  %v6488_v51 = vmul.f32 -1.442695, %v1057_v36  ;;  %v422_v30 = vld [vmem:[#allocation5 + $0x60] sm:$0xff]  ;;  %v8134_v36 = vcombine.high %v411_v25, %v415_v15 }
 0x339   : > { %7272 = vpow2.f32 %v6488_v51  ;;  %10349 = vst [vmem:[#allocation61_spill] sm:$0xff] %v8134_v36  ;;  %v8138_v51 = vcombine.high %v418_v16, %v422_v30 }
 0x33b   : > { %10351 = vst [vmem:[#allocation63_spill] sm:$0xff] %v8138_v51 }
 0x341   : > { %v7271_v29 = vpop.eup %7270 }
 0x342   : > { %v1064_v18 = vadd.f32 1.0, %v7271_v29  ;;  %v423_v29 = vld [vmem:[#allocation5 + $0x68] sm:$0xff] }
 0x343   : > { %v7273_v50 = vpop.eup %7272 }
 0x344   : > { %7274 = vrcp.f32 %v1064_v18  ;;  %v1065_v5 = vadd.f32 1.0, %v7273_v50  ;;  %v426_v18 = vld [vmem:[#allocation5 + $0x80] sm:$0xff] }
 0x346   : > { %7276 = vrcp.f32 %v1065_v5  ;;  %v430_v5 = vld [vmem:[#allocation5 + $0xa0] sm:$0xff] }
 0x347   : > { %v8151_v20 = vcombine.high %v426_v18, %v430_v5 }
 0x349   : > { %10355 = vst [vmem:[#allocation67_spill] sm:$0xff] %v8151_v20 }
 0x34e   : > { %v8116_v60 = vpop.eup %7274 }
 0x34f   : > { %v1070_v6 = vmul.f32 %v8116_v60, %v7764_v1 }
 0x350   : > { %v8118_v62 = vpop.eup %7276 }
 0x351   : > { %v1071_v57 = vmul.f32 %v8118_v62, %v7766_v2 }
 0x353   : > { %v1072_v59 = vpack.c.bf16 %v1071_v57, %v1070_v6  ;;  %v427_v6 = vld [vmem:[#allocation5 + $0x88] sm:$0xff] }
 0x354   : > { %v431_v57 = vld [vmem:[#allocation5 + $0xa8] sm:$0xff] }
 0x355   : > { %6806 = vmatpush3.bf16.msra.mxu0 %v1072_v59  ;;  %6812 = vmatpush3.bf16.msra.mxu1 %v1072_v59  ;;  %v8145_v59 = vcombine.low %v418_v16, %v422_v30  ;;  %v8157_v16 = vcombine.low %v426_v18, %v430_v5  ;;  %v8161_v30 = vcombine.low %v427_v6, %v431_v57 }
 0x356   : > { %1386 = vmatprep.subr.bf16.mxu0 %v8130_v38  ;;  %1429 = vmatprep.subr.bf16.mxu1 %v8134_v36  ;;  %v438_v38 = vld [vmem:[#allocation5 + $0xe0] sm:$0xff]  ;;  %v439_v36 = vld [vmem:[#allocation5 + $0xe8] sm:$0xff] }
 0x357   : > { %10353 = vst [vmem:[#allocation65_spill] sm:$0xff] %v8145_v59  ;;  %10357 = vst [vmem:[#allocation69_spill] sm:$0xff] %v8157_v16  ;;  %v8171_v18 = vcombine.low %v435_v53, %v439_v36 }
 0x358   : > { %6808 = vmatmul.mubr.msk.bf16.vlgmr.msra.gmra.mrb[12].mxu0 %vm473_vm2, %v7782_v13  ;;  %6814 = vmatmul.mubr.msk.bf16.vlgmr.msra.gmra.mrb[12].mxu1 %vm473_vm2, %v7780_v12  ;;  %v8136_v13 = vcombine.low %v411_v25, %v415_v15  ;;  %v419_v12 = vld [vmem:[#allocation5 + $0x48] sm:$0xff]  ;;  %v8154_v25 = vcombine.high %v427_v6, %v431_v57  ;;  %v434_v15 = vld [vmem:[#allocation5 + $0xc0] sm:$0xff]  ;;  %10358 = vst [vmem:[#allocation70_spill] sm:$0xff] %v8161_v30 }
 0x359   : > { %1418 = vmatprep.mubr.bf16.mxu0 %v10347_v46  ;;  %1461 = vmatprep.mubr.bf16.mxu1 %v10347_v46  ;;  %v8141_v50 = vcombine.high %v419_v12, %v423_v29  ;;  %v8149_v37 = vcombine.low %v419_v12, %v423_v29  ;;  %v8163_v12 = vcombine.high %v434_v15, %v438_v38  ;;  %v442_v6 = vld [vmem:[#allocation5 + $0x100] sm:$0x33]  ;;  %v443_v57 = vld [vmem:[#allocation5 + $0x108] sm:$0x33] }
 0x35a   : > { %10350 = vst [vmem:[#allocation62_spill] sm:$0xff] %v8136_v13  ;;  %1387 = vmatpush1.bf16.msra.mxu0 %v8132_v0  ;;  %1430 = vmatpush1.bf16.msra.mxu1 %v8136_v13  ;;  %10356 = vst [vmem:[#allocation68_spill] sm:$0xff] %v8154_v25  ;;  %v8166_v29 = vcombine.high %v435_v53, %v439_v36  ;;  %v8175_v5 = vcombine.low %v434_v15, %v438_v38  ;;  %v412_v36 = vld [vmem:[#allocation5 + $0x10] sm:$0xff]  ;;  %v433_v13 = vld [vmem:[#allocation5 + $0xb8] sm:$0xff] }
 0x35b   : > { %10352 = vst [vmem:[#allocation64_spill] sm:$0xff] %v8141_v50  ;;  %1388 = vmatprep.subr.bf16.mxu0 %v8138_v51  ;;  %10354 = vst [vmem:[#allocation66_spill] sm:$0xff] %v8149_v37  ;;  %1431 = vmatprep.subr.bf16.mxu1 %v8141_v50  ;;  %v416_v15 = vld [vmem:[#allocation5 + $0x30] sm:$0xff] }
 0x35c   : > { %10359 = vst [vmem:[#allocation71_spill] sm:$0xff] %v8163_v12  ;;  %10360 = vst [vmem:[#allocation72_spill] sm:$0xff] %v8166_v29 }
 0x35d   : > { %10361 = vst [vmem:[#allocation73_spill] sm:$0xff] %v8171_v18  ;;  %10362 = vst [vmem:[#allocation74_spill] sm:$0xff] %v8175_v5 }
 0x35e   : > { %1389 = vmatpush1.bf16.msra.mxu0 %v8145_v59  ;;  %1432 = vmatpush1.bf16.msra.mxu1 %v8149_v37 }
 0x35f   : > { %1390 = vmatprep.subr.bf16.mxu0 %v8151_v20  ;;  %1433 = vmatprep.subr.bf16.mxu1 %v8154_v25  ;;  %v8178_v25 = vcombine.high %v442_v6, %v442_v6  ;;  %v8180_v20 = vcombine.high %v443_v57, %v443_v57 }
 0x361   : > { %10363 = vst [vmem:[#allocation75_spill] sm:$0xff] %v8178_v25  ;;  %10364 = vst [vmem:[#allocation76_spill] sm:$0xff] %v8180_v20 }
 0x362   : > { %1391 = vmatpush1.bf16.msra.mxu0 %v8157_v16  ;;  %1434 = vmatpush1.bf16.msra.mxu1 %v8161_v30  ;;  %v6525_v16 = vcombine.low %v443_v57, %v443_v57  ;;  %v6523_v30 = vcombine.low %v442_v6, %v442_v6  ;;  %v8194_v6 = vcombine.high %v412_v36, %v416_v15  ;;  %v417_v57 = vld [vmem:[#allocation5 + $0x38] sm:$0xff] }
 0x363   : > { %1392 = vmatprep.subr.bf16.mxu0 %v8163_v12  ;;  %1435 = vmatprep.subr.bf16.mxu1 %v8166_v29 }
 0x364   : > { %v8187_v53 = vsel %vm763_vm3, %v6525_v16, 0  ;;  %v8191_v38 = vsel %vm763_vm3, %v6523_v30, 0  ;;  %10367 = vst [vmem:[#allocation79_spill] sm:$0xff] %v8194_v6 }
 0x365   : > { %10365 = vst [vmem:[#allocation77_spill] sm:$0xff] %v8187_v53  ;;  %10366 = vst [vmem:[#allocation78_spill] sm:$0xff] %v8191_v38 }
 0x366   : > { %1436 = vmatpush1.bf16.msra.mxu1 %v8171_v18  ;;  %1393 = vmatpush1.bf16.msra.mxu0 %v8175_v5  ;;  %v413_v5 = vld [vmem:[#allocation5 + $0x18] sm:$0xff]  ;;  %v8198_v18 = vcombine.low %v412_v36, %v416_v15  ;;  %v10371_v15 = vunpack.i.h.bf16 %v7942_v27 }
 0x367   : > { %6531 = vmatprep.subr.msk.bf16.mxu0 %vm763_vm3, %v8178_v25  ;;  %6533 = vmatprep.subr.msk.bf16.mxu1 %vm763_vm3, %v8180_v20  ;;  %v8196_v25 = vcombine.high %v413_v5, %v417_v57  ;;  %v8201_v16 = vcombine.low %v413_v5, %v417_v57  ;;  %v10372_v57 = vunpack.i.l.bf16 %v7942_v27 }
 0x368   : > { %10369 = vst [vmem:[#allocation81_spill] sm:$0xff] %v8198_v18 }
 0x369   : > { %10368 = vst [vmem:[#allocation80_spill] sm:$0xff] %v8196_v25  ;;  %10370 = vst [vmem:[#allocation82_spill] sm:$0xff] %v8201_v16 }
 0x36a   : > { %1438 = vmatpush1.bf16.msra.mxu1 %v8187_v53  ;;  %1395 = vmatpush1.bf16.msra.mxu0 %v8191_v38 }
 0x36b   : > { %1472 = vmatprep.subr.bf16.mxu0 %v8194_v6  ;;  %1515 = vmatprep.subr.bf16.mxu1 %v8196_v25  ;;  %v429_v6 = vld [vmem:[#allocation5 + $0x98] sm:$0xff] }
 0x42b   : > { %v1107_v30 = vpop.f32.mrb[12].mxu0  ;;  %v1148_v53 = vpop.f32.mrb[12].mxu1 }
 0x42c   : > { %v6809_v20 = vpop.f32.mrb[13].mxu0  ;;  %v6815_v29 = vpop.f32.mrb[13].mxu1 }
 0x42d   : > { %v1110_v12 = vpop.f32.mrb[14].mxu0  ;;  %v1151_v37 = vpop.f32.mrb[14].mxu1 }
 0x42e   : > { %v7102_v38 = vpack.i.bf16 %v1110_v12, %v1107_v30  ;;  %v7107_v59 = vpack.i.bf16 %v1151_v37, %v1148_v53  ;;  %v6810_v50 = vpop.f32.mrb[15].mxu0  ;;  %v6816_v51 = vpop.f32.mrb[15].mxu1  ;;  %v420_v37 = vld [vmem:[#allocation5 + $0x50] sm:$0xff] }
 0x42f   : > { %v424_v53 = vld [vmem:[#allocation5 + $0x70] sm:$0xff] }
 0x430   : > { %7108 = vrot.lane.b32.xlu0 %v7107_v59, %s7563_s11  ;;  %7103 = vrot.lane.b32.xlu1 %v7102_v38, %s7553_s26  ;;  %v421_v38 = vld [vmem:[#allocation5 + $0x58] sm:$0xff]  ;;  %v8230_v27 = vcombine.low %v420_v37, %v424_v53 }
 0x432   : > { %10375 = vst [vmem:[#allocation85_spill] sm:$0xff] %v8230_v27 }
 0x434   : > { %1594 = vrot.lane.b32.xlu0 %v7766_v2, %s7564_s14  ;;  %1592 = vrot.lane.b32.xlu1 %v7764_v1, %s7564_s14  ;;  %v425_v2 = vld [vmem:[#allocation5 + $0x78] sm:$0xff] }
 0x4a2   : > { %v7109_v20 = vpop.permute.xlu0 %7108  ;;  %v7104_v29 = vpop.permute.xlu1 %7103 }
 0x4a3   : > { %v7106_v5 = vunpack.i.h.bf16 %v7104_v29  ;;  %v7105_v36 = vunpack.i.l.bf16 %v7104_v29  ;;  %v7111_v50 = vunpack.i.h.bf16 %v7109_v20  ;;  %v7110_v51 = vunpack.i.l.bf16 %v7109_v20 }
 0x4a5   : > { %v1172_v59 = vsel %vm464_vm1, %v7933_v7, %v7106_v5  ;;  %v1171_v12 = vsel %vm464_vm1, %v7931_v3, %v7105_v36  ;;  %v8222_v7 = vcombine.high %v420_v37, %v424_v53  ;;  %v8224_v5 = vcombine.high %v421_v38, %v425_v2  ;;  %v428_v3 = vld [vmem:[#allocation5 + $0x90] sm:$0xff] }
 0x4a6   : > { %v1174_v1 = vsel %vm575_vm4, %v1172_v59, %v10371_v15  ;;  %v1173_v30 = vsel %vm575_vm4, %v1171_v12, %v10372_v57  ;;  %v432_v36 = vld [vmem:[#allocation5 + $0xb0] sm:$0xff]  ;;  %v8238_v59 = vcombine.high %v429_v6, %v433_v13  ;;  %v441_v57 = vld [vmem:[#allocation5 + $0xf8] sm:$0xff]  ;;  %v8246_v53 = vcombine.low %v429_v6, %v433_v13 }
 0x4a7   : > { %v1177_v29 = vsel %vm1175_vm6, %v1174_v1, %v7111_v50  ;;  %v1176_v20 = vsel %vm1175_vm6, %v1173_v30, %v7110_v51  ;;  %10373 = vst [vmem:[#allocation83_spill] sm:$0xff] %v8222_v7  ;;  %10374 = vst [vmem:[#allocation84_spill] sm:$0xff] %v8224_v5  ;;  %v8232_v50 = vcombine.low %v421_v38, %v425_v2  ;;  %v436_v12 = vld [vmem:[#allocation5 + $0xd0] sm:$0xff]  ;;  %v437_v1 = vld [vmem:[#allocation5 + $0xd8] sm:$0xff] }
 0x4a8   : > { %v1178_v25 = vpack.c.bf16 %v1177_v29, %v1176_v20  ;;  %v8236_v51 = vcombine.high %v428_v3, %v432_v36  ;;  %10378 = vst [vmem:[#allocation88_spill] sm:$0xff] %v8238_v59  ;;  %v440_v15 = vld [vmem:[#allocation5 + $0xf0] sm:$0xff]  ;;  %v8244_v37 = vcombine.low %v428_v3, %v432_v36  ;;  %10380 = vst [vmem:[#allocation90_spill] sm:$0xff] %v8246_v53  ;;  %v445_v29 = vld [vmem:[#allocation5 + $0x118] sm:$0x33] }
 0x4a9   : > { %10376 = vst [vmem:[#allocation86_spill] sm:$0xff] %v8232_v50  ;;  %v8250_v38 = vcombine.high %v436_v12, %v440_v15  ;;  %v8252_v2 = vcombine.high %v437_v1, %v441_v57  ;;  %v444_v30 = vld [vmem:[#allocation5 + $0x110] sm:$0x33]  ;;  %v8256_v20 = vcombine.low %v436_v12, %v440_v15  ;;  %v8258_v3 = vcombine.low %v437_v1, %v441_v57 }
 0x4aa   : > { %6532 = vmatmul.mubr.msk.bf16.vlgmr.msra.gmra.mrb[16].mxu0 %vm759_vm5, %v1178_v25  ;;  %6534 = vmatmul.mubr.msk.bf16.vlgmr.msra.gmra.mrb[16].mxu1 %vm759_vm5, %v1178_v25  ;;  %10377 = vst [vmem:[#allocation87_spill] sm:$0xff] %v8236_v51  ;;  %10379 = vst [vmem:[#allocation89_spill] sm:$0xff] %v8244_v37  ;;  %v8260_v13 = vcombine.high %v444_v30, %v444_v30  ;;  %v8264_v6 = vcombine.high %v445_v29, %v445_v29  ;;  %v10389_v1 = vmov 0.0  }
 0x4ab   : > { %1473 = vmatpush1.bf16.msra.mxu0 %v8198_v18  ;;  %1516 = vmatpush1.bf16.msra.mxu1 %v8201_v16  ;;  %10381 = vst [vmem:[#allocation91_spill] sm:$0xff] %v8250_v38  ;;  %10382 = vst [vmem:[#allocation92_spill] sm:$0xff] %v8252_v2  ;;  %v6527_v36 = vcombine.low %v444_v30, %v444_v30 }
 0x4ac   : > { %1474 = vmatprep.subr.bf16.mxu0 %v8222_v7  ;;  %1517 = vmatprep.subr.bf16.mxu1 %v8224_v5  ;;  %10383 = vst [vmem:[#allocation93_spill] sm:$0xff] %v8256_v20  ;;  %10384 = vst [vmem:[#allocation94_spill] sm:$0xff] %v8258_v3 }
 0x4ad   : > { %1504 = vmatprep.mubr.bf16.mxu0 %v10347_v46  ;;  %1547 = vmatprep.mubr.bf16.mxu1 %v10347_v46  ;;  %10385 = vst [vmem:[#allocation95_spill] sm:$0xff] %v8260_v13  ;;  %10386 = vst [vmem:[#allocation96_spill] sm:$0xff] %v8264_v6  ;;  %v8273_v12 = vsel %vm763_vm3, %v6527_v36, 0 }
 0x4ae   : > { %10387 = vst [vmem:[#allocation97_spill] sm:$0xff] %v8273_v12 }
 0x4af   : > { %1475 = vmatpush1.bf16.msra.mxu0 %v8230_v27  ;;  %1518 = vmatpush1.bf16.msra.mxu1 %v8232_v50 }
 0x4b0   : > { %1476 = vmatprep.subr.bf16.mxu0 %v8236_v51  ;;  %1519 = vmatprep.subr.bf16.mxu1 %v8238_v59  ;;  %v6529_v59 = vcombine.low %v445_v29, %v445_v29 }
 0x4b2   : > { %v8276_v15 = vsel %vm763_vm3, %v6529_v59, 0 }
 0x4b3   : > { %1477 = vmatpush1.bf16.msra.mxu0 %v8244_v37  ;;  %1520 = vmatpush1.bf16.msra.mxu1 %v8246_v53  ;;  %10388 = vst [vmem:[#allocation98_spill] sm:$0xff] %v8276_v15 }
 0x4b4   : > { %1478 = vmatprep.subr.bf16.mxu0 %v8250_v38  ;;  %1521 = vmatprep.subr.bf16.mxu1 %v8252_v2 }
 0x4b7   : > { %1479 = vmatpush1.bf16.msra.mxu0 %v8256_v20  ;;  %1522 = vmatpush1.bf16.msra.mxu1 %v8258_v3 }
 0x4b8   : > { %6535 = vmatprep.subr.msk.bf16.mxu0 %vm763_vm3, %v8260_v13  ;;  %6537 = vmatprep.subr.msk.bf16.mxu1 %vm763_vm3, %v8264_v6 }
 0x4bb   : > { %1481 = vmatpush1.bf16.msra.mxu0 %v8273_v12  ;;  %1524 = vmatpush1.bf16.msra.mxu1 %v8276_v15 }
 0x4bc   : > { %6817 = vmatprep.subr.bf16.mxu0 %v10389_v1  ;;  %6823 = vmatprep.subr.bf16.mxu1 %v10389_v1 }
 0x4be   : > { %6536 = vmatmul.mubr.msk.bf16.vlgmr.msra.gmra.mrb[20].mxu0 %vm759_vm5, %v1178_v25  ;;  %6538 = vmatmul.mubr.msk.bf16.vlgmr.msra.gmra.mrb[20].mxu1 %vm759_vm5, %v1178_v25 }
 0x4bf   : > { %6825 = vmatprep.mubr.msk.bf16.mxu1 %vm7552_vm0, %v10389_v1  ;;  %6819 = vmatprep.mubr.msk.bf16.mxu0 %vm7552_vm0, %v10389_v1 }
 0x57d   : > { %v1420_v59 = vpop.f32.mrb[16].mxu0  ;;  %v1463_v57 = vpop.f32.mrb[16].mxu1 }
 0x57e   : > { %v1558_v30 = vmul.f32 %v1420_v59, %v8062_v54  ;;  %v1422_v29 = vpop.f32.mrb[17].mxu0  ;;  %v1465_v36 = vpop.f32.mrb[17].mxu1  ;;  %v1564_v20 = vmul.f32 %v1463_v57, %v8068_v58 }
 0x57f   : > { %v1560_v15 = vmul.f32 %v1422_v29, %v8072_v9  ;;  %v1424_v12 = vpop.f32.mrb[18].mxu0  ;;  %v1467_v6 = vpop.f32.mrb[18].mxu1  ;;  %v1568_v37 = vmul.f32 %v1465_v36, %v8070_v8 }
 0x580   : > { %v1559_v13 = vmul.f32 %v1424_v12, %v8064_v55  ;;  %v1426_v3 = vpop.f32.mrb[19].mxu0  ;;  %v1469_v25 = vpop.f32.mrb[19].mxu1  ;;  %v1565_v59 = vmul.f32 %v1467_v6, %v8076_v47 }
 0x581   : > { %v1562_v2 = vadd.f32 %v1560_v15, %v1558_v30  ;;  %v1561_v38 = vmul.f32 %v1426_v3, %v8066_v56  ;;  %v1569_v29 = vmul.f32 %v1469_v25, %v8074_v10 }
 0x583   : > { %v1566_v53 = vadd.f32 %v1564_v20, %v1562_v2  ;;  %v1563_v51 = vadd.f32 %v1561_v38, %v1559_v13 }
 0x585   : > { %v1570_v50 = vadd.f32 %v1568_v37, %v1566_v53  ;;  %v1567_v27 = vadd.f32 %v1565_v59, %v1563_v51 }
 0x587   : > { %v1571_v5 = vadd.f32 %v1569_v29, %v1567_v27  ;;  %v8312_v29 = vld [vmem:[%s10068_s7 + $0x8] sm:$0xff] }
 0x591   : > { %v1506_v7 = vpop.f32.mrb[20].mxu0  ;;  %v1549_v12 = vpop.f32.mrb[20].mxu1 }
 0x592   : > { %v1572_v16 = vmul.f32 %v1506_v7, %v8090_v4  ;;  %v1508_v18 = vpop.f32.mrb[21].mxu0  ;;  %v1551_v57 = vpop.f32.mrb[21].mxu1  ;;  %v1580_v37 = vmul.f32 %v1549_v12, %v8092_v63 }
 0x593   : > { %v1576_v15 = vmul.f32 %v1508_v18, %v8087_v14  ;;  %v1510_v3 = vpop.f32.mrb[22].mxu0  ;;  %v1553_v2 = vpop.f32.mrb[22].mxu1  ;;  %v1584_v7 = vmul.f32 %v1551_v57, %v8101_v21  ;;  %v8306_v18 = vld [vmem:[%s10068_s7] sm:$0xff] }
 0x594   : > { %v1574_v20 = vadd.f32 %v1572_v16, %v1570_v50  ;;  %v1573_v30 = vmul.f32 %v1510_v3, %v8078_v11  ;;  %v1512_v6 = vpop.f32.mrb[23].mxu0  ;;  %v1555_v38 = vpop.f32.mrb[23].mxu1  ;;  %v1581_v36 = vmul.f32 %v1553_v2, %v8096_v39 }
 0x595   : > { %v1577_v51 = vmul.f32 %v1512_v6, %v8094_v31  ;;  %v1585_v59 = vmul.f32 %v1555_v38, %v8105_v26  ;;  %v1593_v2 = vpop.permute.xlu1 %1592 }
 0x596   : > { %v1578_v27 = vadd.f32 %v1576_v15, %v1574_v20  ;;  %v1575_v53 = vadd.f32 %v1573_v30, %v1571_v5  ;;  %v1595_v20 = vpop.permute.xlu0 %1594  ;;  %v1600_v30 = vsub.f32 1.0, %v8116_v60 }
 0x598   : > { %v1582_v13 = vadd.f32 %v1580_v37, %v1578_v27  ;;  %v1579_v25 = vadd.f32 %v1577_v51, %v1575_v53  ;;  %v1601_v51 = vsub.f32 1.0, %v8118_v62  ;;  %v1599_v27 = vmul.f32 %v8118_v62, %v1595_v20  ;;  %v6539_v62 = vld [vmem:[%s7774_s18 + $0x10] sm:$0xff]  ;;  %v10390_v20 = vld [vmem:[#allocation34_spill] sm:$0xff] }
 0x599   : > { %v1598_v53 = vmul.f32 %v8116_v60, %v1593_v2  ;;  %v6540_v60 = vld [vmem:[%s7774_s18 + $0x18] sm:$0xff]  ;;  %v8351_v2 = vld [vmem:[#allocation2] sm:$0xff]  }
 0x59a   : > { %v1586_v16 = vadd.f32 %v1584_v7, %v1582_v13  ;;  %v1583_v50 = vadd.f32 %v1581_v36, %v1579_v25 }
 0x59c   : > { %v1588_v5 = vadd.f32 %v1586_v16, %v8306_v18  ;;  %v1587_v12 = vadd.f32 %v1585_v59, %v1583_v50 }
 0x59e   : > { %7278 = vtanh.f32 %v1588_v5  ;;  %v1589_v57 = vadd.f32 %v1587_v12, %v8312_v29 }
 0x5a0   : > { %7280 = vtanh.f32 %v1589_v57 }
 0x5a8   : > { %v7279_v15 = vpop.eup %7278 }
 0x5a9   : > { %1604 = vrot.lane.b32.xlu1 %v7279_v15, %s7564_s14 }
 0x5aa   : > { %v7281_v3 = vpop.eup %7280 }
 0x5ab   : > { %1606 = vrot.lane.b32.xlu0 %v7281_v3, %s7564_s14  ;;  %v8347_v3 = vld [vmem:[#allocation2 + $0x8] sm:$0xff]  }
 0x61b   : > { %v1605_v6 = vpop.permute.xlu1 %1604 }
 0x61c   : > { %v1610_v38 = vmul.f32 %v1605_v6, %v1600_v30  ;;  %v10391_v30 = vld [vmem:[#allocation35_spill] sm:$0xff]  ;;  %v10392_v6 = vld [vmem:[#allocation36_spill] sm:$0xff] }
 0x61d   : > { %v1607_v37 = vpop.permute.xlu0 %1606 }
 0x61e   : > { %v1611_v13 = vmul.f32 %v1607_v37, %v1601_v51  ;;  %v8322_v7 = vadd.f32 %v1610_v38, %v1598_v53 }
 0x620   : > { %v8324_v36 = vadd.f32 %v1611_v13, %v1599_v27 }
 0x622   : > { %v7112_v25 = vpack.i.bf16 %v8324_v36, %v8322_v7 }
 0x624   : > { %7113 = vrot.lane.b32.xlu1 %v7112_v25, %s7565_s23 }
 0x628   : > { %1616 = vrot.lane.b32.xlu1 %v8322_v7, %s7566_s24 }
 0x696   : > { %v7114_v16 = vpop.permute.xlu1 %7113 }
 0x697   : > { %v7116_v50 = vunpack.i.h.bf16 %v7114_v16  ;;  %v7115_v59 = vunpack.i.l.bf16 %v7114_v16 }
 0x699   : > { %v1635_v5 = vsel %vm464_vm1, %v6540_v60, %v7116_v50  ;;  %v1634_v12 = vsel %vm464_vm1, %v6539_v62, %v7115_v59 }
 0x69a   : > { %v1636_v57 = vpack.c.bf16 %v1635_v5, %v1634_v12  ;;  %v8338_v15 = vpop.permute.xlu1 %1616 }
 0x69b   : > { %1623 = vst.msk [vmem:[%s8340_s21] sm:$0xff] %vm1622_vm7, %v8338_v15 }
 0x69c   : > { %6818 = vmatpush3.bf16.msra.mxu0 %v1636_v57  ;;  %6824 = vmatpush3.bf16.msra.mxu1 %v1636_v57 }
 0x69d   : > { %1733 = vmatprep.subr.bf16.mxu0 %v7797_v17  ;;  %1776 = vmatprep.subr.bf16.mxu1 %v7810_v22 }
 0x69f   : > { %6826 = vmatmul.mubr.msk.bf16.vlgmr.msra.gmra.mrb[24].mxu1 %vm473_vm2, %v8347_v3  ;;  %6820 = vmatmul.mubr.msk.bf16.vlgmr.msra.gmra.mrb[24].mxu0 %vm473_vm2, %v8351_v2 }
 0x6a0   : > { %1734 = vmatpush1.bf16.msra.mxu0 %v7802_v19  ;;  %1777 = vmatpush1.bf16.msra.mxu1 %v7812_v23 }
 0x6a1   : > { %1735 = vmatprep.subr.bf16.mxu0 %v7814_v24  ;;  %1778 = vmatprep.subr.bf16.mxu1 %v7826_v28 }
 0x6a2   : > { %1765 = vmatprep.mubr.bf16.mxu0 %v10347_v46  ;;  %1808 = vmatprep.mubr.bf16.mxu1 %v10347_v46 }
 0x6a4   : > { %1736 = vmatpush1.bf16.msra.mxu0 %v7839_v32  ;;  %1779 = vmatpush1.bf16.msra.mxu1 %v7843_v33 }
 0x6a5   : > { %1737 = vmatprep.subr.bf16.mxu0 %v7845_v34  ;;  %1780 = vmatprep.subr.bf16.mxu1 %v7848_v35  ;;  %v10411_v35 = vld [vmem:[#allocation59_spill] sm:$0xff] }
 0x6a8   : > { %1738 = vmatpush1.bf16.msra.mxu0 %v7863_v40  ;;  %1781 = vmatpush1.bf16.msra.mxu1 %v7867_v41 }
 0x6a9   : > { %1739 = vmatprep.subr.bf16.mxu0 %v7869_v42  ;;  %1782 = vmatprep.subr.bf16.mxu1 %v7872_v43 }
 0x6ac   : > { %1740 = vmatpush1.bf16.msra.mxu0 %v7875_v44  ;;  %1783 = vmatpush1.bf16.msra.mxu1 %v7879_v45 }
 0x6ad   : > { %6543 = vmatprep.subr.msk.bf16.mxu0 %vm763_vm3, %v7890_v48  ;;  %6545 = vmatprep.subr.msk.bf16.mxu1 %vm763_vm3, %v7892_v49 }
 0x6b0   : > { %1742 = vmatpush1.bf16.msra.mxu0 %v7899_v52  ;;  %1785 = vmatpush1.bf16.msra.mxu1 %v10390_v20 }
 0x6b1   : > { %1819 = vmatprep.subr.bf16.mxu0 %v10391_v30  ;;  %1862 = vmatprep.subr.bf16.mxu1 %v10392_v6  ;;  %v10407_v6 = vld [vmem:[#allocation51_spill] sm:$0xff] }
 0x772   : > { %v1712_v38 = vpop.f32.mrb[24].mxu1  ;;  %v8379_v51 = vpop.f32.mrb[24].mxu0 }
 0x773   : > { %v6827_v37 = vpop.f32.mrb[25].mxu1  ;;  %v6821_v27 = vpop.f32.mrb[25].mxu0 }
 0x774   : > { %v1715_v53 = vpop.f32.mrb[26].mxu1  ;;  %v8381_v13 = vpop.f32.mrb[26].mxu0  ;;  %v10393_v37 = vld [vmem:[#allocation37_spill] sm:$0xff]  ;;  %v10394_v27 = vld [vmem:[#allocation38_spill] sm:$0xff] }
 0x775   : > { %v7117_v25 = vpack.i.bf16 %v1715_v53, %v1712_v38  ;;  %v6828_v62 = vpop.f32.mrb[27].mxu1  ;;  %v6822_v60 = vpop.f32.mrb[27].mxu0  ;;  %v10395_v53 = vld [vmem:[#allocation39_spill] sm:$0xff] }
 0x776   : > { %v10397_v62 = vld [vmem:[#allocation41_spill] sm:$0xff]  ;;  %v10398_v60 = vld [vmem:[#allocation42_spill] sm:$0xff] }
 0x777   : > { %7118 = vrot.lane.b32.xlu0 %v7117_v25, %s7555_s13  ;;  %v10396_v25 = vld [vmem:[#allocation40_spill] sm:$0xff] }
 0x77b   : > { %1618 = vrot.lane.b32.xlu0 %v8324_v36, %s7566_s24 }
 0x7e9   : > { %v8386_v16 = vpop.permute.xlu0 %7118 }
 0x7ea   : > { %v10204_v50 = vunpack.i.h.bf16 %v8386_v16  ;;  %v10203_v59 = vunpack.i.l.bf16 %v8386_v16 }
 0x7ec   : > { %v1727_v5 = vsel %vm575_vm4, %v8379_v51, %v10203_v59  ;;  %v1728_v12 = vsel %vm575_vm4, %v8381_v13, %v10204_v50  ;;  %v10401_v59 = vld [vmem:[#allocation45_spill] sm:$0xff]  ;;  %v10402_v50 = vld [vmem:[#allocation46_spill] sm:$0xff] }
 0x7ed   : > { %v1729_v57 = vpack.c.bf16 %v1728_v12, %v1727_v5  ;;  %v8398_v38 = vpop.permute.xlu0 %1618  ;;  %v10399_v5 = vld [vmem:[#allocation43_spill] sm:$0xff]  ;;  %v10400_v12 = vld [vmem:[#allocation44_spill] sm:$0xff] }
 0x7ee   : > { %1624 = vst.msk [vmem:[%s8340_s21 + $0x8] sm:$0xff] %vm1622_vm7, %v8398_v38 }
 0x7ef   : > { %6544 = vmatmul.mubr.msk.bf16.vlgmr.msra.gmra.mrb[28].mxu0 %vm759_vm5, %v1729_v57  ;;  %6546 = vmatmul.mubr.msk.bf16.vlgmr.msra.gmra.mrb[28].mxu1 %vm759_vm5, %v1729_v57 }
 0x7f0   : > { %1820 = vmatpush1.bf16.msra.mxu0 %v10393_v37  ;;  %1863 = vmatpush1.bf16.msra.mxu1 %v10394_v27  ;;  %v10403_v27 = vld [vmem:[#allocation47_spill] sm:$0xff]  ;;  %v10406_v37 = vld [vmem:[#allocation50_spill] sm:$0xff] }
 0x7f1   : > { %1821 = vmatprep.subr.bf16.mxu0 %v10395_v53  ;;  %1864 = vmatprep.subr.bf16.mxu1 %v10396_v25  ;;  %v10404_v53 = vld [vmem:[#allocation48_spill] sm:$0xff]  ;;  %v10405_v25 = vld [vmem:[#allocation49_spill] sm:$0xff] }
 0x7f2   : > { %1851 = vmatprep.mubr.bf16.mxu0 %v10347_v46  ;;  %1894 = vmatprep.mubr.bf16.mxu1 %v10347_v46 }
 0x7f4   : > { %1822 = vmatpush1.bf16.msra.mxu0 %v10397_v62  ;;  %1865 = vmatpush1.bf16.msra.mxu1 %v10398_v60  ;;  %v10408_v60 = vld [vmem:[#allocation52_spill] sm:$0xff] }
 0x7f5   : > { %1823 = vmatprep.subr.bf16.mxu0 %v10399_v5  ;;  %1866 = vmatprep.subr.bf16.mxu1 %v10400_v12  ;;  %v10409_v5 = vld [vmem:[#allocation53_spill] sm:$0xff]  ;;  %v10410_v12 = vld [vmem:[#allocation54_spill] sm:$0xff] }
 0x7f8   : > { %1824 = vmatpush1.bf16.msra.mxu0 %v10401_v59  ;;  %1867 = vmatpush1.bf16.msra.mxu1 %v10402_v50 }
 0x7f9   : > { %1825 = vmatprep.subr.bf16.mxu0 %v10403_v27  ;;  %1868 = vmatprep.subr.bf16.mxu1 %v10404_v53 }
 0x7fc   : > { %1826 = vmatpush1.bf16.msra.mxu0 %v10405_v25  ;;  %1869 = vmatpush1.bf16.msra.mxu1 %v10406_v37 }
 0x7fd   : > { %6547 = vmatprep.subr.msk.bf16.mxu0 %vm763_vm3, %v10407_v6  ;;  %6549 = vmatprep.subr.msk.bf16.mxu1 %vm763_vm3, %v10408_v60 }
 0x800   : > { %1828 = vmatpush1.bf16.msra.mxu0 %v10409_v5  ;;  %1871 = vmatpush1.bf16.msra.mxu1 %v10410_v12 }
 0x801   : > { %6829 = vmatprep.subr.bf16.mxu0 %v10389_v1  ;;  %6835 = vmatprep.subr.bf16.mxu1 %v10389_v1 }
 0x803   : > { %6548 = vmatmul.mubr.msk.bf16.vlgmr.msra.gmra.mrb[32].mxu0 %vm759_vm5, %v1729_v57  ;;  %6550 = vmatmul.mubr.msk.bf16.vlgmr.msra.gmra.mrb[32].mxu1 %vm759_vm5, %v1729_v57 }
 0x804   : > { %6831 = vmatprep.mubr.msk.bf16.mxu0 %vm7552_vm0, %v10389_v1  ;;  %6837 = vmatprep.mubr.msk.bf16.mxu1 %vm7552_vm0, %v10389_v1 }
 0x8c2   : > { %v1767_v6 = vpop.f32.mrb[28].mxu0  ;;  %v1810_v60 = vpop.f32.mrb[28].mxu1 }
 0x8c3   : > { %v1905_v5 = vmul.f32 %v1767_v6, %v8062_v54  ;;  %v1769_v37 = vpop.f32.mrb[29].mxu0  ;;  %v1812_v12 = vpop.f32.mrb[29].mxu1  ;;  %v1911_v62 = vmul.f32 %v1810_v60, %v8068_v58 }
 0x8c4   : > { %v1907_v25 = vmul.f32 %v1769_v37, %v8072_v9  ;;  %v1771_v53 = vpop.f32.mrb[30].mxu0  ;;  %v1814_v27 = vpop.f32.mrb[30].mxu1  ;;  %v1915_v49 = vmul.f32 %v1812_v12, %v8070_v8 }
 0x8c5   : > { %v1906_v50 = vmul.f32 %v1771_v53, %v8064_v55  ;;  %v1773_v59 = vpop.f32.mrb[31].mxu0  ;;  %v1816_v57 = vpop.f32.mrb[31].mxu1  ;;  %v1912_v6 = vmul.f32 %v1814_v27, %v8076_v47 }
 0x8c6   : > { %v1909_v30 = vadd.f32 %v1907_v25, %v1905_v5  ;;  %v1908_v20 = vmul.f32 %v1773_v59, %v8066_v56  ;;  %v1916_v37 = vmul.f32 %v1816_v57, %v8074_v10 }
 0x8c8   : > { %v1913_v52 = vadd.f32 %v1911_v62, %v1909_v30  ;;  %v1910_v48 = vadd.f32 %v1908_v20, %v1906_v50 }
 0x8ca   : > { %v1917_v45 = vadd.f32 %v1915_v49, %v1913_v52  ;;  %v1914_v44 = vadd.f32 %v1912_v6, %v1910_v48 }
 0x8cc   : > { %v1918_v43 = vadd.f32 %v1916_v37, %v1914_v44 }
 0x8d6   : > { %v1853_v42 = vpop.f32.mrb[32].mxu0  ;;  %v1896_v53 = vpop.f32.mrb[32].mxu1 }
 0x8d7   : > { %v1919_v41 = vmul.f32 %v1853_v42, %v8090_v4  ;;  %v1855_v40 = vpop.f32.mrb[33].mxu0  ;;  %v1898_v60 = vpop.f32.mrb[33].mxu1  ;;  %v1927_v49 = vmul.f32 %v1896_v53, %v8092_v63 }
 0x8d8   : > { %v1923_v25 = vmul.f32 %v1855_v40, %v8087_v14  ;;  %v1857_v59 = vpop.f32.mrb[34].mxu0  ;;  %v1900_v30 = vpop.f32.mrb[34].mxu1  ;;  %v1931_v42 = vmul.f32 %v1898_v60, %v8101_v21 }
 0x8d9   : > { %v1921_v62 = vadd.f32 %v1919_v41, %v1917_v45  ;;  %v1920_v5 = vmul.f32 %v1857_v59, %v8078_v11  ;;  %v1859_v27 = vpop.f32.mrb[35].mxu0  ;;  %v1902_v20 = vpop.f32.mrb[35].mxu1  ;;  %v1928_v12 = vmul.f32 %v1900_v30, %v8096_v39 }
 0x8da   : > { %v1924_v48 = vmul.f32 %v1859_v27, %v8094_v31  ;;  %v1932_v41 = vmul.f32 %v1902_v20, %v8105_v26 }
 0x8db   : > { %v1925_v44 = vadd.f32 %v1923_v25, %v1921_v62  ;;  %v1922_v52 = vadd.f32 %v1920_v5, %v1918_v43 }
 0x8dd   : > { %v1929_v50 = vadd.f32 %v1927_v49, %v1925_v44  ;;  %v1926_v57 = vadd.f32 %v1924_v48, %v1922_v52  ;;  %v10412_v48 = vld [vmem:[#allocation60_spill] sm:$0xff]  ;;  %v10413_v49 = vld [vmem:[#allocation61_spill] sm:$0xff]  ;;  %v10414_v44 = vld [vmem:[#allocation62_spill] sm:$0xff] }
 0x8de   : > { %v10417_v52 = vld [vmem:[#allocation65_spill] sm:$0xff] }
 0x8df   : > { %v1933_v40 = vadd.f32 %v1931_v42, %v1929_v50  ;;  %v1930_v6 = vadd.f32 %v1928_v12, %v1926_v57  ;;  %v10418_v50 = vld [vmem:[#allocation66_spill] sm:$0xff]  ;;  %v10419_v42 = vld [vmem:[#allocation67_spill] sm:$0xff]  ;;  %v10420_v12 = vld [vmem:[#allocation68_spill] sm:$0xff] }
 0x8e0   : > { %v10421_v57 = vld [vmem:[#allocation69_spill] sm:$0xff] }
 0x8e1   : > { %v1935_v45 = vadd.f32 %v1933_v40, %v8109_v61  ;;  %v1934_v37 = vadd.f32 %v1932_v41, %v1930_v6  ;;  %v10422_v40 = vld [vmem:[#allocation70_spill] sm:$0xff]  ;;  %v10423_v6 = vld [vmem:[#allocation71_spill] sm:$0xff]  ;;  %v10424_v41 = vld [vmem:[#allocation72_spill] sm:$0xff] }
 0x8e3   : > { %v6551_v59 = vmul.f32 -1.442695, %v1935_v45  ;;  %v1936_v27 = vadd.f32 %v1934_v37, %v10411_v35  ;;  %v10425_v45 = vld [vmem:[#allocation73_spill] sm:$0xff]  ;;  %v10426_v37 = vld [vmem:[#allocation74_spill] sm:$0xff] }
 0x8e5   : > { %7282 = vpow2.f32 %v6551_v59  ;;  %v6552_v53 = vmul.f32 -1.442695, %v1936_v27  ;;  %v10427_v59 = vld [vmem:[#allocation75_spill] sm:$0xff]  ;;  %v10428_v27 = vld [vmem:[#allocation76_spill] sm:$0xff] }
 0x8e7   : > { %7284 = vpow2.f32 %v6552_v53  ;;  %v10429_v53 = vld [vmem:[#allocation78_spill] sm:$0xff] }
 0x8ef   : > { %v7283_v43 = vpop.eup %7282 }
 0x8f0   : > { %v1943_v25 = vadd.f32 1.0, %v7283_v43  ;;  %v10430_v43 = vld [vmem:[#allocation77_spill] sm:$0xff] }
 0x8f1   : > { %v7285_v62 = vpop.eup %7284 }
 0x8f2   : > { %7286 = vrcp.f32 %v1943_v25  ;;  %v1944_v60 = vadd.f32 1.0, %v7285_v62  ;;  %v10431_v25 = vld [vmem:[#allocation79_spill] sm:$0xff]  ;;  %v10432_v62 = vld [vmem:[#allocation80_spill] sm:$0xff] }
 0x8f4   : > { %7288 = vrcp.f32 %v1944_v60 }
 0x8fc   : > { %v8453_v30 = vpop.eup %7286 }
 0x8fd   : > { %v1949_v61 = vmul.f32 %v8453_v30, %v8338_v15  ;;  %v10415_v15 = vld [vmem:[#allocation63_spill] sm:$0xff] }
 0x8fe   : > { %v8455_v5 = vpop.eup %7288 }
 0x8ff   : > { %v1950_v20 = vmul.f32 %v8455_v5, %v8398_v38  ;;  %v10416_v38 = vld [vmem:[#allocation64_spill] sm:$0xff] }
 0x901   : > { %v1951_v35 = vpack.c.bf16 %v1950_v20, %v1949_v61 }
 0x903   : > { %6830 = vmatpush3.bf16.msra.mxu0 %v1951_v35  ;;  %6836 = vmatpush3.bf16.msra.mxu1 %v1951_v35 }
 0x904   : > { %2060 = vmatprep.subr.bf16.mxu0 %v10412_v48  ;;  %2103 = vmatprep.subr.bf16.mxu1 %v10413_v49 }
 0x906   : > { %6832 = vmatmul.mubr.msk.bf16.vlgmr.msra.gmra.mrb[36].mxu0 %vm473_vm2, %v8351_v2  ;;  %6838 = vmatmul.mubr.msk.bf16.vlgmr.msra.gmra.mrb[36].mxu1 %vm473_vm2, %v8347_v3 }
 0x907   : > { %2061 = vmatpush1.bf16.msra.mxu0 %v8132_v0  ;;  %2104 = vmatpush1.bf16.msra.mxu1 %v10414_v44 }
 0x908   : > { %2062 = vmatprep.subr.bf16.mxu0 %v10415_v15  ;;  %2105 = vmatprep.subr.bf16.mxu1 %v10416_v38 }
 0x909   : > { %2092 = vmatprep.mubr.bf16.mxu0 %v10347_v46  ;;  %2135 = vmatprep.mubr.bf16.mxu1 %v10347_v46 }
 0x90b   : > { %2063 = vmatpush1.bf16.msra.mxu0 %v10417_v52  ;;  %2106 = vmatpush1.bf16.msra.mxu1 %v10418_v50 }
 0x90c   : > { %2064 = vmatprep.subr.bf16.mxu0 %v10419_v42  ;;  %2107 = vmatprep.subr.bf16.mxu1 %v10420_v12 }
 0x90f   : > { %2065 = vmatpush1.bf16.msra.mxu0 %v10421_v57  ;;  %2108 = vmatpush1.bf16.msra.mxu1 %v10422_v40 }
 0x910   : > { %2066 = vmatprep.subr.bf16.mxu0 %v10423_v6  ;;  %2109 = vmatprep.subr.bf16.mxu1 %v10424_v41 }
 0x913   : > { %2110 = vmatpush1.bf16.msra.mxu1 %v10425_v45  ;;  %2067 = vmatpush1.bf16.msra.mxu0 %v10426_v37 }
 0x914   : > { %6555 = vmatprep.subr.msk.bf16.mxu0 %vm763_vm3, %v10427_v59  ;;  %6557 = vmatprep.subr.msk.bf16.mxu1 %vm763_vm3, %v10428_v27 }
 0x917   : > { %2069 = vmatpush1.bf16.msra.mxu0 %v10429_v53  ;;  %2112 = vmatpush1.bf16.msra.mxu1 %v10430_v43 }
 0x918   : > { %2146 = vmatprep.subr.bf16.mxu0 %v10431_v25  ;;  %2189 = vmatprep.subr.bf16.mxu1 %v10432_v62 }
 0x9d9   : > { %v1986_v60 = vpop.f32.mrb[36].mxu0  ;;  %v2027_v61 = vpop.f32.mrb[36].mxu1 }
 0x9da   : > { %v6833_v20 = vpop.f32.mrb[37].mxu0  ;;  %v6839_v35 = vpop.f32.mrb[37].mxu1 }
 0x9db   : > { %v1989_v45 = vpop.f32.mrb[38].mxu0  ;;  %v2030_v37 = vpop.f32.mrb[38].mxu1 }
 0x9dc   : > { %v7122_v41 = vpack.i.bf16 %v1989_v45, %v1986_v60  ;;  %v7127_v6 = vpack.i.bf16 %v2030_v37, %v2027_v61  ;;  %v6834_v59 = vpop.f32.mrb[39].mxu0  ;;  %v6840_v40 = vpop.f32.mrb[39].mxu1  ;;  %v10433_v45 = vunpack.i.h.bf16 %v8386_v16  ;;  %v10443_v60 = vld [vmem:[#allocation89_spill] sm:$0xff]  ;;  %v10444_v61 = vld [vmem:[#allocation90_spill] sm:$0xff] }
 0x9de   : > { %7128 = vrot.lane.b32.xlu0 %v7127_v6, %s7563_s11  ;;  %7123 = vrot.lane.b32.xlu1 %v7122_v41, %s7553_s26  ;;  %v10434_v6 = vunpack.i.l.bf16 %v8386_v16  ;;  %v10439_v16 = vld [vmem:[#allocation85_spill] sm:$0xff] }
 0xa50   : > { %v7129_v53 = vpop.permute.xlu0 %7128  ;;  %v7124_v43 = vpop.permute.xlu1 %7123 }
 0xa51   : > { %v7126_v27 = vunpack.i.h.bf16 %v7124_v43  ;;  %v7125_v25 = vunpack.i.l.bf16 %v7124_v43  ;;  %v7131_v57 = vunpack.i.h.bf16 %v7129_v53  ;;  %v7130_v62 = vunpack.i.l.bf16 %v7129_v53  ;;  %v10438_v53 = vld [vmem:[#allocation84_spill] sm:$0xff] }
 0xa53   : > { %v2051_v20 = vsel %vm464_vm1, %v8381_v13, %v7126_v27  ;;  %v2050_v35 = vsel %vm464_vm1, %v8379_v51, %v7125_v25  ;;  %v10435_v13 = vld [vmem:[#allocation81_spill] sm:$0xff]  ;;  %v10436_v51 = vld [vmem:[#allocation82_spill] sm:$0xff]  ;;  %v10437_v27 = vld [vmem:[#allocation83_spill] sm:$0xff] }
 0xa54   : > { %v2053_v40 = vsel %vm575_vm4, %v2051_v20, %v10433_v45  ;;  %v2052_v41 = vsel %vm575_vm4, %v2050_v35, %v10434_v6  ;;  %v10441_v25 = vld [vmem:[#allocation87_spill] sm:$0xff]  ;;  %v10446_v35 = vld [vmem:[#allocation92_spill] sm:$0xff]  ;;  %v10447_v45 = vld [vmem:[#allocation93_spill] sm:$0xff] }
 0xa55   : > { %v2055_v37 = vsel %vm1175_vm6, %v2053_v40, %v7131_v57  ;;  %v2054_v59 = vsel %vm1175_vm6, %v2052_v41, %v7130_v62  ;;  %v10440_v57 = vld [vmem:[#allocation86_spill] sm:$0xff]  ;;  %v10442_v62 = vld [vmem:[#allocation88_spill] sm:$0xff]  ;;  %v10445_v20 = vld [vmem:[#allocation91_spill] sm:$0xff] }
 0xa56   : > { %v2056_v43 = vpack.c.bf16 %v2055_v37, %v2054_v59  ;;  %v10448_v40 = vld [vmem:[#allocation94_spill] sm:$0xff]  ;;  %v10449_v6 = vld [vmem:[#allocation95_spill] sm:$0xff]  ;;  %v10450_v41 = vld [vmem:[#allocation96_spill] sm:$0xff] }
 0xa57   : > { %v10451_v37 = vld [vmem:[#allocation97_spill] sm:$0xff]  ;;  %v10452_v59 = vld [vmem:[#allocation98_spill] sm:$0xff] }
 0xa58   : > { %6556 = vmatmul.mubr.msk.bf16.vlgmr.msra.gmra.mrb[40].mxu0 %vm759_vm5, %v2056_v43  ;;  %6558 = vmatmul.mubr.msk.bf16.vlgmr.msra.gmra.mrb[40].mxu1 %vm759_vm5, %v2056_v43 }
 0xa59   : > { %2147 = vmatpush1.bf16.msra.mxu0 %v10435_v13  ;;  %2190 = vmatpush1.bf16.msra.mxu1 %v10436_v51 }
 0xa5a   : > { %2148 = vmatprep.subr.bf16.mxu0 %v10437_v27  ;;  %2191 = vmatprep.subr.bf16.mxu1 %v10438_v53 }
 0xa5b   : > { %2178 = vmatprep.mubr.bf16.mxu0 %v10347_v46  ;;  %2221 = vmatprep.mubr.bf16.mxu1 %v10347_v46 }
 0xa5d   : > { %2149 = vmatpush1.bf16.msra.mxu0 %v10439_v16  ;;  %2192 = vmatpush1.bf16.msra.mxu1 %v10440_v57 }
 0xa5e   : > { %2150 = vmatprep.subr.bf16.mxu0 %v10441_v25  ;;  %2193 = vmatprep.subr.bf16.mxu1 %v10442_v62 }
 0xa61   : > { %2151 = vmatpush1.bf16.msra.mxu0 %v10443_v60  ;;  %2194 = vmatpush1.bf16.msra.mxu1 %v10444_v61 }
 0xa62   : > { %2152 = vmatprep.subr.bf16.mxu0 %v10445_v20  ;;  %2195 = vmatprep.subr.bf16.mxu1 %v10446_v35 }
 0xa65   : > { %2153 = vmatpush1.bf16.msra.mxu0 %v10447_v45  ;;  %2196 = vmatpush1.bf16.msra.mxu1 %v10448_v40 }
 0xa66   : > { %6559 = vmatprep.subr.msk.bf16.mxu0 %vm763_vm3, %v10449_v6  ;;  %6561 = vmatprep.subr.msk.bf16.mxu1 %vm763_vm3, %v10450_v41 }
 0xa69   : > { %2155 = vmatpush1.bf16.msra.mxu0 %v10451_v37  ;;  %2198 = vmatpush1.bf16.msra.mxu1 %v10452_v59 }
 0xa6a   : > { %6841 = vmatprep.subr.bf16.mxu0 %v10389_v1  ;;  %6847 = vmatprep.subr.bf16.mxu1 %v10389_v1 }
 0xa6c   : > { %6560 = vmatmul.mubr.msk.bf16.vlgmr.msra.gmra.mrb[44].mxu0 %vm759_vm5, %v2056_v43  ;;  %6562 = vmatmul.mubr.msk.bf16.vlgmr.msra.gmra.mrb[44].mxu1 %vm759_vm5, %v2056_v43 }
 0xa6d   : > { %6849 = vmatprep.mubr.msk.bf16.mxu1 %vm7552_vm0, %v10389_v1  ;;  %6843 = vmatprep.mubr.msk.bf16.mxu0 %vm7552_vm0, %v10389_v1 }
 0xb2b   : > { %v2094_v6 = vpop.f32.mrb[40].mxu0  ;;  %v2137_v41 = vpop.f32.mrb[40].mxu1 }
 0xb2c   : > { %v2232_v37 = vmul.f32 %v2094_v6, %v8062_v54  ;;  %v2096_v40 = vpop.f32.mrb[41].mxu0  ;;  %v2139_v59 = vpop.f32.mrb[41].mxu1  ;;  %v2238_v62 = vmul.f32 %v2137_v41, %v8068_v58 }
 0xb2d   : > { %v2234_v45 = vmul.f32 %v2096_v40, %v8072_v9  ;;  %v2098_v35 = vpop.f32.mrb[42].mxu0  ;;  %v2141_v20 = vpop.f32.mrb[42].mxu1  ;;  %v2242_v53 = vmul.f32 %v2139_v59, %v8070_v8 }
 0xb2e   : > { %v2233_v61 = vmul.f32 %v2098_v35, %v8064_v55  ;;  %v2100_v60 = vpop.f32.mrb[43].mxu0  ;;  %v2143_v43 = vpop.f32.mrb[43].mxu1  ;;  %v2239_v6 = vmul.f32 %v2141_v20, %v8076_v47 }
 0xb2f   : > { %v2236_v25 = vadd.f32 %v2234_v45, %v2232_v37  ;;  %v2235_v57 = vmul.f32 %v2100_v60, %v8066_v56  ;;  %v2243_v40 = vmul.f32 %v2143_v43, %v8074_v10 }
 0xb31   : > { %v2240_v16 = vadd.f32 %v2238_v62, %v2236_v25  ;;  %v2237_v27 = vadd.f32 %v2235_v57, %v2233_v61 }
 0xb33   : > { %v2244_v51 = vadd.f32 %v2242_v53, %v2240_v16  ;;  %v2241_v13 = vadd.f32 %v2239_v6, %v2237_v27 }
 0xb35   : > { %v2245_v12 = vadd.f32 %v2243_v40, %v2241_v13 }
 0xb3f   : > { %v2180_v42 = vpop.f32.mrb[44].mxu0  ;;  %v2223_v35 = vpop.f32.mrb[44].mxu1 }
 0xb40   : > { %v2246_v50 = vmul.f32 %v2180_v42, %v8090_v4  ;;  %v2182_v52 = vpop.f32.mrb[45].mxu0  ;;  %v2225_v41 = vpop.f32.mrb[45].mxu1  ;;  %v2254_v53 = vmul.f32 %v2223_v35, %v8092_v63 }
 0xb41   : > { %v2250_v45 = vmul.f32 %v2182_v52, %v8087_v14  ;;  %v2184_v60 = vpop.f32.mrb[46].mxu0  ;;  %v2227_v25 = vpop.f32.mrb[46].mxu1  ;;  %v2258_v42 = vmul.f32 %v2225_v41, %v8101_v21  ;;  %v2268_v41 = vsub.f32 1.0, %v8453_v30 }
 0xb42   : > { %v2248_v62 = vadd.f32 %v2246_v50, %v2244_v51  ;;  %v2247_v37 = vmul.f32 %v2184_v60, %v8078_v11  ;;  %v2186_v20 = vpop.f32.mrb[47].mxu0  ;;  %v2229_v57 = vpop.f32.mrb[47].mxu1  ;;  %v2255_v59 = vmul.f32 %v2227_v25, %v8096_v39 }
 0xb43   : > { %v2251_v27 = vmul.f32 %v2186_v20, %v8094_v31  ;;  %v2259_v50 = vmul.f32 %v2229_v57, %v8105_v26 }
 0xb44   : > { %v2252_v13 = vadd.f32 %v2250_v45, %v2248_v62  ;;  %v2249_v16 = vadd.f32 %v2247_v37, %v2245_v12  ;;  %v2269_v62 = vsub.f32 1.0, %v8455_v5  ;;  %v2266_v37 = vmul.f32 %v8453_v30, %v8322_v7 }
 0xb46   : > { %v2256_v61 = vadd.f32 %v2254_v53, %v2252_v13  ;;  %v2253_v43 = vadd.f32 %v2251_v27, %v2249_v16  ;;  %v6565_v13 = vld [vmem:[%s7774_s18 + $0x20] sm:$0xff]  ;;  %v6566_v16 = vld [vmem:[%s7774_s18 + $0x28] sm:$0xff] }
 0xb48   : > { %v2260_v52 = vadd.f32 %v2258_v42, %v2256_v61  ;;  %v2257_v6 = vadd.f32 %v2255_v59, %v2253_v43  ;;  %v10453_v43 = vld [vmem:[#allocation24_spill] sm:$0xff] }
 0xb4a   : > { %v2262_v51 = vadd.f32 %v2260_v52, %v8306_v18  ;;  %v2261_v40 = vadd.f32 %v2259_v50, %v2257_v6  ;;  %v10454_v52 = vld [vmem:[#allocation25_spill] sm:$0xff]  ;;  %v10455_v6 = vld [vmem:[#allocation26_spill] sm:$0xff]  ;;  %v10456_v50 = vld [vmem:[#allocation27_spill] sm:$0xff] }
 0xb4c   : > { %7290 = vtanh.f32 %v2262_v51  ;;  %v2263_v60 = vadd.f32 %v2261_v40, %v8312_v29  ;;  %v2267_v29 = vmul.f32 %v8455_v5, %v8324_v36  ;;  %v10457_v51 = vld [vmem:[#allocation28_spill] sm:$0xff]  ;;  %v10458_v40 = vld [vmem:[#allocation29_spill] sm:$0xff] }
 0xb4e   : > { %7292 = vtanh.f32 %v2263_v60  ;;  %v10459_v60 = vld [vmem:[#allocation30_spill] sm:$0xff] }
 0xb56   : > { %v7291_v35 = vpop.eup %7290 }
 0xb57   : > { %2272 = vrot.lane.b32.xlu1 %v7291_v35, %s7564_s14  ;;  %v10460_v35 = vld [vmem:[#allocation31_spill] sm:$0xff] }
 0xb58   : > { %v7293_v12 = vpop.eup %7292 }
 0xb59   : > { %2274 = vrot.lane.b32.xlu0 %v7293_v12, %s7564_s14  ;;  %v10461_v12 = vld [vmem:[#allocation32_spill] sm:$0xff] }
 0xbc9   : > { %v2273_v45 = vpop.permute.xlu1 %2272 }
 0xbca   : > { %v2278_v25 = vmul.f32 %v2273_v45, %v2268_v41  ;;  %v10462_v41 = vld [vmem:[#allocation33_spill] sm:$0xff]  ;;  %v10463_v45 = vld [vmem:[#allocation34_spill] sm:$0xff] }
 0xbcb   : > { %v2275_v18 = vpop.permute.xlu0 %2274 }
 0xbcc   : > { %v2279_v20 = vmul.f32 %v2275_v18, %v2269_v62  ;;  %v8563_v57 = vadd.f32 %v2278_v25, %v2266_v37  ;;  %v10464_v25 = vld [vmem:[#allocation35_spill] sm:$0xff]  ;;  %v10465_v62 = vld [vmem:[#allocation36_spill] sm:$0xff] }
 0xbce   : > { %v8565_v27 = vadd.f32 %v2279_v20, %v2267_v29 }
 0xbd0   : > { %v7132_v53 = vpack.i.bf16 %v8565_v27, %v8563_v57 }
 0xbd2   : > { %7133 = vrot.lane.b32.xlu1 %v7132_v53, %s7565_s23 }
 0xbd6   : > { %2284 = vrot.lane.b32.xlu1 %v8563_v57, %s7566_s24 }
 0xc44   : > { %v7134_v7 = vpop.permute.xlu1 %7133 }
 0xc45   : > { %v7136_v30 = vunpack.i.h.bf16 %v7134_v7  ;;  %v7135_v61 = vunpack.i.l.bf16 %v7134_v7 }
 0xc47   : > { %v2303_v36 = vsel %vm464_vm1, %v6566_v16, %v7136_v30  ;;  %v2302_v5 = vsel %vm464_vm1, %v6565_v13, %v7135_v61 }
 0xc48   : > { %v2304_v42 = vpack.c.bf16 %v2303_v36, %v2302_v5  ;;  %v8576_v59 = vpop.permute.xlu1 %2284 }
 0xc49   : > { %6563 = vst.msk [vmem:[%s8340_s21 + $0x10] sm:$0xff] %vm1622_vm7, %v8576_v59 }
 0xc4a   : > { %6842 = vmatpush3.bf16.msra.mxu0 %v2304_v42  ;;  %6848 = vmatpush3.bf16.msra.mxu1 %v2304_v42 }
 0xc4b   : > { %2401 = vmatprep.subr.bf16.mxu0 %v7797_v17  ;;  %2444 = vmatprep.subr.bf16.mxu1 %v7810_v22 }
 0xc4d   : > { %6850 = vmatmul.mubr.msk.bf16.vlgmr.msra.gmra.mrb[48].mxu1 %vm473_vm2, %v8347_v3  ;;  %6844 = vmatmul.mubr.msk.bf16.vlgmr.msra.gmra.mrb[48].mxu0 %vm473_vm2, %v8351_v2 }
 0xc4e   : > { %2402 = vmatpush1.bf16.msra.mxu0 %v7802_v19  ;;  %2445 = vmatpush1.bf16.msra.mxu1 %v7812_v23 }
 0xc4f   : > { %2403 = vmatprep.subr.bf16.mxu0 %v7814_v24  ;;  %2446 = vmatprep.subr.bf16.mxu1 %v7826_v28 }
 0xc50   : > { %2433 = vmatprep.mubr.bf16.mxu0 %v10347_v46  ;;  %2476 = vmatprep.mubr.bf16.mxu1 %v10347_v46 }
 0xc52   : > { %2404 = vmatpush1.bf16.msra.mxu0 %v7839_v32  ;;  %2447 = vmatpush1.bf16.msra.mxu1 %v7843_v33  ;;  %v8686_v33 = vld [vmem:[#allocation7 + $0x8] sm:$0xff] }
 0xc53   : > { %2405 = vmatprep.subr.bf16.mxu0 %v7845_v34  ;;  %2448 = vmatprep.subr.bf16.mxu1 %v10453_v43 }
 0xc56   : > { %2406 = vmatpush1.bf16.msra.mxu0 %v10454_v52  ;;  %2449 = vmatpush1.bf16.msra.mxu1 %v10455_v6 }
 0xc57   : > { %2407 = vmatprep.subr.bf16.mxu0 %v10456_v50  ;;  %2450 = vmatprep.subr.bf16.mxu1 %v10457_v51 }
 0xc5a   : > { %2408 = vmatpush1.bf16.msra.mxu0 %v10458_v40  ;;  %2451 = vmatpush1.bf16.msra.mxu1 %v10459_v60 }
 0xc5b   : > { %6569 = vmatprep.subr.msk.bf16.mxu0 %vm763_vm3, %v10460_v35  ;;  %6571 = vmatprep.subr.msk.bf16.mxu1 %vm763_vm3, %v10461_v12 }
 0xc5e   : > { %2410 = vmatpush1.bf16.msra.mxu0 %v10462_v41  ;;  %2453 = vmatpush1.bf16.msra.mxu1 %v10463_v45  ;;  %v10480_v45 = vld [vmem:[#allocation51_spill] sm:$0xff] }
 0xc5f   : > { %2487 = vmatprep.subr.bf16.mxu0 %v10464_v25  ;;  %2530 = vmatprep.subr.bf16.mxu1 %v10465_v62  ;;  %v10474_v62 = vld [vmem:[#allocation45_spill] sm:$0xff]  ;;  %v10479_v25 = vld [vmem:[#allocation50_spill] sm:$0xff] }
 0xd20   : > { %v2380_v18 = vpop.f32.mrb[48].mxu1  ;;  %v8611_v37 = vpop.f32.mrb[48].mxu0 }
 0xd21   : > { %v6851_v29 = vpop.f32.mrb[49].mxu1  ;;  %v6845_v20 = vpop.f32.mrb[49].mxu0 }
 0xd22   : > { %v2383_v53 = vpop.f32.mrb[50].mxu1  ;;  %v8613_v13 = vpop.f32.mrb[50].mxu0 }
 0xd23   : > { %v7137_v16 = vpack.i.bf16 %v2383_v53, %v2380_v18  ;;  %v6852_v7 = vpop.f32.mrb[51].mxu1  ;;  %v6846_v30 = vpop.f32.mrb[51].mxu0  ;;  %v10466_v53 = vld [vmem:[#allocation37_spill] sm:$0xff] }
 0xd24   : > { %v10468_v7 = vld [vmem:[#allocation39_spill] sm:$0xff]  ;;  %v10469_v30 = vld [vmem:[#allocation40_spill] sm:$0xff] }
 0xd25   : > { %7138 = vrot.lane.b32.xlu0 %v7137_v16, %s7555_s13  ;;  %v10467_v16 = vld [vmem:[#allocation38_spill] sm:$0xff] }
 0xd29   : > { %2286 = vrot.lane.b32.xlu0 %v8565_v27, %s7566_s24 }
 0xd97   : > { %v8618_v61 = vpop.permute.xlu0 %7138 }
 0xd98   : > { %v10226_v36 = vunpack.i.h.bf16 %v8618_v61  ;;  %v10225_v5 = vunpack.i.l.bf16 %v8618_v61 }
 0xd9a   : > { %v2395_v42 = vsel %vm575_vm4, %v8611_v37, %v10225_v5  ;;  %v2396_v18 = vsel %vm575_vm4, %v8613_v13, %v10226_v36  ;;  %v10472_v5 = vld [vmem:[#allocation43_spill] sm:$0xff]  ;;  %v10473_v36 = vld [vmem:[#allocation44_spill] sm:$0xff] }
 0xd9b   : > { %v2397_v29 = vpack.c.bf16 %v2396_v18, %v2395_v42  ;;  %v8630_v20 = vpop.permute.xlu0 %2286  ;;  %v10470_v42 = vld [vmem:[#allocation41_spill] sm:$0xff]  ;;  %v10471_v18 = vld [vmem:[#allocation42_spill] sm:$0xff] }
 0xd9c   : > { %6564 = vst.msk [vmem:[%s8340_s21 + $0x18] sm:$0xff] %vm1622_vm7, %v8630_v20 }
 0xd9d   : > { %6570 = vmatmul.mubr.msk.bf16.vlgmr.msra.gmra.mrb[52].mxu0 %vm759_vm5, %v2397_v29  ;;  %6572 = vmatmul.mubr.msk.bf16.vlgmr.msra.gmra.mrb[52].mxu1 %vm759_vm5, %v2397_v29 }
 0xd9e   : > { %2488 = vmatpush1.bf16.msra.mxu0 %v10466_v53  ;;  %2531 = vmatpush1.bf16.msra.mxu1 %v10467_v16  ;;  %v10475_v53 = vld [vmem:[#allocation46_spill] sm:$0xff]  ;;  %v10476_v16 = vld [vmem:[#allocation47_spill] sm:$0xff] }
 0xd9f   : > { %2489 = vmatprep.subr.bf16.mxu0 %v10468_v7  ;;  %2532 = vmatprep.subr.bf16.mxu1 %v10469_v30  ;;  %v10477_v7 = vld [vmem:[#allocation48_spill] sm:$0xff]  ;;  %v10478_v30 = vld [vmem:[#allocation49_spill] sm:$0xff] }
 0xda0   : > { %2519 = vmatprep.mubr.bf16.mxu0 %v10347_v46  ;;  %2562 = vmatprep.mubr.bf16.mxu1 %v10347_v46 }
 0xda2   : > { %2490 = vmatpush1.bf16.msra.mxu0 %v10470_v42  ;;  %2533 = vmatpush1.bf16.msra.mxu1 %v10471_v18  ;;  %v10481_v18 = vld [vmem:[#allocation52_spill] sm:$0xff] }
 0xda3   : > { %2491 = vmatprep.subr.bf16.mxu0 %v10472_v5  ;;  %2534 = vmatprep.subr.bf16.mxu1 %v10473_v36  ;;  %v10482_v5 = vld [vmem:[#allocation53_spill] sm:$0xff]  ;;  %v10483_v36 = vld [vmem:[#allocation54_spill] sm:$0xff] }
 0xda6   : > { %2492 = vmatpush1.bf16.msra.mxu0 %v10474_v62  ;;  %2535 = vmatpush1.bf16.msra.mxu1 %v10475_v53 }
 0xda7   : > { %2493 = vmatprep.subr.bf16.mxu0 %v10476_v16  ;;  %2536 = vmatprep.subr.bf16.mxu1 %v10477_v7 }
 0xdaa   : > { %2494 = vmatpush1.bf16.msra.mxu0 %v10478_v30  ;;  %2537 = vmatpush1.bf16.msra.mxu1 %v10479_v25 }
 0xdab   : > { %6573 = vmatprep.subr.msk.bf16.mxu0 %vm763_vm3, %v10480_v45  ;;  %6575 = vmatprep.subr.msk.bf16.mxu1 %vm763_vm3, %v10481_v18 }
 0xdae   : > { %2496 = vmatpush1.bf16.msra.mxu0 %v10482_v5  ;;  %2539 = vmatpush1.bf16.msra.mxu1 %v10483_v36 }
 0xdaf   : > { %6853 = vmatprep.subr.bf16.mxu0 %v10389_v1  ;;  %6859 = vmatprep.subr.bf16.mxu1 %v10389_v1 }
 0xdb1   : > { %6574 = vmatmul.mubr.msk.bf16.vlgmr.msra.gmra.mrb[56].mxu0 %vm759_vm5, %v2397_v29  ;;  %6576 = vmatmul.mubr.msk.bf16.vlgmr.msra.gmra.mrb[56].mxu1 %vm759_vm5, %v2397_v29 }
 0xdb2   : > { %6855 = vmatprep.mubr.msk.bf16.mxu0 %vm7552_vm0, %v10389_v1  ;;  %6861 = vmatprep.mubr.msk.bf16.mxu1 %vm7552_vm0, %v10389_v1 }
 0xe70   : > { %v2435_v45 = vpop.f32.mrb[52].mxu0  ;;  %v2478_v18 = vpop.f32.mrb[52].mxu1 }
 0xe71   : > { %v2573_v5 = vmul.f32 %v2435_v45, %v8062_v54  ;;  %v2437_v25 = vpop.f32.mrb[53].mxu0  ;;  %v2480_v36 = vpop.f32.mrb[53].mxu1  ;;  %v2579_v42 = vmul.f32 %v2478_v18, %v8068_v58 }
 0xe72   : > { %v2575_v30 = vmul.f32 %v2437_v25, %v8072_v9  ;;  %v2439_v7 = vpop.f32.mrb[54].mxu0  ;;  %v2482_v16 = vpop.f32.mrb[54].mxu1  ;;  %v2583_v60 = vmul.f32 %v2480_v36, %v8070_v8 }
 0xe73   : > { %v2574_v53 = vmul.f32 %v2439_v7, %v8064_v55  ;;  %v2441_v62 = vpop.f32.mrb[55].mxu0  ;;  %v2484_v29 = vpop.f32.mrb[55].mxu1  ;;  %v2580_v45 = vmul.f32 %v2482_v16, %v8076_v47 }
 0xe74   : > { %v2577_v41 = vadd.f32 %v2575_v30, %v2573_v5  ;;  %v2576_v12 = vmul.f32 %v2441_v62, %v8066_v56  ;;  %v2584_v25 = vmul.f32 %v2484_v29, %v8074_v10 }
 0xe76   : > { %v2581_v35 = vadd.f32 %v2579_v42, %v2577_v41  ;;  %v2578_v40 = vadd.f32 %v2576_v12, %v2574_v53 }
 0xe78   : > { %v2585_v51 = vadd.f32 %v2583_v60, %v2581_v35  ;;  %v2582_v50 = vadd.f32 %v2580_v45, %v2578_v40 }
 0xe7a   : > { %v2586_v6 = vadd.f32 %v2584_v25, %v2582_v50 }
 0xe84   : > { %v2521_v52 = vpop.f32.mrb[56].mxu0  ;;  %v2564_v7 = vpop.f32.mrb[56].mxu1 }
 0xe85   : > { %v2587_v43 = vmul.f32 %v2521_v52, %v8090_v4  ;;  %v2523_v34 = vpop.f32.mrb[57].mxu0  ;;  %v2566_v18 = vpop.f32.mrb[57].mxu1  ;;  %v2595_v60 = vmul.f32 %v2564_v7, %v8092_v63 }
 0xe86   : > { %v2591_v5 = vmul.f32 %v2523_v34, %v8087_v14  ;;  %v2525_v62 = vpop.f32.mrb[58].mxu0  ;;  %v2568_v41 = vpop.f32.mrb[58].mxu1  ;;  %v2599_v52 = vmul.f32 %v2566_v18, %v8101_v21 }
 0xe87   : > { %v2589_v30 = vadd.f32 %v2587_v43, %v2585_v51  ;;  %v2588_v36 = vmul.f32 %v2525_v62, %v8078_v11  ;;  %v2527_v16 = vpop.f32.mrb[59].mxu0  ;;  %v2570_v12 = vpop.f32.mrb[59].mxu1  ;;  %v2596_v42 = vmul.f32 %v2568_v41, %v8096_v39  ;;  %v8683_v51 = vld [vmem:[#allocation7] sm:$0xff] }
 0xe88   : > { %v2592_v40 = vmul.f32 %v2527_v16, %v8094_v31  ;;  %v2600_v43 = vmul.f32 %v2570_v12, %v8105_v26 }
 0xe89   : > { %v2593_v50 = vadd.f32 %v2591_v5, %v2589_v30  ;;  %v2590_v35 = vadd.f32 %v2588_v36, %v2586_v6 }
 0xe8b   : > { %v2597_v53 = vadd.f32 %v2595_v60, %v2593_v50  ;;  %v2594_v29 = vadd.f32 %v2592_v40, %v2590_v35  ;;  %v10487_v35 = vld [vmem:[#allocation68_spill] sm:$0xff] }
 0xe8d   : > { %v2601_v34 = vadd.f32 %v2599_v52, %v2597_v53  ;;  %v2598_v45 = vadd.f32 %v2596_v42, %v2594_v29  ;;  %v10489_v53 = vld [vmem:[#allocation70_spill] sm:$0xff]  ;;  %v10490_v52 = vld [vmem:[#allocation71_spill] sm:$0xff]  ;;  %v10491_v42 = vld [vmem:[#allocation72_spill] sm:$0xff] }
 0xe8e   : > { %v10492_v29 = vld [vmem:[#allocation73_spill] sm:$0xff] }
 0xe8f   : > { %v2603_v25 = vadd.f32 %v8683_v51, %v2601_v34  ;;  %v2602_v62 = vadd.f32 %v2600_v43, %v2598_v45  ;;  %v10493_v34 = vld [vmem:[#allocation74_spill] sm:$0xff]  ;;  %v10494_v45 = vld [vmem:[#allocation75_spill] sm:$0xff]  ;;  %v10495_v43 = vld [vmem:[#allocation76_spill] sm:$0xff] }
 0xe91   : > { %v6577_v16 = vmul.f32 -1.442695, %v2603_v25  ;;  %v2604_v6 = vadd.f32 %v8686_v33, %v2602_v62  ;;  %v10496_v25 = vld [vmem:[#allocation78_spill] sm:$0xff]  ;;  %v10497_v62 = vld [vmem:[#allocation77_spill] sm:$0xff] }
 0xe93   : > { %7294 = vpow2.f32 %v6577_v16  ;;  %v6578_v7 = vmul.f32 -1.442695, %v2604_v6  ;;  %v10498_v16 = vld [vmem:[#allocation79_spill] sm:$0xff]  ;;  %v10499_v6 = vld [vmem:[#allocation80_spill] sm:$0xff] }
 0xe95   : > { %7296 = vpow2.f32 %v6578_v7 }
 0xe9d   : > { %v7295_v18 = vpop.eup %7294 }
 0xe9e   : > { %v2611_v5 = vadd.f32 1.0, %v7295_v18 }
 0xe9f   : > { %v7297_v41 = vpop.eup %7296 }
 0xea0   : > { %7298 = vrcp.f32 %v2611_v5  ;;  %v2612_v30 = vadd.f32 1.0, %v7297_v41 }
 0xea2   : > { %7300 = vrcp.f32 %v2612_v30 }
 0xeaa   : > { %v8689_v36 = vpop.eup %7298 }
 0xeab   : > { %v2617_v40 = vmul.f32 %v8689_v36, %v8576_v59  ;;  %v10484_v59 = vld [vmem:[#allocation65_spill] sm:$0xff] }
 0xeac   : > { %v8691_v12 = vpop.eup %7300 }
 0xead   : > { %v2618_v60 = vmul.f32 %v8691_v12, %v8630_v20  ;;  %v10485_v20 = vld [vmem:[#allocation66_spill] sm:$0xff] }
 0xeaf   : > { %v2619_v50 = vpack.c.bf16 %v2618_v60, %v2617_v40 }
 0xeb1   : > { %6854 = vmatpush3.bf16.msra.mxu0 %v2619_v50  ;;  %6860 = vmatpush3.bf16.msra.mxu1 %v2619_v50 }
 0xeb2   : > { %2728 = vmatprep.subr.bf16.mxu0 %v10412_v48  ;;  %2771 = vmatprep.subr.bf16.mxu1 %v10413_v49 }
 0xeb4   : > { %6856 = vmatmul.mubr.msk.bf16.vlgmr.msra.gmra.mrb[60].mxu0 %vm473_vm2, %v8351_v2  ;;  %6862 = vmatmul.mubr.msk.bf16.vlgmr.msra.gmra.mrb[60].mxu1 %vm473_vm2, %v8347_v3  ;;  %v10486_v2 = vld [vmem:[#allocation67_spill] sm:$0xff]  ;;  %v10488_v3 = vld [vmem:[#allocation69_spill] sm:$0xff] }
 0xeb5   : > { %2729 = vmatpush1.bf16.msra.mxu0 %v8132_v0  ;;  %2772 = vmatpush1.bf16.msra.mxu1 %v10414_v44 }
 0xeb6   : > { %2730 = vmatprep.subr.bf16.mxu0 %v10415_v15  ;;  %2773 = vmatprep.subr.bf16.mxu1 %v10416_v38 }
 0xeb7   : > { %2760 = vmatprep.mubr.bf16.mxu0 %v10347_v46  ;;  %2803 = vmatprep.mubr.bf16.mxu1 %v10347_v46 }
 0xeb9   : > { %2731 = vmatpush1.bf16.msra.mxu0 %v10484_v59  ;;  %2774 = vmatpush1.bf16.msra.mxu1 %v10485_v20 }
 0xeba   : > { %2732 = vmatprep.subr.bf16.mxu0 %v10486_v2  ;;  %2775 = vmatprep.subr.bf16.mxu1 %v10487_v35 }
 0xebd   : > { %2733 = vmatpush1.bf16.msra.mxu0 %v10488_v3  ;;  %2776 = vmatpush1.bf16.msra.mxu1 %v10489_v53 }
 0xebe   : > { %2734 = vmatprep.subr.bf16.mxu0 %v10490_v52  ;;  %2777 = vmatprep.subr.bf16.mxu1 %v10491_v42 }
 0xec1   : > { %2778 = vmatpush1.bf16.msra.mxu1 %v10492_v29  ;;  %2735 = vmatpush1.bf16.msra.mxu0 %v10493_v34 }
 0xec2   : > { %6581 = vmatprep.subr.msk.bf16.mxu0 %vm763_vm3, %v10494_v45  ;;  %6583 = vmatprep.subr.msk.bf16.mxu1 %vm763_vm3, %v10495_v43 }
 0xec5   : > { %2737 = vmatpush1.bf16.msra.mxu0 %v10496_v25  ;;  %2780 = vmatpush1.bf16.msra.mxu1 %v10497_v62 }
 0xec6   : > { %2814 = vmatprep.subr.bf16.mxu0 %v10498_v16  ;;  %2857 = vmatprep.subr.bf16.mxu1 %v10499_v6 }
 0xf87   : > { %v2654_v7 = vpop.f32.mrb[60].mxu0  ;;  %v2695_v18 = vpop.f32.mrb[60].mxu1 }
 0xf88   : > { %v6857_v5 = vpop.f32.mrb[61].mxu0  ;;  %v6863_v41 = vpop.f32.mrb[61].mxu1 }
 0xf89   : > { %v2657_v30 = vpop.f32.mrb[62].mxu0  ;;  %v2698_v40 = vpop.f32.mrb[62].mxu1 }
 0xf8a   : > { %v7142_v60 = vpack.i.bf16 %v2657_v30, %v2654_v7  ;;  %v7147_v50 = vpack.i.bf16 %v2698_v40, %v2695_v18  ;;  %v6858_v45 = vpop.f32.mrb[63].mxu0  ;;  %v6864_v34 = vpop.f32.mrb[63].mxu1  ;;  %v10500_v7 = vunpack.i.h.bf16 %v8618_v61 }
 0xf8b   : > { %v10501_v45 = vunpack.i.l.bf16 %v8618_v61  ;;  %v10506_v61 = vld [vmem:[#allocation85_spill] sm:$0xff] }
 0xf8c   : > { %7148 = vrot.lane.b32.xlu0 %v7147_v50, %s7563_s11  ;;  %7143 = vrot.lane.b32.xlu1 %v7142_v60, %s7553_s26  ;;  %v10510_v60 = vld [vmem:[#allocation89_spill] sm:$0xff]  ;;  %v10511_v50 = vld [vmem:[#allocation90_spill] sm:$0xff] }
 0xffe   : > { %v7149_v25 = vpop.permute.xlu0 %7148  ;;  %v7144_v62 = vpop.permute.xlu1 %7143 }
 0xfff   : > { %v7146_v43 = vunpack.i.h.bf16 %v7144_v62  ;;  %v7145_v16 = vunpack.i.l.bf16 %v7144_v62  ;;  %v7151_v29 = vunpack.i.h.bf16 %v7149_v25  ;;  %v7150_v6 = vunpack.i.l.bf16 %v7149_v25  ;;  %v10505_v25 = vld [vmem:[#allocation84_spill] sm:$0xff] }
0x1001   : > { %v2719_v5 = vsel %vm464_vm1, %v8613_v13, %v7146_v43  ;;  %v2718_v41 = vsel %vm464_vm1, %v8611_v37, %v7145_v16  ;;  %v10502_v13 = vld [vmem:[#allocation81_spill] sm:$0xff]  ;;  %v10503_v37 = vld [vmem:[#allocation82_spill] sm:$0xff]  ;;  %v10504_v43 = vld [vmem:[#allocation83_spill] sm:$0xff] }
0x1002   : > { %v2721_v34 = vsel %vm575_vm4, %v2719_v5, %v10500_v7  ;;  %v2720_v18 = vsel %vm575_vm4, %v2718_v41, %v10501_v45  ;;  %v10508_v16 = vld [vmem:[#allocation87_spill] sm:$0xff]  ;;  %v10513_v41 = vld [vmem:[#allocation92_spill] sm:$0xff]  ;;  %v10514_v7 = vld [vmem:[#allocation93_spill] sm:$0xff] }
0x1003   : > { %v2723_v30 = vsel %vm1175_vm6, %v2721_v34, %v7151_v29  ;;  %v2722_v62 = vsel %vm1175_vm6, %v2720_v18, %v7150_v6  ;;  %v10507_v29 = vld [vmem:[#allocation86_spill] sm:$0xff]  ;;  %v10509_v6 = vld [vmem:[#allocation88_spill] sm:$0xff]  ;;  %v10512_v5 = vld [vmem:[#allocation91_spill] sm:$0xff] }
0x1004   : > { %v2724_v40 = vpack.c.bf16 %v2723_v30, %v2722_v62  ;;  %v10515_v34 = vld [vmem:[#allocation94_spill] sm:$0xff]  ;;  %v10516_v45 = vld [vmem:[#allocation95_spill] sm:$0xff]  ;;  %v10517_v18 = vld [vmem:[#allocation96_spill] sm:$0xff] }
0x1005   : > { %v10518_v30 = vld [vmem:[#allocation97_spill] sm:$0xff]  ;;  %v10519_v62 = vld [vmem:[#allocation98_spill] sm:$0xff] }
0x1006   : > { %6582 = vmatmul.mubr.msk.bf16.vlgmr.msra.gmra.mrb[64].mxu0 %vm759_vm5, %v2724_v40  ;;  %6584 = vmatmul.mubr.msk.bf16.vlgmr.msra.gmra.mrb[64].mxu1 %vm759_vm5, %v2724_v40 }
0x1007   : > { %2815 = vmatpush1.bf16.msra.mxu0 %v10502_v13  ;;  %2858 = vmatpush1.bf16.msra.mxu1 %v10503_v37 }
0x1008   : > { %2816 = vmatprep.subr.bf16.mxu0 %v10504_v43  ;;  %2859 = vmatprep.subr.bf16.mxu1 %v10505_v25 }
0x1009   : > { %2846 = vmatprep.mubr.bf16.mxu0 %v10347_v46  ;;  %2889 = vmatprep.mubr.bf16.mxu1 %v10347_v46 }
0x100b   : > { %2817 = vmatpush1.bf16.msra.mxu0 %v10506_v61  ;;  %2860 = vmatpush1.bf16.msra.mxu1 %v10507_v29 }
0x100c   : > { %2818 = vmatprep.subr.bf16.mxu0 %v10508_v16  ;;  %2861 = vmatprep.subr.bf16.mxu1 %v10509_v6 }
0x100f   : > { %2819 = vmatpush1.bf16.msra.mxu0 %v10510_v60  ;;  %2862 = vmatpush1.bf16.msra.mxu1 %v10511_v50 }
0x1010   : > { %2820 = vmatprep.subr.bf16.mxu0 %v10512_v5  ;;  %2863 = vmatprep.subr.bf16.mxu1 %v10513_v41 }
0x1013   : > { %2821 = vmatpush1.bf16.msra.mxu0 %v10514_v7  ;;  %2864 = vmatpush1.bf16.msra.mxu1 %v10515_v34 }
0x1014   : > { %6585 = vmatprep.subr.msk.bf16.mxu0 %vm763_vm3, %v10516_v45  ;;  %6587 = vmatprep.subr.msk.bf16.mxu1 %vm763_vm3, %v10517_v18 }
0x1017   : > { %2823 = vmatpush1.bf16.msra.mxu0 %v10518_v30  ;;  %2866 = vmatpush1.bf16.msra.mxu1 %v10519_v62 }
0x1018   : > { %6865 = vmatprep.subr.bf16.mxu0 %v10389_v1  ;;  %6871 = vmatprep.subr.bf16.mxu1 %v10389_v1 }
0x101a   : > { %6586 = vmatmul.mubr.msk.bf16.vlgmr.msra.gmra.mrb[68].mxu0 %vm759_vm5, %v2724_v40  ;;  %6588 = vmatmul.mubr.msk.bf16.vlgmr.msra.gmra.mrb[68].mxu1 %vm759_vm5, %v2724_v40 }
0x101b   : > { %6873 = vmatprep.mubr.msk.bf16.mxu1 %vm7552_vm0, %v10389_v1  ;;  %6867 = vmatprep.mubr.msk.bf16.mxu0 %vm7552_vm0, %v10389_v1 }
0x10d9   : > { %v2762_v45 = vpop.f32.mrb[64].mxu0  ;;  %v2805_v18 = vpop.f32.mrb[64].mxu1 }
0x10da   : > { %v2900_v30 = vmul.f32 %v2762_v45, %v8062_v54  ;;  %v2764_v34 = vpop.f32.mrb[65].mxu0  ;;  %v2807_v62 = vpop.f32.mrb[65].mxu1  ;;  %v2906_v6 = vmul.f32 %v2805_v18, %v8068_v58 }
0x10db   : > { %v2902_v7 = vmul.f32 %v2764_v34, %v8072_v9  ;;  %v2766_v41 = vpop.f32.mrb[66].mxu0  ;;  %v2809_v5 = vpop.f32.mrb[66].mxu1  ;;  %v2910_v25 = vmul.f32 %v2807_v62, %v8070_v8 }
0x10dc   : > { %v2901_v50 = vmul.f32 %v2766_v41, %v8064_v55  ;;  %v2768_v60 = vpop.f32.mrb[67].mxu0  ;;  %v2811_v40 = vpop.f32.mrb[67].mxu1  ;;  %v2907_v45 = vmul.f32 %v2809_v5, %v8076_v47 }
0x10dd   : > { %v2904_v16 = vadd.f32 %v2902_v7, %v2900_v30  ;;  %v2903_v29 = vmul.f32 %v2768_v60, %v8066_v56  ;;  %v2911_v34 = vmul.f32 %v2811_v40, %v8074_v10 }
0x10df   : > { %v2908_v61 = vadd.f32 %v2906_v6, %v2904_v16  ;;  %v2905_v43 = vadd.f32 %v2903_v29, %v2901_v50 }
0x10e1   : > { %v2912_v37 = vadd.f32 %v2910_v25, %v2908_v61  ;;  %v2909_v13 = vadd.f32 %v2907_v45, %v2905_v43 }
0x10e3   : > { %v2913_v42 = vadd.f32 %v2911_v34, %v2909_v13 }
0x10ed   : > { %v2848_v52 = vpop.f32.mrb[68].mxu0  ;;  %v2891_v41 = vpop.f32.mrb[68].mxu1 }
0x10ee   : > { %v2914_v53 = vmul.f32 %v2848_v52, %v8090_v4  ;;  %v2850_v3 = vpop.f32.mrb[69].mxu0  ;;  %v2893_v18 = vpop.f32.mrb[69].mxu1  ;;  %v2922_v25 = vmul.f32 %v2891_v41, %v8092_v63 }
0x10ef   : > { %v2918_v7 = vmul.f32 %v2850_v3, %v8087_v14  ;;  %v2852_v60 = vpop.f32.mrb[70].mxu0  ;;  %v2895_v16 = vpop.f32.mrb[70].mxu1  ;;  %v2926_v52 = vmul.f32 %v2893_v18, %v8101_v21 }
0x10f0   : > { %v2916_v6 = vadd.f32 %v2914_v53, %v2912_v37  ;;  %v2915_v30 = vmul.f32 %v2852_v60, %v8078_v11  ;;  %v2854_v5 = vpop.f32.mrb[71].mxu0  ;;  %v2897_v29 = vpop.f32.mrb[71].mxu1  ;;  %v2923_v62 = vmul.f32 %v2895_v16, %v8096_v39  ;;  %v8792_v37 = vld [vmem:[%s10068_s7] sm:$0xff]  ;;  %v2936_v16 = vsub.f32 1.0, %v8689_v36 }
0x10f1   : > { %v2919_v43 = vmul.f32 %v2854_v5, %v8094_v31  ;;  %v2927_v53 = vmul.f32 %v2897_v29, %v8105_v26  ;;  %v2937_v5 = vsub.f32 1.0, %v8691_v12 }
0x10f2   : > { %v2920_v13 = vadd.f32 %v2918_v7, %v2916_v6  ;;  %v2917_v61 = vadd.f32 %v2915_v30, %v2913_v42  ;;  %v8798_v42 = vld [vmem:[%s10068_s7 + $0x8] sm:$0xff] }
0x10f4   : > { %v2924_v50 = vadd.f32 %v2922_v25, %v2920_v13  ;;  %v2921_v40 = vadd.f32 %v2919_v43, %v2917_v61  ;;  %v2934_v43 = vmul.f32 %v8689_v36, %v8563_v57  ;;  %v2935_v25 = vmul.f32 %v8691_v12, %v8565_v27 }
0x10f6   : > { %v2928_v3 = vadd.f32 %v2926_v52, %v2924_v50  ;;  %v2925_v45 = vadd.f32 %v2923_v62, %v2921_v40  ;;  %v6591_v62 = vld [vmem:[%s7774_s18 + $0x30] sm:$0xff]  ;;  %v6592_v40 = vld [vmem:[%s7774_s18 + $0x38] sm:$0xff] }
0x10f8   : > { %v2930_v34 = vadd.f32 %v8792_v37, %v2928_v3  ;;  %v2929_v41 = vadd.f32 %v2927_v53, %v2925_v45 }
0x10fa   : > { %7302 = vtanh.f32 %v2930_v34  ;;  %v2931_v18 = vadd.f32 %v8798_v42, %v2929_v41  ;;  %v8829_v34 = vld [vmem:[#allocation2 + $0x8] sm:$0xff]   ;;  %v8833_v41 = vld [vmem:[#allocation2] sm:$0xff]  }
0x10fc   : > { %7304 = vtanh.f32 %v2931_v18  ;;  %v10520_v18 = vld [vmem:[#allocation22_spill] sm:$0xff] }
0x1104   : > { %v7303_v7 = vpop.eup %7302 }
0x1105   : > { %2940 = vrot.lane.b32.xlu1 %v7303_v7, %s7564_s14  ;;  %v10521_v7 = vld [vmem:[#allocation23_spill] sm:$0xff] }
0x1106   : > { %v7305_v60 = vpop.eup %7304 }
0x1107   : > { %2942 = vrot.lane.b32.xlu0 %v7305_v60, %s7564_s14  ;;  %v10522_v60 = vld [vmem:[#allocation24_spill] sm:$0xff] }
0x1177   : > { %v2941_v6 = vpop.permute.xlu1 %2940 }
0x1178   : > { %v2946_v30 = vmul.f32 %v2941_v6, %v2936_v16  ;;  %v10523_v16 = vld [vmem:[#allocation25_spill] sm:$0xff]  ;;  %v10524_v6 = vld [vmem:[#allocation26_spill] sm:$0xff] }
0x1179   : > { %v2943_v29 = vpop.permute.xlu0 %2942 }
0x117a   : > { %v2947_v13 = vmul.f32 %v2943_v29, %v2937_v5  ;;  %v8809_v61 = vadd.f32 %v2946_v30, %v2934_v43  ;;  %v10525_v30 = vld [vmem:[#allocation27_spill] sm:$0xff]  ;;  %v10526_v5 = vld [vmem:[#allocation28_spill] sm:$0xff]  ;;  %v10527_v29 = vld [vmem:[#allocation29_spill] sm:$0xff] }
0x117b   : > { %v10528_v43 = vld [vmem:[#allocation30_spill] sm:$0xff] }
0x117c   : > { %v8811_v50 = vadd.f32 %v2947_v13, %v2935_v25  ;;  %v10529_v25 = vld [vmem:[#allocation31_spill] sm:$0xff]  ;;  %v10530_v13 = vld [vmem:[#allocation32_spill] sm:$0xff] }
0x117e   : > { %v7152_v52 = vpack.i.bf16 %v8811_v50, %v8809_v61 }
0x1180   : > { %7153 = vrot.lane.b32.xlu1 %v7152_v52, %s7565_s23  ;;  %v10531_v52 = vld [vmem:[#allocation33_spill] sm:$0xff] }
0x1184   : > { %2952 = vrot.lane.b32.xlu1 %v8809_v61, %s7566_s24 }
0x11f2   : > { %v7154_v57 = vpop.permute.xlu1 %7153 }
0x11f3   : > { %v7156_v36 = vunpack.i.h.bf16 %v7154_v57  ;;  %v7155_v3 = vunpack.i.l.bf16 %v7154_v57  ;;  %v10534_v57 = vld [vmem:[#allocation36_spill] sm:$0xff] }
0x11f5   : > { %v2971_v27 = vsel %vm464_vm1, %v6592_v40, %v7156_v36  ;;  %v2970_v12 = vsel %vm464_vm1, %v6591_v62, %v7155_v3  ;;  %v10532_v62 = vld [vmem:[#allocation34_spill] sm:$0xff]  ;;  %v10533_v40 = vld [vmem:[#allocation35_spill] sm:$0xff] }
0x11f6   : > { %v2972_v45 = vpack.c.bf16 %v2971_v27, %v2970_v12  ;;  %v8822_v53 = vpop.permute.xlu1 %2952 }
0x11f7   : > { %6589 = vst.msk [vmem:[%s8340_s21 + $0x20] sm:$0xff] %vm1622_vm7, %v8822_v53 }
0x11f8   : > { %6866 = vmatpush3.bf16.msra.mxu0 %v2972_v45  ;;  %6872 = vmatpush3.bf16.msra.mxu1 %v2972_v45 }
0x11f9   : > { %3069 = vmatprep.subr.bf16.mxu0 %v7797_v17  ;;  %3112 = vmatprep.subr.bf16.mxu1 %v7810_v22 }
0x11fb   : > { %6874 = vmatmul.mubr.msk.bf16.vlgmr.msra.gmra.mrb[72].mxu1 %vm473_vm2, %v8829_v34  ;;  %6868 = vmatmul.mubr.msk.bf16.vlgmr.msra.gmra.mrb[72].mxu0 %vm473_vm2, %v8833_v41 }
0x11fc   : > { %3070 = vmatpush1.bf16.msra.mxu0 %v7802_v19  ;;  %3113 = vmatpush1.bf16.msra.mxu1 %v7812_v23 }
0x11fd   : > { %3071 = vmatprep.subr.bf16.mxu0 %v7814_v24  ;;  %3114 = vmatprep.subr.bf16.mxu1 %v7826_v28 }
0x11fe   : > { %3101 = vmatprep.mubr.bf16.mxu0 %v10347_v46  ;;  %3144 = vmatprep.mubr.bf16.mxu1 %v10347_v46 }
0x1200   : > { %3072 = vmatpush1.bf16.msra.mxu0 %v7839_v32  ;;  %3115 = vmatpush1.bf16.msra.mxu1 %v10520_v18 }
0x1201   : > { %3073 = vmatprep.subr.bf16.mxu0 %v10521_v7  ;;  %3116 = vmatprep.subr.bf16.mxu1 %v10522_v60 }
0x1204   : > { %3074 = vmatpush1.bf16.msra.mxu0 %v10523_v16  ;;  %3117 = vmatpush1.bf16.msra.mxu1 %v10524_v6  ;;  %v10549_v6 = vld [vmem:[#allocation51_spill] sm:$0xff] }
0x1205   : > { %3075 = vmatprep.subr.bf16.mxu0 %v10525_v30  ;;  %3118 = vmatprep.subr.bf16.mxu1 %v10526_v5  ;;  %v10543_v5 = vld [vmem:[#allocation45_spill] sm:$0xff]  ;;  %v10548_v30 = vld [vmem:[#allocation50_spill] sm:$0xff] }
0x1208   : > { %3076 = vmatpush1.bf16.msra.mxu0 %v10527_v29  ;;  %3119 = vmatpush1.bf16.msra.mxu1 %v10528_v43 }
0x1209   : > { %6595 = vmatprep.subr.msk.bf16.mxu0 %vm763_vm3, %v10529_v25  ;;  %6597 = vmatprep.subr.msk.bf16.mxu1 %vm763_vm3, %v10530_v13 }
0x120c   : > { %3078 = vmatpush1.bf16.msra.mxu0 %v10531_v52  ;;  %3121 = vmatpush1.bf16.msra.mxu1 %v10532_v62  ;;  %v10542_v52 = vld [vmem:[#allocation44_spill] sm:$0xff] }
0x120d   : > { %3155 = vmatprep.subr.bf16.mxu0 %v10533_v40  ;;  %3198 = vmatprep.subr.bf16.mxu1 %v10534_v57 }
0x12ce   : > { %v3048_v36 = vpop.f32.mrb[72].mxu1  ;;  %v8861_v3 = vpop.f32.mrb[72].mxu0 }
0x12cf   : > { %v6875_v27 = vpop.f32.mrb[73].mxu1  ;;  %v6869_v12 = vpop.f32.mrb[73].mxu0 }
0x12d0   : > { %v3051_v45 = vpop.f32.mrb[74].mxu1  ;;  %v8863_v43 = vpop.f32.mrb[74].mxu0  ;;  %v10536_v12 = vld [vmem:[#allocation38_spill] sm:$0xff] }
0x12d1   : > { %v7157_v25 = vpack.i.bf16 %v3051_v45, %v3048_v36  ;;  %v6876_v29 = vpop.f32.mrb[75].mxu1  ;;  %v6870_v13 = vpop.f32.mrb[75].mxu0  ;;  %v10535_v36 = vld [vmem:[#allocation37_spill] sm:$0xff]  ;;  %v10537_v45 = vld [vmem:[#allocation39_spill] sm:$0xff] }
0x12d3   : > { %7158 = vrot.lane.b32.xlu0 %v7157_v25, %s7555_s13 }
0x12d7   : > { %2954 = vrot.lane.b32.xlu0 %v8811_v50, %s7566_s24 }
0x1345   : > { %v8868_v40 = vpop.permute.xlu0 %7158 }
0x1346   : > { %v10232_v57 = vunpack.i.h.bf16 %v8868_v40  ;;  %v10231_v62 = vunpack.i.l.bf16 %v8868_v40 }
0x1348   : > { %v3063_v27 = vsel %vm575_vm4, %v8861_v3, %v10231_v62  ;;  %v3064_v29 = vsel %vm575_vm4, %v8863_v43, %v10232_v57  ;;  %v10538_v62 = vld [vmem:[#allocation40_spill] sm:$0xff]  ;;  %v10541_v57 = vld [vmem:[#allocation43_spill] sm:$0xff] }
0x1349   : > { %v3065_v25 = vpack.c.bf16 %v3064_v29, %v3063_v27  ;;  %v8880_v13 = vpop.permute.xlu0 %2954  ;;  %v10539_v27 = vld [vmem:[#allocation41_spill] sm:$0xff]  ;;  %v10540_v29 = vld [vmem:[#allocation42_spill] sm:$0xff] }
0x134a   : > { %6590 = vst.msk [vmem:[%s8340_s21 + $0x28] sm:$0xff] %vm1622_vm7, %v8880_v13 }
0x134b   : > { %6596 = vmatmul.mubr.msk.bf16.vlgmr.msra.gmra.mrb[76].mxu0 %vm759_vm5, %v3065_v25  ;;  %6598 = vmatmul.mubr.msk.bf16.vlgmr.msra.gmra.mrb[76].mxu1 %vm759_vm5, %v3065_v25 }
0x134c   : > { %3156 = vmatpush1.bf16.msra.mxu0 %v10535_v36  ;;  %3199 = vmatpush1.bf16.msra.mxu1 %v10536_v12  ;;  %v10544_v36 = vld [vmem:[#allocation46_spill] sm:$0xff]  ;;  %v10545_v12 = vld [vmem:[#allocation47_spill] sm:$0xff] }
0x134d   : > { %3157 = vmatprep.subr.bf16.mxu0 %v10537_v45  ;;  %3200 = vmatprep.subr.bf16.mxu1 %v10538_v62  ;;  %v10546_v45 = vld [vmem:[#allocation48_spill] sm:$0xff]  ;;  %v10547_v62 = vld [vmem:[#allocation49_spill] sm:$0xff] }
0x134e   : > { %3187 = vmatprep.mubr.bf16.mxu0 %v10347_v46  ;;  %3230 = vmatprep.mubr.bf16.mxu1 %v10347_v46 }
0x1350   : > { %3158 = vmatpush1.bf16.msra.mxu0 %v10539_v27  ;;  %3201 = vmatpush1.bf16.msra.mxu1 %v10540_v29  ;;  %v10550_v29 = vld [vmem:[#allocation52_spill] sm:$0xff] }
0x1351   : > { %3159 = vmatprep.subr.bf16.mxu0 %v10541_v57  ;;  %3202 = vmatprep.subr.bf16.mxu1 %v10542_v52  ;;  %v10551_v57 = vld [vmem:[#allocation53_spill] sm:$0xff]  ;;  %v10552_v52 = vld [vmem:[#allocation54_spill] sm:$0xff] }
0x1354   : > { %3160 = vmatpush1.bf16.msra.mxu0 %v10543_v5  ;;  %3203 = vmatpush1.bf16.msra.mxu1 %v10544_v36 }
0x1355   : > { %3161 = vmatprep.subr.bf16.mxu0 %v10545_v12  ;;  %3204 = vmatprep.subr.bf16.mxu1 %v10546_v45 }
0x1358   : > { %3162 = vmatpush1.bf16.msra.mxu0 %v10547_v62  ;;  %3205 = vmatpush1.bf16.msra.mxu1 %v10548_v30 }
0x1359   : > { %6599 = vmatprep.subr.msk.bf16.mxu0 %vm763_vm3, %v10549_v6  ;;  %6601 = vmatprep.subr.msk.bf16.mxu1 %vm763_vm3, %v10550_v29 }
0x135c   : > { %3164 = vmatpush1.bf16.msra.mxu0 %v10551_v57  ;;  %3207 = vmatpush1.bf16.msra.mxu1 %v10552_v52 }
0x135d   : > { %6877 = vmatprep.subr.bf16.mxu0 %v10389_v1  ;;  %6883 = vmatprep.subr.bf16.mxu1 %v10389_v1 }
0x135f   : > { %6600 = vmatmul.mubr.msk.bf16.vlgmr.msra.gmra.mrb[80].mxu0 %vm759_vm5, %v3065_v25  ;;  %6602 = vmatmul.mubr.msk.bf16.vlgmr.msra.gmra.mrb[80].mxu1 %vm759_vm5, %v3065_v25 }
0x1360   : > { %6879 = vmatprep.mubr.msk.bf16.mxu0 %vm7552_vm0, %v10389_v1  ;;  %6885 = vmatprep.mubr.msk.bf16.mxu1 %vm7552_vm0, %v10389_v1 }
0x141e   : > { %v3103_v6 = vpop.f32.mrb[76].mxu0  ;;  %v3146_v29 = vpop.f32.mrb[76].mxu1 }
0x141f   : > { %v3241_v57 = vmul.f32 %v3103_v6, %v8062_v54  ;;  %v3105_v30 = vpop.f32.mrb[77].mxu0  ;;  %v3148_v52 = vpop.f32.mrb[77].mxu1  ;;  %v3247_v27 = vmul.f32 %v3146_v29, %v8068_v58 }
0x1420   : > { %v3243_v62 = vmul.f32 %v3105_v30, %v8072_v9  ;;  %v3107_v45 = vpop.f32.mrb[78].mxu0  ;;  %v3150_v12 = vpop.f32.mrb[78].mxu1  ;;  %v3251_v18 = vmul.f32 %v3148_v52, %v8070_v8 }
0x1421   : > { %v3242_v36 = vmul.f32 %v3107_v45, %v8064_v55  ;;  %v3109_v5 = vpop.f32.mrb[79].mxu0  ;;  %v3152_v25 = vpop.f32.mrb[79].mxu1  ;;  %v3248_v6 = vmul.f32 %v3150_v12, %v8076_v47 }
0x1422   : > { %v3245_v16 = vadd.f32 %v3243_v62, %v3241_v57  ;;  %v3244_v60 = vmul.f32 %v3109_v5, %v8066_v56  ;;  %v3252_v30 = vmul.f32 %v3152_v25, %v8074_v10 }
0x1424   : > { %v3249_v7 = vadd.f32 %v3247_v27, %v3245_v16  ;;  %v3246_v32 = vadd.f32 %v3244_v60, %v3242_v36 }
0x1426   : > { %v3253_v28 = vadd.f32 %v3251_v18, %v3249_v7  ;;  %v3250_v24 = vadd.f32 %v3248_v6, %v3246_v32 }
0x1428   : > { %v3254_v23 = vadd.f32 %v3252_v30, %v3250_v24 }
0x1432   : > { %v3189_v19 = vpop.f32.mrb[80].mxu0  ;;  %v3232_v45 = vpop.f32.mrb[80].mxu1 }
0x1433   : > { %v3255_v22 = vmul.f32 %v3189_v19, %v8090_v4  ;;  %v3191_v17 = vpop.f32.mrb[81].mxu0  ;;  %v3234_v29 = vpop.f32.mrb[81].mxu1  ;;  %v3263_v18 = vmul.f32 %v3232_v45, %v8092_v63 }
0x1434   : > { %v3259_v62 = vmul.f32 %v3191_v17, %v8087_v14  ;;  %v3193_v5 = vpop.f32.mrb[82].mxu0  ;;  %v3236_v16 = vpop.f32.mrb[82].mxu1  ;;  %v3267_v19 = vmul.f32 %v3234_v29, %v8101_v21 }
0x1435   : > { %v3257_v57 = vadd.f32 %v3255_v22, %v3253_v28  ;;  %v3256_v52 = vmul.f32 %v3193_v5, %v8078_v11  ;;  %v3195_v12 = vpop.f32.mrb[83].mxu0  ;;  %v3238_v60 = vpop.f32.mrb[83].mxu1  ;;  %v3264_v27 = vmul.f32 %v3236_v16, %v8096_v39 }
0x1436   : > { %v3260_v32 = vmul.f32 %v3195_v12, %v8094_v31  ;;  %v3268_v22 = vmul.f32 %v3238_v60, %v8105_v26 }
0x1437   : > { %v3261_v24 = vadd.f32 %v3259_v62, %v3257_v57  ;;  %v3258_v7 = vadd.f32 %v3256_v52, %v3254_v23 }
0x1439   : > { %v3265_v36 = vadd.f32 %v3263_v18, %v3261_v24  ;;  %v3262_v25 = vadd.f32 %v3260_v32, %v3258_v7  ;;  %v10555_v32 = vld [vmem:[#allocation71_spill] sm:$0xff]  ;;  %v10556_v18 = vld [vmem:[#allocation72_spill] sm:$0xff]  ;;  %v10557_v24 = vld [vmem:[#allocation73_spill] sm:$0xff] }
0x143a   : > { %v10558_v7 = vld [vmem:[#allocation74_spill] sm:$0xff] }
0x143b   : > { %v3269_v17 = vadd.f32 %v3267_v19, %v3265_v36  ;;  %v3266_v6 = vadd.f32 %v3264_v27, %v3262_v25  ;;  %v10559_v36 = vld [vmem:[#allocation75_spill] sm:$0xff]  ;;  %v10560_v19 = vld [vmem:[#allocation76_spill] sm:$0xff]  ;;  %v10561_v27 = vld [vmem:[#allocation78_spill] sm:$0xff] }
0x143c   : > { %v10562_v25 = vld [vmem:[#allocation77_spill] sm:$0xff] }
0x143d   : > { %v3271_v28 = vadd.f32 %v8683_v51, %v3269_v17  ;;  %v3270_v30 = vadd.f32 %v3268_v22, %v3266_v6  ;;  %v10563_v17 = vld [vmem:[#allocation79_spill] sm:$0xff]  ;;  %v10564_v6 = vld [vmem:[#allocation80_spill] sm:$0xff] }
0x143f   : > { %v6603_v5 = vmul.f32 -1.442695, %v3271_v28  ;;  %v3272_v12 = vadd.f32 %v8686_v33, %v3270_v30 }
0x1441   : > { %7306 = vpow2.f32 %v6603_v5  ;;  %v6604_v45 = vmul.f32 -1.442695, %v3272_v12 }
0x1443   : > { %7308 = vpow2.f32 %v6604_v45 }
0x144b   : > { %v7307_v23 = vpop.eup %7306 }
0x144c   : > { %v3279_v62 = vadd.f32 1.0, %v7307_v23 }
0x144d   : > { %v7309_v57 = vpop.eup %7308 }
0x144e   : > { %7310 = vrcp.f32 %v3279_v62  ;;  %v3280_v29 = vadd.f32 1.0, %v7309_v57 }
0x1450   : > { %7312 = vrcp.f32 %v3280_v29 }
0x1458   : > { %v8935_v16 = vpop.eup %7310 }
0x1459   : > { %v3285_v51 = vmul.f32 %v8935_v16, %v8822_v53  ;;  %v10553_v53 = vld [vmem:[#allocation69_spill] sm:$0xff] }
0x145a   : > { %v8937_v52 = vpop.eup %7312 }
0x145b   : > { %v3286_v60 = vmul.f32 %v8937_v52, %v8880_v13  ;;  %v10554_v13 = vld [vmem:[#allocation70_spill] sm:$0xff] }
0x145d   : > { %v3287_v33 = vpack.c.bf16 %v3286_v60, %v3285_v51 }
0x145f   : > { %6878 = vmatpush3.bf16.msra.mxu0 %v3287_v33  ;;  %6884 = vmatpush3.bf16.msra.mxu1 %v3287_v33 }
0x1460   : > { %3396 = vmatprep.subr.bf16.mxu0 %v10412_v48  ;;  %3439 = vmatprep.subr.bf16.mxu1 %v10413_v49 }
0x1462   : > { %6880 = vmatmul.mubr.msk.bf16.vlgmr.msra.gmra.mrb[84].mxu0 %vm473_vm2, %v8833_v41  ;;  %6886 = vmatmul.mubr.msk.bf16.vlgmr.msra.gmra.mrb[84].mxu1 %vm473_vm2, %v8829_v34 }
0x1463   : > { %3397 = vmatpush1.bf16.msra.mxu0 %v8132_v0  ;;  %3440 = vmatpush1.bf16.msra.mxu1 %v10414_v44 }
0x1464   : > { %3398 = vmatprep.subr.bf16.mxu0 %v10415_v15  ;;  %3441 = vmatprep.subr.bf16.mxu1 %v10416_v38 }
0x1465   : > { %3428 = vmatprep.mubr.bf16.mxu0 %v10347_v46  ;;  %3471 = vmatprep.mubr.bf16.mxu1 %v10347_v46 }
0x1467   : > { %3399 = vmatpush1.bf16.msra.mxu0 %v10484_v59  ;;  %3442 = vmatpush1.bf16.msra.mxu1 %v10485_v20 }
0x1468   : > { %3400 = vmatprep.subr.bf16.mxu0 %v10486_v2  ;;  %3443 = vmatprep.subr.bf16.mxu1 %v10487_v35 }
0x146b   : > { %3401 = vmatpush1.bf16.msra.mxu0 %v10553_v53  ;;  %3444 = vmatpush1.bf16.msra.mxu1 %v10554_v13 }
0x146c   : > { %3402 = vmatprep.subr.bf16.mxu0 %v10555_v32  ;;  %3445 = vmatprep.subr.bf16.mxu1 %v10556_v18 }
0x146f   : > { %3446 = vmatpush1.bf16.msra.mxu1 %v10557_v24  ;;  %3403 = vmatpush1.bf16.msra.mxu0 %v10558_v7 }
0x1470   : > { %6607 = vmatprep.subr.msk.bf16.mxu0 %vm763_vm3, %v10559_v36  ;;  %6609 = vmatprep.subr.msk.bf16.mxu1 %vm763_vm3, %v10560_v19 }
0x1473   : > { %3405 = vmatpush1.bf16.msra.mxu0 %v10561_v27  ;;  %3448 = vmatpush1.bf16.msra.mxu1 %v10562_v25 }
0x1474   : > { %3482 = vmatprep.subr.bf16.mxu0 %v10563_v17  ;;  %3525 = vmatprep.subr.bf16.mxu1 %v10564_v6 }
0x1535   : > { %v3322_v22 = vpop.f32.mrb[84].mxu0  ;;  %v3363_v28 = vpop.f32.mrb[84].mxu1 }
0x1536   : > { %v6881_v30 = vpop.f32.mrb[85].mxu0  ;;  %v6887_v5 = vpop.f32.mrb[85].mxu1 }
0x1537   : > { %v3325_v12 = vpop.f32.mrb[86].mxu0  ;;  %v3366_v45 = vpop.f32.mrb[86].mxu1 }
0x1538   : > { %v7162_v23 = vpack.i.bf16 %v3325_v12, %v3322_v22  ;;  %v7167_v62 = vpack.i.bf16 %v3366_v45, %v3363_v28  ;;  %v6882_v57 = vpop.f32.mrb[87].mxu0  ;;  %v6888_v29 = vpop.f32.mrb[87].mxu1  ;;  %v10565_v22 = vunpack.i.h.bf16 %v8868_v40  ;;  %v10566_v12 = vunpack.i.l.bf16 %v8868_v40  ;;  %v10571_v40 = vld [vmem:[#allocation85_spill] sm:$0xff] }
0x1539   : > { %v10570_v29 = vld [vmem:[#allocation84_spill] sm:$0xff] }
0x153a   : > { %7168 = vrot.lane.b32.xlu0 %v7167_v62, %s7563_s11  ;;  %7163 = vrot.lane.b32.xlu1 %v7162_v23, %s7553_s26 }
0x15ac   : > { %v7169_v51 = vpop.permute.xlu0 %7168  ;;  %v7164_v60 = vpop.permute.xlu1 %7163 }
0x15ad   : > { %v7166_v33 = vunpack.i.h.bf16 %v7164_v60  ;;  %v7165_v17 = vunpack.i.l.bf16 %v7164_v60  ;;  %v7171_v25 = vunpack.i.h.bf16 %v7169_v51  ;;  %v7170_v6 = vunpack.i.l.bf16 %v7169_v51  ;;  %v10574_v51 = vld [vmem:[#allocation88_spill] sm:$0xff]  ;;  %v10575_v60 = vld [vmem:[#allocation89_spill] sm:$0xff] }
0x15af   : > { %v3387_v30 = vsel %vm464_vm1, %v8863_v43, %v7166_v33  ;;  %v3386_v5 = vsel %vm464_vm1, %v8861_v3, %v7165_v17  ;;  %v10567_v43 = vld [vmem:[#allocation81_spill] sm:$0xff]  ;;  %v10568_v3 = vld [vmem:[#allocation82_spill] sm:$0xff]  ;;  %v10569_v17 = vld [vmem:[#allocation83_spill] sm:$0xff] }
0x15b0   : > { %v3389_v28 = vsel %vm575_vm4, %v3387_v30, %v10565_v22  ;;  %v3388_v45 = vsel %vm575_vm4, %v3386_v5, %v10566_v12  ;;  %v10576_v33 = vld [vmem:[#allocation90_spill] sm:$0xff]  ;;  %v10577_v30 = vld [vmem:[#allocation91_spill] sm:$0xff]  ;;  %v10578_v5 = vld [vmem:[#allocation92_spill] sm:$0xff] }
0x15b1   : > { %v3391_v23 = vsel %vm1175_vm6, %v3389_v28, %v7171_v25  ;;  %v3390_v62 = vsel %vm1175_vm6, %v3388_v45, %v7170_v6  ;;  %v10572_v25 = vld [vmem:[#allocation86_spill] sm:$0xff]  ;;  %v10573_v6 = vld [vmem:[#allocation87_spill] sm:$0xff]  ;;  %v10579_v22 = vld [vmem:[#allocation93_spill] sm:$0xff] }
0x15b2   : > { %v3392_v57 = vpack.c.bf16 %v3391_v23, %v3390_v62  ;;  %v10580_v28 = vld [vmem:[#allocation94_spill] sm:$0xff]  ;;  %v10581_v12 = vld [vmem:[#allocation95_spill] sm:$0xff]  ;;  %v10582_v45 = vld [vmem:[#allocation96_spill] sm:$0xff] }
0x15b3   : > { %v10583_v23 = vld [vmem:[#allocation97_spill] sm:$0xff]  ;;  %v10584_v62 = vld [vmem:[#allocation98_spill] sm:$0xff] }
0x15b4   : > { %6608 = vmatmul.mubr.msk.bf16.vlgmr.msra.gmra.mrb[88].mxu0 %vm759_vm5, %v3392_v57  ;;  %6610 = vmatmul.mubr.msk.bf16.vlgmr.msra.gmra.mrb[88].mxu1 %vm759_vm5, %v3392_v57 }
0x15b5   : > { %3483 = vmatpush1.bf16.msra.mxu0 %v10567_v43  ;;  %3526 = vmatpush1.bf16.msra.mxu1 %v10568_v3 }
0x15b6   : > { %3484 = vmatprep.subr.bf16.mxu0 %v10569_v17  ;;  %3527 = vmatprep.subr.bf16.mxu1 %v10570_v29 }
0x15b7   : > { %3514 = vmatprep.mubr.bf16.mxu0 %v10347_v46  ;;  %3557 = vmatprep.mubr.bf16.mxu1 %v10347_v46 }
0x15b9   : > { %3485 = vmatpush1.bf16.msra.mxu0 %v10571_v40  ;;  %3528 = vmatpush1.bf16.msra.mxu1 %v10572_v25 }
0x15ba   : > { %3486 = vmatprep.subr.bf16.mxu0 %v10573_v6  ;;  %3529 = vmatprep.subr.bf16.mxu1 %v10574_v51 }
0x15bd   : > { %3487 = vmatpush1.bf16.msra.mxu0 %v10575_v60  ;;  %3530 = vmatpush1.bf16.msra.mxu1 %v10576_v33 }
0x15be   : > { %3488 = vmatprep.subr.bf16.mxu0 %v10577_v30  ;;  %3531 = vmatprep.subr.bf16.mxu1 %v10578_v5 }
0x15c1   : > { %3489 = vmatpush1.bf16.msra.mxu0 %v10579_v22  ;;  %3532 = vmatpush1.bf16.msra.mxu1 %v10580_v28 }
0x15c2   : > { %6611 = vmatprep.subr.msk.bf16.mxu0 %vm763_vm3, %v10581_v12  ;;  %6613 = vmatprep.subr.msk.bf16.mxu1 %vm763_vm3, %v10582_v45 }
0x15c5   : > { %3491 = vmatpush1.bf16.msra.mxu0 %v10583_v23  ;;  %3534 = vmatpush1.bf16.msra.mxu1 %v10584_v62 }
0x15c6   : > { %6889 = vmatprep.subr.bf16.mxu0 %v10389_v1  ;;  %6895 = vmatprep.subr.bf16.mxu1 %v10389_v1 }
0x15c8   : > { %6612 = vmatmul.mubr.msk.bf16.vlgmr.msra.gmra.mrb[92].mxu0 %vm759_vm5, %v3392_v57  ;;  %6614 = vmatmul.mubr.msk.bf16.vlgmr.msra.gmra.mrb[92].mxu1 %vm759_vm5, %v3392_v57 }
0x15c9   : > { %6897 = vmatprep.mubr.msk.bf16.mxu1 %vm7552_vm0, %v10389_v1  ;;  %6891 = vmatprep.mubr.msk.bf16.mxu0 %vm7552_vm0, %v10389_v1 }
0x1687   : > { %v3430_v12 = vpop.f32.mrb[88].mxu0  ;;  %v3473_v45 = vpop.f32.mrb[88].mxu1 }
0x1688   : > { %v3568_v23 = vmul.f32 %v3430_v12, %v8062_v54  ;;  %v3432_v28 = vpop.f32.mrb[89].mxu0  ;;  %v3475_v62 = vpop.f32.mrb[89].mxu1  ;;  %v3574_v51 = vmul.f32 %v3473_v45, %v8068_v58 }
0x1689   : > { %v3570_v22 = vmul.f32 %v3432_v28, %v8072_v9  ;;  %v3434_v5 = vpop.f32.mrb[90].mxu0  ;;  %v3477_v30 = vpop.f32.mrb[90].mxu1  ;;  %v3578_v29 = vmul.f32 %v3475_v62, %v8070_v8 }
0x168a   : > { %v3569_v33 = vmul.f32 %v3434_v5, %v8064_v55  ;;  %v3436_v60 = vpop.f32.mrb[91].mxu0  ;;  %v3479_v57 = vpop.f32.mrb[91].mxu1  ;;  %v3575_v12 = vmul.f32 %v3477_v30, %v8076_v47 }
0x168b   : > { %v3572_v6 = vadd.f32 %v3570_v22, %v3568_v23  ;;  %v3571_v25 = vmul.f32 %v3436_v60, %v8066_v56  ;;  %v3579_v28 = vmul.f32 %v3479_v57, %v8074_v10 }
0x168d   : > { %v3576_v40 = vadd.f32 %v3574_v51, %v3572_v6  ;;  %v3573_v17 = vadd.f32 %v3571_v25, %v3569_v33 }
0x168f   : > { %v3580_v3 = vadd.f32 %v3578_v29, %v3576_v40  ;;  %v3577_v43 = vadd.f32 %v3575_v12, %v3573_v17 }
0x1691   : > { %v3581_v27 = vadd.f32 %v3579_v28, %v3577_v43 }
0x169b   : > { %v3516_v19 = vpop.f32.mrb[92].mxu0  ;;  %v3559_v5 = vpop.f32.mrb[92].mxu1 }
0x169c   : > { %v3582_v36 = vmul.f32 %v3516_v19, %v8090_v4  ;;  %v3518_v7 = vpop.f32.mrb[93].mxu0  ;;  %v3561_v45 = vpop.f32.mrb[93].mxu1  ;;  %v3590_v29 = vmul.f32 %v3559_v5, %v8092_v63 }
0x169d   : > { %v3586_v22 = vmul.f32 %v3518_v7, %v8087_v14  ;;  %v3520_v60 = vpop.f32.mrb[94].mxu0  ;;  %v3563_v6 = vpop.f32.mrb[94].mxu1  ;;  %v3594_v19 = vmul.f32 %v3561_v45, %v8101_v21  ;;  %v3604_v45 = vsub.f32 1.0, %v8935_v16 }
0x169e   : > { %v3584_v51 = vadd.f32 %v3582_v36, %v3580_v3  ;;  %v3583_v23 = vmul.f32 %v3520_v60, %v8078_v11  ;;  %v3522_v30 = vpop.f32.mrb[95].mxu0  ;;  %v3565_v25 = vpop.f32.mrb[95].mxu1  ;;  %v3591_v62 = vmul.f32 %v3563_v6, %v8096_v39 }
0x169f   : > { %v3587_v17 = vmul.f32 %v3522_v30, %v8094_v31  ;;  %v3595_v36 = vmul.f32 %v3565_v25, %v8105_v26 }
0x16a0   : > { %v3588_v43 = vadd.f32 %v3586_v22, %v3584_v51  ;;  %v3585_v40 = vadd.f32 %v3583_v23, %v3581_v27  ;;  %v3605_v51 = vsub.f32 1.0, %v8937_v52  ;;  %v3602_v23 = vmul.f32 %v8935_v16, %v8809_v61 }
0x16a2   : > { %v3592_v33 = vadd.f32 %v3590_v29, %v3588_v43  ;;  %v3589_v57 = vadd.f32 %v3587_v17, %v3585_v40  ;;  %v6617_v43 = vld [vmem:[%s7774_s18 + $0x40] sm:$0xff]  ;;  %v6618_v40 = vld [vmem:[%s7774_s18 + $0x48] sm:$0xff] }
0x16a4   : > { %v3596_v7 = vadd.f32 %v3594_v19, %v3592_v33  ;;  %v3593_v12 = vadd.f32 %v3591_v62, %v3589_v57  ;;  %v10587_v57 = vld [vmem:[#allocation15_spill] sm:$0xff] }
0x16a6   : > { %v3598_v3 = vadd.f32 %v8792_v37, %v3596_v7  ;;  %v3597_v28 = vadd.f32 %v3595_v36, %v3593_v12  ;;  %v10588_v7 = vld [vmem:[#allocation17_spill] sm:$0xff]  ;;  %v10589_v12 = vld [vmem:[#allocation16_spill] sm:$0xff]  ;;  %v10590_v36 = vld [vmem:[#allocation18_spill] sm:$0xff] }
0x16a8   : > { %7314 = vtanh.f32 %v3598_v3  ;;  %v3599_v60 = vadd.f32 %v8798_v42, %v3597_v28  ;;  %v3603_v42 = vmul.f32 %v8937_v52, %v8811_v50  ;;  %v10591_v3 = vld [vmem:[#allocation19_spill] sm:$0xff]  ;;  %v10592_v28 = vld [vmem:[#allocation20_spill] sm:$0xff] }
0x16aa   : > { %7316 = vtanh.f32 %v3599_v60  ;;  %v10593_v60 = vld [vmem:[#allocation21_spill] sm:$0xff] }
0x16b2   : > { %v7315_v5 = vpop.eup %7314 }
0x16b3   : > { %3608 = vrot.lane.b32.xlu1 %v7315_v5, %s7564_s14  ;;  %v10594_v5 = vld [vmem:[#allocation22_spill] sm:$0xff] }
0x16b4   : > { %v7317_v27 = vpop.eup %7316 }
0x16b5   : > { %3610 = vrot.lane.b32.xlu0 %v7317_v27, %s7564_s14  ;;  %v10595_v27 = vld [vmem:[#allocation23_spill] sm:$0xff] }
0x1725   : > { %v3609_v22 = vpop.permute.xlu1 %3608 }
0x1726   : > { %v3614_v6 = vmul.f32 %v3609_v22, %v3604_v45  ;;  %v10596_v45 = vld [vmem:[#allocation24_spill] sm:$0xff]  ;;  %v10597_v22 = vld [vmem:[#allocation25_spill] sm:$0xff] }
0x1727   : > { %v3611_v37 = vpop.permute.xlu0 %3610 }
0x1728   : > { %v3615_v30 = vmul.f32 %v3611_v37, %v3605_v51  ;;  %v9045_v25 = vadd.f32 %v3614_v6, %v3602_v23  ;;  %v10598_v6 = vld [vmem:[#allocation26_spill] sm:$0xff]  ;;  %v10599_v51 = vld [vmem:[#allocation27_spill] sm:$0xff]  ;;  %v10600_v37 = vld [vmem:[#allocation28_spill] sm:$0xff] }
0x1729   : > { %v10601_v23 = vld [vmem:[#allocation29_spill] sm:$0xff] }
0x172a   : > { %10585 = vst [vmem:[#allocation59_spill] sm:$0xff] %v9045_v25  ;;  %v9047_v17 = vadd.f32 %v3615_v30, %v3603_v42  ;;  %v10602_v42 = vld [vmem:[#allocation30_spill] sm:$0xff]  ;;  %v10603_v30 = vld [vmem:[#allocation31_spill] sm:$0xff] }
0x172c   : > { %10586 = vst [vmem:[#allocation60_spill] sm:$0xff] %v9047_v17  ;;  %v7172_v29 = vpack.i.bf16 %v9047_v17, %v9045_v25 }
0x172e   : > { %7173 = vrot.lane.b32.xlu1 %v7172_v29, %s7565_s23  ;;  %v10604_v29 = vld [vmem:[#allocation32_spill] sm:$0xff] }
0x1732   : > { %3620 = vrot.lane.b32.xlu1 %v9045_v25, %s7566_s24  ;;  %v9168_v25 = vld [vmem:[#allocation7 + $0x8] sm:$0xff] }
0x17a0   : > { %v7174_v61 = vpop.permute.xlu1 %7173 }
0x17a1   : > { %v7176_v16 = vunpack.i.h.bf16 %v7174_v61  ;;  %v7175_v33 = vunpack.i.l.bf16 %v7174_v61  ;;  %v10607_v61 = vld [vmem:[#allocation35_spill] sm:$0xff] }
0x17a3   : > { %v3639_v50 = vsel %vm464_vm1, %v6618_v40, %v7176_v16  ;;  %v3638_v52 = vsel %vm464_vm1, %v6617_v43, %v7175_v33  ;;  %v10605_v43 = vld [vmem:[#allocation33_spill] sm:$0xff]  ;;  %v10606_v40 = vld [vmem:[#allocation34_spill] sm:$0xff]  ;;  %v10608_v16 = vld [vmem:[#allocation36_spill] sm:$0xff] }
0x17a4   : > { %v3640_v19 = vpack.c.bf16 %v3639_v50, %v3638_v52  ;;  %v9058_v62 = vpop.permute.xlu1 %3620 }
0x17a5   : > { %6615 = vst.msk [vmem:[%s8340_s21 + $0x30] sm:$0xff] %vm1622_vm7, %v9058_v62 }
0x17a6   : > { %6890 = vmatpush3.bf16.msra.mxu0 %v3640_v19  ;;  %6896 = vmatpush3.bf16.msra.mxu1 %v3640_v19 }
0x17a7   : > { %3737 = vmatprep.subr.bf16.mxu0 %v10587_v57  ;;  %3780 = vmatprep.subr.bf16.mxu1 %v10588_v7 }
0x17a9   : > { %6898 = vmatmul.mubr.msk.bf16.vlgmr.msra.gmra.mrb[96].mxu1 %vm473_vm2, %v8829_v34  ;;  %6892 = vmatmul.mubr.msk.bf16.vlgmr.msra.gmra.mrb[96].mxu0 %vm473_vm2, %v8833_v41 }
0x17aa   : > { %3738 = vmatpush1.bf16.msra.mxu0 %v10589_v12  ;;  %3781 = vmatpush1.bf16.msra.mxu1 %v10590_v36 }
0x17ab   : > { %3739 = vmatprep.subr.bf16.mxu0 %v10591_v3  ;;  %3782 = vmatprep.subr.bf16.mxu1 %v10592_v28 }
0x17ac   : > { %3769 = vmatprep.mubr.bf16.mxu0 %v10347_v46  ;;  %3812 = vmatprep.mubr.bf16.mxu1 %v10347_v46 }
0x17ae   : > { %3740 = vmatpush1.bf16.msra.mxu0 %v10593_v60  ;;  %3783 = vmatpush1.bf16.msra.mxu1 %v10594_v5 }
0x17af   : > { %3741 = vmatprep.subr.bf16.mxu0 %v10595_v27  ;;  %3784 = vmatprep.subr.bf16.mxu1 %v10596_v45 }
0x17b2   : > { %3742 = vmatpush1.bf16.msra.mxu0 %v10597_v22  ;;  %3785 = vmatpush1.bf16.msra.mxu1 %v10598_v6  ;;  %v10622_v6 = vld [vmem:[#allocation50_spill] sm:$0xff]  ;;  %v10623_v22 = vld [vmem:[#allocation51_spill] sm:$0xff] }
0x17b3   : > { %3743 = vmatprep.subr.bf16.mxu0 %v10599_v51  ;;  %3786 = vmatprep.subr.bf16.mxu1 %v10600_v37  ;;  %v10617_v51 = vld [vmem:[#allocation45_spill] sm:$0xff] }
0x17b6   : > { %3744 = vmatpush1.bf16.msra.mxu0 %v10601_v23  ;;  %3787 = vmatpush1.bf16.msra.mxu1 %v10602_v42 }
0x17b7   : > { %6621 = vmatprep.subr.msk.bf16.mxu0 %vm763_vm3, %v10603_v30  ;;  %6623 = vmatprep.subr.msk.bf16.mxu1 %vm763_vm3, %v10604_v29 }
0x17ba   : > { %3746 = vmatpush1.bf16.msra.mxu0 %v10605_v43  ;;  %3789 = vmatpush1.bf16.msra.mxu1 %v10606_v40  ;;  %v10616_v43 = vld [vmem:[#allocation44_spill] sm:$0xff] }
0x17bb   : > { %3823 = vmatprep.subr.bf16.mxu0 %v10607_v61  ;;  %3866 = vmatprep.subr.bf16.mxu1 %v10608_v16 }
0x187c   : > { %v3716_v33 = vpop.f32.mrb[96].mxu1  ;;  %v9093_v50 = vpop.f32.mrb[96].mxu0 }
0x187d   : > { %v6899_v52 = vpop.f32.mrb[97].mxu1  ;;  %v6893_v19 = vpop.f32.mrb[97].mxu0 }
0x187e   : > { %v3719_v42 = vpop.f32.mrb[98].mxu1  ;;  %v9095_v23 = vpop.f32.mrb[98].mxu0  ;;  %v10611_v19 = vld [vmem:[#allocation39_spill] sm:$0xff] }
0x187f   : > { %v7177_v30 = vpack.i.bf16 %v3719_v42, %v3716_v33  ;;  %v6900_v37 = vpop.f32.mrb[99].mxu1  ;;  %v6894_v29 = vpop.f32.mrb[99].mxu0  ;;  %v10610_v33 = vld [vmem:[#allocation38_spill] sm:$0xff] }
0x1880   : > { %v10609_v29 = vld [vmem:[#allocation37_spill] sm:$0xff] }
0x1881   : > { %7178 = vrot.lane.b32.xlu0 %v7177_v30, %s7555_s13 }
0x1885   : > { %3622 = vrot.lane.b32.xlu0 %v9047_v17, %s7566_s24 }
0x18f3   : > { %v9100_v61 = vpop.permute.xlu0 %7178 }
0x18f4   : > { %v10248_v16 = vunpack.i.h.bf16 %v9100_v61  ;;  %v10247_v40 = vunpack.i.l.bf16 %v9100_v61 }
0x18f6   : > { %v3731_v52 = vsel %vm575_vm4, %v9093_v50, %v10247_v40  ;;  %v3732_v37 = vsel %vm575_vm4, %v9095_v23, %v10248_v16  ;;  %v10612_v40 = vld [vmem:[#allocation40_spill] sm:$0xff]  ;;  %v10615_v16 = vld [vmem:[#allocation43_spill] sm:$0xff] }
0x18f7   : > { %v3733_v42 = vpack.c.bf16 %v3732_v37, %v3731_v52  ;;  %v9112_v30 = vpop.permute.xlu0 %3622  ;;  %v10613_v52 = vld [vmem:[#allocation41_spill] sm:$0xff]  ;;  %v10614_v37 = vld [vmem:[#allocation42_spill] sm:$0xff] }
0x18f8   : > { %6616 = vst.msk [vmem:[%s8340_s21 + $0x38] sm:$0xff] %vm1622_vm7, %v9112_v30 }
0x18f9   : > { %6622 = vmatmul.mubr.msk.bf16.vlgmr.msra.gmra.mrb[100].mxu0 %vm759_vm5, %v3733_v42  ;;  %6624 = vmatmul.mubr.msk.bf16.vlgmr.msra.gmra.mrb[100].mxu1 %vm759_vm5, %v3733_v42 }
0x18fa   : > { %3824 = vmatpush1.bf16.msra.mxu0 %v10609_v29  ;;  %3867 = vmatpush1.bf16.msra.mxu1 %v10610_v33  ;;  %v10618_v29 = vld [vmem:[#allocation46_spill] sm:$0xff]  ;;  %v10619_v33 = vld [vmem:[#allocation47_spill] sm:$0xff] }
0x18fb   : > { %3825 = vmatprep.subr.bf16.mxu0 %v10611_v19  ;;  %3868 = vmatprep.subr.bf16.mxu1 %v10612_v40  ;;  %v10620_v19 = vld [vmem:[#allocation48_spill] sm:$0xff]  ;;  %v10621_v40 = vld [vmem:[#allocation49_spill] sm:$0xff] }
0x18fc   : > { %3855 = vmatprep.mubr.bf16.mxu0 %v10347_v46  ;;  %3898 = vmatprep.mubr.bf16.mxu1 %v10347_v46 }
0x18fe   : > { %3826 = vmatpush1.bf16.msra.mxu0 %v10613_v52  ;;  %3869 = vmatpush1.bf16.msra.mxu1 %v10614_v37  ;;  %v10624_v37 = vld [vmem:[#allocation52_spill] sm:$0xff] }
0x18ff   : > { %3827 = vmatprep.subr.bf16.mxu0 %v10615_v16  ;;  %3870 = vmatprep.subr.bf16.mxu1 %v10616_v43  ;;  %v10625_v16 = vld [vmem:[#allocation53_spill] sm:$0xff]  ;;  %v10626_v43 = vld [vmem:[#allocation54_spill] sm:$0xff] }
0x1902   : > { %3828 = vmatpush1.bf16.msra.mxu0 %v10617_v51  ;;  %3871 = vmatpush1.bf16.msra.mxu1 %v10618_v29 }
0x1903   : > { %3829 = vmatprep.subr.bf16.mxu0 %v10619_v33  ;;  %3872 = vmatprep.subr.bf16.mxu1 %v10620_v19 }
0x1906   : > { %3830 = vmatpush1.bf16.msra.mxu0 %v10621_v40  ;;  %3873 = vmatpush1.bf16.msra.mxu1 %v10622_v6 }
0x1907   : > { %6625 = vmatprep.subr.msk.bf16.mxu0 %vm763_vm3, %v10623_v22  ;;  %6627 = vmatprep.subr.msk.bf16.mxu1 %vm763_vm3, %v10624_v37 }
0x190a   : > { %3832 = vmatpush1.bf16.msra.mxu0 %v10625_v16  ;;  %3875 = vmatpush1.bf16.msra.mxu1 %v10626_v43 }
0x190b   : > { %6901 = vmatprep.subr.bf16.mxu0 %v10389_v1  ;;  %6907 = vmatprep.subr.bf16.mxu1 %v10389_v1 }
0x190d   : > { %6626 = vmatmul.mubr.msk.bf16.vlgmr.msra.gmra.mrb[104].mxu0 %vm759_vm5, %v3733_v42  ;;  %6628 = vmatmul.mubr.msk.bf16.vlgmr.msra.gmra.mrb[104].mxu1 %vm759_vm5, %v3733_v42 }
0x190e   : > { %6903 = vmatprep.mubr.msk.bf16.mxu0 %vm7552_vm0, %v10389_v1  ;;  %6909 = vmatprep.mubr.msk.bf16.mxu1 %vm7552_vm0, %v10389_v1 }
0x19cc   : > { %v3771_v22 = vpop.f32.mrb[100].mxu0  ;;  %v3814_v37 = vpop.f32.mrb[100].mxu1 }
0x19cd   : > { %v3909_v16 = vmul.f32 %v3771_v22, %v8062_v54  ;;  %v3773_v6 = vpop.f32.mrb[101].mxu0  ;;  %v3816_v43 = vpop.f32.mrb[101].mxu1  ;;  %v3915_v52 = vmul.f32 %v3814_v37, %v8068_v58 }
0x19ce   : > { %v3911_v40 = vmul.f32 %v3773_v6, %v8072_v9  ;;  %v3775_v19 = vpop.f32.mrb[102].mxu0  ;;  %v3818_v33 = vpop.f32.mrb[102].mxu1  ;;  %v3919_v60 = vmul.f32 %v3816_v43, %v8070_v8 }
0x19cf   : > { %v3910_v29 = vmul.f32 %v3775_v19, %v8064_v55  ;;  %v3777_v51 = vpop.f32.mrb[103].mxu0  ;;  %v3820_v42 = vpop.f32.mrb[103].mxu1  ;;  %v3916_v22 = vmul.f32 %v3818_v33, %v8076_v47 }
0x19d0   : > { %v3913_v45 = vadd.f32 %v3911_v40, %v3909_v16  ;;  %v3912_v27 = vmul.f32 %v3777_v51, %v8066_v56  ;;  %v3920_v6 = vmul.f32 %v3820_v42, %v8074_v10 }
0x19d2   : > { %v3917_v5 = vadd.f32 %v3915_v52, %v3913_v45  ;;  %v3914_v28 = vadd.f32 %v3912_v27, %v3910_v29 }
0x19d4   : > { %v3921_v3 = vadd.f32 %v3919_v60, %v3917_v5  ;;  %v3918_v36 = vadd.f32 %v3916_v22, %v3914_v28 }
0x19d6   : > { %v3922_v12 = vadd.f32 %v3920_v6, %v3918_v36 }
0x19e0   : > { %v3857_v7 = vpop.f32.mrb[104].mxu0  ;;  %v3900_v19 = vpop.f32.mrb[104].mxu1 }
0x19e1   : > { %v3923_v57 = vmul.f32 %v3857_v7, %v8090_v4  ;;  %v3859_v17 = vpop.f32.mrb[105].mxu0  ;;  %v3902_v37 = vpop.f32.mrb[105].mxu1  ;;  %v3931_v60 = vmul.f32 %v3900_v19, %v8092_v63 }
0x19e2   : > { %v3927_v40 = vmul.f32 %v3859_v17, %v8087_v14  ;;  %v3861_v51 = vpop.f32.mrb[106].mxu0  ;;  %v3904_v45 = vpop.f32.mrb[106].mxu1  ;;  %v3935_v7 = vmul.f32 %v3902_v37, %v8101_v21 }
0x19e3   : > { %v3925_v16 = vadd.f32 %v3923_v57, %v3921_v3  ;;  %v3924_v43 = vmul.f32 %v3861_v51, %v8078_v11  ;;  %v3863_v33 = vpop.f32.mrb[107].mxu0  ;;  %v3906_v27 = vpop.f32.mrb[107].mxu1  ;;  %v3932_v52 = vmul.f32 %v3904_v45, %v8096_v39  ;;  %v9165_v3 = vld [vmem:[#allocation7] sm:$0xff] }
0x19e4   : > { %v3928_v28 = vmul.f32 %v3863_v33, %v8094_v31  ;;  %v3936_v57 = vmul.f32 %v3906_v27, %v8105_v26 }
0x19e5   : > { %v3929_v36 = vadd.f32 %v3927_v40, %v3925_v16  ;;  %v3926_v5 = vadd.f32 %v3924_v43, %v3922_v12 }
0x19e7   : > { %v3933_v29 = vadd.f32 %v3931_v60, %v3929_v36  ;;  %v3930_v42 = vadd.f32 %v3928_v28, %v3926_v5  ;;  %v10631_v5 = vld [vmem:[#allocation77_spill] sm:$0xff] }
0x19e9   : > { %v3937_v17 = vadd.f32 %v3935_v7, %v3933_v29  ;;  %v3934_v22 = vadd.f32 %v3932_v52, %v3930_v42  ;;  %v10632_v29 = vld [vmem:[#allocation79_spill] sm:$0xff]  ;;  %v10633_v7 = vld [vmem:[#allocation80_spill] sm:$0xff] }
0x19eb   : > { %v3939_v6 = vadd.f32 %v9165_v3, %v3937_v17  ;;  %v3938_v51 = vadd.f32 %v3936_v57, %v3934_v22 }
0x19ed   : > { %v6629_v33 = vmul.f32 -1.442695, %v3939_v6  ;;  %v3940_v12 = vadd.f32 %v9168_v25, %v3938_v51 }
0x19ef   : > { %7318 = vpow2.f32 %v6629_v33  ;;  %v6630_v19 = vmul.f32 -1.442695, %v3940_v12 }
0x19f1   : > { %7320 = vpow2.f32 %v6630_v19 }
0x19f9   : > { %v7319_v37 = vpop.eup %7318 }
0x19fa   : > { %v3947_v40 = vadd.f32 1.0, %v7319_v37 }
0x19fb   : > { %v7321_v45 = vpop.eup %7320 }
0x19fc   : > { %7322 = vrcp.f32 %v3947_v40  ;;  %v3948_v16 = vadd.f32 1.0, %v7321_v45 }
0x19fe   : > { %7324 = vrcp.f32 %v3948_v16 }
0x1a06   : > { %v9171_v43 = vpop.eup %7322 }
0x1a07   : > { %v3953_v28 = vmul.f32 %v9171_v43, %v9058_v62  ;;  %v10629_v62 = vld [vmem:[#allocation76_spill] sm:$0xff] }
0x1a08   : > { %v9173_v27 = vpop.eup %7324 }
0x1a09   : > { %v3954_v60 = vmul.f32 %v9173_v27, %v9112_v30  ;;  %v10630_v30 = vld [vmem:[#allocation78_spill] sm:$0xff] }
0x1a0b   : > { %v3955_v36 = vpack.c.bf16 %v3954_v60, %v3953_v28 }
0x1a0d   : > { %6902 = vmatpush3.bf16.msra.mxu0 %v3955_v36  ;;  %6908 = vmatpush3.bf16.msra.mxu1 %v3955_v36 }
0x1a0e   : > { %4064 = vmatprep.subr.bf16.mxu0 %v10412_v48  ;;  %4107 = vmatprep.subr.bf16.mxu1 %v10413_v49 }
0x1a10   : > { %6904 = vmatmul.mubr.msk.bf16.vlgmr.msra.gmra.mrb[108].mxu0 %vm473_vm2, %v8833_v41  ;;  %6910 = vmatmul.mubr.msk.bf16.vlgmr.msra.gmra.mrb[108].mxu1 %vm473_vm2, %v8829_v34  ;;  %v10627_v34 = vld [vmem:[#allocation74_spill] sm:$0xff]  ;;  %v10628_v41 = vld [vmem:[#allocation75_spill] sm:$0xff] }
0x1a11   : > { %4065 = vmatpush1.bf16.msra.mxu0 %v8132_v0  ;;  %4108 = vmatpush1.bf16.msra.mxu1 %v10414_v44 }
0x1a12   : > { %4066 = vmatprep.subr.bf16.mxu0 %v10415_v15  ;;  %4109 = vmatprep.subr.bf16.mxu1 %v10416_v38 }
0x1a13   : > { %4096 = vmatprep.mubr.bf16.mxu0 %v10347_v46  ;;  %4139 = vmatprep.mubr.bf16.mxu1 %v10347_v46 }
0x1a15   : > { %4067 = vmatpush1.bf16.msra.mxu0 %v10484_v59  ;;  %4110 = vmatpush1.bf16.msra.mxu1 %v10485_v20 }
0x1a16   : > { %4068 = vmatprep.subr.bf16.mxu0 %v10486_v2  ;;  %4111 = vmatprep.subr.bf16.mxu1 %v10487_v35 }
0x1a19   : > { %4069 = vmatpush1.bf16.msra.mxu0 %v10553_v53  ;;  %4112 = vmatpush1.bf16.msra.mxu1 %v10554_v13 }
0x1a1a   : > { %4070 = vmatprep.subr.bf16.mxu0 %v10555_v32  ;;  %4113 = vmatprep.subr.bf16.mxu1 %v10556_v18 }
0x1a1d   : > { %4114 = vmatpush1.bf16.msra.mxu1 %v10557_v24  ;;  %4071 = vmatpush1.bf16.msra.mxu0 %v10627_v34 }
0x1a1e   : > { %6633 = vmatprep.subr.msk.bf16.mxu0 %vm763_vm3, %v10628_v41  ;;  %6635 = vmatprep.subr.msk.bf16.mxu1 %vm763_vm3, %v10629_v62 }
0x1a21   : > { %4073 = vmatpush1.bf16.msra.mxu0 %v10630_v30  ;;  %4116 = vmatpush1.bf16.msra.mxu1 %v10631_v5 }
0x1a22   : > { %4150 = vmatprep.subr.bf16.mxu0 %v10632_v29  ;;  %4193 = vmatprep.subr.bf16.mxu1 %v10633_v7 }
0x1ae3   : > { %v3990_v52 = vpop.f32.mrb[108].mxu0  ;;  %v4031_v42 = vpop.f32.mrb[108].mxu1 }
0x1ae4   : > { %v6905_v17 = vpop.f32.mrb[109].mxu0  ;;  %v6911_v22 = vpop.f32.mrb[109].mxu1 }
0x1ae5   : > { %v3993_v57 = vpop.f32.mrb[110].mxu0  ;;  %v4034_v6 = vpop.f32.mrb[110].mxu1  ;;  %v10635_v22 = vunpack.i.l.bf16 %v9100_v61 }
0x1ae6   : > { %v7182_v51 = vpack.i.bf16 %v3993_v57, %v3990_v52  ;;  %v7187_v33 = vpack.i.bf16 %v4034_v6, %v4031_v42  ;;  %v6906_v12 = vpop.f32.mrb[111].mxu0  ;;  %v6912_v19 = vpop.f32.mrb[111].mxu1  ;;  %v10634_v52 = vunpack.i.h.bf16 %v9100_v61  ;;  %v10640_v61 = vld [vmem:[#allocation85_spill] sm:$0xff] }
0x1ae7   : > { %v10638_v12 = vld [vmem:[#allocation83_spill] sm:$0xff]  ;;  %v10639_v19 = vld [vmem:[#allocation84_spill] sm:$0xff] }
0x1ae8   : > { %7188 = vrot.lane.b32.xlu0 %v7187_v33, %s7563_s11  ;;  %7183 = vrot.lane.b32.xlu1 %v7182_v51, %s7553_s26 }
0x1b5a   : > { %v7189_v37 = vpop.permute.xlu0 %7188  ;;  %v7184_v40 = vpop.permute.xlu1 %7183 }
0x1b5b   : > { %v7186_v45 = vunpack.i.h.bf16 %v7184_v40  ;;  %v7185_v16 = vunpack.i.l.bf16 %v7184_v40  ;;  %v7191_v28 = vunpack.i.h.bf16 %v7189_v37  ;;  %v7190_v60 = vunpack.i.l.bf16 %v7189_v37  ;;  %v10641_v37 = vld [vmem:[#allocation86_spill] sm:$0xff]  ;;  %v10642_v40 = vld [vmem:[#allocation87_spill] sm:$0xff] }
0x1b5d   : > { %v4055_v36 = vsel %vm464_vm1, %v9095_v23, %v7186_v45  ;;  %v4054_v17 = vsel %vm464_vm1, %v9093_v50, %v7185_v16  ;;  %v10636_v23 = vld [vmem:[#allocation81_spill] sm:$0xff]  ;;  %v10637_v50 = vld [vmem:[#allocation82_spill] sm:$0xff]  ;;  %v10643_v45 = vld [vmem:[#allocation88_spill] sm:$0xff] }
0x1b5e   : > { %v4057_v42 = vsel %vm575_vm4, %v4055_v36, %v10634_v52  ;;  %v4056_v57 = vsel %vm575_vm4, %v4054_v17, %v10635_v22  ;;  %v10644_v16 = vld [vmem:[#allocation89_spill] sm:$0xff]  ;;  %v10647_v36 = vld [vmem:[#allocation92_spill] sm:$0xff]  ;;  %v10649_v52 = vld [vmem:[#allocation94_spill] sm:$0xff] }
0x1b5f   : > { %v4059_v6 = vsel %vm1175_vm6, %v4057_v42, %v7191_v28  ;;  %v4058_v51 = vsel %vm1175_vm6, %v4056_v57, %v7190_v60  ;;  %v10645_v28 = vld [vmem:[#allocation90_spill] sm:$0xff]  ;;  %v10646_v60 = vld [vmem:[#allocation91_spill] sm:$0xff]  ;;  %v10648_v17 = vld [vmem:[#allocation93_spill] sm:$0xff] }
0x1b60   : > { %v4060_v33 = vpack.c.bf16 %v4059_v6, %v4058_v51  ;;  %v10650_v42 = vld [vmem:[#allocation95_spill] sm:$0xff]  ;;  %v10651_v22 = vld [vmem:[#allocation96_spill] sm:$0xff]  ;;  %v10652_v57 = vld [vmem:[#allocation97_spill] sm:$0xff] }
0x1b61   : > { %v10653_v6 = vld [vmem:[#allocation98_spill] sm:$0xff] }
0x1b62   : > { %6634 = vmatmul.mubr.msk.bf16.vlgmr.msra.gmra.mrb[112].mxu0 %vm759_vm5, %v4060_v33  ;;  %6636 = vmatmul.mubr.msk.bf16.vlgmr.msra.gmra.mrb[112].mxu1 %vm759_vm5, %v4060_v33 }
0x1b63   : > { %4151 = vmatpush1.bf16.msra.mxu0 %v10636_v23  ;;  %4194 = vmatpush1.bf16.msra.mxu1 %v10637_v50 }
0x1b64   : > { %4152 = vmatprep.subr.bf16.mxu0 %v10638_v12  ;;  %4195 = vmatprep.subr.bf16.mxu1 %v10639_v19 }
0x1b65   : > { %4182 = vmatprep.mubr.bf16.mxu0 %v10347_v46  ;;  %4225 = vmatprep.mubr.bf16.mxu1 %v10347_v46 }
0x1b67   : > { %4153 = vmatpush1.bf16.msra.mxu0 %v10640_v61  ;;  %4196 = vmatpush1.bf16.msra.mxu1 %v10641_v37 }
0x1b68   : > { %4154 = vmatprep.subr.bf16.mxu0 %v10642_v40  ;;  %4197 = vmatprep.subr.bf16.mxu1 %v10643_v45 }
0x1b6b   : > { %4155 = vmatpush1.bf16.msra.mxu0 %v10644_v16  ;;  %4198 = vmatpush1.bf16.msra.mxu1 %v10645_v28 }
0x1b6c   : > { %4156 = vmatprep.subr.bf16.mxu0 %v10646_v60  ;;  %4199 = vmatprep.subr.bf16.mxu1 %v10647_v36 }
0x1b6f   : > { %4157 = vmatpush1.bf16.msra.mxu0 %v10648_v17  ;;  %4200 = vmatpush1.bf16.msra.mxu1 %v10649_v52 }
0x1b70   : > { %6637 = vmatprep.subr.msk.bf16.mxu0 %vm763_vm3, %v10650_v42  ;;  %6639 = vmatprep.subr.msk.bf16.mxu1 %vm763_vm3, %v10651_v22 }
0x1b73   : > { %4159 = vmatpush1.bf16.msra.mxu0 %v10652_v57  ;;  %4202 = vmatpush1.bf16.msra.mxu1 %v10653_v6 }
0x1b74   : > { %6913 = vmatprep.subr.bf16.mxu0 %v10389_v1  ;;  %6919 = vmatprep.subr.bf16.mxu1 %v10389_v1 }
0x1b76   : > { %6638 = vmatmul.mubr.msk.bf16.vlgmr.msra.gmra.mrb[116].mxu0 %vm759_vm5, %v4060_v33  ;;  %6640 = vmatmul.mubr.msk.bf16.vlgmr.msra.gmra.mrb[116].mxu1 %vm759_vm5, %v4060_v33 }
0x1b77   : > { %6921 = vmatprep.mubr.msk.bf16.mxu1 %vm7552_vm0, %v10389_v1  ;;  %6915 = vmatprep.mubr.msk.bf16.mxu0 %vm7552_vm0, %v10389_v1 }
0x1c35   : > { %v4098_v51 = vpop.f32.mrb[112].mxu0  ;;  %v4141_v22 = vpop.f32.mrb[112].mxu1 }
0x1c36   : > { %v4236_v57 = vmul.f32 %v4098_v51, %v8062_v54  ;;  %v4100_v42 = vpop.f32.mrb[113].mxu0  ;;  %v4143_v6 = vpop.f32.mrb[113].mxu1  ;;  %v4242_v16 = vmul.f32 %v4141_v22, %v8068_v58 }
0x1c37   : > { %v4238_v52 = vmul.f32 %v4100_v42, %v8072_v9  ;;  %v4102_v17 = vpop.f32.mrb[114].mxu0  ;;  %v4145_v36 = vpop.f32.mrb[114].mxu1  ;;  %v4246_v61 = vmul.f32 %v4143_v6, %v8070_v8 }
0x1c38   : > { %v4237_v60 = vmul.f32 %v4102_v17, %v8064_v55  ;;  %v4104_v28 = vpop.f32.mrb[115].mxu0  ;;  %v4147_v33 = vpop.f32.mrb[115].mxu1  ;;  %v4243_v51 = vmul.f32 %v4145_v36, %v8076_v47 }
0x1c39   : > { %v4240_v45 = vadd.f32 %v4238_v52, %v4236_v57  ;;  %v4239_v40 = vmul.f32 %v4104_v28, %v8066_v56  ;;  %v4247_v42 = vmul.f32 %v4147_v33, %v8074_v10 }
0x1c3b   : > { %v4244_v37 = vadd.f32 %v4242_v16, %v4240_v45  ;;  %v4241_v19 = vadd.f32 %v4239_v40, %v4237_v60 }
0x1c3d   : > { %v4248_v12 = vadd.f32 %v4246_v61, %v4244_v37  ;;  %v4245_v50 = vadd.f32 %v4243_v51, %v4241_v19 }
0x1c3f   : > { %v4249_v23 = vadd.f32 %v4247_v42, %v4245_v50 }
0x1c49   : > { %v4184_v7 = vpop.f32.mrb[116].mxu0  ;;  %v4227_v17 = vpop.f32.mrb[116].mxu1 }
0x1c4a   : > { %v4250_v29 = vmul.f32 %v4184_v7, %v8090_v4  ;;  %v4186_v5 = vpop.f32.mrb[117].mxu0  ;;  %v4229_v22 = vpop.f32.mrb[117].mxu1  ;;  %v4258_v61 = vmul.f32 %v4227_v17, %v8092_v63 }
0x1c4b   : > { %v4254_v52 = vmul.f32 %v4186_v5, %v8087_v14  ;;  %v4188_v28 = vpop.f32.mrb[118].mxu0  ;;  %v4231_v45 = vpop.f32.mrb[118].mxu1  ;;  %v4262_v7 = vmul.f32 %v4229_v22, %v8101_v21 }
0x1c4c   : > { %v4252_v16 = vadd.f32 %v4250_v29, %v4248_v12  ;;  %v4251_v57 = vmul.f32 %v4188_v28, %v8078_v11  ;;  %v4190_v36 = vpop.f32.mrb[119].mxu0  ;;  %v4233_v40 = vpop.f32.mrb[119].mxu1  ;;  %v4259_v6 = vmul.f32 %v4231_v45, %v8096_v39  ;;  %v9274_v12 = vld [vmem:[%s10068_s7] sm:$0xff]  ;;  %v4272_v45 = vsub.f32 1.0, %v9171_v43 }
0x1c4d   : > { %v4255_v19 = vmul.f32 %v4190_v36, %v8094_v31  ;;  %v4263_v29 = vmul.f32 %v4233_v40, %v8105_v26  ;;  %10654 = vst [vmem:[#allocation61_spill] sm:$0xff] %v9274_v12  ;;  %v4273_v36 = vsub.f32 1.0, %v9173_v27 }
0x1c4e   : > { %v4256_v50 = vadd.f32 %v4254_v52, %v4252_v16  ;;  %v4253_v37 = vadd.f32 %v4251_v57, %v4249_v23  ;;  %v9280_v23 = vld [vmem:[%s10068_s7 + $0x8] sm:$0xff] }
0x1c4f   : > { %10655 = vst [vmem:[#allocation62_spill] sm:$0xff] %v9280_v23 }
0x1c50   : > { %v4260_v60 = vadd.f32 %v4258_v61, %v4256_v50  ;;  %v4257_v33 = vadd.f32 %v4255_v19, %v4253_v37  ;;  %v10656_v19 = vld [vmem:[#allocation59_spill] sm:$0xff]  ;;  %v10657_v50 = vld [vmem:[#allocation60_spill] sm:$0xff] }
0x1c51   : > { %v4270_v61 = vmul.f32 %v9171_v43, %v10656_v19  ;;  %v4271_v37 = vmul.f32 %v9173_v27, %v10657_v50  ;;  %v10664_v19 = vld [vmem:[#allocation19_spill] sm:$0xff]  ;;  %v10666_v50 = vld [vmem:[#allocation21_spill] sm:$0xff] }
0x1c52   : > { %v4264_v5 = vadd.f32 %v4262_v7, %v4260_v60  ;;  %v4261_v51 = vadd.f32 %v4259_v6, %v4257_v33 }
0x1c54   : > { %v4266_v42 = vadd.f32 %v9274_v12, %v4264_v5  ;;  %v4265_v17 = vadd.f32 %v4263_v29, %v4261_v51  ;;  %v6643_v5 = vld [vmem:[%s7774_s18 + $0x50] sm:$0xff]  ;;  %v6644_v51 = vld [vmem:[%s7774_s18 + $0x58] sm:$0xff] }
0x1c56   : > { %7326 = vtanh.f32 %v4266_v42  ;;  %v4267_v22 = vadd.f32 %v9280_v23, %v4265_v17 }
0x1c58   : > { %7328 = vtanh.f32 %v4267_v22 }
0x1c60   : > { %v7327_v52 = vpop.eup %7326 }
0x1c61   : > { %4276 = vrot.lane.b32.xlu1 %v7327_v52, %s7564_s14 }
0x1c62   : > { %v7329_v28 = vpop.eup %7328 }
0x1c63   : > { %4278 = vrot.lane.b32.xlu0 %v7329_v28, %s7564_s14  ;;  %v10660_v28 = vld [vmem:[#allocation15_spill] sm:$0xff] }
0x1cd3   : > { %v4277_v16 = vpop.permute.xlu1 %4276 }
0x1cd4   : > { %v4282_v57 = vmul.f32 %v4277_v16, %v4272_v45  ;;  %v10661_v45 = vld [vmem:[#allocation17_spill] sm:$0xff]  ;;  %v9311_v16 = vld [vmem:[#allocation2 + $0x8] sm:$0xff]  }
0x1cd5   : > { %v4279_v40 = vpop.permute.xlu0 %4278 }
0x1cd6   : > { %v4283_v60 = vmul.f32 %v4279_v40, %v4273_v36  ;;  %v9291_v7 = vadd.f32 %v4282_v57, %v4270_v61  ;;  %v9315_v57 = vld [vmem:[#allocation2] sm:$0xff]   ;;  %v10662_v36 = vld [vmem:[#allocation16_spill] sm:$0xff]  ;;  %v10663_v40 = vld [vmem:[#allocation18_spill] sm:$0xff] }
0x1cd7   : > { %v10665_v61 = vld [vmem:[#allocation20_spill] sm:$0xff] }
0x1cd8   : > { %10658 = vst [vmem:[#allocation63_spill] sm:$0xff] %v9291_v7  ;;  %v9293_v6 = vadd.f32 %v4283_v60, %v4271_v37  ;;  %v10667_v37 = vld [vmem:[#allocation22_spill] sm:$0xff]  ;;  %v10668_v60 = vld [vmem:[#allocation23_spill] sm:$0xff] }
0x1cda   : > { %10659 = vst [vmem:[#allocation64_spill] sm:$0xff] %v9293_v6  ;;  %v7192_v33 = vpack.i.bf16 %v9293_v6, %v9291_v7 }
0x1cdc   : > { %7193 = vrot.lane.b32.xlu1 %v7192_v33, %s7565_s23  ;;  %v10669_v33 = vld [vmem:[#allocation24_spill] sm:$0xff] }
0x1ce0   : > { %4288 = vrot.lane.b32.xlu1 %v9291_v7, %s7566_s24 }
0x1d4e   : > { %v7194_v43 = vpop.permute.xlu1 %7193 }
0x1d4f   : > { %v7196_v29 = vunpack.i.h.bf16 %v7194_v43  ;;  %v7195_v42 = vunpack.i.l.bf16 %v7194_v43  ;;  %v10672_v43 = vld [vmem:[#allocation27_spill] sm:$0xff] }
0x1d51   : > { %v4307_v27 = vsel %vm464_vm1, %v6644_v51, %v7196_v29  ;;  %v4306_v17 = vsel %vm464_vm1, %v6643_v5, %v7195_v42  ;;  %v10670_v5 = vld [vmem:[#allocation25_spill] sm:$0xff]  ;;  %v10671_v51 = vld [vmem:[#allocation26_spill] sm:$0xff]  ;;  %v10673_v29 = vld [vmem:[#allocation28_spill] sm:$0xff] }
0x1d52   : > { %v4308_v22 = vpack.c.bf16 %v4307_v27, %v4306_v17  ;;  %v9304_v52 = vpop.permute.xlu1 %4288  ;;  %v10674_v42 = vld [vmem:[#allocation29_spill] sm:$0xff]  ;;  %v10675_v27 = vld [vmem:[#allocation30_spill] sm:$0xff]  ;;  %v10676_v17 = vld [vmem:[#allocation31_spill] sm:$0xff] }
0x1d53   : > { %6641 = vst.msk [vmem:[%s8340_s21 + $0x40] sm:$0xff] %vm1622_vm7, %v9304_v52 }
0x1d54   : > { %6914 = vmatpush3.bf16.msra.mxu0 %v4308_v22  ;;  %6920 = vmatpush3.bf16.msra.mxu1 %v4308_v22  ;;  %v10677_v22 = vld [vmem:[#allocation32_spill] sm:$0xff] }
0x1d55   : > { %4405 = vmatprep.subr.bf16.mxu0 %v10660_v28  ;;  %4448 = vmatprep.subr.bf16.mxu1 %v10661_v45 }
0x1d57   : > { %6922 = vmatmul.mubr.msk.bf16.vlgmr.msra.gmra.mrb[120].mxu1 %vm473_vm2, %v9311_v16  ;;  %6916 = vmatmul.mubr.msk.bf16.vlgmr.msra.gmra.mrb[120].mxu0 %vm473_vm2, %v9315_v57 }
0x1d58   : > { %4406 = vmatpush1.bf16.msra.mxu0 %v10662_v36  ;;  %4449 = vmatpush1.bf16.msra.mxu1 %v10663_v40  ;;  %v10696_v40 = vld [vmem:[#allocation50_spill] sm:$0xff]  ;;  %v10697_v36 = vld [vmem:[#allocation51_spill] sm:$0xff] }
0x1d59   : > { %4407 = vmatprep.subr.bf16.mxu0 %v10664_v19  ;;  %4450 = vmatprep.subr.bf16.mxu1 %v10665_v61  ;;  %v10691_v19 = vld [vmem:[#allocation45_spill] sm:$0xff] }
0x1d5a   : > { %4437 = vmatprep.mubr.bf16.mxu0 %v10347_v46  ;;  %4480 = vmatprep.mubr.bf16.mxu1 %v10347_v46 }
0x1d5c   : > { %4408 = vmatpush1.bf16.msra.mxu0 %v10666_v50  ;;  %4451 = vmatpush1.bf16.msra.mxu1 %v10667_v37 }
0x1d5d   : > { %4409 = vmatprep.subr.bf16.mxu0 %v10668_v60  ;;  %4452 = vmatprep.subr.bf16.mxu1 %v10669_v33  ;;  %v10678_v60 = vld [vmem:[#allocation33_spill] sm:$0xff]  ;;  %v10679_v33 = vld [vmem:[#allocation34_spill] sm:$0xff] }
0x1d60   : > { %4410 = vmatpush1.bf16.msra.mxu0 %v10670_v5  ;;  %4453 = vmatpush1.bf16.msra.mxu1 %v10671_v51  ;;  %v10680_v5 = vld [vmem:[#allocation35_spill] sm:$0xff]  ;;  %v10681_v51 = vld [vmem:[#allocation36_spill] sm:$0xff] }
0x1d61   : > { %4411 = vmatprep.subr.bf16.mxu0 %v10672_v43  ;;  %4454 = vmatprep.subr.bf16.mxu1 %v10673_v29 }
0x1d64   : > { %4412 = vmatpush1.bf16.msra.mxu0 %v10674_v42  ;;  %4455 = vmatpush1.bf16.msra.mxu1 %v10675_v27 }
0x1d65   : > { %6647 = vmatprep.subr.msk.bf16.mxu0 %vm763_vm3, %v10676_v17  ;;  %6649 = vmatprep.subr.msk.bf16.mxu1 %vm763_vm3, %v10677_v22 }
0x1d68   : > { %4414 = vmatpush1.bf16.msra.mxu0 %v10678_v60  ;;  %4457 = vmatpush1.bf16.msra.mxu1 %v10679_v33  ;;  %v10690_v60 = vld [vmem:[#allocation44_spill] sm:$0xff] }
0x1d69   : > { %4491 = vmatprep.subr.bf16.mxu0 %v10680_v5  ;;  %4534 = vmatprep.subr.bf16.mxu1 %v10681_v51 }
0x1e2a   : > { %v4384_v43 = vpop.f32.mrb[120].mxu1  ;;  %v9343_v29 = vpop.f32.mrb[120].mxu0 }
0x1e2b   : > { %v6923_v42 = vpop.f32.mrb[121].mxu1  ;;  %v6917_v27 = vpop.f32.mrb[121].mxu0 }
0x1e2c   : > { %v4387_v37 = vpop.f32.mrb[122].mxu1  ;;  %v9345_v50 = vpop.f32.mrb[122].mxu0  ;;  %v10683_v27 = vld [vmem:[#allocation37_spill] sm:$0xff] }
0x1e2d   : > { %v7197_v17 = vpack.i.bf16 %v4387_v37, %v4384_v43  ;;  %v6924_v61 = vpop.f32.mrb[123].mxu1  ;;  %v6918_v22 = vpop.f32.mrb[123].mxu0 }
0x1e2e   : > { %v10685_v22 = vld [vmem:[#allocation39_spill] sm:$0xff] }
0x1e2f   : > { %7198 = vrot.lane.b32.xlu0 %v7197_v17, %s7555_s13  ;;  %v10684_v17 = vld [vmem:[#allocation38_spill] sm:$0xff] }
0x1e33   : > { %4290 = vrot.lane.b32.xlu0 %v9293_v6, %s7566_s24 }
0x1ea1   : > { %v9350_v5 = vpop.permute.xlu0 %7198 }
0x1ea2   : > { %10682 = vst [vmem:[#allocation65_spill] sm:$0xff] %v9350_v5  ;;  %v10252_v51 = vunpack.i.h.bf16 %v9350_v5  ;;  %v10251_v33 = vunpack.i.l.bf16 %v9350_v5 }
0x1ea4   : > { %v4399_v42 = vsel %vm575_vm4, %v9343_v29, %v10251_v33  ;;  %v4400_v61 = vsel %vm575_vm4, %v9345_v50, %v10252_v51  ;;  %v10686_v33 = vld [vmem:[#allocation40_spill] sm:$0xff]  ;;  %v10689_v51 = vld [vmem:[#allocation43_spill] sm:$0xff] }
0x1ea5   : > { %v4401_v37 = vpack.c.bf16 %v4400_v61, %v4399_v42  ;;  %v9362_v43 = vpop.permute.xlu0 %4290  ;;  %v10687_v42 = vld [vmem:[#allocation41_spill] sm:$0xff]  ;;  %v10688_v61 = vld [vmem:[#allocation42_spill] sm:$0xff] }
0x1ea6   : > { %6642 = vst.msk [vmem:[%s8340_s21 + $0x48] sm:$0xff] %vm1622_vm7, %v9362_v43 }
0x1ea7   : > { %6648 = vmatmul.mubr.msk.bf16.vlgmr.msra.gmra.mrb[124].mxu0 %vm759_vm5, %v4401_v37  ;;  %6650 = vmatmul.mubr.msk.bf16.vlgmr.msra.gmra.mrb[124].mxu1 %vm759_vm5, %v4401_v37 }
0x1ea8   : > { %4492 = vmatpush1.bf16.msra.mxu0 %v10683_v27  ;;  %4535 = vmatpush1.bf16.msra.mxu1 %v10684_v17  ;;  %v10692_v27 = vld [vmem:[#allocation46_spill] sm:$0xff]  ;;  %v10693_v17 = vld [vmem:[#allocation47_spill] sm:$0xff] }
0x1ea9   : > { %4493 = vmatprep.subr.bf16.mxu0 %v10685_v22  ;;  %4536 = vmatprep.subr.bf16.mxu1 %v10686_v33  ;;  %v10694_v22 = vld [vmem:[#allocation48_spill] sm:$0xff]  ;;  %v10695_v33 = vld [vmem:[#allocation49_spill] sm:$0xff] }
0x1eaa   : > { %4523 = vmatprep.mubr.bf16.mxu0 %v10347_v46  ;;  %4566 = vmatprep.mubr.bf16.mxu1 %v10347_v46 }
0x1eac   : > { %4494 = vmatpush1.bf16.msra.mxu0 %v10687_v42  ;;  %4537 = vmatpush1.bf16.msra.mxu1 %v10688_v61  ;;  %v10698_v61 = vld [vmem:[#allocation52_spill] sm:$0xff] }
0x1ead   : > { %4495 = vmatprep.subr.bf16.mxu0 %v10689_v51  ;;  %4538 = vmatprep.subr.bf16.mxu1 %v10690_v60  ;;  %v10699_v51 = vld [vmem:[#allocation53_spill] sm:$0xff]  ;;  %v10700_v60 = vld [vmem:[#allocation54_spill] sm:$0xff] }
0x1eb0   : > { %4496 = vmatpush1.bf16.msra.mxu0 %v10691_v19  ;;  %4539 = vmatpush1.bf16.msra.mxu1 %v10692_v27 }
0x1eb1   : > { %4497 = vmatprep.subr.bf16.mxu0 %v10693_v17  ;;  %4540 = vmatprep.subr.bf16.mxu1 %v10694_v22 }
0x1eb4   : > { %4498 = vmatpush1.bf16.msra.mxu0 %v10695_v33  ;;  %4541 = vmatpush1.bf16.msra.mxu1 %v10696_v40 }
0x1eb5   : > { %6651 = vmatprep.subr.msk.bf16.mxu0 %vm763_vm3, %v10697_v36  ;;  %6653 = vmatprep.subr.msk.bf16.mxu1 %vm763_vm3, %v10698_v61 }
0x1eb8   : > { %4500 = vmatpush1.bf16.msra.mxu0 %v10699_v51  ;;  %4543 = vmatpush1.bf16.msra.mxu1 %v10700_v60 }
0x1eb9   : > { %6925 = vmatprep.subr.bf16.mxu0 %v10389_v1  ;;  %6931 = vmatprep.subr.bf16.mxu1 %v10389_v1 }
0x1ebb   : > { %6652 = vmatmul.mubr.msk.bf16.vlgmr.msra.gmra.mrb[128].mxu0 %vm759_vm5, %v4401_v37  ;;  %6654 = vmatmul.mubr.msk.bf16.vlgmr.msra.gmra.mrb[128].mxu1 %vm759_vm5, %v4401_v37 }
0x1ebc   : > { %6927 = vmatprep.mubr.msk.bf16.mxu0 %vm7552_vm0, %v10389_v1  ;;  %6933 = vmatprep.mubr.msk.bf16.mxu1 %vm7552_vm0, %v10389_v1 }
0x1f7a   : > { %v4439_v36 = vpop.f32.mrb[124].mxu0  ;;  %v4482_v61 = vpop.f32.mrb[124].mxu1 }
0x1f7b   : > { %v4577_v51 = vmul.f32 %v4439_v36, %v8062_v54  ;;  %v4441_v40 = vpop.f32.mrb[125].mxu0  ;;  %v4484_v60 = vpop.f32.mrb[125].mxu1  ;;  %v4583_v42 = vmul.f32 %v4482_v61, %v8068_v58 }
0x1f7c   : > { %v4579_v33 = vmul.f32 %v4441_v40, %v8072_v9  ;;  %v4443_v22 = vpop.f32.mrb[126].mxu0  ;;  %v4486_v17 = vpop.f32.mrb[126].mxu1  ;;  %v4587_v7 = vmul.f32 %v4484_v60, %v8070_v8 }
0x1f7d   : > { %v4578_v27 = vmul.f32 %v4443_v22, %v8064_v55  ;;  %v4445_v19 = vpop.f32.mrb[127].mxu0  ;;  %v4488_v37 = vpop.f32.mrb[127].mxu1  ;;  %v4584_v36 = vmul.f32 %v4486_v17, %v8076_v47 }
0x1f7e   : > { %v4581_v45 = vadd.f32 %v4579_v33, %v4577_v51  ;;  %v4580_v28 = vmul.f32 %v4445_v19, %v8066_v56  ;;  %v4588_v40 = vmul.f32 %v4488_v37, %v8074_v10 }
0x1f80   : > { %v4585_v6 = vadd.f32 %v4583_v42, %v4581_v45  ;;  %v4582_v23 = vadd.f32 %v4580_v28, %v4578_v27 }
0x1f82   : > { %v4589_v12 = vadd.f32 %v4587_v7, %v4585_v6  ;;  %v4586_v54 = vadd.f32 %v4584_v36, %v4582_v23 }
0x1f84   : > { %v4590_v9 = vadd.f32 %v4588_v40, %v4586_v54 }
0x1f8e   : > { %v4525_v1 = vpop.f32.mrb[128].mxu0  ;;  %v4568_v22 = vpop.f32.mrb[128].mxu1 }
0x1f8f   : > { %v4591_v55 = vmul.f32 %v4525_v1, %v8090_v4  ;;  %v4527_v5 = vpop.f32.mrb[129].mxu0  ;;  %v4570_v61 = vpop.f32.mrb[129].mxu1  ;;  %v4599_v7 = vmul.f32 %v4568_v22, %v8092_v63 }
0x1f90   : > { %v4595_v33 = vmul.f32 %v4527_v5, %v8087_v14  ;;  %v4529_v19 = vpop.f32.mrb[130].mxu0  ;;  %v4572_v45 = vpop.f32.mrb[130].mxu1  ;;  %v4603_v1 = vmul.f32 %v4570_v61, %v8101_v21 }
0x1f91   : > { %v4593_v51 = vadd.f32 %v4591_v55, %v4589_v12  ;;  %v4592_v60 = vmul.f32 %v4529_v19, %v8078_v11  ;;  %v4531_v17 = vpop.f32.mrb[131].mxu0  ;;  %v4574_v28 = vpop.f32.mrb[131].mxu1  ;;  %v4600_v42 = vmul.f32 %v4572_v45, %v8096_v39 }
0x1f92   : > { %v4596_v23 = vmul.f32 %v4531_v17, %v8094_v31  ;;  %v4604_v55 = vmul.f32 %v4574_v28, %v8105_v26 }
0x1f93   : > { %v4597_v54 = vadd.f32 %v4595_v33, %v4593_v51  ;;  %v4594_v6 = vadd.f32 %v4592_v60, %v4590_v9 }
0x1f95   : > { %v4601_v27 = vadd.f32 %v4599_v7, %v4597_v54  ;;  %v4598_v37 = vadd.f32 %v4596_v23, %v4594_v6  ;;  %v10703_v23 = vld [vmem:[#allocation80_spill] sm:$0xff] }
0x1f97   : > { %v4605_v5 = vadd.f32 %v4603_v1, %v4601_v27  ;;  %v4602_v36 = vadd.f32 %v4600_v42, %v4598_v37 }
0x1f99   : > { %v4607_v12 = vadd.f32 %v9165_v3, %v4605_v5  ;;  %v4606_v40 = vadd.f32 %v4604_v55, %v4602_v36 }
0x1f9b   : > { %v6655_v19 = vmul.f32 -1.442695, %v4607_v12  ;;  %v4608_v17 = vadd.f32 %v9168_v25, %v4606_v40 }
0x1f9d   : > { %7330 = vpow2.f32 %v6655_v19  ;;  %v6656_v22 = vmul.f32 -1.442695, %v4608_v17 }
0x1f9f   : > { %7332 = vpow2.f32 %v6656_v22 }
0x1fa7   : > { %v7331_v9 = vpop.eup %7330 }
0x1fa8   : > { %v4615_v33 = vadd.f32 1.0, %v7331_v9 }
0x1fa9   : > { %v7333_v51 = vpop.eup %7332 }
0x1faa   : > { %7334 = vrcp.f32 %v4615_v33  ;;  %v4616_v61 = vadd.f32 1.0, %v7333_v51 }
0x1fac   : > { %7336 = vrcp.f32 %v4616_v61  ;;  %v10704_v61 = vld [vmem:[#allocation65_spill] sm:$0xff] }
0x1fb4   : > { %v9417_v45 = vpop.eup %7334 }
0x1fb5   : > { %v4621_v3 = vmul.f32 %v9417_v45, %v9304_v52  ;;  %v10701_v52 = vld [vmem:[#allocation77_spill] sm:$0xff] }
0x1fb6   : > { %v9419_v60 = vpop.eup %7336 }
0x1fb7   : > { %v4622_v28 = vmul.f32 %v9419_v60, %v9362_v43  ;;  %v10702_v43 = vld [vmem:[#allocation79_spill] sm:$0xff] }
0x1fb9   : > { %v4623_v25 = vpack.c.bf16 %v4622_v28, %v4621_v3  ;;  %v10705_v3 = vunpack.i.h.bf16 %v10704_v61 }
0x1fbb   : > { %6926 = vmatpush3.bf16.msra.mxu0 %v4623_v25  ;;  %6932 = vmatpush3.bf16.msra.mxu1 %v4623_v25  ;;  %v10706_v25 = vunpack.i.l.bf16 %v10704_v61  ;;  %v10723_v61 = vld [vmem:[#allocation97_spill] sm:$0xff] }
0x1fbc   : > { %4732 = vmatprep.subr.bf16.mxu0 %v10412_v48  ;;  %4775 = vmatprep.subr.bf16.mxu1 %v10413_v49 }
0x1fbe   : > { %6928 = vmatmul.mubr.msk.bf16.vlgmr.msra.gmra.mrb[132].mxu0 %vm473_vm2, %v9315_v57  ;;  %6934 = vmatmul.mubr.msk.bf16.vlgmr.msra.gmra.mrb[132].mxu1 %vm473_vm2, %v9311_v16 }
0x1fbf   : > { %4733 = vmatpush1.bf16.msra.mxu0 %v8132_v0  ;;  %4776 = vmatpush1.bf16.msra.mxu1 %v10414_v44 }
0x1fc0   : > { %4734 = vmatprep.subr.bf16.mxu0 %v10415_v15  ;;  %4777 = vmatprep.subr.bf16.mxu1 %v10416_v38 }
0x1fc1   : > { %4764 = vmatprep.mubr.bf16.mxu0 %v10347_v46  ;;  %4807 = vmatprep.mubr.bf16.mxu1 %v10347_v46 }
0x1fc3   : > { %4735 = vmatpush1.bf16.msra.mxu0 %v10484_v59  ;;  %4778 = vmatpush1.bf16.msra.mxu1 %v10485_v20 }
0x1fc4   : > { %4736 = vmatprep.subr.bf16.mxu0 %v10486_v2  ;;  %4779 = vmatprep.subr.bf16.mxu1 %v10487_v35 }
0x1fc7   : > { %4737 = vmatpush1.bf16.msra.mxu0 %v10553_v53  ;;  %4780 = vmatpush1.bf16.msra.mxu1 %v10554_v13 }
0x1fc8   : > { %4738 = vmatprep.subr.bf16.mxu0 %v10555_v32  ;;  %4781 = vmatprep.subr.bf16.mxu1 %v10556_v18 }
0x1fcb   : > { %4782 = vmatpush1.bf16.msra.mxu1 %v10557_v24  ;;  %4739 = vmatpush1.bf16.msra.mxu0 %v10627_v34 }
0x1fcc   : > { %6659 = vmatprep.subr.msk.bf16.mxu0 %vm763_vm3, %v10628_v41  ;;  %6661 = vmatprep.subr.msk.bf16.mxu1 %vm763_vm3, %v10629_v62 }
0x1fcf   : > { %4741 = vmatpush1.bf16.msra.mxu0 %v10630_v30  ;;  %4784 = vmatpush1.bf16.msra.mxu1 %v10701_v52  ;;  %v10730_v30 = vld [vmem:[#allocation62_spill] sm:$0xff] }
0x1fd0   : > { %4818 = vmatprep.subr.bf16.mxu0 %v10702_v43  ;;  %4861 = vmatprep.subr.bf16.mxu1 %v10703_v23 }
0x2091   : > { %v4658_v7 = vpop.f32.mrb[132].mxu0  ;;  %v4699_v54 = vpop.f32.mrb[132].mxu1 }
0x2092   : > { %v6929_v6 = vpop.f32.mrb[133].mxu0  ;;  %v6935_v27 = vpop.f32.mrb[133].mxu1 }
0x2093   : > { %v4661_v1 = vpop.f32.mrb[134].mxu0  ;;  %v4702_v42 = vpop.f32.mrb[134].mxu1 }
0x2094   : > { %v7202_v37 = vpack.i.bf16 %v4661_v1, %v4658_v7  ;;  %v7207_v5 = vpack.i.bf16 %v4702_v42, %v4699_v54  ;;  %v6930_v36 = vpop.f32.mrb[135].mxu0  ;;  %v6936_v55 = vpop.f32.mrb[135].mxu1  ;;  %v10709_v1 = vld [vmem:[#allocation83_spill] sm:$0xff]  ;;  %v10710_v42 = vld [vmem:[#allocation84_spill] sm:$0xff] }
0x2095   : > { %v10713_v36 = vld [vmem:[#allocation87_spill] sm:$0xff]  ;;  %v10714_v55 = vld [vmem:[#allocation88_spill] sm:$0xff] }
0x2096   : > { %7208 = vrot.lane.b32.xlu0 %v7207_v5, %s7563_s11  ;;  %7203 = vrot.lane.b32.xlu1 %v7202_v37, %s7553_s26  ;;  %v10711_v37 = vld [vmem:[#allocation85_spill] sm:$0xff]  ;;  %v10712_v5 = vld [vmem:[#allocation86_spill] sm:$0xff] }
0x2108   : > { %v7209_v12 = vpop.permute.xlu0 %7208  ;;  %v7204_v40 = vpop.permute.xlu1 %7203 }
0x2109   : > { %v7206_v19 = vunpack.i.h.bf16 %v7204_v40  ;;  %v7205_v17 = vunpack.i.l.bf16 %v7204_v40  ;;  %v7211_v22 = vunpack.i.h.bf16 %v7209_v12  ;;  %v7210_v9 = vunpack.i.l.bf16 %v7209_v12  ;;  %v10715_v12 = vld [vmem:[#allocation89_spill] sm:$0xff]  ;;  %v10716_v40 = vld [vmem:[#allocation90_spill] sm:$0xff] }
0x210b   : > { %v4723_v33 = vsel %vm464_vm1, %v9345_v50, %v7206_v19  ;;  %v4722_v51 = vsel %vm464_vm1, %v9343_v29, %v7205_v17  ;;  %v10707_v50 = vld [vmem:[#allocation81_spill] sm:$0xff]  ;;  %v10708_v29 = vld [vmem:[#allocation82_spill] sm:$0xff]  ;;  %v10717_v19 = vld [vmem:[#allocation91_spill] sm:$0xff] }
0x210c   : > { %v4725_v28 = vsel %vm575_vm4, %v4723_v33, %v10705_v3  ;;  %v4724_v7 = vsel %vm575_vm4, %v4722_v51, %v10706_v25  ;;  %v10718_v17 = vld [vmem:[#allocation92_spill] sm:$0xff]  ;;  %v10721_v33 = vld [vmem:[#allocation95_spill] sm:$0xff]  ;;  %v10724_v3 = vld [vmem:[#allocation98_spill] sm:$0xff] }
0x210d   : > { %v4727_v54 = vsel %vm1175_vm6, %v4725_v28, %v7211_v22  ;;  %v4726_v6 = vsel %vm1175_vm6, %v4724_v7, %v7210_v9  ;;  %v10719_v22 = vld [vmem:[#allocation93_spill] sm:$0xff]  ;;  %v10720_v9 = vld [vmem:[#allocation94_spill] sm:$0xff]  ;;  %v10722_v51 = vld [vmem:[#allocation96_spill] sm:$0xff]  ;;  %v10725_v28 = vmov 0.0  }
0x210e   : > { %v4728_v27 = vpack.c.bf16 %v4727_v54, %v4726_v6  ;;  %v10726_v54 = vld [vmem:[#allocation55_spill] sm:$0xff] }
0x2110   : > { %6660 = vmatmul.mubr.msk.bf16.vlgmr.msra.gmra.mrb[136].mxu0 %vm759_vm5, %v4728_v27  ;;  %6662 = vmatmul.mubr.msk.bf16.vlgmr.msra.gmra.mrb[136].mxu1 %vm759_vm5, %v4728_v27 }
0x2111   : > { %4819 = vmatpush1.bf16.msra.mxu0 %v10707_v50  ;;  %4862 = vmatpush1.bf16.msra.mxu1 %v10708_v29 }
0x2112   : > { %4820 = vmatprep.subr.bf16.mxu0 %v10709_v1  ;;  %4863 = vmatprep.subr.bf16.mxu1 %v10710_v42 }
0x2113   : > { %4850 = vmatprep.mubr.bf16.mxu0 %v10347_v46  ;;  %4893 = vmatprep.mubr.bf16.mxu1 %v10347_v46 }
0x2115   : > { %4821 = vmatpush1.bf16.msra.mxu0 %v10711_v37  ;;  %4864 = vmatpush1.bf16.msra.mxu1 %v10712_v5 }
0x2116   : > { %4822 = vmatprep.subr.bf16.mxu0 %v10713_v36  ;;  %4865 = vmatprep.subr.bf16.mxu1 %v10714_v55 }
0x2119   : > { %4823 = vmatpush1.bf16.msra.mxu0 %v10715_v12  ;;  %4866 = vmatpush1.bf16.msra.mxu1 %v10716_v40 }
0x211a   : > { %4824 = vmatprep.subr.bf16.mxu0 %v10717_v19  ;;  %4867 = vmatprep.subr.bf16.mxu1 %v10718_v17  ;;  %v10728_v17 = vld [vmem:[#allocation56_spill] sm:$0xff] }
0x211d   : > { %4825 = vmatpush1.bf16.msra.mxu0 %v10719_v22  ;;  %4868 = vmatpush1.bf16.msra.mxu1 %v10720_v9 }
0x211e   : > { %6663 = vmatprep.subr.msk.bf16.mxu0 %vm763_vm3, %v10721_v33  ;;  %6665 = vmatprep.subr.msk.bf16.mxu1 %vm763_vm3, %v10722_v51  ;;  %v10727_v51 = vld [vmem:[#allocation57_spill] sm:$0xff] }
0x2121   : > { %4827 = vmatpush1.bf16.msra.mxu0 %v10723_v61  ;;  %4870 = vmatpush1.bf16.msra.mxu1 %v10724_v3 }
0x2122   : > { %6937 = vmatprep.subr.bf16.mxu0 %v10725_v28  ;;  %6943 = vmatprep.subr.bf16.mxu1 %v10725_v28 }
0x2124   : > { %6664 = vmatmul.mubr.msk.bf16.vlgmr.msra.gmra.mrb[140].mxu0 %vm759_vm5, %v4728_v27  ;;  %6666 = vmatmul.mubr.msk.bf16.vlgmr.msra.gmra.mrb[140].mxu1 %vm759_vm5, %v4728_v27 }
0x2125   : > { %6945 = vmatprep.mubr.msk.bf16.mxu1 %vm7552_vm0, %v10725_v28  ;;  %6939 = vmatprep.mubr.msk.bf16.mxu0 %vm7552_vm0, %v10725_v28 }
0x21e3   : > { %v4766_v25 = vpop.f32.mrb[136].mxu0  ;;  %v4809_v7 = vpop.f32.mrb[136].mxu1 }
0x21e4   : > { %v4904_v6 = vmul.f32 %v4766_v25, %v10726_v54  ;;  %v4768_v61 = vpop.f32.mrb[137].mxu0  ;;  %v4811_v3 = vpop.f32.mrb[137].mxu1  ;;  %v4910_v12 = vmul.f32 %v4809_v7, %v8068_v58 }
0x21e5   : > { %v4906_v33 = vmul.f32 %v4768_v61, %v10727_v51  ;;  %v4770_v9 = vpop.f32.mrb[138].mxu0  ;;  %v4813_v22 = vpop.f32.mrb[138].mxu1  ;;  %v4914_v37 = vmul.f32 %v4811_v3, %v8070_v8 }
0x21e6   : > { %v4905_v19 = vmul.f32 %v4770_v9, %v10728_v17  ;;  %v4772_v40 = vpop.f32.mrb[139].mxu0  ;;  %v4815_v27 = vpop.f32.mrb[139].mxu1  ;;  %v4911_v25 = vmul.f32 %v4813_v22, %v8076_v47 }
0x21e7   : > { %v4908_v55 = vadd.f32 %v4906_v33, %v4904_v6  ;;  %v4907_v36 = vmul.f32 %v4772_v40, %v8066_v56  ;;  %v4915_v61 = vmul.f32 %v4815_v27, %v8074_v10 }
0x21e9   : > { %v4912_v5 = vadd.f32 %v4910_v12, %v4908_v55  ;;  %v4909_v42 = vadd.f32 %v4907_v36, %v4905_v19 }
0x21eb   : > { %v4916_v1 = vadd.f32 %v4914_v37, %v4912_v5  ;;  %v4913_v29 = vadd.f32 %v4911_v25, %v4909_v42 }
0x21ed   : > { %v4917_v50 = vadd.f32 %v4915_v61, %v4913_v29 }
0x21f7   : > { %v4852_v23 = vpop.f32.mrb[140].mxu0  ;;  %v4895_v9 = vpop.f32.mrb[140].mxu1 }
0x21f8   : > { %v4918_v43 = vmul.f32 %v4852_v23, %v8090_v4  ;;  %v4854_v52 = vpop.f32.mrb[141].mxu0  ;;  %v4897_v7 = vpop.f32.mrb[141].mxu1  ;;  %v4926_v37 = vmul.f32 %v4895_v9, %v8092_v63 }
0x21f9   : > { %v4922_v33 = vmul.f32 %v4854_v52, %v8087_v14  ;;  %v4856_v40 = vpop.f32.mrb[142].mxu0  ;;  %v4899_v55 = vpop.f32.mrb[142].mxu1  ;;  %v4930_v23 = vmul.f32 %v4897_v7, %v8101_v21  ;;  %v4940_v7 = vsub.f32 1.0, %v9417_v45 }
0x21fa   : > { %v4920_v12 = vadd.f32 %v4918_v43, %v4916_v1  ;;  %v4919_v3 = vmul.f32 %v4856_v40, %v8078_v11  ;;  %v4858_v22 = vpop.f32.mrb[143].mxu0  ;;  %v4901_v36 = vpop.f32.mrb[143].mxu1  ;;  %v4927_v6 = vmul.f32 %v4899_v55, %v8096_v39  ;;  %v10729_v1 = vld [vmem:[#allocation61_spill] sm:$0xff] }
0x21fb   : > { %v4923_v42 = vmul.f32 %v4858_v22, %v8094_v31  ;;  %v4931_v43 = vmul.f32 %v4901_v36, %v8105_v26  ;;  %v10731_v36 = vld [vmem:[#allocation63_spill] sm:$0xff] }
0x21fc   : > { %v4924_v29 = vadd.f32 %v4922_v33, %v4920_v12  ;;  %v4921_v5 = vadd.f32 %v4919_v3, %v4917_v50  ;;  %v4941_v12 = vsub.f32 1.0, %v9419_v60 }
0x21fe   : > { %v4928_v19 = vadd.f32 %v4926_v37, %v4924_v29  ;;  %v4925_v27 = vadd.f32 %v4923_v42, %v4921_v5  ;;  %v4938_v42 = vmul.f32 %v9417_v45, %v10731_v36  ;;  %v10744_v36 = vld [vmem:[#allocation24_spill] sm:$0xff] }
0x2200   : > { %v4932_v52 = vadd.f32 %v4930_v23, %v4928_v19  ;;  %v4929_v25 = vadd.f32 %v4927_v6, %v4925_v27  ;;  %v6669_v6 = vld [vmem:[%s7774_s18 + $0x60] sm:$0xff]  ;;  %v6670_v27 = vld [vmem:[%s7774_s18 + $0x68] sm:$0xff] }
0x2202   : > { %v4934_v61 = vadd.f32 %v10729_v1, %v4932_v52  ;;  %v4933_v40 = vadd.f32 %v4931_v43, %v4929_v25 }
0x2204   : > { %7338 = vtanh.f32 %v4934_v61  ;;  %v4935_v22 = vadd.f32 %v10730_v30, %v4933_v40  ;;  %v10732_v30 = vld [vmem:[#allocation64_spill] sm:$0xff]  ;;  %v10735_v40 = vld [vmem:[#allocation15_spill] sm:$0xff] }
0x2205   : > { %v4939_v37 = vmul.f32 %v9419_v60, %v10732_v30  ;;  %v10746_v30 = vld [vmem:[#allocation26_spill] sm:$0xff] }
0x2206   : > { %7340 = vtanh.f32 %v4935_v22  ;;  %v10736_v22 = vld [vmem:[#allocation17_spill] sm:$0xff] }
0x220e   : > { %v7339_v9 = vpop.eup %7338 }
0x220f   : > { %4944 = vrot.lane.b32.xlu1 %v7339_v9, %s7564_s14  ;;  %v10737_v9 = vld [vmem:[#allocation16_spill] sm:$0xff] }
0x2210   : > { %v7341_v50 = vpop.eup %7340 }
0x2211   : > { %4946 = vrot.lane.b32.xlu0 %v7341_v50, %s7564_s14  ;;  %v10738_v50 = vld [vmem:[#allocation18_spill] sm:$0xff] }
0x2281   : > { %v4945_v33 = vpop.permute.xlu1 %4944 }
0x2282   : > { %v4950_v55 = vmul.f32 %v4945_v33, %v4940_v7  ;;  %v10739_v7 = vld [vmem:[#allocation19_spill] sm:$0xff]  ;;  %v10740_v33 = vld [vmem:[#allocation20_spill] sm:$0xff] }
0x2283   : > { %v4947_v3 = vpop.permute.xlu0 %4946 }
0x2284   : > { %v4951_v29 = vmul.f32 %v4947_v3, %v4941_v12  ;;  %v9527_v5 = vadd.f32 %v4950_v55, %v4938_v42  ;;  %v10741_v55 = vld [vmem:[#allocation21_spill] sm:$0xff]  ;;  %v10742_v12 = vld [vmem:[#allocation22_spill] sm:$0xff]  ;;  %v10743_v3 = vld [vmem:[#allocation23_spill] sm:$0xff] }
0x2285   : > { %v10745_v42 = vld [vmem:[#allocation25_spill] sm:$0xff] }
0x2286   : > { %10733 = vst [vmem:[#allocation66_spill] sm:$0xff] %v9527_v5  ;;  %v9529_v19 = vadd.f32 %v4951_v29, %v4939_v37  ;;  %v10747_v37 = vld [vmem:[#allocation27_spill] sm:$0xff]  ;;  %v10748_v29 = vld [vmem:[#allocation28_spill] sm:$0xff] }
0x2288   : > { %10734 = vst [vmem:[#allocation67_spill] sm:$0xff] %v9529_v19  ;;  %v7212_v23 = vpack.i.bf16 %v9529_v19, %v9527_v5 }
0x228a   : > { %7213 = vrot.lane.b32.xlu1 %v7212_v23, %s7565_s23  ;;  %v10749_v23 = vld [vmem:[#allocation29_spill] sm:$0xff] }
0x228e   : > { %4956 = vrot.lane.b32.xlu1 %v9527_v5, %s7566_s24 }
0x22fc   : > { %v7214_v45 = vpop.permute.xlu1 %7213 }
0x22fd   : > { %v7216_v52 = vunpack.i.h.bf16 %v7214_v45  ;;  %v7215_v25 = vunpack.i.l.bf16 %v7214_v45  ;;  %v10752_v45 = vld [vmem:[#allocation32_spill] sm:$0xff] }
0x22ff   : > { %v4975_v60 = vsel %vm464_vm1, %v6670_v27, %v7216_v52  ;;  %v4974_v43 = vsel %vm464_vm1, %v6669_v6, %v7215_v25  ;;  %v10750_v6 = vld [vmem:[#allocation30_spill] sm:$0xff]  ;;  %v10751_v27 = vld [vmem:[#allocation31_spill] sm:$0xff]  ;;  %v10753_v52 = vld [vmem:[#allocation33_spill] sm:$0xff] }
0x2300   : > { %v4976_v1 = vpack.c.bf16 %v4975_v60, %v4974_v43  ;;  %v9540_v61 = vpop.permute.xlu1 %4956  ;;  %v10754_v25 = vld [vmem:[#allocation34_spill] sm:$0xff]  ;;  %v10755_v60 = vld [vmem:[#allocation35_spill] sm:$0xff]  ;;  %v10756_v43 = vld [vmem:[#allocation36_spill] sm:$0xff] }
0x2301   : > { %6667 = vst.msk [vmem:[%s8340_s21 + $0x50] sm:$0xff] %vm1622_vm7, %v9540_v61 }
0x2302   : > { %6938 = vmatpush3.bf16.msra.mxu0 %v4976_v1  ;;  %6944 = vmatpush3.bf16.msra.mxu1 %v4976_v1 }
0x2303   : > { %5073 = vmatprep.subr.bf16.mxu0 %v10735_v40  ;;  %5116 = vmatprep.subr.bf16.mxu1 %v10736_v22 }
0x2305   : > { %6946 = vmatmul.mubr.msk.bf16.vlgmr.msra.gmra.mrb[144].mxu1 %vm473_vm2, %v9311_v16  ;;  %6940 = vmatmul.mubr.msk.bf16.vlgmr.msra.gmra.mrb[144].mxu0 %vm473_vm2, %v9315_v57 }
0x2306   : > { %5074 = vmatpush1.bf16.msra.mxu0 %v10737_v9  ;;  %5117 = vmatpush1.bf16.msra.mxu1 %v10738_v50 }
0x2307   : > { %5075 = vmatprep.subr.bf16.mxu0 %v10739_v7  ;;  %5118 = vmatprep.subr.bf16.mxu1 %v10740_v33 }
0x2308   : > { %5105 = vmatprep.mubr.bf16.mxu0 %v10347_v46  ;;  %5148 = vmatprep.mubr.bf16.mxu1 %v10347_v46 }
0x230a   : > { %5076 = vmatpush1.bf16.msra.mxu0 %v10741_v55  ;;  %5119 = vmatpush1.bf16.msra.mxu1 %v10742_v12  ;;  %v10771_v12 = vld [vmem:[#allocation51_spill] sm:$0xff] }
0x230b   : > { %5077 = vmatprep.subr.bf16.mxu0 %v10743_v3  ;;  %5120 = vmatprep.subr.bf16.mxu1 %v10744_v36  ;;  %v10765_v36 = vld [vmem:[#allocation45_spill] sm:$0xff]  ;;  %v10770_v3 = vld [vmem:[#allocation50_spill] sm:$0xff] }
0x230e   : > { %5078 = vmatpush1.bf16.msra.mxu0 %v10745_v42  ;;  %5121 = vmatpush1.bf16.msra.mxu1 %v10746_v30 }
0x230f   : > { %5079 = vmatprep.subr.bf16.mxu0 %v10747_v37  ;;  %5122 = vmatprep.subr.bf16.mxu1 %v10748_v29 }
0x2312   : > { %5080 = vmatpush1.bf16.msra.mxu0 %v10749_v23  ;;  %5123 = vmatpush1.bf16.msra.mxu1 %v10750_v6 }
0x2313   : > { %6673 = vmatprep.subr.msk.bf16.mxu0 %vm763_vm3, %v10751_v27  ;;  %6675 = vmatprep.subr.msk.bf16.mxu1 %vm763_vm3, %v10752_v45 }
0x2316   : > { %5082 = vmatpush1.bf16.msra.mxu0 %v10753_v52  ;;  %5125 = vmatpush1.bf16.msra.mxu1 %v10754_v25  ;;  %v10764_v52 = vld [vmem:[#allocation44_spill] sm:$0xff] }
0x2317   : > { %5159 = vmatprep.subr.bf16.mxu0 %v10755_v60  ;;  %5202 = vmatprep.subr.bf16.mxu1 %v10756_v43 }
0x23d8   : > { %v5052_v1 = vpop.f32.mrb[144].mxu1  ;;  %v9575_v29 = vpop.f32.mrb[144].mxu0 }
0x23d9   : > { %v6947_v23 = vpop.f32.mrb[145].mxu1  ;;  %v6941_v6 = vpop.f32.mrb[145].mxu0 }
0x23da   : > { %v5055_v37 = vpop.f32.mrb[146].mxu1  ;;  %v9577_v30 = vpop.f32.mrb[146].mxu0 }
0x23db   : > { %v7217_v27 = vpack.i.bf16 %v5055_v37, %v5052_v1  ;;  %v6948_v42 = vpop.f32.mrb[147].mxu1  ;;  %v6942_v45 = vpop.f32.mrb[147].mxu0  ;;  %v10759_v1 = vld [vmem:[#allocation39_spill] sm:$0xff] }
0x23dc   : > { %v10758_v45 = vld [vmem:[#allocation38_spill] sm:$0xff] }
0x23dd   : > { %7218 = vrot.lane.b32.xlu0 %v7217_v27, %s7555_s13  ;;  %v10757_v27 = vld [vmem:[#allocation37_spill] sm:$0xff] }
0x23e1   : > { %4958 = vrot.lane.b32.xlu0 %v9529_v19, %s7566_s24 }
0x244f   : > { %v9582_v60 = vpop.permute.xlu0 %7218 }
0x2450   : > { %v10268_v43 = vunpack.i.h.bf16 %v9582_v60  ;;  %v10267_v25 = vunpack.i.l.bf16 %v9582_v60 }
0x2452   : > { %v5067_v23 = vsel %vm575_vm4, %v9575_v29, %v10267_v25  ;;  %v5068_v42 = vsel %vm575_vm4, %v9577_v30, %v10268_v43  ;;  %v10760_v25 = vld [vmem:[#allocation40_spill] sm:$0xff]  ;;  %v10763_v43 = vld [vmem:[#allocation43_spill] sm:$0xff] }
0x2453   : > { %v5069_v37 = vpack.c.bf16 %v5068_v42, %v5067_v23  ;;  %v9594_v6 = vpop.permute.xlu0 %4958  ;;  %v10761_v23 = vld [vmem:[#allocation41_spill] sm:$0xff]  ;;  %v10762_v42 = vld [vmem:[#allocation42_spill] sm:$0xff] }
0x2454   : > { %6668 = vst.msk [vmem:[%s8340_s21 + $0x58] sm:$0xff] %vm1622_vm7, %v9594_v6 }
0x2455   : > { %6674 = vmatmul.mubr.msk.bf16.vlgmr.msra.gmra.mrb[148].mxu0 %vm759_vm5, %v5069_v37  ;;  %6676 = vmatmul.mubr.msk.bf16.vlgmr.msra.gmra.mrb[148].mxu1 %vm759_vm5, %v5069_v37 }
0x2456   : > { %5160 = vmatpush1.bf16.msra.mxu0 %v10757_v27  ;;  %5203 = vmatpush1.bf16.msra.mxu1 %v10758_v45  ;;  %v10766_v27 = vld [vmem:[#allocation46_spill] sm:$0xff]  ;;  %v10767_v45 = vld [vmem:[#allocation47_spill] sm:$0xff] }
0x2457   : > { %5161 = vmatprep.subr.bf16.mxu0 %v10759_v1  ;;  %5204 = vmatprep.subr.bf16.mxu1 %v10760_v25  ;;  %v10768_v1 = vld [vmem:[#allocation48_spill] sm:$0xff]  ;;  %v10769_v25 = vld [vmem:[#allocation49_spill] sm:$0xff] }
0x2458   : > { %5191 = vmatprep.mubr.bf16.mxu0 %v10347_v46  ;;  %5234 = vmatprep.mubr.bf16.mxu1 %v10347_v46 }
0x245a   : > { %5162 = vmatpush1.bf16.msra.mxu0 %v10761_v23  ;;  %5205 = vmatpush1.bf16.msra.mxu1 %v10762_v42  ;;  %v10772_v42 = vld [vmem:[#allocation52_spill] sm:$0xff] }
0x245b   : > { %5163 = vmatprep.subr.bf16.mxu0 %v10763_v43  ;;  %5206 = vmatprep.subr.bf16.mxu1 %v10764_v52  ;;  %v10773_v43 = vld [vmem:[#allocation53_spill] sm:$0xff]  ;;  %v10774_v52 = vld [vmem:[#allocation54_spill] sm:$0xff] }
0x245e   : > { %5164 = vmatpush1.bf16.msra.mxu0 %v10765_v36  ;;  %5207 = vmatpush1.bf16.msra.mxu1 %v10766_v27 }
0x245f   : > { %5165 = vmatprep.subr.bf16.mxu0 %v10767_v45  ;;  %5208 = vmatprep.subr.bf16.mxu1 %v10768_v1 }
0x2462   : > { %5166 = vmatpush1.bf16.msra.mxu0 %v10769_v25  ;;  %5209 = vmatpush1.bf16.msra.mxu1 %v10770_v3 }
0x2463   : > { %6677 = vmatprep.subr.msk.bf16.mxu0 %vm763_vm3, %v10771_v12  ;;  %6679 = vmatprep.subr.msk.bf16.mxu1 %vm763_vm3, %v10772_v42 }
0x2466   : > { %5168 = vmatpush1.bf16.msra.mxu0 %v10773_v43  ;;  %5211 = vmatpush1.bf16.msra.mxu1 %v10774_v52 }
0x2467   : > { %6949 = vmatprep.subr.bf16.mxu0 %v10725_v28  ;;  %6955 = vmatprep.subr.bf16.mxu1 %v10725_v28 }
0x2469   : > { %6678 = vmatmul.mubr.msk.bf16.vlgmr.msra.gmra.mrb[152].mxu0 %vm759_vm5, %v5069_v37  ;;  %6680 = vmatmul.mubr.msk.bf16.vlgmr.msra.gmra.mrb[152].mxu1 %vm759_vm5, %v5069_v37 }
0x246a   : > { %6951 = vmatprep.mubr.msk.bf16.mxu0 %vm7552_vm0, %v10725_v28  ;;  %6957 = vmatprep.mubr.msk.bf16.mxu1 %vm7552_vm0, %v10725_v28 }
0x2528   : > { %v5107_v12 = vpop.f32.mrb[148].mxu0  ;;  %v5150_v42 = vpop.f32.mrb[148].mxu1 }
0x2529   : > { %v5245_v43 = vmul.f32 %v5107_v12, %v10726_v54  ;;  %v5109_v3 = vpop.f32.mrb[149].mxu0  ;;  %v5152_v52 = vpop.f32.mrb[149].mxu1  ;;  %v5251_v23 = vmul.f32 %v5150_v42, %v8068_v58 }
0x252a   : > { %v5247_v25 = vmul.f32 %v5109_v3, %v10727_v51  ;;  %v5111_v1 = vpop.f32.mrb[150].mxu0  ;;  %v5154_v45 = vpop.f32.mrb[150].mxu1  ;;  %v5255_v50 = vmul.f32 %v5152_v52, %v8070_v8 }
0x252b   : > { %v5246_v27 = vmul.f32 %v5111_v1, %v10728_v17  ;;  %v5113_v36 = vpop.f32.mrb[151].mxu0  ;;  %v5156_v37 = vpop.f32.mrb[151].mxu1  ;;  %v5252_v12 = vmul.f32 %v5154_v45, %v8076_v47 }
0x252c   : > { %v5249_v55 = vadd.f32 %v5247_v25, %v5245_v43  ;;  %v5248_v33 = vmul.f32 %v5113_v36, %v8066_v56  ;;  %v5256_v3 = vmul.f32 %v5156_v37, %v8074_v10 }
0x252e   : > { %v5253_v7 = vadd.f32 %v5251_v23, %v5249_v55  ;;  %v5250_v9 = vadd.f32 %v5248_v33, %v5246_v27 }
0x2530   : > { %v5257_v22 = vadd.f32 %v5255_v50, %v5253_v7  ;;  %v5254_v40 = vadd.f32 %v5252_v12, %v5250_v9 }
0x2532   : > { %v5258_v19 = vadd.f32 %v5256_v3, %v5254_v40 }
0x253c   : > { %v5193_v5 = vpop.f32.mrb[152].mxu0  ;;  %v5236_v1 = vpop.f32.mrb[152].mxu1 }
0x253d   : > { %v5259_v17 = vmul.f32 %v5193_v5, %v8090_v4  ;;  %v5195_v51 = vpop.f32.mrb[153].mxu0  ;;  %v5238_v42 = vpop.f32.mrb[153].mxu1  ;;  %v5267_v50 = vmul.f32 %v5236_v1, %v8092_v63 }
0x253e   : > { %v5263_v25 = vmul.f32 %v5195_v51, %v8087_v14  ;;  %v5197_v36 = vpop.f32.mrb[154].mxu0  ;;  %v5240_v55 = vpop.f32.mrb[154].mxu1  ;;  %v5271_v5 = vmul.f32 %v5238_v42, %v8101_v21 }
0x253f   : > { %v5261_v43 = vadd.f32 %v5259_v17, %v5257_v22  ;;  %v5260_v52 = vmul.f32 %v5197_v36, %v8078_v11  ;;  %v5199_v45 = vpop.f32.mrb[155].mxu0  ;;  %v5242_v33 = vpop.f32.mrb[155].mxu1  ;;  %v5268_v23 = vmul.f32 %v5240_v55, %v8096_v39  ;;  %v9647_v22 = vld [vmem:[#allocation7] sm:$0xff] }
0x2540   : > { %v5264_v9 = vmul.f32 %v5199_v45, %v8094_v31  ;;  %v5272_v17 = vmul.f32 %v5242_v33, %v8105_v26  ;;  %v9650_v31 = vld [vmem:[#allocation7 + $0x8] sm:$0xff] }
0x2541   : > { %v5265_v40 = vadd.f32 %v5263_v25, %v5261_v43  ;;  %v5262_v7 = vadd.f32 %v5260_v52, %v5258_v19 }
0x2543   : > { %v5269_v27 = vadd.f32 %v5267_v50, %v5265_v40  ;;  %v5266_v37 = vadd.f32 %v5264_v9, %v5262_v7 }
0x2545   : > { %v5273_v51 = vadd.f32 %v5271_v5, %v5269_v27  ;;  %v5270_v12 = vadd.f32 %v5268_v23, %v5266_v37 }
0x2547   : > { %v5275_v3 = vadd.f32 %v9647_v22, %v5273_v51  ;;  %v5274_v36 = vadd.f32 %v5272_v17, %v5270_v12 }
0x2549   : > { %v6681_v45 = vmul.f32 -1.442695, %v5275_v3  ;;  %v5276_v19 = vadd.f32 %v9650_v31, %v5274_v36 }
0x254b   : > { %7342 = vpow2.f32 %v6681_v45  ;;  %v6682_v1 = vmul.f32 -1.442695, %v5276_v19 }
0x254d   : > { %7344 = vpow2.f32 %v6682_v1 }
0x2555   : > { %v7343_v42 = vpop.eup %7342 }
0x2556   : > { %v5283_v25 = vadd.f32 1.0, %v7343_v42 }
0x2557   : > { %v7345_v55 = vpop.eup %7344 }
0x2558   : > { %7346 = vrcp.f32 %v5283_v25  ;;  %v5284_v43 = vadd.f32 1.0, %v7345_v55 }
0x255a   : > { %7348 = vrcp.f32 %v5284_v43 }
0x2562   : > { %v9653_v52 = vpop.eup %7346 }
0x2563   : > { %v5289_v9 = vmul.f32 %v9653_v52, %v9540_v61  ;;  %v10777_v61 = vld [vmem:[#allocation79_spill] sm:$0xff] }
0x2564   : > { %v9655_v33 = vpop.eup %7348 }
0x2565   : > { %v5290_v50 = vmul.f32 %v9655_v33, %v9594_v6  ;;  %v10778_v6 = vld [vmem:[#allocation80_spill] sm:$0xff] }
0x2567   : > { %v5291_v40 = vpack.c.bf16 %v5290_v50, %v5289_v9  ;;  %v10779_v50 = vunpack.i.h.bf16 %v9582_v60 }
0x2569   : > { %6950 = vmatpush3.bf16.msra.mxu0 %v5291_v40  ;;  %6956 = vmatpush3.bf16.msra.mxu1 %v5291_v40 }
0x256a   : > { %5400 = vmatprep.subr.bf16.mxu0 %v10412_v48  ;;  %5443 = vmatprep.subr.bf16.mxu1 %v10413_v49 }
0x256c   : > { %6952 = vmatmul.mubr.msk.bf16.vlgmr.msra.gmra.mrb[156].mxu0 %vm473_vm2, %v9315_v57  ;;  %6958 = vmatmul.mubr.msk.bf16.vlgmr.msra.gmra.mrb[156].mxu1 %vm473_vm2, %v9311_v16  ;;  %v10775_v16 = vld [vmem:[#allocation78_spill] sm:$0xff]  ;;  %v10776_v57 = vld [vmem:[#allocation77_spill] sm:$0xff] }
0x256d   : > { %5401 = vmatpush1.bf16.msra.mxu0 %v8132_v0  ;;  %5444 = vmatpush1.bf16.msra.mxu1 %v10414_v44 }
0x256e   : > { %5402 = vmatprep.subr.bf16.mxu0 %v10415_v15  ;;  %5445 = vmatprep.subr.bf16.mxu1 %v10416_v38 }
0x256f   : > { %5432 = vmatprep.mubr.bf16.mxu0 %v10347_v46  ;;  %5475 = vmatprep.mubr.bf16.mxu1 %v10347_v46 }
0x2571   : > { %5403 = vmatpush1.bf16.msra.mxu0 %v10484_v59  ;;  %5446 = vmatpush1.bf16.msra.mxu1 %v10485_v20 }
0x2572   : > { %5404 = vmatprep.subr.bf16.mxu0 %v10486_v2  ;;  %5447 = vmatprep.subr.bf16.mxu1 %v10487_v35 }
0x2575   : > { %5405 = vmatpush1.bf16.msra.mxu0 %v10553_v53  ;;  %5448 = vmatpush1.bf16.msra.mxu1 %v10554_v13 }
0x2576   : > { %5406 = vmatprep.subr.bf16.mxu0 %v10555_v32  ;;  %5449 = vmatprep.subr.bf16.mxu1 %v10556_v18 }
0x2579   : > { %5450 = vmatpush1.bf16.msra.mxu1 %v10557_v24  ;;  %5407 = vmatpush1.bf16.msra.mxu0 %v10627_v34 }
0x257a   : > { %6685 = vmatprep.subr.msk.bf16.mxu0 %vm763_vm3, %v10628_v41  ;;  %6687 = vmatprep.subr.msk.bf16.mxu1 %vm763_vm3, %v10629_v62 }
0x257d   : > { %5409 = vmatpush1.bf16.msra.mxu0 %v10775_v16  ;;  %5452 = vmatpush1.bf16.msra.mxu1 %v10776_v57 }
0x257e   : > { %5486 = vmatprep.subr.bf16.mxu0 %v10777_v61  ;;  %5529 = vmatprep.subr.bf16.mxu1 %v10778_v6 }
0x263f   : > { %v5326_v7 = vpop.f32.mrb[156].mxu0  ;;  %v5367_v27 = vpop.f32.mrb[156].mxu1 }
0x2640   : > { %v6953_v5 = vpop.f32.mrb[157].mxu0  ;;  %v6959_v23 = vpop.f32.mrb[157].mxu1 }
0x2641   : > { %v5329_v37 = vpop.f32.mrb[158].mxu0  ;;  %v5370_v51 = vpop.f32.mrb[158].mxu1 }
0x2642   : > { %v7222_v12 = vpack.i.bf16 %v5329_v37, %v5326_v7  ;;  %v7227_v17 = vpack.i.bf16 %v5370_v51, %v5367_v27  ;;  %v6954_v3 = vpop.f32.mrb[159].mxu0  ;;  %v6960_v36 = vpop.f32.mrb[159].mxu1  ;;  %v10780_v7 = vunpack.i.l.bf16 %v9582_v60  ;;  %v10783_v51 = vld [vmem:[#allocation83_spill] sm:$0xff]  ;;  %v10785_v60 = vld [vmem:[#allocation85_spill] sm:$0xff] }
0x2643   : > { %v10787_v3 = vld [vmem:[#allocation87_spill] sm:$0xff]  ;;  %v10788_v36 = vld [vmem:[#allocation88_spill] sm:$0xff] }
0x2644   : > { %7228 = vrot.lane.b32.xlu0 %v7227_v17, %s7563_s11  ;;  %7223 = vrot.lane.b32.xlu1 %v7222_v12, %s7553_s26  ;;  %v10784_v12 = vld [vmem:[#allocation84_spill] sm:$0xff]  ;;  %v10786_v17 = vld [vmem:[#allocation86_spill] sm:$0xff] }
0x26b6   : > { %v7229_v45 = vpop.permute.xlu0 %7228  ;;  %v7224_v19 = vpop.permute.xlu1 %7223 }
0x26b7   : > { %v7226_v1 = vunpack.i.h.bf16 %v7224_v19  ;;  %v7225_v42 = vunpack.i.l.bf16 %v7224_v19  ;;  %v7231_v25 = vunpack.i.h.bf16 %v7229_v45  ;;  %v7230_v55 = vunpack.i.l.bf16 %v7229_v45  ;;  %v10789_v45 = vld [vmem:[#allocation89_spill] sm:$0xff]  ;;  %v10790_v19 = vld [vmem:[#allocation90_spill] sm:$0xff] }
0x26b9   : > { %v5391_v43 = vsel %vm464_vm1, %v9577_v30, %v7226_v1  ;;  %v5390_v9 = vsel %vm464_vm1, %v9575_v29, %v7225_v42  ;;  %v10781_v30 = vld [vmem:[#allocation81_spill] sm:$0xff]  ;;  %v10782_v29 = vld [vmem:[#allocation82_spill] sm:$0xff]  ;;  %v10791_v1 = vld [vmem:[#allocation91_spill] sm:$0xff] }
0x26ba   : > { %v5393_v40 = vsel %vm575_vm4, %v5391_v43, %v10779_v50  ;;  %v5392_v27 = vsel %vm575_vm4, %v5390_v9, %v10780_v7  ;;  %v10792_v42 = vld [vmem:[#allocation92_spill] sm:$0xff]  ;;  %v10795_v43 = vld [vmem:[#allocation95_spill] sm:$0xff]  ;;  %v10797_v50 = vld [vmem:[#allocation97_spill] sm:$0xff] }
0x26bb   : > { %v5395_v5 = vsel %vm1175_vm6, %v5393_v40, %v7231_v25  ;;  %v5394_v23 = vsel %vm1175_vm6, %v5392_v27, %v7230_v55  ;;  %v10793_v25 = vld [vmem:[#allocation93_spill] sm:$0xff]  ;;  %v10794_v55 = vld [vmem:[#allocation94_spill] sm:$0xff]  ;;  %v10796_v9 = vld [vmem:[#allocation96_spill] sm:$0xff] }
0x26bc   : > { %v5396_v37 = vpack.c.bf16 %v5395_v5, %v5394_v23  ;;  %v10798_v40 = vld [vmem:[#allocation98_spill] sm:$0xff] }
0x26be   : > { %6686 = vmatmul.mubr.msk.bf16.vlgmr.msra.gmra.mrb[160].mxu0 %vm759_vm5, %v5396_v37  ;;  %6688 = vmatmul.mubr.msk.bf16.vlgmr.msra.gmra.mrb[160].mxu1 %vm759_vm5, %v5396_v37 }
0x26bf   : > { %5487 = vmatpush1.bf16.msra.mxu0 %v10781_v30  ;;  %5530 = vmatpush1.bf16.msra.mxu1 %v10782_v29 }
0x26c0   : > { %5488 = vmatprep.subr.bf16.mxu0 %v10783_v51  ;;  %5531 = vmatprep.subr.bf16.mxu1 %v10784_v12 }
0x26c1   : > { %5518 = vmatprep.mubr.bf16.mxu0 %v10347_v46  ;;  %5561 = vmatprep.mubr.bf16.mxu1 %v10347_v46 }
0x26c3   : > { %5489 = vmatpush1.bf16.msra.mxu0 %v10785_v60  ;;  %5532 = vmatpush1.bf16.msra.mxu1 %v10786_v17 }
0x26c4   : > { %5490 = vmatprep.subr.bf16.mxu0 %v10787_v3  ;;  %5533 = vmatprep.subr.bf16.mxu1 %v10788_v36 }
0x26c7   : > { %5491 = vmatpush1.bf16.msra.mxu0 %v10789_v45  ;;  %5534 = vmatpush1.bf16.msra.mxu1 %v10790_v19 }
0x26c8   : > { %5492 = vmatprep.subr.bf16.mxu0 %v10791_v1  ;;  %5535 = vmatprep.subr.bf16.mxu1 %v10792_v42 }
0x26cb   : > { %5493 = vmatpush1.bf16.msra.mxu0 %v10793_v25  ;;  %5536 = vmatpush1.bf16.msra.mxu1 %v10794_v55  ;;  %v10800_v25 = vld [vmem:[#allocation56_spill] sm:$0xff] }
0x26cc   : > { %6689 = vmatprep.subr.msk.bf16.mxu0 %vm763_vm3, %v10795_v43  ;;  %6691 = vmatprep.subr.msk.bf16.mxu1 %vm763_vm3, %v10796_v9 }
0x26cf   : > { %5495 = vmatpush1.bf16.msra.mxu0 %v10797_v50  ;;  %5538 = vmatpush1.bf16.msra.mxu1 %v10798_v40  ;;  %v10799_v50 = vld [vmem:[#allocation57_spill] sm:$0xff] }
0x26d0   : > { %6961 = vmatprep.subr.bf16.mxu0 %v10725_v28  ;;  %6967 = vmatprep.subr.bf16.mxu1 %v10725_v28 }
0x26d2   : > { %6690 = vmatmul.mubr.msk.bf16.vlgmr.msra.gmra.mrb[164].mxu0 %vm759_vm5, %v5396_v37  ;;  %6692 = vmatmul.mubr.msk.bf16.vlgmr.msra.gmra.mrb[164].mxu1 %vm759_vm5, %v5396_v37 }
0x26d3   : > { %6969 = vmatprep.mubr.msk.bf16.mxu1 %vm7552_vm0, %v10725_v28  ;;  %6963 = vmatprep.mubr.msk.bf16.mxu0 %vm7552_vm0, %v10725_v28 }
0x2791   : > { %v5434_v7 = vpop.f32.mrb[160].mxu0  ;;  %v5477_v27 = vpop.f32.mrb[160].mxu1 }
0x2792   : > { %v5572_v5 = vmul.f32 %v5434_v7, %v10726_v54  ;;  %v5436_v23 = vpop.f32.mrb[161].mxu0  ;;  %v5479_v40 = vpop.f32.mrb[161].mxu1  ;;  %v5578_v19 = vmul.f32 %v5477_v27, %v8068_v58 }
0x2793   : > { %v5574_v9 = vmul.f32 %v5436_v23, %v10799_v50  ;;  %v5438_v43 = vpop.f32.mrb[162].mxu0  ;;  %v5481_v55 = vpop.f32.mrb[162].mxu1  ;;  %v5582_v17 = vmul.f32 %v5479_v40, %v8070_v8 }
0x2794   : > { %v5573_v42 = vmul.f32 %v5438_v43, %v10800_v25  ;;  %v5440_v1 = vpop.f32.mrb[163].mxu0  ;;  %v5483_v37 = vpop.f32.mrb[163].mxu1  ;;  %v5579_v7 = vmul.f32 %v5481_v55, %v8076_v47 }
0x2795   : > { %v5576_v45 = vadd.f32 %v5574_v9, %v5572_v5  ;;  %v5575_v36 = vmul.f32 %v5440_v1, %v8066_v56  ;;  %v5583_v23 = vmul.f32 %v5483_v37, %v8074_v10 }
0x2797   : > { %v5580_v3 = vadd.f32 %v5578_v19, %v5576_v45  ;;  %v5577_v60 = vadd.f32 %v5575_v36, %v5573_v42 }
0x2799   : > { %v5584_v12 = vadd.f32 %v5582_v17, %v5580_v3  ;;  %v5581_v51 = vadd.f32 %v5579_v7, %v5577_v60  ;;  %v10801_v17 = vld [vmem:[#allocation58_spill] sm:$0xff] }
0x279b   : > { %v5585_v29 = vadd.f32 %v5583_v23, %v5581_v51 }
0x27a5   : > { %v5520_v30 = vpop.f32.mrb[164].mxu0  ;;  %v5563_v43 = vpop.f32.mrb[164].mxu1 }
0x27a6   : > { %v5586_v6 = vmul.f32 %v5520_v30, %v8090_v4  ;;  %v5522_v61 = vpop.f32.mrb[165].mxu0  ;;  %v5565_v27 = vpop.f32.mrb[165].mxu1  ;;  %v5594_v3 = vmul.f32 %v5563_v43, %v8092_v63 }
0x27a7   : > { %v5590_v9 = vmul.f32 %v5522_v61, %v8087_v14  ;;  %v5524_v1 = vpop.f32.mrb[166].mxu0  ;;  %v5567_v45 = vpop.f32.mrb[166].mxu1  ;;  %v5598_v30 = vmul.f32 %v5565_v27, %v8101_v21 }
0x27a8   : > { %v5588_v19 = vadd.f32 %v5586_v6, %v5584_v12  ;;  %v5587_v40 = vmul.f32 %v5524_v1, %v8078_v11  ;;  %v5526_v55 = vpop.f32.mrb[167].mxu0  ;;  %v5569_v36 = vpop.f32.mrb[167].mxu1  ;;  %v5595_v37 = vmul.f32 %v5567_v45, %v8096_v39  ;;  %v9756_v12 = vld [vmem:[%s10068_s7] sm:$0xff] }
0x27a9   : > { %v5591_v60 = vmul.f32 %v5526_v55, %v10801_v17  ;;  %v5599_v6 = vmul.f32 %v5569_v36, %v8105_v26  ;;  %10802 = vst [vmem:[#allocation68_spill] sm:$0xff] %v9756_v12  ;;  %v5609_v36 = vsub.f32 1.0, %v9655_v33 }
0x27aa   : > { %v5592_v51 = vadd.f32 %v5590_v9, %v5588_v19  ;;  %v5589_v42 = vadd.f32 %v5587_v40, %v5585_v29  ;;  %v9762_v29 = vld [vmem:[%s10068_s7 + $0x8] sm:$0xff]  ;;  %v5608_v19 = vsub.f32 1.0, %v9653_v52 }
0x27ab   : > { %10803 = vst [vmem:[#allocation69_spill] sm:$0xff] %v9762_v29 }
0x27ac   : > { %v5596_v5 = vadd.f32 %v5594_v3, %v5592_v51  ;;  %v5593_v7 = vadd.f32 %v5591_v60, %v5589_v42  ;;  %v10804_v3 = vld [vmem:[#allocation66_spill] sm:$0xff]  ;;  %v10805_v42 = vld [vmem:[#allocation67_spill] sm:$0xff] }
0x27ad   : > { %v5606_v51 = vmul.f32 %v9653_v52, %v10804_v3  ;;  %v10811_v3 = vld [vmem:[#allocation18_spill] sm:$0xff] }
0x27ae   : > { %v5600_v61 = vadd.f32 %v5598_v30, %v5596_v5  ;;  %v5597_v23 = vadd.f32 %v5595_v37, %v5593_v7  ;;  %v5607_v5 = vmul.f32 %v9655_v33, %v10805_v42  ;;  %v10813_v42 = vld [vmem:[#allocation20_spill] sm:$0xff] }
0x27b0   : > { %v5602_v1 = vadd.f32 %v9756_v12, %v5600_v61  ;;  %v5601_v43 = vadd.f32 %v5599_v6, %v5597_v23  ;;  %v6695_v23 = vld [vmem:[%s7774_s18 + $0x70] sm:$0xff]  ;;  %v6696_v6 = vld [vmem:[%s7774_s18 + $0x78] sm:$0xff]  ;;  %s6315_s18 = sshll.u32 %s8340_s21, 4  ;;  %s10012_s18 = int_to_ptr.vmem [resolvable:$true] %s6315_s18 }
0x27b2   : > { %7350 = vtanh.f32 %v5602_v1  ;;  %v5603_v27 = vadd.f32 %v9762_v29, %v5601_v43 }
0x27b4   : > { %7352 = vtanh.f32 %v5603_v27 }
0x27bc   : > { %v7351_v9 = vpop.eup %7350 }
0x27bd   : > { %5612 = vrot.lane.b32.xlu1 %v7351_v9, %s7564_s14 }
0x27be   : > { %v7353_v45 = vpop.eup %7352 }
0x27bf   : > { %5614 = vrot.lane.b32.xlu0 %v7353_v45, %s7564_s14 }
0x282f   : > { %v5613_v40 = vpop.permute.xlu1 %5612 }
0x2830   : > { %v5618_v55 = vmul.f32 %v5613_v40, %v5608_v19  ;;  %v10808_v19 = vld [vmem:[#allocation15_spill] sm:$0xff]  ;;  %v10809_v40 = vld [vmem:[#allocation17_spill] sm:$0xff] }
0x2831   : > { %v5615_v60 = vpop.permute.xlu0 %5614 }
0x2832   : > { %v5619_v30 = vmul.f32 %v5615_v60, %v5609_v36  ;;  %v9773_v37 = vadd.f32 %v5618_v55, %v5606_v51  ;;  %v9793_v55 = vld [vmem:[#allocation2 + $0x8] sm:$0xff]   ;;  %v9797_v36 = vld [vmem:[#allocation2] sm:$0xff]  }
0x2833   : > { %v10810_v60 = vld [vmem:[#allocation16_spill] sm:$0xff]  ;;  %v10812_v51 = vld [vmem:[#allocation19_spill] sm:$0xff] }
0x2834   : > { %10806 = vst [vmem:[#allocation70_spill] sm:$0xff] %v9773_v37  ;;  %v9775_v7 = vadd.f32 %v5619_v30, %v5607_v5  ;;  %v10814_v5 = vld [vmem:[#allocation21_spill] sm:$0xff]  ;;  %v10815_v30 = vld [vmem:[#allocation22_spill] sm:$0xff] }
0x2836   : > { %10807 = vst [vmem:[#allocation71_spill] sm:$0xff] %v9775_v7  ;;  %v7232_v61 = vpack.i.bf16 %v9775_v7, %v9773_v37 }
0x2838   : > { %7233 = vrot.lane.b32.xlu1 %v7232_v61, %s7565_s23  ;;  %v10816_v61 = vld [vmem:[#allocation23_spill] sm:$0xff]  ;;  %s10020_s23 = scalar_lea.sflag [#allocation4], %s355_s25 }
0x283c   : > { %5624 = vrot.lane.b32.xlu1 %v9773_v37, %s7566_s24 }
0x28aa   : > { %v7234_v52 = vpop.permute.xlu1 %7233 }
0x28ab   : > { %v7236_v1 = vunpack.i.h.bf16 %v7234_v52  ;;  %v7235_v43 = vunpack.i.l.bf16 %v7234_v52  ;;  %v10819_v52 = vld [vmem:[#allocation26_spill] sm:$0xff] }
0x28ad   : > { %v5643_v33 = vsel %vm464_vm1, %v6696_v6, %v7236_v1  ;;  %v5642_v27 = vsel %vm464_vm1, %v6695_v23, %v7235_v43  ;;  %v10817_v23 = vld [vmem:[#allocation24_spill] sm:$0xff]  ;;  %v10818_v6 = vld [vmem:[#allocation25_spill] sm:$0xff]  ;;  %v10820_v1 = vld [vmem:[#allocation27_spill] sm:$0xff] }
0x28ae   : > { %v5644_v9 = vpack.c.bf16 %v5643_v33, %v5642_v27  ;;  %v9786_v45 = vpop.permute.xlu1 %5624  ;;  %v10821_v43 = vld [vmem:[#allocation28_spill] sm:$0xff]  ;;  %v10822_v33 = vld [vmem:[#allocation29_spill] sm:$0xff]  ;;  %v10823_v27 = vld [vmem:[#allocation30_spill] sm:$0xff] }
0x28af   : > { %6693 = vst.msk [vmem:[%s8340_s21 + $0x60] sm:$0xff] %vm1622_vm7, %v9786_v45 }
0x28b0   : > { %6962 = vmatpush3.bf16.msra.mxu0 %v5644_v9  ;;  %6968 = vmatpush3.bf16.msra.mxu1 %v5644_v9  ;;  %v10824_v9 = vld [vmem:[#allocation31_spill] sm:$0xff] }
0x28b1   : > { %5741 = vmatprep.subr.bf16.mxu0 %v10808_v19  ;;  %5784 = vmatprep.subr.bf16.mxu1 %v10809_v40  ;;  %v10825_v19 = vld [vmem:[#allocation32_spill] sm:$0xff]  ;;  %v10826_v40 = vld [vmem:[#allocation33_spill] sm:$0xff] }
0x28b3   : > { %6970 = vmatmul.mubr.msk.bf16.vlgmr.msra.gmra.mrb[168].mxu1 %vm473_vm2, %v9793_v55  ;;  %6964 = vmatmul.mubr.msk.bf16.vlgmr.msra.gmra.mrb[168].mxu0 %vm473_vm2, %v9797_v36 }
0x28b4   : > { %5742 = vmatpush1.bf16.msra.mxu0 %v10810_v60  ;;  %5785 = vmatpush1.bf16.msra.mxu1 %v10811_v3  ;;  %v10827_v60 = vld [vmem:[#allocation34_spill] sm:$0xff]  ;;  %v10828_v3 = vld [vmem:[#allocation35_spill] sm:$0xff] }
0x28b5   : > { %5743 = vmatprep.subr.bf16.mxu0 %v10812_v51  ;;  %5786 = vmatprep.subr.bf16.mxu1 %v10813_v42  ;;  %v10829_v51 = vld [vmem:[#allocation36_spill] sm:$0xff] }
0x28b6   : > { %5773 = vmatprep.mubr.bf16.mxu0 %v10347_v46  ;;  %5816 = vmatprep.mubr.bf16.mxu1 %v10347_v46 }
0x28b8   : > { %5744 = vmatpush1.bf16.msra.mxu0 %v10814_v5  ;;  %5787 = vmatpush1.bf16.msra.mxu1 %v10815_v30 }
0x28b9   : > { %5745 = vmatprep.subr.bf16.mxu0 %v10816_v61  ;;  %5788 = vmatprep.subr.bf16.mxu1 %v10817_v23 }
0x28bc   : > { %5746 = vmatpush1.bf16.msra.mxu0 %v10818_v6  ;;  %5789 = vmatpush1.bf16.msra.mxu1 %v10819_v52 }
0x28bd   : > { %5747 = vmatprep.subr.bf16.mxu0 %v10820_v1  ;;  %5790 = vmatprep.subr.bf16.mxu1 %v10821_v43 }
0x28c0   : > { %5748 = vmatpush1.bf16.msra.mxu0 %v10822_v33  ;;  %5791 = vmatpush1.bf16.msra.mxu1 %v10823_v27 }
0x28c1   : > { %6699 = vmatprep.subr.msk.bf16.mxu0 %vm763_vm3, %v10824_v9  ;;  %6701 = vmatprep.subr.msk.bf16.mxu1 %vm763_vm3, %v10825_v19 }
0x28c4   : > { %5750 = vmatpush1.bf16.msra.mxu0 %v10826_v40  ;;  %5793 = vmatpush1.bf16.msra.mxu1 %v10827_v60 }
0x28c5   : > { %5827 = vmatprep.subr.bf16.mxu0 %v10828_v3  ;;  %5870 = vmatprep.subr.bf16.mxu1 %v10829_v51  ;;  %v10832_v51 = vld [vmem:[#allocation37_spill] sm:$0xff] }
0x2986   : > { %v5720_v42 = vpop.f32.mrb[168].mxu1  ;;  %v9825_v5 = vpop.f32.mrb[168].mxu0 }
0x2987   : > { %10830 = vst [vmem:[#allocation72_spill] sm:$0xff] %v9825_v5  ;;  %v6971_v30 = vpop.f32.mrb[169].mxu1  ;;  %v6965_v61 = vpop.f32.mrb[169].mxu0 }
0x2988   : > { %v5723_v23 = vpop.f32.mrb[170].mxu1  ;;  %v9827_v6 = vpop.f32.mrb[170].mxu0  ;;  %v10834_v30 = vld [vmem:[#allocation39_spill] sm:$0xff]  ;;  %v10835_v61 = vld [vmem:[#allocation40_spill] sm:$0xff] }
0x2989   : > { %v7237_v52 = vpack.i.bf16 %v5723_v23, %v5720_v42  ;;  %v6972_v1 = vpop.f32.mrb[171].mxu1  ;;  %v6966_v43 = vpop.f32.mrb[171].mxu0  ;;  %v10833_v42 = vld [vmem:[#allocation38_spill] sm:$0xff]  ;;  %v10836_v23 = vld [vmem:[#allocation41_spill] sm:$0xff] }
0x298a   : > { %v10838_v1 = vld [vmem:[#allocation43_spill] sm:$0xff]  ;;  %v10839_v43 = vld [vmem:[#allocation44_spill] sm:$0xff] }
0x298b   : > { %7238 = vrot.lane.b32.xlu0 %v7237_v52, %s7555_s13  ;;  %v10837_v52 = vld [vmem:[#allocation42_spill] sm:$0xff] }
0x298f   : > { %5626 = vrot.lane.b32.xlu0 %v9775_v7, %s7566_s24 }
0x29fd   : > { %v9832_v33 = vpop.permute.xlu0 %7238 }
0x29fe   : > { %10831 = vst [vmem:[#allocation73_spill] sm:$0xff] %v9832_v33  ;;  %v10275_v27 = vunpack.i.h.bf16 %v9832_v33  ;;  %v10276_v9 = vunpack.i.l.bf16 %v9832_v33 }
0x2a00   : > { %v5735_v19 = vsel %vm575_vm4, %v9825_v5, %v10276_v9  ;;  %v5736_v40 = vsel %vm575_vm4, %v9827_v6, %v10275_v27  ;;  %v10846_v27 = vld [vmem:[#allocation51_spill] sm:$0xff] }
0x2a01   : > { %v5737_v60 = vpack.c.bf16 %v5736_v40, %v5735_v19  ;;  %v9844_v3 = vpop.permute.xlu0 %5626  ;;  %v10840_v19 = vld [vmem:[#allocation45_spill] sm:$0xff]  ;;  %v10841_v40 = vld [vmem:[#allocation46_spill] sm:$0xff] }
0x2a02   : > { %6694 = vst.msk [vmem:[%s8340_s21 + $0x68] sm:$0xff] %vm1622_vm7, %v9844_v3 }
0x2a03   : > { %6700 = vmatmul.mubr.msk.bf16.vlgmr.msra.gmra.mrb[172].mxu0 %vm759_vm5, %v5737_v60  ;;  %6702 = vmatmul.mubr.msk.bf16.vlgmr.msra.gmra.mrb[172].mxu1 %vm759_vm5, %v5737_v60 }
0x2a04   : > { %5828 = vmatpush1.bf16.msra.mxu0 %v10832_v51  ;;  %5871 = vmatpush1.bf16.msra.mxu1 %v10833_v42  ;;  %v10842_v51 = vld [vmem:[#allocation47_spill] sm:$0xff]  ;;  %v10843_v42 = vld [vmem:[#allocation48_spill] sm:$0xff] }
0x2a05   : > { %5829 = vmatprep.subr.bf16.mxu0 %v10834_v30  ;;  %5872 = vmatprep.subr.bf16.mxu1 %v10835_v61  ;;  %v10844_v30 = vld [vmem:[#allocation49_spill] sm:$0xff]  ;;  %v10845_v61 = vld [vmem:[#allocation50_spill] sm:$0xff] }
0x2a06   : > { %5859 = vmatprep.mubr.bf16.mxu0 %v10347_v46  ;;  %5902 = vmatprep.mubr.bf16.mxu1 %v10347_v46 }
0x2a08   : > { %5830 = vmatpush1.bf16.msra.mxu0 %v10836_v23  ;;  %5873 = vmatpush1.bf16.msra.mxu1 %v10837_v52  ;;  %v10847_v23 = vld [vmem:[#allocation52_spill] sm:$0xff]  ;;  %v10848_v52 = vld [vmem:[#allocation53_spill] sm:$0xff] }
0x2a09   : > { %5831 = vmatprep.subr.bf16.mxu0 %v10838_v1  ;;  %5874 = vmatprep.subr.bf16.mxu1 %v10839_v43  ;;  %v10849_v1 = vld [vmem:[#allocation54_spill] sm:$0xff] }
0x2a0c   : > { %5832 = vmatpush1.bf16.msra.mxu0 %v10840_v19  ;;  %5875 = vmatpush1.bf16.msra.mxu1 %v10841_v40 }
0x2a0d   : > { %5833 = vmatprep.subr.bf16.mxu0 %v10842_v51  ;;  %5876 = vmatprep.subr.bf16.mxu1 %v10843_v42 }
0x2a10   : > { %5834 = vmatpush1.bf16.msra.mxu0 %v10844_v30  ;;  %5877 = vmatpush1.bf16.msra.mxu1 %v10845_v61 }
0x2a11   : > { %6703 = vmatprep.subr.msk.bf16.mxu0 %vm763_vm3, %v10846_v27  ;;  %6705 = vmatprep.subr.msk.bf16.mxu1 %vm763_vm3, %v10847_v23 }
0x2a14   : > { %5836 = vmatpush1.bf16.msra.mxu0 %v10848_v52  ;;  %5879 = vmatpush1.bf16.msra.mxu1 %v10849_v1 }
0x2a15   : > { %6973 = vmatprep.subr.bf16.mxu0 %v10725_v28  ;;  %6979 = vmatprep.subr.bf16.mxu1 %v10725_v28 }
0x2a17   : > { %6704 = vmatmul.mubr.msk.bf16.vlgmr.msra.gmra.mrb[176].mxu0 %vm759_vm5, %v5737_v60  ;;  %6706 = vmatmul.mubr.msk.bf16.vlgmr.msra.gmra.mrb[176].mxu1 %vm759_vm5, %v5737_v60 }
0x2a18   : > { %6975 = vmatprep.mubr.msk.bf16.mxu0 %vm7552_vm0, %v10725_v28  ;;  %6981 = vmatprep.mubr.msk.bf16.mxu1 %vm7552_vm0, %v10725_v28 }
0x2ad6   : > { %v5775_v27 = vpop.f32.mrb[172].mxu0  ;;  %v5818_v43 = vpop.f32.mrb[172].mxu1 }
0x2ad7   : > { %v5913_v19 = vmul.f32 %v5775_v27, %v10726_v54  ;;  %v5777_v40 = vpop.f32.mrb[173].mxu0  ;;  %v5820_v51 = vpop.f32.mrb[173].mxu1  ;;  %v5919_v1 = vmul.f32 %v5818_v43, %v8068_v58 }
0x2ad8   : > { %v5915_v42 = vmul.f32 %v5777_v40, %v10799_v50  ;;  %v5779_v30 = vpop.f32.mrb[174].mxu0  ;;  %v5822_v61 = vpop.f32.mrb[174].mxu1  ;;  %v5923_v37 = vmul.f32 %v5820_v51, %v8070_v8 }
0x2ad9   : > { %v5914_v23 = vmul.f32 %v5779_v30, %v10800_v25  ;;  %v5781_v52 = vpop.f32.mrb[175].mxu0  ;;  %v5824_v60 = vpop.f32.mrb[175].mxu1  ;;  %v5920_v27 = vmul.f32 %v5822_v61, %v8076_v47 }
0x2ada   : > { %v5917_v9 = vadd.f32 %v5915_v42, %v5913_v19  ;;  %v5916_v7 = vmul.f32 %v5781_v52, %v8066_v56  ;;  %v5924_v40 = vmul.f32 %v5824_v60, %v8074_v10 }
0x2adc   : > { %v5921_v28 = vadd.f32 %v5919_v1, %v5917_v9  ;;  %v5918_v29 = vadd.f32 %v5916_v7, %v5914_v23 }
0x2ade   : > { %v5925_v12 = vadd.f32 %v5923_v37, %v5921_v28  ;;  %v5922_v54 = vadd.f32 %v5920_v27, %v5918_v29 }
0x2ae0   : > { %v5926_v50 = vadd.f32 %v5924_v40, %v5922_v54 }
0x2aea   : > { %v5861_v33 = vpop.f32.mrb[176].mxu0  ;;  %v5904_v30 = vpop.f32.mrb[176].mxu1 }
0x2aeb   : > { %v5927_v25 = vmul.f32 %v5861_v33, %v8090_v4  ;;  %v5863_v5 = vpop.f32.mrb[177].mxu0  ;;  %v5906_v43 = vpop.f32.mrb[177].mxu1  ;;  %v5935_v37 = vmul.f32 %v5904_v30, %v8092_v63 }
0x2aec   : > { %v5931_v19 = vmul.f32 %v5863_v5, %v8087_v14  ;;  %v5865_v42 = vpop.f32.mrb[178].mxu0  ;;  %v5908_v9 = vpop.f32.mrb[178].mxu1  ;;  %v5939_v33 = vmul.f32 %v5906_v43, %v8101_v21 }
0x2aed   : > { %v5929_v52 = vadd.f32 %v5927_v25, %v5925_v12  ;;  %v5928_v51 = vmul.f32 %v5865_v42, %v8078_v11  ;;  %v5867_v61 = vpop.f32.mrb[179].mxu0  ;;  %v5910_v7 = vpop.f32.mrb[179].mxu1  ;;  %v5936_v1 = vmul.f32 %v5908_v9, %v8096_v39 }
0x2aee   : > { %v5932_v29 = vmul.f32 %v5867_v61, %v10801_v17  ;;  %v5940_v25 = vmul.f32 %v5910_v7, %v8105_v26 }
0x2aef   : > { %v5933_v54 = vadd.f32 %v5931_v19, %v5929_v52  ;;  %v5930_v23 = vadd.f32 %v5928_v51, %v5926_v50 }
0x2af1   : > { %v5937_v60 = vadd.f32 %v5935_v37, %v5933_v54  ;;  %v5934_v28 = vadd.f32 %v5932_v29, %v5930_v23 }
0x2af3   : > { %v5941_v5 = vadd.f32 %v5939_v33, %v5937_v60  ;;  %v5938_v27 = vadd.f32 %v5936_v1, %v5934_v28  ;;  %v10857_v33 = vld [vmem:[#allocation82_spill] sm:$0xff]  ;;  %v10858_v1 = vld [vmem:[#allocation83_spill] sm:$0xff]  ;;  %v10859_v28 = vld [vmem:[#allocation84_spill] sm:$0xff] }
0x2af5   : > { %v5943_v12 = vadd.f32 %v9647_v22, %v5941_v5  ;;  %v5942_v40 = vadd.f32 %v5940_v25, %v5938_v27  ;;  %v10860_v5 = vld [vmem:[#allocation85_spill] sm:$0xff]  ;;  %v10861_v27 = vld [vmem:[#allocation86_spill] sm:$0xff]  ;;  %v10862_v25 = vld [vmem:[#allocation87_spill] sm:$0xff] }
0x2af7   : > { %v6707_v42 = vmul.f32 -1.442695, %v5943_v12  ;;  %v5944_v61 = vadd.f32 %v9650_v31, %v5942_v40  ;;  %v10863_v12 = vld [vmem:[#allocation88_spill] sm:$0xff]  ;;  %v10864_v40 = vld [vmem:[#allocation89_spill] sm:$0xff] }
0x2af9   : > { %7354 = vpow2.f32 %v6707_v42  ;;  %v6708_v30 = vmul.f32 -1.442695, %v5944_v61  ;;  %v10865_v42 = vld [vmem:[#allocation90_spill] sm:$0xff]  ;;  %v10866_v61 = vld [vmem:[#allocation91_spill] sm:$0xff] }
0x2afb   : > { %7356 = vpow2.f32 %v6708_v30  ;;  %v10867_v30 = vld [vmem:[#allocation92_spill] sm:$0xff] }
0x2b03   : > { %v7355_v50 = vpop.eup %7354 }
0x2b04   : > { %v5951_v19 = vadd.f32 1.0, %v7355_v50  ;;  %v10868_v50 = vld [vmem:[#allocation93_spill] sm:$0xff] }
0x2b05   : > { %v7357_v52 = vpop.eup %7356 }
0x2b06   : > { %7358 = vrcp.f32 %v5951_v19  ;;  %v5952_v43 = vadd.f32 1.0, %v7357_v52  ;;  %v10869_v19 = vld [vmem:[#allocation94_spill] sm:$0xff]  ;;  %v10871_v52 = vld [vmem:[#allocation96_spill] sm:$0xff] }
0x2b08   : > { %7360 = vrcp.f32 %v5952_v43  ;;  %v10872_v43 = vld [vmem:[#allocation97_spill] sm:$0xff] }
0x2b10   : > { %v9899_v9 = vpop.eup %7358 }
0x2b11   : > { %v5957_v22 = vmul.f32 %v9899_v9, %v9786_v45 }
0x2b12   : > { %v9901_v51 = vpop.eup %7360 }
0x2b13   : > { %v5958_v7 = vmul.f32 %v9901_v51, %v9844_v3 }
0x2b15   : > { %v5959_v31 = vpack.c.bf16 %v5958_v7, %v5957_v22  ;;  %v10873_v22 = vld [vmem:[#allocation98_spill] sm:$0xff] }
0x2b17   : > { %6974 = vmatpush3.bf16.msra.mxu0 %v5959_v31  ;;  %6980 = vmatpush3.bf16.msra.mxu1 %v5959_v31 }
0x2b18   : > { %6068 = vmatprep.subr.bf16.mxu0 %v10412_v48  ;;  %6111 = vmatprep.subr.bf16.mxu1 %v10413_v49  ;;  %v10851_v48 = vld [vmem:[#allocation80_spill] sm:$0xff] }
0x2b1a   : > { %6976 = vmatmul.mubr.msk.bf16.vlgmr.msra.gmra.mrb[180].mxu0 %vm473_vm2, %v9797_v36  ;;  %6982 = vmatmul.mubr.msk.bf16.vlgmr.msra.gmra.mrb[180].mxu1 %vm473_vm2, %v9793_v55  ;;  %v10853_v55 = vld [vmem:[#allocation73_spill] sm:$0xff] }
0x2b1b   : > { %6069 = vmatpush1.bf16.msra.mxu0 %v8132_v0  ;;  %6112 = vmatpush1.bf16.msra.mxu1 %v10414_v44  ;;  %v10850_v0 = vld [vmem:[#allocation79_spill] sm:$0xff]  ;;  %v10854_v36 = vunpack.i.l.bf16 %v10853_v55  ;;  %v10855_v29 = vunpack.i.h.bf16 %v10853_v55 }
0x2b1c   : > { %6070 = vmatprep.subr.bf16.mxu0 %v10415_v15  ;;  %6113 = vmatprep.subr.bf16.mxu1 %v10416_v38 }
0x2b1d   : > { %6100 = vmatprep.mubr.bf16.mxu0 %v10347_v46  ;;  %6143 = vmatprep.mubr.bf16.mxu1 %v10347_v46 }
0x2b1f   : > { %6071 = vmatpush1.bf16.msra.mxu0 %v10484_v59  ;;  %6114 = vmatpush1.bf16.msra.mxu1 %v10485_v20 }
0x2b20   : > { %6072 = vmatprep.subr.bf16.mxu0 %v10486_v2  ;;  %6115 = vmatprep.subr.bf16.mxu1 %v10487_v35 }
0x2b23   : > { %6073 = vmatpush1.bf16.msra.mxu0 %v10553_v53  ;;  %6116 = vmatpush1.bf16.msra.mxu1 %v10554_v13 }
0x2b24   : > { %6074 = vmatprep.subr.bf16.mxu0 %v10555_v32  ;;  %6117 = vmatprep.subr.bf16.mxu1 %v10556_v18 }
0x2b27   : > { %6075 = vmatpush1.bf16.msra.mxu0 %v10627_v34  ;;  %6118 = vmatpush1.bf16.msra.mxu1 %v10557_v24 }
0x2b28   : > { %6711 = vmatprep.subr.msk.bf16.mxu0 %vm763_vm3, %v10628_v41  ;;  %6713 = vmatprep.subr.msk.bf16.mxu1 %vm763_vm3, %v10629_v62  ;;  %v10852_v62 = vld [vmem:[#allocation72_spill] sm:$0xff] }
0x2b2b   : > { %6077 = vmatpush1.bf16.msra.mxu0 %v10775_v16  ;;  %6120 = vmatpush1.bf16.msra.mxu1 %v10776_v57 }
0x2b2c   : > { %6154 = vmatprep.subr.bf16.mxu0 %v10850_v0  ;;  %6197 = vmatprep.subr.bf16.mxu1 %v10851_v48  ;;  %v10874_v0 = vld [vmem:[#allocation55_spill] sm:$0xff] }
0x2bed   : > { %v5994_v49 = vpop.f32.mrb[180].mxu0  ;;  %v6035_v44 = vpop.f32.mrb[180].mxu1 }
0x2bee   : > { %v6977_v15 = vpop.f32.mrb[181].mxu0  ;;  %v6983_v38 = vpop.f32.mrb[181].mxu1 }
0x2bef   : > { %v5997_v59 = vpop.f32.mrb[182].mxu0  ;;  %v6038_v20 = vpop.f32.mrb[182].mxu1  ;;  %v10875_v15 = vld [vmem:[#allocation57_spill] sm:$0xff] }
0x2bf0   : > { %v7242_v2 = vpack.i.bf16 %v5997_v59, %v5994_v49  ;;  %v7247_v35 = vpack.i.bf16 %v6038_v20, %v6035_v44  ;;  %v6978_v53 = vpop.f32.mrb[183].mxu0  ;;  %v6984_v13 = vpop.f32.mrb[183].mxu1 }
0x2bf2   : > { %7243 = vrot.lane.b32.xlu1 %v7242_v2, %s7553_s26  ;;  %7248 = vrot.lane.b32.xlu0 %v7247_v35, %s7563_s11  ;;  %v10876_v2 = vld [vmem:[#allocation56_spill] sm:$0xff]  ;;  %s6728_s26 = sshll.u32 %s7636_s9, 11  ;;  %s7470_s9 = scalar_lea.vmem %s10012_s18, 2048 }
0x2bf3   : > { %p7471_p12 = scmp.ne.s32.totalorder %s10012_s18, %s7470_s9 }
0x2bf5   : > { %p7472_p2 = pnand %p7471_p12, %p10881_p1 }
0x2bf7   : > { %p7473_p3 = pneg %p7472_p2 }
0x2c64   : > { %v7244_v32 = vpop.permute.xlu1 %7243  ;;  %v7249_v18 = vpop.permute.xlu0 %7248 }
0x2c65   : > { %v7246_v24 = vunpack.i.h.bf16 %v7244_v32  ;;  %v7245_v34 = vunpack.i.l.bf16 %v7244_v32  ;;  %v7251_v57 = vunpack.i.h.bf16 %v7249_v18  ;;  %v7250_v45 = vunpack.i.l.bf16 %v7249_v18 }
0x2c67   : > { %v6059_v41 = vsel %vm464_vm1, %v9827_v6, %v7246_v24  ;;  %v6058_v16 = vsel %vm464_vm1, %v10852_v62, %v7245_v34  ;;  %v10856_v6 = vld [vmem:[#allocation81_spill] sm:$0xff] }
0x2c68   : > { %v6060_v3 = vsel %vm575_vm4, %v6058_v16, %v10854_v36  ;;  %v6061_v37 = vsel %vm575_vm4, %v6059_v41, %v10855_v29 }
0x2c69   : > { %v6062_v54 = vsel %vm1175_vm6, %v6060_v3, %v7250_v45  ;;  %v6063_v23 = vsel %vm1175_vm6, %v6061_v37, %v7251_v57 }
0x2c6a   : > { %v6064_v60 = vpack.c.bf16 %v6063_v23, %v6062_v54 }
0x2c6c   : > { %6712 = vmatmul.mubr.msk.bf16.vlgmr.msra.gmra.mrb[184].mxu0 %vm759_vm5, %v6064_v60  ;;  %6714 = vmatmul.mubr.msk.bf16.vlgmr.msra.gmra.mrb[184].mxu1 %vm759_vm5, %v6064_v60 }
0x2c6d   : > { %6155 = vmatpush1.bf16.msra.mxu0 %v10856_v6  ;;  %6198 = vmatpush1.bf16.msra.mxu1 %v10857_v33 }
0x2c6e   : > { %6156 = vmatprep.subr.bf16.mxu0 %v10858_v1  ;;  %6199 = vmatprep.subr.bf16.mxu1 %v10859_v28 }
0x2c6f   : > { %6186 = vmatprep.mubr.bf16.mxu0 %v10347_v46  ;;  %6229 = vmatprep.mubr.bf16.mxu1 %v10347_v46  ;;  %v10870_v46 = vld [vmem:[#allocation95_spill] sm:$0xff] }
0x2c71   : > { %6157 = vmatpush1.bf16.msra.mxu0 %v10860_v5  ;;  %6200 = vmatpush1.bf16.msra.mxu1 %v10861_v27 }
0x2c72   : > { %6158 = vmatprep.subr.bf16.mxu0 %v10862_v25  ;;  %6201 = vmatprep.subr.bf16.mxu1 %v10863_v12 }
0x2c75   : > { %6159 = vmatpush1.bf16.msra.mxu0 %v10864_v40  ;;  %6202 = vmatpush1.bf16.msra.mxu1 %v10865_v42 }
0x2c76   : > { %6160 = vmatprep.subr.bf16.mxu0 %v10866_v61  ;;  %6203 = vmatprep.subr.bf16.mxu1 %v10867_v30  ;;  %v10877_v61 = vld [vmem:[#allocation68_spill] sm:$0xff] }
0x2c79   : > { %6161 = vmatpush1.bf16.msra.mxu0 %v10868_v50  ;;  %6204 = vmatpush1.bf16.msra.mxu1 %v10869_v19  ;;  %v10878_v50 = vld [vmem:[#allocation69_spill] sm:$0xff] }
0x2c7a   : > { %6715 = vmatprep.subr.msk.bf16.mxu0 %vm763_vm3, %v10870_v46  ;;  %6717 = vmatprep.subr.msk.bf16.mxu1 %vm763_vm3, %v10871_v52  ;;  %v10879_v46 = vld [vmem:[#allocation70_spill] sm:$0xff] }
0x2c7d   : > { %6163 = vmatpush1.bf16.msra.mxu0 %v10872_v43  ;;  %6206 = vmatpush1.bf16.msra.mxu1 %v10873_v22  ;;  %v6277_v43 = vsub.f32 1.0, %v9901_v51 }
0x2c80   : > { %6716 = vmatmul.mubr.msk.bf16.vlgmr.msra.gmra.mrb[188].mxu0 %vm759_vm5, %v6064_v60  ;;  %6718 = vmatmul.mubr.msk.bf16.vlgmr.msra.gmra.mrb[188].mxu1 %vm759_vm5, %v6064_v60 }
0x2d3f   : > { %v6102_v7 = vpop.f32.mrb[184].mxu0  ;;  %v6145_v31 = vpop.f32.mrb[184].mxu1 }
0x2d40   : > { %v6240_v48 = vmul.f32 %v6102_v7, %v10874_v0  ;;  %v6104_v49 = vpop.f32.mrb[185].mxu0  ;;  %v6147_v44 = vpop.f32.mrb[185].mxu1  ;;  %v6246_v32 = vmul.f32 %v6145_v31, %v8068_v58  ;;  %v10880_v31 = vld [vmem:[#allocation71_spill] sm:$0xff] }
0x2d41   : > { %v6242_v38 = vmul.f32 %v6104_v49, %v10875_v15  ;;  %v6106_v59 = vpop.f32.mrb[186].mxu0  ;;  %v6149_v20 = vpop.f32.mrb[186].mxu1  ;;  %v6250_v41 = vmul.f32 %v6147_v44, %v8070_v8  ;;  %v6275_v0 = vmul.f32 %v9901_v51, %v10880_v31 }
0x2d42   : > { %v6241_v35 = vmul.f32 %v6106_v59, %v10876_v2  ;;  %v6108_v53 = vpop.f32.mrb[187].mxu0  ;;  %v6151_v13 = vpop.f32.mrb[187].mxu1  ;;  %v6247_v62 = vmul.f32 %v6149_v20, %v8076_v47 }
0x2d43   : > { %v6244_v18 = vadd.f32 %v6242_v38, %v6240_v48  ;;  %v6243_v24 = vmul.f32 %v6108_v53, %v8066_v56  ;;  %v6251_v55 = vmul.f32 %v6151_v13, %v8074_v10 }
0x2d45   : > { %v6248_v34 = vadd.f32 %v6246_v32, %v6244_v18  ;;  %v6245_v16 = vadd.f32 %v6243_v24, %v6241_v35 }
0x2d47   : > { %v6252_v57 = vadd.f32 %v6250_v41, %v6248_v34  ;;  %v6249_v45 = vadd.f32 %v6247_v62, %v6245_v16 }
0x2d49   : > { %v6253_v36 = vadd.f32 %v6251_v55, %v6249_v45 }
0x2d53   : > { %v6188_v3 = vpop.f32.mrb[188].mxu0  ;;  %v6231_v29 = vpop.f32.mrb[188].mxu1 }
0x2d54   : > { %v6254_v37 = vmul.f32 %v6188_v3, %v8090_v4  ;;  %v6190_v54 = vpop.f32.mrb[189].mxu0  ;;  %v6233_v58 = vpop.f32.mrb[189].mxu1  ;;  %v6262_v10 = vmul.f32 %v6231_v29, %v8092_v63 }
0x2d55   : > { %v6258_v23 = vmul.f32 %v6190_v54, %v8087_v14  ;;  %v6192_v56 = vpop.f32.mrb[190].mxu0  ;;  %v6235_v60 = vpop.f32.mrb[190].mxu1  ;;  %v6266_v4 = vmul.f32 %v6233_v58, %v8101_v21 }
0x2d56   : > { %v6256_v6 = vadd.f32 %v6254_v37, %v6252_v57  ;;  %v6255_v8 = vmul.f32 %v6192_v56, %v8078_v11  ;;  %v6194_v47 = vpop.f32.mrb[191].mxu0  ;;  %v6237_v33 = vpop.f32.mrb[191].mxu1  ;;  %v6263_v25 = vmul.f32 %v6235_v60, %v8096_v39  ;;  %v6276_v39 = vsub.f32 1.0, %v9899_v9 }
0x2d57   : > { %v6259_v1 = vmul.f32 %v6194_v47, %v10801_v17  ;;  %v6267_v42 = vmul.f32 %v6237_v33, %v8105_v26  ;;  %v6274_v26 = vmul.f32 %v9899_v9, %v10879_v46 }
0x2d58   : > { %v6260_v28 = vadd.f32 %v6258_v23, %v6256_v6  ;;  %v6257_v5 = vadd.f32 %v6255_v8, %v6253_v36 }
0x2d5a   : > { %v6264_v27 = vadd.f32 %v6262_v10, %v6260_v28  ;;  %v6261_v12 = vadd.f32 %v6259_v1, %v6257_v5 }
0x2d5c   : > { %v6268_v14 = vadd.f32 %v6266_v4, %v6264_v27  ;;  %v6265_v40 = vadd.f32 %v6263_v25, %v6261_v12 }
0x2d5e   : > { %v6270_v11 = vadd.f32 %v10877_v61, %v6268_v14  ;;  %v6269_v30 = vadd.f32 %v6267_v42, %v6265_v40 }
0x2d60   : > { %7362 = vtanh.f32 %v6270_v11  ;;  %v6271_v17 = vadd.f32 %v10878_v50, %v6269_v30 }
0x2d62   : > { %7364 = vtanh.f32 %v6271_v17 }
0x2d6a   : > { %v7363_v63 = vpop.eup %7362 }
0x2d6b   : > { %6280 = vrot.lane.b32.xlu1 %v7363_v63, %s7564_s14 }
0x2d6c   : > { %v7365_v21 = vpop.eup %7364 }
0x2d6d   : > { %6282 = vrot.lane.b32.xlu0 %v7365_v21, %s7564_s14  ;;  %s10010_s14 = scalar_lea.hbm %s10069_s8, %s6728_s26 }
0x2ddd   : > { %v6281_v19 = vpop.permute.xlu1 %6280 }
0x2dde   : > { %v6286_v52 = vmul.f32 %v6281_v19, %v6276_v39 }
0x2ddf   : > { %v6283_v22 = vpop.permute.xlu0 %6282 }
0x2de0   : > { %v6288_v7 = vadd.f32 %v6286_v52, %v6274_v26  ;;  %v6287_v48 = vmul.f32 %v6283_v22, %v6277_v43 }
0x2de2   : > { %v6289_v49 = vadd.f32 %v6287_v48, %v6275_v0  ;;  %6292 = vrot.lane.b32.xlu1 %v6288_v7, %s7566_s24 }
0x2de4   : > { %6294 = vrot.lane.b32.xlu0 %v6289_v49, %s7566_s24  ;;  %s7567_s24 = smov [#allocation8]  }
0x2de5   : > { %s7474_s17 = sshll.u32 %s7567_s24, 4  ;;  %s7475_s17 = int_to_ptr.vmem [resolvable:$false] %s7474_s17 }
0x2de6   : > { %s7476_s20 = scalar_lea.vmem %s7475_s17, 4096  ;;  %p7477_p4 = scmp.lt.s32.totalorder %s10012_s18, %s7475_s17 }
0x2de7   : > { %p7478_p7 = scmp.lt.s32.totalorder %s7476_s20, %s7470_s9 }
0x2de9   : > { %p7479_p8 = por %p7478_p7, %p7477_p4 }
0x2deb   : > { %p7480_p11 = pnand %p7479_p8, %p7473_p3 }
0x2e54   : > { %v6293_v9 = vpop.permute.xlu1 %6292 }
0x2e55   : > { %6719 = vst.msk [vmem:[%s8340_s21 + $0x70] sm:$0xff] %vm1622_vm7, %v6293_v9 }
0x2e56   : > { %v6295_v51 = vpop.permute.xlu0 %6294 }
0x2e57   : > { %6720 = vst.msk [vmem:[%s8340_s21 + $0x78] sm:$0xff] %vm1622_vm7, %v6295_v51 }
0x2e58   : > { %7483 = shalt.err (!%p7480_p11)
}
0x2e59   : > { %s7484_s25 = scalar_lea.hbm %s10010_s14, 2048  ;;  %s7488_s10 = scalar_lea.hbm %s10069_s8, 4096 }
0x2e5a   : > { %p7485_p13 = scmp.ne.s32.totalorder %s10010_s14, %s7484_s25  ;;  %p7489_p6 = scmp.lt.u32.totalorder %s10010_s14, %s10069_s8 }
0x2e5b   : > { %p7490_p9 = scmp.lt.u32.totalorder %s7488_s10, %s7484_s25  ;;  %p7492_p12 = scmp.lt.u32.totalorder %s7484_s25, %s10010_s14 }
0x2e5c   : > { %p7486_p5 = pnand %p7485_p13, %p10881_p1 }
0x2e5d   : > { %p7491_p10 = por %p7490_p9, %p7489_p6 }
0x2e5e   : > { %p7487_p0 = pneg %p7486_p5 }
0x2e5f   : > { %p7493_p2 = por %p7492_p12, %p7491_p10 }
0x2e61   : > { %p7494_p3 = pnand %p7493_p2, %p7487_p0 }
0x2e63   : > { %7497 = shalt.err (!%p7494_p3)
}
0x2e64   : > { %s7568_s29 = smov 128   ;;  %s7569_s4 = smov 8  }
0x2e65   : > { %6997 = dma.vmem_to_hbm [thread:$0]  (%p10881_p1), %s10012_s18, 2048, %s10010_s14, %s10020_s23, %s7568_s29, %s7568_s29, %s7569_s4  }
0x2e66 PF: > { %p7019_p4 = scmp.ge.s32.totalorder %s7540_s30, 2  ;;  %s6330_s26 = sand.u32 1, %s7528_s27  }
0x2e67   : > { %p10882_p7 = scmp.ne.s32.totalorder %s10292_s16, 0  ;;  %s6331_s13 = scalar_lea.sflag [#allocation4], %s6330_s26 }
0x2e69   : > { %p7010_p8 = pnand %p7019_p4, %p10882_p7 }
0x2e6b   : > { %7523 = dma.done.wait (!%p7010_p8), %s6331_s13, 2048  }
0x2e6c   : > { %7525 = vsyncadd (!%p7010_p8), %s6331_s13, 4294965248  ;;  %s10883_s30 = sld [smem:[#allocation13_spill]]  ;;  %s10884_s11 = sld [smem:[#allocation12_spill]] }
0x2e6d   : > { %s10885_s29 = sld [smem:[#allocation14_spill]]  ;;  %s10886_s27 = smov %s7532_s28 }
0x2e72   : > { %p20_p11 = scmp.ge.s32.totalorder %s10883_s30, 4   ;;  %s10887_s28 = smov %s10884_s11 }
0x2e74   :  { %22 = sbr.rel (!%p20_p11) target bundleno = 7 (0x7), region = 118 }
0x2e7b   :  { %6336 = vsyncpa [#allocation3], 1 }
0x2e7c   :  { %6338 = vsyncpa [#allocation3 + $0x1], 1 }
0x2e7d   :  { %6339 = vsyncpa [#allocation6], 1 }
0x2e7e   :  { %6340 = vsyncpa [#allocation4], 1 }
0x2e7f   :  { %6342 = vsyncpa [#allocation4 + $0x1], 1 }

</bundles_post_ra>
